<compile_context>
chip_gen: v5e
topology: v5e:2x2
jax: 0.10.0
libtpu: 0.0.40
codegen_flags: <defaults>
</compile_context>

<pallas_src>
import functools

import jax
import jax.numpy as jnp
from jax import lax
from jax.experimental import pallas as pl
from jax.experimental.pallas import tpu as pltpu


def _talent_kernel(hidden_dim, num_layers,
                   jd_ref, len_ref, jt_ref, ct_ref, cr_ref,
                   wih0_ref, whh0_ref, b0_ref, wcat_ref, bcat_ref,
                   w1_ref, b1_ref, w2_ref, b2_ref, w3_ref, b3_ref,
                   out_ref, xproj_scr):
    """Packed 5-layer LSTM + Linear heads + interaction + sigmoid."""
    H = hidden_dim
    L = num_layers
    B = out_ref.shape[0]
    TB = jd_ref.shape[0]
    T = TB // B

    # ---- (1) layer-0 input projection hoisted out of the recurrence:
    #      one big MXU matmul over all time steps, bias folded in.
    xproj_scr[...] = (
        jnp.dot(jd_ref[...], wih0_ref[...], preferred_element_type=jnp.float32)
        + b0_ref[...])

    # ---- loop invariants hoisted out of the time loop (kept in vregs)
    lengths = len_ref[...]                                          # (B, 1) int32
    biases = [jnp.broadcast_to(bcat_ref[l], (B, 4 * H)) for l in range(L - 1)]

    def time_step(t, carry):
        hs, cs = carry                                              # tuples of (B, H)
        valid = t < lengths                                         # (B, 1) bool
        start = pl.multiple_of(t * B, B)
        x0_gates = xproj_scr[pl.ds(start, B), :]                    # (B, 4H): x @ W_ih0 + b0
        layer_in = None
        new_h, new_c = [], []
        for l in range(L):                                          # static unroll over layers
            h_prev, c_prev = hs[l], cs[l]
            if l == 0:
                gates = x0_gates + jnp.dot(h_prev, whh0_ref[...],
                                           preferred_element_type=jnp.float32)
            else:
                # fused [x ; h_prev] @ [W_ih ; W_hh] -> one MXU dot per layer
                xcat = jnp.concatenate([layer_in, h_prev], axis=1)  # (B, 2H)
                gates = (jnp.dot(xcat, wcat_ref[l - 1],
                                 preferred_element_type=jnp.float32)
                         + biases[l - 1])
            # gate order [i, f, o, g]: one sigmoid over 3H lanes, one tanh over H lanes
            sig = jax.nn.sigmoid(gates[:, :3 * H])
            g_g = jnp.tanh(gates[:, 3 * H:])
            i_g = sig[:, 0 * H:1 * H]
            f_g = sig[:, 1 * H:2 * H]
            o_g = sig[:, 2 * H:3 * H]
            c_new = f_g * c_prev + i_g * g_g
            h_new = o_g * jnp.tanh(c_new)
            # packed-sequence semantics: freeze state once t >= length
            c_new = jnp.where(valid, c_new, c_prev)
            h_new = jnp.where(valid, h_new, h_prev)
            new_h.append(h_new)
            new_c.append(c_new)
            layer_in = h_new
        return tuple(new_h), tuple(new_c)

    zeros = tuple(jnp.zeros((B, H), jnp.float32) for _ in range(L))
    hs, _ = lax.fori_loop(0, T, time_step, (zeros, zeros), unroll=True)
    h_last = hs[L - 1]                              # == lstm_hidden[-1] (h_n of last layer)

    # ---- heads: Linear(300 -> 50) x3 (Dropout == identity at inference) + interaction
    # TODO(synk): nn.Dropout(p1/p2/p3) is treated as identity (inference mode).
    jt = jnp.dot(jt_ref[...], w1_ref[...], preferred_element_type=jnp.float32) + b1_ref[...]
    ct = jnp.dot(ct_ref[...], w2_ref[...], preferred_element_type=jnp.float32) + b2_ref[...]
    cr = jnp.dot(cr_ref[...], w3_ref[...], preferred_element_type=jnp.float32) + b3_ref[...]
    score = jnp.sum(jt * h_last * ct * cr, axis=1, keepdims=True)   # (B, 1)
    out_ref[...] = jax.nn.sigmoid(score)


def _reorder_gates(m):
    """Reorder last-dim gate blocks from PyTorch's [i, f, g, o] to [i, f, o, g]."""
    i, f, g, o = jnp.split(m, 4, axis=-1)
    return jnp.concatenate([i, f, o, g], axis=-1)


def _prepare_lstm_params(torch_layers, hidden_dim):
    """torch_layers[l] = (w_ih (4H,in), w_hh (4H,H), b_ih (4H,), b_hh (4H,)).

    Returns gate-reordered ([i,f,o,g]), pre-transposed, bias-combined params:
      wih0 (E,4H), whh0 (H,4H), b0 (1,4H),
      wcat (L-1,2H,4H) fused [W_ih; W_hh] for layers >= 1, bcat (L-1,1,4H).
    """
    H = hidden_dim
    w_ih0, w_hh0, b_ih0, b_hh0 = torch_layers[0]
    wih0 = _reorder_gates(w_ih0.T)
    whh0 = _reorder_gates(w_hh0.T)
    b0 = _reorder_gates((b_ih0 + b_hh0)[None, :])
    if len(torch_layers) > 1:
        wcat = jnp.stack([_reorder_gates(jnp.concatenate([w_ih.T, w_hh.T], axis=0))
                          for (w_ih, w_hh, _, _) in torch_layers[1:]])
        bcat = jnp.stack([_reorder_gates((b_ih + b_hh)[None, :])
                          for (_, _, b_ih, b_hh) in torch_layers[1:]])
    else:
        wcat = jnp.zeros((1, 2 * H, 4 * H), jnp.float32)
        bcat = jnp.zeros((1, 1, 4 * H), jnp.float32)
    return wih0, whh0, b0, wcat, bcat


def _mean_pool(tokens, table):
    """sum(embed(tokens), axis=0) / count(tokens != 1)   (pad index == 1)."""
    emb = table[tokens]                                              # (T, B, E)
    cnt = jnp.count_nonzero(tokens - 1, axis=0).astype(jnp.float32)  # (B,)
    return jnp.sum(emb, axis=0) / cnt[:, None]


def talent_net_forward(job_title_tokens, job_description_tokens,
                       candidate_title_tokens, candidate_resume_tokens,
                       job_description_lengths,
                       jt_table, jd_table, ct_table, cr_table,
                       lstm_layers_params, l1, l2, l3,
                       hidden_dim, num_layers):
    H, L = hidden_dim, num_layers
    T, B = job_description_tokens.shape

    # Embedding lookups + masked mean pooling: data-dependent gathers kept as JAX glue.
    jt_feat = _mean_pool(job_title_tokens, jt_table)                 # (B, 300)
    ct_feat = _mean_pool(candidate_title_tokens, ct_table)           # (B, 300)
    cr_feat = _mean_pool(candidate_resume_tokens, cr_table)          # (B, 300)
    jd_emb = jd_table[job_description_tokens]                        # (T, B, E)
    E = jd_emb.shape[-1]
    jd_flat = jd_emb.reshape(T * B, E)                               # row t*B + b

    wih0, whh0, b0, wcat, bcat = _prepare_lstm_params(lstm_layers_params, H)
    (w1, b1), (w2, b2), (w3, b3) = l1, l2, l3

    kernel = functools.partial(_talent_kernel, H, L)
    vmem = pl.BlockSpec(memory_space=pltpu.MemorySpace.VMEM)

    out = pl.pallas_call(
        kernel,
        out_shape=jax.ShapeDtypeStruct((B, 1), jnp.float32),
        in_specs=[vmem] * 16,
        out_specs=vmem,
        scratch_shapes=[pltpu.VMEM((T * B, 4 * H), jnp.float32)],    # hoisted x-projection
    )(jd_flat,
      job_description_lengths.reshape(B, 1).astype(jnp.int32),
      jt_feat, ct_feat, cr_feat,
      wih0, whh0, b0, wcat, bcat,
      w1.T, b1.reshape(1, H),
      w2.T, b2.reshape(1, H),
      w3.T, b3.reshape(1, H))
    return out[:, 0]


def ref_forward(job_title_tokens, job_description_tokens,
                candidate_title_tokens, candidate_resume_tokens,
                job_description_lengths,
                jt_table, jd_table, ct_table, cr_table,
                lstm_layers_params, l1, l2, l3, H, L):
    """Pure-JAX reference with the same packed-LSTM semantics."""
    jt = _mean_pool(job_title_tokens, jt_table)
    ct = _mean_pool(candidate_title_tokens, ct_table)
    cr = _mean_pool(candidate_resume_tokens, cr_table)

    x = jd_table[job_description_tokens]                             # (T, B, E)
    T, B, _ = x.shape
    h_last = None
    for l in range(L):
        w_ih, w_hh, b_ih, b_hh = lstm_layers_params[l]
        b = b_ih + b_hh

        def step(carry, inp, w_ih=w_ih, w_hh=w_hh, b=b):
            h, c = carry
            x_t, t = inp
            gates = x_t @ w_ih.T + h @ w_hh.T + b
            i = jax.nn.sigmoid(gates[:, 0 * H:1 * H])
            f = jax.nn.sigmoid(gates[:, 1 * H:2 * H])
            g = jnp.tanh(gates[:, 2 * H:3 * H])
            o = jax.nn.sigmoid(gates[:, 3 * H:4 * H])
            c_new = f * c + i * g
            h_new = o * jnp.tanh(c_new)
            valid = (t < job_description_lengths)[:, None]
            h_new = jnp.where(valid, h_new, h)
            c_new = jnp.where(valid, c_new, c)
            return (h_new, c_new), h_new

        init = (jnp.zeros((B, H), jnp.float32), jnp.zeros((B, H), jnp.float32))
        (h_last, _), outs = lax.scan(step, init, (x, jnp.arange(T)))
        x = outs

    (w1, b1), (w2, b2), (w3, b3) = l1, l2, l3
    jt_l = jt @ w1.T + b1
    ct_l = ct @ w2.T + b2
    cr_l = cr @ w3.T + b3
    return jax.nn.sigmoid(jnp.sum(jt_l * h_last * ct_l * cr_l, axis=1))


if __name__ == "__main__":
    B = 8                        # batch (8 rows -> sublane-aligned per-step slice)
    H, L = 50, 5                 # hidden_dim / lstm_layers from the module
    E = 300                      # embedding dims (l1/l2/l3 have in_features=300)
    T_JD, T_JT, T_CT, T_CR = 8, 6, 5, 10
    V = 120                      # small vocab; pad index == 1 (torchtext convention)

    key = jax.random.PRNGKey(0)
    keys = iter(jax.random.split(key, 40))

    # "pretrained" embedding tables
    jt_table = jax.random.normal(next(keys), (V, E), jnp.float32) * 0.1
    jd_table = jax.random.normal(next(keys), (V, E), jnp.float32) * 0.1
    ct_table = jax.random.normal(next(keys), (V, E), jnp.float32) * 0.1
    cr_table = jax.random.normal(next(keys), (V, E), jnp.float32) * 0.1

    def make_tokens(k, T, lengths):
        toks = jax.random.randint(k, (T, B), 2, V)
        return jnp.where(jnp.arange(T)[:, None] < lengths[None, :], toks, 1)

    jd_len = jnp.array([8, 7, 6, 5, 4, 3, 2, 2], jnp.int32)   # sorted desc (pack_padded)
    jt_len = jnp.array([6, 5, 5, 4, 3, 3, 2, 1], jnp.int32)
    ct_len = jnp.array([5, 5, 4, 4, 3, 2, 2, 1], jnp.int32)
    cr_len = jnp.array([10, 9, 8, 7, 5, 4, 3, 2], jnp.int32)

    jt_tokens = make_tokens(next(keys), T_JT, jt_len)
    jd_tokens = make_tokens(next(keys), T_JD, jd_len)
    ct_tokens = make_tokens(next(keys), T_CT, ct_len)
    cr_tokens = make_tokens(next(keys), T_CR, cr_len)

    # LSTM parameters in PyTorch layout (gate order [i, f, g, o])
    s = 1.0 / (H ** 0.5)
    lstm_layers_params = []
    for l in range(L):
        in_dim = E if l == 0 else H
        w_ih = jax.random.uniform(next(keys), (4 * H, in_dim), jnp.float32, -s, s)
        w_hh = jax.random.uniform(next(keys), (4 * H, H), jnp.float32, -s, s)
        b_ih = jax.random.uniform(next(keys), (4 * H,), jnp.float32, -s, s)
        b_hh = jax.random.uniform(next(keys), (4 * H,), jnp.float32, -s, s)
        lstm_layers_params.append((w_ih, w_hh, b_ih, b_hh))

    # l1 / l2 / l3 linear heads (PyTorch layout: weight (50, 300), bias (50,))
    sl = 1.0 / (E ** 0.5)
    heads = []
    for _ in range(3):
        w = jax.random.uniform(next(keys), (H, E), jnp.float32, -sl, sl)
        b = jax.random.uniform(next(keys), (H,), jnp.float32, -sl, sl)
        heads.append((w, b))
    l1, l2, l3 = heads

    out = talent_net_forward(jt_tokens, jd_tokens, ct_tokens, cr_tokens, jd_len,
                             jt_table, jd_table, ct_table, cr_table,
                             lstm_layers_params, l1, l2, l3, H, L)
    out = jax.block_until_ready(out)

    ref = ref_forward(jt_tokens, jd_tokens, ct_tokens, cr_tokens, jd_len,
                      jt_table, jd_table, ct_table, cr_table,
                      lstm_layers_params, l1, l2, l3, H, L)
    assert out.shape == (B,)
    assert jnp.allclose(out, ref, atol=2e-3, rtol=2e-3), (out, ref)

    print("KERNEL_OK")
</pallas_src>

<mosaic_0001>
module attributes {stable_mosaic.version = 11 : i64} {
  func.func @_talent_kernel(%arg0: memref<64x300xf32, #tpu.memory_space<vmem>>, %arg1: memref<8x1xi32, #tpu.memory_space<vmem>>, %arg2: memref<8x300xf32, #tpu.memory_space<vmem>>, %arg3: memref<8x300xf32, #tpu.memory_space<vmem>>, %arg4: memref<8x300xf32, #tpu.memory_space<vmem>>, %arg5: memref<300x200xf32, #tpu.memory_space<vmem>>, %arg6: memref<50x200xf32, #tpu.memory_space<vmem>>, %arg7: memref<1x200xf32, #tpu.memory_space<vmem>>, %arg8: memref<4x100x200xf32, #tpu.memory_space<vmem>>, %arg9: memref<4x1x200xf32, #tpu.memory_space<vmem>>, %arg10: memref<300x50xf32, #tpu.memory_space<vmem>>, %arg11: memref<1x50xf32, #tpu.memory_space<vmem>>, %arg12: memref<300x50xf32, #tpu.memory_space<vmem>>, %arg13: memref<1x50xf32, #tpu.memory_space<vmem>>, %arg14: memref<300x50xf32, #tpu.memory_space<vmem>>, %arg15: memref<1x50xf32, #tpu.memory_space<vmem>>, %arg16: memref<8x1xf32, #tpu.memory_space<vmem>>, %arg17: memref<64x200xf32, #tpu.memory_space<vmem>>) attributes {dimension_semantics = [], scalar_prefetch = 0 : i64, scratch_operands = 1 : i64, tpu.core_type = #tpu.core_type<tc>} {
    %c0 = arith.constant 0 : index
    %c0_0 = arith.constant 0 : index
    %0 = vector.load %arg0[%c0, %c0_0] : memref<64x300xf32, #tpu.memory_space<vmem>>, vector<64x300xf32>
    %c0_1 = arith.constant 0 : index
    %c0_2 = arith.constant 0 : index
    %1 = vector.load %arg5[%c0_1, %c0_2] : memref<300x200xf32, #tpu.memory_space<vmem>>, vector<300x200xf32>
    %cst = arith.constant dense<0.000000e+00> : vector<64x200xf32>
    %2 = tpu.matmul %0, %1, %cst {dimension_numbers = #tpu.dot_dimension_numbers<[1], [0], [0], [1], [0, 0, 1, 1], [], []>} : vector<64x300xf32>, vector<300x200xf32>, vector<64x200xf32> -> vector<64x200xf32>
    %c0_3 = arith.constant 0 : index
    %c0_4 = arith.constant 0 : index
    %3 = vector.load %arg7[%c0_3, %c0_4] : memref<1x200xf32, #tpu.memory_space<vmem>>, vector<1x200xf32>
    %4 = vector.broadcast %3 : vector<1x200xf32> to vector<64x200xf32>
    %5 = arith.addf %2, %4 : vector<64x200xf32>
    %c0_5 = arith.constant 0 : index
    %c0_6 = arith.constant 0 : index
    %6 = vector.load %arg17[%c0_5, %c0_6] : memref<64x200xf32, #tpu.memory_space<vmem>>, vector<64x200xf32>
    tpu.vector_store %arg17[%c0_5, %c0_6], %5 {strides = array<i32>} : memref<64x200xf32, #tpu.memory_space<vmem>>, vector<64x200xf32>,
    %c0_7 = arith.constant 0 : index
    %c0_8 = arith.constant 0 : index
    %7 = vector.load %arg1[%c0_7, %c0_8] : memref<8x1xi32, #tpu.memory_space<vmem>>, vector<8x1xi32>
    %c0_9 = arith.constant 0 : index
    %c0_10 = arith.constant 0 : index
    %c0_11 = arith.constant 0 : index
    %8 = vector.load %arg9[%c0_9, %c0_10, %c0_11] : memref<4x1x200xf32, #tpu.memory_space<vmem>>, vector<1x1x200xf32>
    %9 = vector.shape_cast %8 : vector<1x1x200xf32> to vector<1x200xf32>
    %10 = vector.shape_cast %9 : vector<1x200xf32> to vector<1x200xf32>
    %11 = vector.broadcast %10 : vector<1x200xf32> to vector<8x200xf32>
    %c1 = arith.constant 1 : index
    %c0_12 = arith.constant 0 : index
    %c0_13 = arith.constant 0 : index
    %12 = vector.load %arg9[%c1, %c0_12, %c0_13] : memref<4x1x200xf32, #tpu.memory_space<vmem>>, vector<1x1x200xf32>
    %13 = vector.shape_cast %12 : vector<1x1x200xf32> to vector<1x200xf32>
    %14 = vector.shape_cast %13 : vector<1x200xf32> to vector<1x200xf32>
    %15 = vector.broadcast %14 : vector<1x200xf32> to vector<8x200xf32>
    %c2 = arith.constant 2 : index
    %c0_14 = arith.constant 0 : index
    %c0_15 = arith.constant 0 : index
    %16 = vector.load %arg9[%c2, %c0_14, %c0_15] : memref<4x1x200xf32, #tpu.memory_space<vmem>>, vector<1x1x200xf32>
    %17 = vector.shape_cast %16 : vector<1x1x200xf32> to vector<1x200xf32>
    %18 = vector.shape_cast %17 : vector<1x200xf32> to vector<1x200xf32>
    %19 = vector.broadcast %18 : vector<1x200xf32> to vector<8x200xf32>
    %c3 = arith.constant 3 : index
    %c0_16 = arith.constant 0 : index
    %c0_17 = arith.constant 0 : index
    %20 = vector.load %arg9[%c3, %c0_16, %c0_17] : memref<4x1x200xf32, #tpu.memory_space<vmem>>, vector<1x1x200xf32>
    %21 = vector.shape_cast %20 : vector<1x1x200xf32> to vector<1x200xf32>
    %22 = vector.shape_cast %21 : vector<1x200xf32> to vector<1x200xf32>
    %23 = vector.broadcast %22 : vector<1x200xf32> to vector<8x200xf32>
    %cst_18 = arith.constant 0.000000e+00 : f32
    %24 = vector.broadcast %cst_18 : f32 to vector<8x50xf32>
    %cst_19 = arith.constant 0.000000e+00 : f32
    %25 = vector.broadcast %cst_19 : f32 to vector<8x50xf32>
    %cst_20 = arith.constant 0.000000e+00 : f32
    %26 = vector.broadcast %cst_20 : f32 to vector<8x50xf32>
    %cst_21 = arith.constant 0.000000e+00 : f32
    %27 = vector.broadcast %cst_21 : f32 to vector<8x50xf32>
    %cst_22 = arith.constant 0.000000e+00 : f32
    %28 = vector.broadcast %cst_22 : f32 to vector<8x50xf32>
    %c0_i32 = arith.constant 0 : i32
    %29 = vector.broadcast %c0_i32 : i32 to vector<8x1xi32>
    %30 = arith.cmpi slt, %29, %7 : vector<8x1xi32>
    %c8_i32 = arith.constant 8 : i32
    %31 = arith.muli %c0_i32, %c8_i32 : i32
    %32 = tpu.assume_multiple %31, 8 : i32
    %33 = arith.index_cast %32 : i32 to index
    %c0_23 = arith.constant 0 : index
    %34 = vector.load %arg17[%33, %c0_23] : memref<64x200xf32, #tpu.memory_space<vmem>>, vector<8x200xf32>
    %c0_24 = arith.constant 0 : index
    %c0_25 = arith.constant 0 : index
    %35 = vector.load %arg6[%c0_24, %c0_25] : memref<50x200xf32, #tpu.memory_space<vmem>>, vector<50x200xf32>
    %cst_26 = arith.constant dense<0.000000e+00> : vector<8x200xf32>
    %36 = tpu.matmul %24, %35, %cst_26 {dimension_numbers = #tpu.dot_dimension_numbers<[1], [0], [0], [1], [0, 0, 1, 1], [], []>} : vector<8x50xf32>, vector<50x200xf32>, vector<8x200xf32> -> vector<8x200xf32>
    %37 = arith.addf %34, %36 : vector<8x200xf32>
    %38 = vector.extract_strided_slice %37 {offsets = [0, 0], sizes = [8, 150], strides = [1, 1]} : vector<8x200xf32> to vector<8x150xf32>
    %39 = arith.negf %38 : vector<8x150xf32>
    %40 = math.exp %39 : vector<8x150xf32>
    %cst_27 = arith.constant 1.000000e+00 : f32
    %41 = vector.broadcast %cst_27 : f32 to vector<8x150xf32>
    %42 = arith.addf %41, %40 : vector<8x150xf32>
    %43 = arith.divf %41, %42 : vector<8x150xf32>
    %44 = vector.extract_strided_slice %37 {offsets = [0, 150], sizes = [8, 50], strides = [1, 1]} : vector<8x200xf32> to vector<8x50xf32>
    %45 = math.tanh %44 : vector<8x50xf32>
    %46 = vector.extract_strided_slice %43 {offsets = [0, 0], sizes = [8, 50], strides = [1, 1]} : vector<8x150xf32> to vector<8x50xf32>
    %47 = vector.extract_strided_slice %43 {offsets = [0, 50], sizes = [8, 50], strides = [1, 1]} : vector<8x150xf32> to vector<8x50xf32>
    %48 = vector.extract_strided_slice %43 {offsets = [0, 100], sizes = [8, 50], strides = [1, 1]} : vector<8x150xf32> to vector<8x50xf32>
    %49 = arith.mulf %47, %24 : vector<8x50xf32>
    %50 = arith.mulf %46, %45 : vector<8x50xf32>
    %51 = arith.addf %49, %50 : vector<8x50xf32>
    %52 = math.tanh %51 : vector<8x50xf32>
    %53 = arith.mulf %48, %52 : vector<8x50xf32>
    %54 = vector.shape_cast %30 : vector<8x1xi1> to vector<8x1xi1>
    %55 = vector.broadcast %54 : vector<8x1xi1> to vector<8x50xi1>
    %56 = arith.select %55, %51, %24 : vector<8x50xi1>, vector<8x50xf32>
    %57 = vector.shape_cast %30 : vector<8x1xi1> to vector<8x1xi1>
    %58 = vector.broadcast %57 : vector<8x1xi1> to vector<8x50xi1>
    %59 = arith.select %58, %53, %24 : vector<8x50xi1>, vector<8x50xf32>
    %60 = tpu.concatenate %59, %25 in 1 : vector<8x50xf32>, vector<8x50xf32> -> vector<8x100xf32>
    %c0_28 = arith.constant 0 : index
    %c0_29 = arith.constant 0 : index
    %c0_30 = arith.constant 0 : index
    %61 = vector.load %arg8[%c0_28, %c0_29, %c0_30] : memref<4x100x200xf32, #tpu.memory_space<vmem>>, vector<1x100x200xf32>
    %62 = vector.shape_cast %61 : vector<1x100x200xf32> to vector<100x200xf32>
    %cst_31 = arith.constant dense<0.000000e+00> : vector<8x200xf32>
    %63 = tpu.matmul %60, %62, %cst_31 {dimension_numbers = #tpu.dot_dimension_numbers<[1], [0], [0], [1], [0, 0, 1, 1], [], []>} : vector<8x100xf32>, vector<100x200xf32>, vector<8x200xf32> -> vector<8x200xf32>
    %64 = arith.addf %63, %11 : vector<8x200xf32>
    %65 = vector.extract_strided_slice %64 {offsets = [0, 0], sizes = [8, 150], strides = [1, 1]} : vector<8x200xf32> to vector<8x150xf32>
    %66 = arith.negf %65 : vector<8x150xf32>
    %67 = math.exp %66 : vector<8x150xf32>
    %cst_32 = arith.constant 1.000000e+00 : f32
    %68 = vector.broadcast %cst_32 : f32 to vector<8x150xf32>
    %69 = arith.addf %68, %67 : vector<8x150xf32>
    %70 = arith.divf %68, %69 : vector<8x150xf32>
    %71 = vector.extract_strided_slice %64 {offsets = [0, 150], sizes = [8, 50], strides = [1, 1]} : vector<8x200xf32> to vector<8x50xf32>
    %72 = math.tanh %71 : vector<8x50xf32>
    %73 = vector.extract_strided_slice %70 {offsets = [0, 0], sizes = [8, 50], strides = [1, 1]} : vector<8x150xf32> to vector<8x50xf32>
    %74 = vector.extract_strided_slice %70 {offsets = [0, 50], sizes = [8, 50], strides = [1, 1]} : vector<8x150xf32> to vector<8x50xf32>
    %75 = vector.extract_strided_slice %70 {offsets = [0, 100], sizes = [8, 50], strides = [1, 1]} : vector<8x150xf32> to vector<8x50xf32>
    %76 = arith.mulf %74, %25 : vector<8x50xf32>
    %77 = arith.mulf %73, %72 : vector<8x50xf32>
    %78 = arith.addf %76, %77 : vector<8x50xf32>
    %79 = math.tanh %78 : vector<8x50xf32>
    %80 = arith.mulf %75, %79 : vector<8x50xf32>
    %81 = vector.shape_cast %30 : vector<8x1xi1> to vector<8x1xi1>
    %82 = vector.broadcast %81 : vector<8x1xi1> to vector<8x50xi1>
    %83 = arith.select %82, %78, %25 : vector<8x50xi1>, vector<8x50xf32>
    %84 = vector.shape_cast %30 : vector<8x1xi1> to vector<8x1xi1>
    %85 = vector.broadcast %84 : vector<8x1xi1> to vector<8x50xi1>
    %86 = arith.select %85, %80, %25 : vector<8x50xi1>, vector<8x50xf32>
    %87 = tpu.concatenate %86, %26 in 1 : vector<8x50xf32>, vector<8x50xf32> -> vector<8x100xf32>
    %c1_33 = arith.constant 1 : index
    %c0_34 = arith.constant 0 : index
    %c0_35 = arith.constant 0 : index
    %88 = vector.load %arg8[%c1_33, %c0_34, %c0_35] : memref<4x100x200xf32, #tpu.memory_space<vmem>>, vector<1x100x200xf32>
    %89 = vector.shape_cast %88 : vector<1x100x200xf32> to vector<100x200xf32>
    %cst_36 = arith.constant dense<0.000000e+00> : vector<8x200xf32>
    %90 = tpu.matmul %87, %89, %cst_36 {dimension_numbers = #tpu.dot_dimension_numbers<[1], [0], [0], [1], [0, 0, 1, 1], [], []>} : vector<8x100xf32>, vector<100x200xf32>, vector<8x200xf32> -> vector<8x200xf32>
    %91 = arith.addf %90, %15 : vector<8x200xf32>
    %92 = vector.extract_strided_slice %91 {offsets = [0, 0], sizes = [8, 150], strides = [1, 1]} : vector<8x200xf32> to vector<8x150xf32>
    %93 = arith.negf %92 : vector<8x150xf32>
    %94 = math.exp %93 : vector<8x150xf32>
    %cst_37 = arith.constant 1.000000e+00 : f32
    %95 = vector.broadcast %cst_37 : f32 to vector<8x150xf32>
    %96 = arith.addf %95, %94 : vector<8x150xf32>
    %97 = arith.divf %95, %96 : vector<8x150xf32>
    %98 = vector.extract_strided_slice %91 {offsets = [0, 150], sizes = [8, 50], strides = [1, 1]} : vector<8x200xf32> to vector<8x50xf32>
    %99 = math.tanh %98 : vector<8x50xf32>
    %100 = vector.extract_strided_slice %97 {offsets = [0, 0], sizes = [8, 50], strides = [1, 1]} : vector<8x150xf32> to vector<8x50xf32>
    %101 = vector.extract_strided_slice %97 {offsets = [0, 50], sizes = [8, 50], strides = [1, 1]} : vector<8x150xf32> to vector<8x50xf32>
    %102 = vector.extract_strided_slice %97 {offsets = [0, 100], sizes = [8, 50], strides = [1, 1]} : vector<8x150xf32> to vector<8x50xf32>
    %103 = arith.mulf %101, %26 : vector<8x50xf32>
    %104 = arith.mulf %100, %99 : vector<8x50xf32>
    %105 = arith.addf %103, %104 : vector<8x50xf32>
    %106 = math.tanh %105 : vector<8x50xf32>
    %107 = arith.mulf %102, %106 : vector<8x50xf32>
    %108 = vector.shape_cast %30 : vector<8x1xi1> to vector<8x1xi1>
    %109 = vector.broadcast %108 : vector<8x1xi1> to vector<8x50xi1>
    %110 = arith.select %109, %105, %26 : vector<8x50xi1>, vector<8x50xf32>
    %111 = vector.shape_cast %30 : vector<8x1xi1> to vector<8x1xi1>
    %112 = vector.broadcast %111 : vector<8x1xi1> to vector<8x50xi1>
    %113 = arith.select %112, %107, %26 : vector<8x50xi1>, vector<8x50xf32>
    %114 = tpu.concatenate %113, %27 in 1 : vector<8x50xf32>, vector<8x50xf32> -> vector<8x100xf32>
    %c2_38 = arith.constant 2 : index
    %c0_39 = arith.constant 0 : index
    %c0_40 = arith.constant 0 : index
    %115 = vector.load %arg8[%c2_38, %c0_39, %c0_40] : memref<4x100x200xf32, #tpu.memory_space<vmem>>, vector<1x100x200xf32>
    %116 = vector.shape_cast %115 : vector<1x100x200xf32> to vector<100x200xf32>
    %cst_41 = arith.constant dense<0.000000e+00> : vector<8x200xf32>
    %117 = tpu.matmul %114, %116, %cst_41 {dimension_numbers = #tpu.dot_dimension_numbers<[1], [0], [0], [1], [0, 0, 1, 1], [], []>} : vector<8x100xf32>, vector<100x200xf32>, vector<8x200xf32> -> vector<8x200xf32>
    %118 = arith.addf %117, %19 : vector<8x200xf32>
    %119 = vector.extract_strided_slice %118 {offsets = [0, 0], sizes = [8, 150], strides = [1, 1]} : vector<8x200xf32> to vector<8x150xf32>
    %120 = arith.negf %119 : vector<8x150xf32>
    %121 = math.exp %120 : vector<8x150xf32>
    %cst_42 = arith.constant 1.000000e+00 : f32
    %122 = vector.broadcast %cst_42 : f32 to vector<8x150xf32>
    %123 = arith.addf %122, %121 : vector<8x150xf32>
    %124 = arith.divf %122, %123 : vector<8x150xf32>
    %125 = vector.extract_strided_slice %118 {offsets = [0, 150], sizes = [8, 50], strides = [1, 1]} : vector<8x200xf32> to vector<8x50xf32>
    %126 = math.tanh %125 : vector<8x50xf32>
    %127 = vector.extract_strided_slice %124 {offsets = [0, 0], sizes = [8, 50], strides = [1, 1]} : vector<8x150xf32> to vector<8x50xf32>
    %128 = vector.extract_strided_slice %124 {offsets = [0, 50], sizes = [8, 50], strides = [1, 1]} : vector<8x150xf32> to vector<8x50xf32>
    %129 = vector.extract_strided_slice %124 {offsets = [0, 100], sizes = [8, 50], strides = [1, 1]} : vector<8x150xf32> to vector<8x50xf32>
    %130 = arith.mulf %128, %27 : vector<8x50xf32>
    %131 = arith.mulf %127, %126 : vector<8x50xf32>
    %132 = arith.addf %130, %131 : vector<8x50xf32>
    %133 = math.tanh %132 : vector<8x50xf32>
    %134 = arith.mulf %129, %133 : vector<8x50xf32>
    %135 = vector.shape_cast %30 : vector<8x1xi1> to vector<8x1xi1>
    %136 = vector.broadcast %135 : vector<8x1xi1> to vector<8x50xi1>
    %137 = arith.select %136, %132, %27 : vector<8x50xi1>, vector<8x50xf32>
    %138 = vector.shape_cast %30 : vector<8x1xi1> to vector<8x1xi1>
    %139 = vector.broadcast %138 : vector<8x1xi1> to vector<8x50xi1>
    %140 = arith.select %139, %134, %27 : vector<8x50xi1>, vector<8x50xf32>
    %141 = tpu.concatenate %140, %28 in 1 : vector<8x50xf32>, vector<8x50xf32> -> vector<8x100xf32>
    %c3_43 = arith.constant 3 : index
    %c0_44 = arith.constant 0 : index
    %c0_45 = arith.constant 0 : index
    %142 = vector.load %arg8[%c3_43, %c0_44, %c0_45] : memref<4x100x200xf32, #tpu.memory_space<vmem>>, vector<1x100x200xf32>
    %143 = vector.shape_cast %142 : vector<1x100x200xf32> to vector<100x200xf32>
    %cst_46 = arith.constant dense<0.000000e+00> : vector<8x200xf32>
    %144 = tpu.matmul %141, %143, %cst_46 {dimension_numbers = #tpu.dot_dimension_numbers<[1], [0], [0], [1], [0, 0, 1, 1], [], []>} : vector<8x100xf32>, vector<100x200xf32>, vector<8x200xf32> -> vector<8x200xf32>
    %145 = arith.addf %144, %23 : vector<8x200xf32>
    %146 = vector.extract_strided_slice %145 {offsets = [0, 0], sizes = [8, 150], strides = [1, 1]} : vector<8x200xf32> to vector<8x150xf32>
    %147 = arith.negf %146 : vector<8x150xf32>
    %148 = math.exp %147 : vector<8x150xf32>
    %cst_47 = arith.constant 1.000000e+00 : f32
    %149 = vector.broadcast %cst_47 : f32 to vector<8x150xf32>
    %150 = arith.addf %149, %148 : vector<8x150xf32>
    %151 = arith.divf %149, %150 : vector<8x150xf32>
    %152 = vector.extract_strided_slice %145 {offsets = [0, 150], sizes = [8, 50], strides = [1, 1]} : vector<8x200xf32> to vector<8x50xf32>
    %153 = math.tanh %152 : vector<8x50xf32>
    %154 = vector.extract_strided_slice %151 {offsets = [0, 0], sizes = [8, 50], strides = [1, 1]} : vector<8x150xf32> to vector<8x50xf32>
    %155 = vector.extract_strided_slice %151 {offsets = [0, 50], sizes = [8, 50], strides = [1, 1]} : vector<8x150xf32> to vector<8x50xf32>
    %156 = vector.extract_strided_slice %151 {offsets = [0, 100], sizes = [8, 50], strides = [1, 1]} : vector<8x150xf32> to vector<8x50xf32>
    %157 = arith.mulf %155, %28 : vector<8x50xf32>
    %158 = arith.mulf %154, %153 : vector<8x50xf32>
    %159 = arith.addf %157, %158 : vector<8x50xf32>
    %160 = math.tanh %159 : vector<8x50xf32>
    %161 = arith.mulf %156, %160 : vector<8x50xf32>
    %162 = vector.shape_cast %30 : vector<8x1xi1> to vector<8x1xi1>
    %163 = vector.broadcast %162 : vector<8x1xi1> to vector<8x50xi1>
    %164 = arith.select %163, %159, %28 : vector<8x50xi1>, vector<8x50xf32>
    %165 = vector.shape_cast %30 : vector<8x1xi1> to vector<8x1xi1>
    %166 = vector.broadcast %165 : vector<8x1xi1> to vector<8x50xi1>
    %167 = arith.select %166, %161, %28 : vector<8x50xi1>, vector<8x50xf32>
    %c1_i32 = arith.constant 1 : i32
    %168 = vector.broadcast %c1_i32 : i32 to vector<8x1xi32>
    %169 = arith.cmpi slt, %168, %7 : vector<8x1xi32>
    %c8_i32_48 = arith.constant 8 : i32
    %170 = arith.muli %c1_i32, %c8_i32_48 : i32
    %171 = tpu.assume_multiple %170, 8 : i32
    %172 = arith.index_cast %171 : i32 to index
    %c0_49 = arith.constant 0 : index
    %173 = vector.load %arg17[%172, %c0_49] : memref<64x200xf32, #tpu.memory_space<vmem>>, vector<8x200xf32>
    %c0_50 = arith.constant 0 : index
    %c0_51 = arith.constant 0 : index
    %174 = vector.load %arg6[%c0_50, %c0_51] : memref<50x200xf32, #tpu.memory_space<vmem>>, vector<50x200xf32>
    %cst_52 = arith.constant dense<0.000000e+00> : vector<8x200xf32>
    %175 = tpu.matmul %59, %174, %cst_52 {dimension_numbers = #tpu.dot_dimension_numbers<[1], [0], [0], [1], [0, 0, 1, 1], [], []>} : vector<8x50xf32>, vector<50x200xf32>, vector<8x200xf32> -> vector<8x200xf32>
    %176 = arith.addf %173, %175 : vector<8x200xf32>
    %177 = vector.extract_strided_slice %176 {offsets = [0, 0], sizes = [8, 150], strides = [1, 1]} : vector<8x200xf32> to vector<8x150xf32>
    %178 = arith.negf %177 : vector<8x150xf32>
    %179 = math.exp %178 : vector<8x150xf32>
    %cst_53 = arith.constant 1.000000e+00 : f32
    %180 = vector.broadcast %cst_53 : f32 to vector<8x150xf32>
    %181 = arith.addf %180, %179 : vector<8x150xf32>
    %182 = arith.divf %180, %181 : vector<8x150xf32>
    %183 = vector.extract_strided_slice %176 {offsets = [0, 150], sizes = [8, 50], strides = [1, 1]} : vector<8x200xf32> to vector<8x50xf32>
    %184 = math.tanh %183 : vector<8x50xf32>
    %185 = vector.extract_strided_slice %182 {offsets = [0, 0], sizes = [8, 50], strides = [1, 1]} : vector<8x150xf32> to vector<8x50xf32>
    %186 = vector.extract_strided_slice %182 {offsets = [0, 50], sizes = [8, 50], strides = [1, 1]} : vector<8x150xf32> to vector<8x50xf32>
    %187 = vector.extract_strided_slice %182 {offsets = [0, 100], sizes = [8, 50], strides = [1, 1]} : vector<8x150xf32> to vector<8x50xf32>
    %188 = arith.mulf %186, %56 : vector<8x50xf32>
    %189 = arith.mulf %185, %184 : vector<8x50xf32>
    %190 = arith.addf %188, %189 : vector<8x50xf32>
    %191 = math.tanh %190 : vector<8x50xf32>
    %192 = arith.mulf %187, %191 : vector<8x50xf32>
    %193 = vector.shape_cast %169 : vector<8x1xi1> to vector<8x1xi1>
    %194 = vector.broadcast %193 : vector<8x1xi1> to vector<8x50xi1>
    %195 = arith.select %194, %190, %56 : vector<8x50xi1>, vector<8x50xf32>
    %196 = vector.shape_cast %169 : vector<8x1xi1> to vector<8x1xi1>
    %197 = vector.broadcast %196 : vector<8x1xi1> to vector<8x50xi1>
    %198 = arith.select %197, %192, %59 : vector<8x50xi1>, vector<8x50xf32>
    %199 = tpu.concatenate %198, %86 in 1 : vector<8x50xf32>, vector<8x50xf32> -> vector<8x100xf32>
    %c0_54 = arith.constant 0 : index
    %c0_55 = arith.constant 0 : index
    %c0_56 = arith.constant 0 : index
    %200 = vector.load %arg8[%c0_54, %c0_55, %c0_56] : memref<4x100x200xf32, #tpu.memory_space<vmem>>, vector<1x100x200xf32>
    %201 = vector.shape_cast %200 : vector<1x100x200xf32> to vector<100x200xf32>
    %cst_57 = arith.constant dense<0.000000e+00> : vector<8x200xf32>
    %202 = tpu.matmul %199, %201, %cst_57 {dimension_numbers = #tpu.dot_dimension_numbers<[1], [0], [0], [1], [0, 0, 1, 1], [], []>} : vector<8x100xf32>, vector<100x200xf32>, vector<8x200xf32> -> vector<8x200xf32>
    %203 = arith.addf %202, %11 : vector<8x200xf32>
    %204 = vector.extract_strided_slice %203 {offsets = [0, 0], sizes = [8, 150], strides = [1, 1]} : vector<8x200xf32> to vector<8x150xf32>
    %205 = arith.negf %204 : vector<8x150xf32>
    %206 = math.exp %205 : vector<8x150xf32>
    %cst_58 = arith.constant 1.000000e+00 : f32
    %207 = vector.broadcast %cst_58 : f32 to vector<8x150xf32>
    %208 = arith.addf %207, %206 : vector<8x150xf32>
    %209 = arith.divf %207, %208 : vector<8x150xf32>
    %210 = vector.extract_strided_slice %203 {offsets = [0, 150], sizes = [8, 50], strides = [1, 1]} : vector<8x200xf32> to vector<8x50xf32>
    %211 = math.tanh %210 : vector<8x50xf32>
    %212 = vector.extract_strided_slice %209 {offsets = [0, 0], sizes = [8, 50], strides = [1, 1]} : vector<8x150xf32> to vector<8x50xf32>
    %213 = vector.extract_strided_slice %209 {offsets = [0, 50], sizes = [8, 50], strides = [1, 1]} : vector<8x150xf32> to vector<8x50xf32>
    %214 = vector.extract_strided_slice %209 {offsets = [0, 100], sizes = [8, 50], strides = [1, 1]} : vector<8x150xf32> to vector<8x50xf32>
    %215 = arith.mulf %213, %83 : vector<8x50xf32>
    %216 = arith.mulf %212, %211 : vector<8x50xf32>
    %217 = arith.addf %215, %216 : vector<8x50xf32>
    %218 = math.tanh %217 : vector<8x50xf32>
    %219 = arith.mulf %214, %218 : vector<8x50xf32>
    %220 = vector.shape_cast %169 : vector<8x1xi1> to vector<8x1xi1>
    %221 = vector.broadcast %220 : vector<8x1xi1> to vector<8x50xi1>
    %222 = arith.select %221, %217, %83 : vector<8x50xi1>, vector<8x50xf32>
    %223 = vector.shape_cast %169 : vector<8x1xi1> to vector<8x1xi1>
    %224 = vector.broadcast %223 : vector<8x1xi1> to vector<8x50xi1>
    %225 = arith.select %224, %219, %86 : vector<8x50xi1>, vector<8x50xf32>
    %226 = tpu.concatenate %225, %113 in 1 : vector<8x50xf32>, vector<8x50xf32> -> vector<8x100xf32>
    %c1_59 = arith.constant 1 : index
    %c0_60 = arith.constant 0 : index
    %c0_61 = arith.constant 0 : index
    %227 = vector.load %arg8[%c1_59, %c0_60, %c0_61] : memref<4x100x200xf32, #tpu.memory_space<vmem>>, vector<1x100x200xf32>
    %228 = vector.shape_cast %227 : vector<1x100x200xf32> to vector<100x200xf32>
    %cst_62 = arith.constant dense<0.000000e+00> : vector<8x200xf32>
    %229 = tpu.matmul %226, %228, %cst_62 {dimension_numbers = #tpu.dot_dimension_numbers<[1], [0], [0], [1], [0, 0, 1, 1], [], []>} : vector<8x100xf32>, vector<100x200xf32>, vector<8x200xf32> -> vector<8x200xf32>
    %230 = arith.addf %229, %15 : vector<8x200xf32>
    %231 = vector.extract_strided_slice %230 {offsets = [0, 0], sizes = [8, 150], strides = [1, 1]} : vector<8x200xf32> to vector<8x150xf32>
    %232 = arith.negf %231 : vector<8x150xf32>
    %233 = math.exp %232 : vector<8x150xf32>
    %cst_63 = arith.constant 1.000000e+00 : f32
    %234 = vector.broadcast %cst_63 : f32 to vector<8x150xf32>
    %235 = arith.addf %234, %233 : vector<8x150xf32>
    %236 = arith.divf %234, %235 : vector<8x150xf32>
    %237 = vector.extract_strided_slice %230 {offsets = [0, 150], sizes = [8, 50], strides = [1, 1]} : vector<8x200xf32> to vector<8x50xf32>
    %238 = math.tanh %237 : vector<8x50xf32>
    %239 = vector.extract_strided_slice %236 {offsets = [0, 0], sizes = [8, 50], strides = [1, 1]} : vector<8x150xf32> to vector<8x50xf32>
    %240 = vector.extract_strided_slice %236 {offsets = [0, 50], sizes = [8, 50], strides = [1, 1]} : vector<8x150xf32> to vector<8x50xf32>
    %241 = vector.extract_strided_slice %236 {offsets = [0, 100], sizes = [8, 50], strides = [1, 1]} : vector<8x150xf32> to vector<8x50xf32>
    %242 = arith.mulf %240, %110 : vector<8x50xf32>
    %243 = arith.mulf %239, %238 : vector<8x50xf32>
    %244 = arith.addf %242, %243 : vector<8x50xf32>
    %245 = math.tanh %244 : vector<8x50xf32>
    %246 = arith.mulf %241, %245 : vector<8x50xf32>
    %247 = vector.shape_cast %169 : vector<8x1xi1> to vector<8x1xi1>
    %248 = vector.broadcast %247 : vector<8x1xi1> to vector<8x50xi1>
    %249 = arith.select %248, %244, %110 : vector<8x50xi1>, vector<8x50xf32>
    %250 = vector.shape_cast %169 : vector<8x1xi1> to vector<8x1xi1>
    %251 = vector.broadcast %250 : vector<8x1xi1> to vector<8x50xi1>
    %252 = arith.select %251, %246, %113 : vector<8x50xi1>, vector<8x50xf32>
    %253 = tpu.concatenate %252, %140 in 1 : vector<8x50xf32>, vector<8x50xf32> -> vector<8x100xf32>
    %c2_64 = arith.constant 2 : index
    %c0_65 = arith.constant 0 : index
    %c0_66 = arith.constant 0 : index
    %254 = vector.load %arg8[%c2_64, %c0_65, %c0_66] : memref<4x100x200xf32, #tpu.memory_space<vmem>>, vector<1x100x200xf32>
    %255 = vector.shape_cast %254 : vector<1x100x200xf32> to vector<100x200xf32>
    %cst_67 = arith.constant dense<0.000000e+00> : vector<8x200xf32>
    %256 = tpu.matmul %253, %255, %cst_67 {dimension_numbers = #tpu.dot_dimension_numbers<[1], [0], [0], [1], [0, 0, 1, 1], [], []>} : vector<8x100xf32>, vector<100x200xf32>, vector<8x200xf32> -> vector<8x200xf32>
    %257 = arith.addf %256, %19 : vector<8x200xf32>
    %258 = vector.extract_strided_slice %257 {offsets = [0, 0], sizes = [8, 150], strides = [1, 1]} : vector<8x200xf32> to vector<8x150xf32>
    %259 = arith.negf %258 : vector<8x150xf32>
    %260 = math.exp %259 : vector<8x150xf32>
    %cst_68 = arith.constant 1.000000e+00 : f32
    %261 = vector.broadcast %cst_68 : f32 to vector<8x150xf32>
    %262 = arith.addf %261, %260 : vector<8x150xf32>
    %263 = arith.divf %261, %262 : vector<8x150xf32>
    %264 = vector.extract_strided_slice %257 {offsets = [0, 150], sizes = [8, 50], strides = [1, 1]} : vector<8x200xf32> to vector<8x50xf32>
    %265 = math.tanh %264 : vector<8x50xf32>
    %266 = vector.extract_strided_slice %263 {offsets = [0, 0], sizes = [8, 50], strides = [1, 1]} : vector<8x150xf32> to vector<8x50xf32>
    %267 = vector.extract_strided_slice %263 {offsets = [0, 50], sizes = [8, 50], strides = [1, 1]} : vector<8x150xf32> to vector<8x50xf32>
    %268 = vector.extract_strided_slice %263 {offsets = [0, 100], sizes = [8, 50], strides = [1, 1]} : vector<8x150xf32> to vector<8x50xf32>
    %269 = arith.mulf %267, %137 : vector<8x50xf32>
    %270 = arith.mulf %266, %265 : vector<8x50xf32>
    %271 = arith.addf %269, %270 : vector<8x50xf32>
    %272 = math.tanh %271 : vector<8x50xf32>
    %273 = arith.mulf %268, %272 : vector<8x50xf32>
    %274 = vector.shape_cast %169 : vector<8x1xi1> to vector<8x1xi1>
    %275 = vector.broadcast %274 : vector<8x1xi1> to vector<8x50xi1>
    %276 = arith.select %275, %271, %137 : vector<8x50xi1>, vector<8x50xf32>
    %277 = vector.shape_cast %169 : vector<8x1xi1> to vector<8x1xi1>
    %278 = vector.broadcast %277 : vector<8x1xi1> to vector<8x50xi1>
    %279 = arith.select %278, %273, %140 : vector<8x50xi1>, vector<8x50xf32>
    %280 = tpu.concatenate %279, %167 in 1 : vector<8x50xf32>, vector<8x50xf32> -> vector<8x100xf32>
    %c3_69 = arith.constant 3 : index
    %c0_70 = arith.constant 0 : index
    %c0_71 = arith.constant 0 : index
    %281 = vector.load %arg8[%c3_69, %c0_70, %c0_71] : memref<4x100x200xf32, #tpu.memory_space<vmem>>, vector<1x100x200xf32>
    %282 = vector.shape_cast %281 : vector<1x100x200xf32> to vector<100x200xf32>
    %cst_72 = arith.constant dense<0.000000e+00> : vector<8x200xf32>
    %283 = tpu.matmul %280, %282, %cst_72 {dimension_numbers = #tpu.dot_dimension_numbers<[1], [0], [0], [1], [0, 0, 1, 1], [], []>} : vector<8x100xf32>, vector<100x200xf32>, vector<8x200xf32> -> vector<8x200xf32>
    %284 = arith.addf %283, %23 : vector<8x200xf32>
    %285 = vector.extract_strided_slice %284 {offsets = [0, 0], sizes = [8, 150], strides = [1, 1]} : vector<8x200xf32> to vector<8x150xf32>
    %286 = arith.negf %285 : vector<8x150xf32>
    %287 = math.exp %286 : vector<8x150xf32>
    %cst_73 = arith.constant 1.000000e+00 : f32
    %288 = vector.broadcast %cst_73 : f32 to vector<8x150xf32>
    %289 = arith.addf %288, %287 : vector<8x150xf32>
    %290 = arith.divf %288, %289 : vector<8x150xf32>
    %291 = vector.extract_strided_slice %284 {offsets = [0, 150], sizes = [8, 50], strides = [1, 1]} : vector<8x200xf32> to vector<8x50xf32>
    %292 = math.tanh %291 : vector<8x50xf32>
    %293 = vector.extract_strided_slice %290 {offsets = [0, 0], sizes = [8, 50], strides = [1, 1]} : vector<8x150xf32> to vector<8x50xf32>
    %294 = vector.extract_strided_slice %290 {offsets = [0, 50], sizes = [8, 50], strides = [1, 1]} : vector<8x150xf32> to vector<8x50xf32>
    %295 = vector.extract_strided_slice %290 {offsets = [0, 100], sizes = [8, 50], strides = [1, 1]} : vector<8x150xf32> to vector<8x50xf32>
    %296 = arith.mulf %294, %164 : vector<8x50xf32>
    %297 = arith.mulf %293, %292 : vector<8x50xf32>
    %298 = arith.addf %296, %297 : vector<8x50xf32>
    %299 = math.tanh %298 : vector<8x50xf32>
    %300 = arith.mulf %295, %299 : vector<8x50xf32>
    %301 = vector.shape_cast %169 : vector<8x1xi1> to vector<8x1xi1>
    %302 = vector.broadcast %301 : vector<8x1xi1> to vector<8x50xi1>
    %303 = arith.select %302, %298, %164 : vector<8x50xi1>, vector<8x50xf32>
    %304 = vector.shape_cast %169 : vector<8x1xi1> to vector<8x1xi1>
    %305 = vector.broadcast %304 : vector<8x1xi1> to vector<8x50xi1>
    %306 = arith.select %305, %300, %167 : vector<8x50xi1>, vector<8x50xf32>
    %c2_i32 = arith.constant 2 : i32
    %307 = vector.broadcast %c2_i32 : i32 to vector<8x1xi32>
    %308 = arith.cmpi slt, %307, %7 : vector<8x1xi32>
    %c8_i32_74 = arith.constant 8 : i32
    %309 = arith.muli %c2_i32, %c8_i32_74 : i32
    %310 = tpu.assume_multiple %309, 8 : i32
    %311 = arith.index_cast %310 : i32 to index
    %c0_75 = arith.constant 0 : index
    %312 = vector.load %arg17[%311, %c0_75] : memref<64x200xf32, #tpu.memory_space<vmem>>, vector<8x200xf32>
    %c0_76 = arith.constant 0 : index
    %c0_77 = arith.constant 0 : index
    %313 = vector.load %arg6[%c0_76, %c0_77] : memref<50x200xf32, #tpu.memory_space<vmem>>, vector<50x200xf32>
    %cst_78 = arith.constant dense<0.000000e+00> : vector<8x200xf32>
    %314 = tpu.matmul %198, %313, %cst_78 {dimension_numbers = #tpu.dot_dimension_numbers<[1], [0], [0], [1], [0, 0, 1, 1], [], []>} : vector<8x50xf32>, vector<50x200xf32>, vector<8x200xf32> -> vector<8x200xf32>
    %315 = arith.addf %312, %314 : vector<8x200xf32>
    %316 = vector.extract_strided_slice %315 {offsets = [0, 0], sizes = [8, 150], strides = [1, 1]} : vector<8x200xf32> to vector<8x150xf32>
    %317 = arith.negf %316 : vector<8x150xf32>
    %318 = math.exp %317 : vector<8x150xf32>
    %cst_79 = arith.constant 1.000000e+00 : f32
    %319 = vector.broadcast %cst_79 : f32 to vector<8x150xf32>
    %320 = arith.addf %319, %318 : vector<8x150xf32>
    %321 = arith.divf %319, %320 : vector<8x150xf32>
    %322 = vector.extract_strided_slice %315 {offsets = [0, 150], sizes = [8, 50], strides = [1, 1]} : vector<8x200xf32> to vector<8x50xf32>
    %323 = math.tanh %322 : vector<8x50xf32>
    %324 = vector.extract_strided_slice %321 {offsets = [0, 0], sizes = [8, 50], strides = [1, 1]} : vector<8x150xf32> to vector<8x50xf32>
    %325 = vector.extract_strided_slice %321 {offsets = [0, 50], sizes = [8, 50], strides = [1, 1]} : vector<8x150xf32> to vector<8x50xf32>
    %326 = vector.extract_strided_slice %321 {offsets = [0, 100], sizes = [8, 50], strides = [1, 1]} : vector<8x150xf32> to vector<8x50xf32>
    %327 = arith.mulf %325, %195 : vector<8x50xf32>
    %328 = arith.mulf %324, %323 : vector<8x50xf32>
    %329 = arith.addf %327, %328 : vector<8x50xf32>
    %330 = math.tanh %329 : vector<8x50xf32>
    %331 = arith.mulf %326, %330 : vector<8x50xf32>
    %332 = vector.shape_cast %308 : vector<8x1xi1> to vector<8x1xi1>
    %333 = vector.broadcast %332 : vector<8x1xi1> to vector<8x50xi1>
    %334 = arith.select %333, %329, %195 : vector<8x50xi1>, vector<8x50xf32>
    %335 = vector.shape_cast %308 : vector<8x1xi1> to vector<8x1xi1>
    %336 = vector.broadcast %335 : vector<8x1xi1> to vector<8x50xi1>
    %337 = arith.select %336, %331, %198 : vector<8x50xi1>, vector<8x50xf32>
    %338 = tpu.concatenate %337, %225 in 1 : vector<8x50xf32>, vector<8x50xf32> -> vector<8x100xf32>
    %c0_80 = arith.constant 0 : index
    %c0_81 = arith.constant 0 : index
    %c0_82 = arith.constant 0 : index
    %339 = vector.load %arg8[%c0_80, %c0_81, %c0_82] : memref<4x100x200xf32, #tpu.memory_space<vmem>>, vector<1x100x200xf32>
    %340 = vector.shape_cast %339 : vector<1x100x200xf32> to vector<100x200xf32>
    %cst_83 = arith.constant dense<0.000000e+00> : vector<8x200xf32>
    %341 = tpu.matmul %338, %340, %cst_83 {dimension_numbers = #tpu.dot_dimension_numbers<[1], [0], [0], [1], [0, 0, 1, 1], [], []>} : vector<8x100xf32>, vector<100x200xf32>, vector<8x200xf32> -> vector<8x200xf32>
    %342 = arith.addf %341, %11 : vector<8x200xf32>
    %343 = vector.extract_strided_slice %342 {offsets = [0, 0], sizes = [8, 150], strides = [1, 1]} : vector<8x200xf32> to vector<8x150xf32>
    %344 = arith.negf %343 : vector<8x150xf32>
    %345 = math.exp %344 : vector<8x150xf32>
    %cst_84 = arith.constant 1.000000e+00 : f32
    %346 = vector.broadcast %cst_84 : f32 to vector<8x150xf32>
    %347 = arith.addf %346, %345 : vector<8x150xf32>
    %348 = arith.divf %346, %347 : vector<8x150xf32>
    %349 = vector.extract_strided_slice %342 {offsets = [0, 150], sizes = [8, 50], strides = [1, 1]} : vector<8x200xf32> to vector<8x50xf32>
    %350 = math.tanh %349 : vector<8x50xf32>
    %351 = vector.extract_strided_slice %348 {offsets = [0, 0], sizes = [8, 50], strides = [1, 1]} : vector<8x150xf32> to vector<8x50xf32>
    %352 = vector.extract_strided_slice %348 {offsets = [0, 50], sizes = [8, 50], strides = [1, 1]} : vector<8x150xf32> to vector<8x50xf32>
    %353 = vector.extract_strided_slice %348 {offsets = [0, 100], sizes = [8, 50], strides = [1, 1]} : vector<8x150xf32> to vector<8x50xf32>
    %354 = arith.mulf %352, %222 : vector<8x50xf32>
    %355 = arith.mulf %351, %350 : vector<8x50xf32>
    %356 = arith.addf %354, %355 : vector<8x50xf32>
    %357 = math.tanh %356 : vector<8x50xf32>
    %358 = arith.mulf %353, %357 : vector<8x50xf32>
    %359 = vector.shape_cast %308 : vector<8x1xi1> to vector<8x1xi1>
    %360 = vector.broadcast %359 : vector<8x1xi1> to vector<8x50xi1>
    %361 = arith.select %360, %356, %222 : vector<8x50xi1>, vector<8x50xf32>
    %362 = vector.shape_cast %308 : vector<8x1xi1> to vector<8x1xi1>
    %363 = vector.broadcast %362 : vector<8x1xi1> to vector<8x50xi1>
    %364 = arith.select %363, %358, %225 : vector<8x50xi1>, vector<8x50xf32>
    %365 = tpu.concatenate %364, %252 in 1 : vector<8x50xf32>, vector<8x50xf32> -> vector<8x100xf32>
    %c1_85 = arith.constant 1 : index
    %c0_86 = arith.constant 0 : index
    %c0_87 = arith.constant 0 : index
    %366 = vector.load %arg8[%c1_85, %c0_86, %c0_87] : memref<4x100x200xf32, #tpu.memory_space<vmem>>, vector<1x100x200xf32>
    %367 = vector.shape_cast %366 : vector<1x100x200xf32> to vector<100x200xf32>
    %cst_88 = arith.constant dense<0.000000e+00> : vector<8x200xf32>
    %368 = tpu.matmul %365, %367, %cst_88 {dimension_numbers = #tpu.dot_dimension_numbers<[1], [0], [0], [1], [0, 0, 1, 1], [], []>} : vector<8x100xf32>, vector<100x200xf32>, vector<8x200xf32> -> vector<8x200xf32>
    %369 = arith.addf %368, %15 : vector<8x200xf32>
    %370 = vector.extract_strided_slice %369 {offsets = [0, 0], sizes = [8, 150], strides = [1, 1]} : vector<8x200xf32> to vector<8x150xf32>
    %371 = arith.negf %370 : vector<8x150xf32>
    %372 = math.exp %371 : vector<8x150xf32>
    %cst_89 = arith.constant 1.000000e+00 : f32
    %373 = vector.broadcast %cst_89 : f32 to vector<8x150xf32>
    %374 = arith.addf %373, %372 : vector<8x150xf32>
    %375 = arith.divf %373, %374 : vector<8x150xf32>
    %376 = vector.extract_strided_slice %369 {offsets = [0, 150], sizes = [8, 50], strides = [1, 1]} : vector<8x200xf32> to vector<8x50xf32>
    %377 = math.tanh %376 : vector<8x50xf32>
    %378 = vector.extract_strided_slice %375 {offsets = [0, 0], sizes = [8, 50], strides = [1, 1]} : vector<8x150xf32> to vector<8x50xf32>
    %379 = vector.extract_strided_slice %375 {offsets = [0, 50], sizes = [8, 50], strides = [1, 1]} : vector<8x150xf32> to vector<8x50xf32>
    %380 = vector.extract_strided_slice %375 {offsets = [0, 100], sizes = [8, 50], strides = [1, 1]} : vector<8x150xf32> to vector<8x50xf32>
    %381 = arith.mulf %379, %249 : vector<8x50xf32>
    %382 = arith.mulf %378, %377 : vector<8x50xf32>
    %383 = arith.addf %381, %382 : vector<8x50xf32>
    %384 = math.tanh %383 : vector<8x50xf32>
    %385 = arith.mulf %380, %384 : vector<8x50xf32>
    %386 = vector.shape_cast %308 : vector<8x1xi1> to vector<8x1xi1>
    %387 = vector.broadcast %386 : vector<8x1xi1> to vector<8x50xi1>
    %388 = arith.select %387, %383, %249 : vector<8x50xi1>, vector<8x50xf32>
    %389 = vector.shape_cast %308 : vector<8x1xi1> to vector<8x1xi1>
    %390 = vector.broadcast %389 : vector<8x1xi1> to vector<8x50xi1>
    %391 = arith.select %390, %385, %252 : vector<8x50xi1>, vector<8x50xf32>
    %392 = tpu.concatenate %391, %279 in 1 : vector<8x50xf32>, vector<8x50xf32> -> vector<8x100xf32>
    %c2_90 = arith.constant 2 : index
    %c0_91 = arith.constant 0 : index
    %c0_92 = arith.constant 0 : index
    %393 = vector.load %arg8[%c2_90, %c0_91, %c0_92] : memref<4x100x200xf32, #tpu.memory_space<vmem>>, vector<1x100x200xf32>
    %394 = vector.shape_cast %393 : vector<1x100x200xf32> to vector<100x200xf32>
    %cst_93 = arith.constant dense<0.000000e+00> : vector<8x200xf32>
    %395 = tpu.matmul %392, %394, %cst_93 {dimension_numbers = #tpu.dot_dimension_numbers<[1], [0], [0], [1], [0, 0, 1, 1], [], []>} : vector<8x100xf32>, vector<100x200xf32>, vector<8x200xf32> -> vector<8x200xf32>
    %396 = arith.addf %395, %19 : vector<8x200xf32>
    %397 = vector.extract_strided_slice %396 {offsets = [0, 0], sizes = [8, 150], strides = [1, 1]} : vector<8x200xf32> to vector<8x150xf32>
    %398 = arith.negf %397 : vector<8x150xf32>
    %399 = math.exp %398 : vector<8x150xf32>
    %cst_94 = arith.constant 1.000000e+00 : f32
    %400 = vector.broadcast %cst_94 : f32 to vector<8x150xf32>
    %401 = arith.addf %400, %399 : vector<8x150xf32>
    %402 = arith.divf %400, %401 : vector<8x150xf32>
    %403 = vector.extract_strided_slice %396 {offsets = [0, 150], sizes = [8, 50], strides = [1, 1]} : vector<8x200xf32> to vector<8x50xf32>
    %404 = math.tanh %403 : vector<8x50xf32>
    %405 = vector.extract_strided_slice %402 {offsets = [0, 0], sizes = [8, 50], strides = [1, 1]} : vector<8x150xf32> to vector<8x50xf32>
    %406 = vector.extract_strided_slice %402 {offsets = [0, 50], sizes = [8, 50], strides = [1, 1]} : vector<8x150xf32> to vector<8x50xf32>
    %407 = vector.extract_strided_slice %402 {offsets = [0, 100], sizes = [8, 50], strides = [1, 1]} : vector<8x150xf32> to vector<8x50xf32>
    %408 = arith.mulf %406, %276 : vector<8x50xf32>
    %409 = arith.mulf %405, %404 : vector<8x50xf32>
    %410 = arith.addf %408, %409 : vector<8x50xf32>
    %411 = math.tanh %410 : vector<8x50xf32>
    %412 = arith.mulf %407, %411 : vector<8x50xf32>
    %413 = vector.shape_cast %308 : vector<8x1xi1> to vector<8x1xi1>
    %414 = vector.broadcast %413 : vector<8x1xi1> to vector<8x50xi1>
    %415 = arith.select %414, %410, %276 : vector<8x50xi1>, vector<8x50xf32>
    %416 = vector.shape_cast %308 : vector<8x1xi1> to vector<8x1xi1>
    %417 = vector.broadcast %416 : vector<8x1xi1> to vector<8x50xi1>
    %418 = arith.select %417, %412, %279 : vector<8x50xi1>, vector<8x50xf32>
    %419 = tpu.concatenate %418, %306 in 1 : vector<8x50xf32>, vector<8x50xf32> -> vector<8x100xf32>
    %c3_95 = arith.constant 3 : index
    %c0_96 = arith.constant 0 : index
    %c0_97 = arith.constant 0 : index
    %420 = vector.load %arg8[%c3_95, %c0_96, %c0_97] : memref<4x100x200xf32, #tpu.memory_space<vmem>>, vector<1x100x200xf32>
    %421 = vector.shape_cast %420 : vector<1x100x200xf32> to vector<100x200xf32>
    %cst_98 = arith.constant dense<0.000000e+00> : vector<8x200xf32>
    %422 = tpu.matmul %419, %421, %cst_98 {dimension_numbers = #tpu.dot_dimension_numbers<[1], [0], [0], [1], [0, 0, 1, 1], [], []>} : vector<8x100xf32>, vector<100x200xf32>, vector<8x200xf32> -> vector<8x200xf32>
    %423 = arith.addf %422, %23 : vector<8x200xf32>
    %424 = vector.extract_strided_slice %423 {offsets = [0, 0], sizes = [8, 150], strides = [1, 1]} : vector<8x200xf32> to vector<8x150xf32>
    %425 = arith.negf %424 : vector<8x150xf32>
    %426 = math.exp %425 : vector<8x150xf32>
    %cst_99 = arith.constant 1.000000e+00 : f32
    %427 = vector.broadcast %cst_99 : f32 to vector<8x150xf32>
    %428 = arith.addf %427, %426 : vector<8x150xf32>
    %429 = arith.divf %427, %428 : vector<8x150xf32>
    %430 = vector.extract_strided_slice %423 {offsets = [0, 150], sizes = [8, 50], strides = [1, 1]} : vector<8x200xf32> to vector<8x50xf32>
    %431 = math.tanh %430 : vector<8x50xf32>
    %432 = vector.extract_strided_slice %429 {offsets = [0, 0], sizes = [8, 50], strides = [1, 1]} : vector<8x150xf32> to vector<8x50xf32>
    %433 = vector.extract_strided_slice %429 {offsets = [0, 50], sizes = [8, 50], strides = [1, 1]} : vector<8x150xf32> to vector<8x50xf32>
    %434 = vector.extract_strided_slice %429 {offsets = [0, 100], sizes = [8, 50], strides = [1, 1]} : vector<8x150xf32> to vector<8x50xf32>
    %435 = arith.mulf %433, %303 : vector<8x50xf32>
    %436 = arith.mulf %432, %431 : vector<8x50xf32>
    %437 = arith.addf %435, %436 : vector<8x50xf32>
    %438 = math.tanh %437 : vector<8x50xf32>
    %439 = arith.mulf %434, %438 : vector<8x50xf32>
    %440 = vector.shape_cast %308 : vector<8x1xi1> to vector<8x1xi1>
    %441 = vector.broadcast %440 : vector<8x1xi1> to vector<8x50xi1>
    %442 = arith.select %441, %437, %303 : vector<8x50xi1>, vector<8x50xf32>
    %443 = vector.shape_cast %308 : vector<8x1xi1> to vector<8x1xi1>
    %444 = vector.broadcast %443 : vector<8x1xi1> to vector<8x50xi1>
    %445 = arith.select %444, %439, %306 : vector<8x50xi1>, vector<8x50xf32>
    %c3_i32 = arith.constant 3 : i32
    %446 = vector.broadcast %c3_i32 : i32 to vector<8x1xi32>
    %447 = arith.cmpi slt, %446, %7 : vector<8x1xi32>
    %c8_i32_100 = arith.constant 8 : i32
    %448 = arith.muli %c3_i32, %c8_i32_100 : i32
    %449 = tpu.assume_multiple %448, 8 : i32
    %450 = arith.index_cast %449 : i32 to index
    %c0_101 = arith.constant 0 : index
    %451 = vector.load %arg17[%450, %c0_101] : memref<64x200xf32, #tpu.memory_space<vmem>>, vector<8x200xf32>
    %c0_102 = arith.constant 0 : index
    %c0_103 = arith.constant 0 : index
    %452 = vector.load %arg6[%c0_102, %c0_103] : memref<50x200xf32, #tpu.memory_space<vmem>>, vector<50x200xf32>
    %cst_104 = arith.constant dense<0.000000e+00> : vector<8x200xf32>
    %453 = tpu.matmul %337, %452, %cst_104 {dimension_numbers = #tpu.dot_dimension_numbers<[1], [0], [0], [1], [0, 0, 1, 1], [], []>} : vector<8x50xf32>, vector<50x200xf32>, vector<8x200xf32> -> vector<8x200xf32>
    %454 = arith.addf %451, %453 : vector<8x200xf32>
    %455 = vector.extract_strided_slice %454 {offsets = [0, 0], sizes = [8, 150], strides = [1, 1]} : vector<8x200xf32> to vector<8x150xf32>
    %456 = arith.negf %455 : vector<8x150xf32>
    %457 = math.exp %456 : vector<8x150xf32>
    %cst_105 = arith.constant 1.000000e+00 : f32
    %458 = vector.broadcast %cst_105 : f32 to vector<8x150xf32>
    %459 = arith.addf %458, %457 : vector<8x150xf32>
    %460 = arith.divf %458, %459 : vector<8x150xf32>
    %461 = vector.extract_strided_slice %454 {offsets = [0, 150], sizes = [8, 50], strides = [1, 1]} : vector<8x200xf32> to vector<8x50xf32>
    %462 = math.tanh %461 : vector<8x50xf32>
    %463 = vector.extract_strided_slice %460 {offsets = [0, 0], sizes = [8, 50], strides = [1, 1]} : vector<8x150xf32> to vector<8x50xf32>
    %464 = vector.extract_strided_slice %460 {offsets = [0, 50], sizes = [8, 50], strides = [1, 1]} : vector<8x150xf32> to vector<8x50xf32>
    %465 = vector.extract_strided_slice %460 {offsets = [0, 100], sizes = [8, 50], strides = [1, 1]} : vector<8x150xf32> to vector<8x50xf32>
    %466 = arith.mulf %464, %334 : vector<8x50xf32>
    %467 = arith.mulf %463, %462 : vector<8x50xf32>
    %468 = arith.addf %466, %467 : vector<8x50xf32>
    %469 = math.tanh %468 : vector<8x50xf32>
    %470 = arith.mulf %465, %469 : vector<8x50xf32>
    %471 = vector.shape_cast %447 : vector<8x1xi1> to vector<8x1xi1>
    %472 = vector.broadcast %471 : vector<8x1xi1> to vector<8x50xi1>
    %473 = arith.select %472, %468, %334 : vector<8x50xi1>, vector<8x50xf32>
    %474 = vector.shape_cast %447 : vector<8x1xi1> to vector<8x1xi1>
    %475 = vector.broadcast %474 : vector<8x1xi1> to vector<8x50xi1>
    %476 = arith.select %475, %470, %337 : vector<8x50xi1>, vector<8x50xf32>
    %477 = tpu.concatenate %476, %364 in 1 : vector<8x50xf32>, vector<8x50xf32> -> vector<8x100xf32>
    %c0_106 = arith.constant 0 : index
    %c0_107 = arith.constant 0 : index
    %c0_108 = arith.constant 0 : index
    %478 = vector.load %arg8[%c0_106, %c0_107, %c0_108] : memref<4x100x200xf32, #tpu.memory_space<vmem>>, vector<1x100x200xf32>
    %479 = vector.shape_cast %478 : vector<1x100x200xf32> to vector<100x200xf32>
    %cst_109 = arith.constant dense<0.000000e+00> : vector<8x200xf32>
    %480 = tpu.matmul %477, %479, %cst_109 {dimension_numbers = #tpu.dot_dimension_numbers<[1], [0], [0], [1], [0, 0, 1, 1], [], []>} : vector<8x100xf32>, vector<100x200xf32>, vector<8x200xf32> -> vector<8x200xf32>
    %481 = arith.addf %480, %11 : vector<8x200xf32>
    %482 = vector.extract_strided_slice %481 {offsets = [0, 0], sizes = [8, 150], strides = [1, 1]} : vector<8x200xf32> to vector<8x150xf32>
    %483 = arith.negf %482 : vector<8x150xf32>
    %484 = math.exp %483 : vector<8x150xf32>
    %cst_110 = arith.constant 1.000000e+00 : f32
    %485 = vector.broadcast %cst_110 : f32 to vector<8x150xf32>
    %486 = arith.addf %485, %484 : vector<8x150xf32>
    %487 = arith.divf %485, %486 : vector<8x150xf32>
    %488 = vector.extract_strided_slice %481 {offsets = [0, 150], sizes = [8, 50], strides = [1, 1]} : vector<8x200xf32> to vector<8x50xf32>
    %489 = math.tanh %488 : vector<8x50xf32>
    %490 = vector.extract_strided_slice %487 {offsets = [0, 0], sizes = [8, 50], strides = [1, 1]} : vector<8x150xf32> to vector<8x50xf32>
    %491 = vector.extract_strided_slice %487 {offsets = [0, 50], sizes = [8, 50], strides = [1, 1]} : vector<8x150xf32> to vector<8x50xf32>
    %492 = vector.extract_strided_slice %487 {offsets = [0, 100], sizes = [8, 50], strides = [1, 1]} : vector<8x150xf32> to vector<8x50xf32>
    %493 = arith.mulf %491, %361 : vector<8x50xf32>
    %494 = arith.mulf %490, %489 : vector<8x50xf32>
    %495 = arith.addf %493, %494 : vector<8x50xf32>
    %496 = math.tanh %495 : vector<8x50xf32>
    %497 = arith.mulf %492, %496 : vector<8x50xf32>
    %498 = vector.shape_cast %447 : vector<8x1xi1> to vector<8x1xi1>
    %499 = vector.broadcast %498 : vector<8x1xi1> to vector<8x50xi1>
    %500 = arith.select %499, %495, %361 : vector<8x50xi1>, vector<8x50xf32>
    %501 = vector.shape_cast %447 : vector<8x1xi1> to vector<8x1xi1>
    %502 = vector.broadcast %501 : vector<8x1xi1> to vector<8x50xi1>
    %503 = arith.select %502, %497, %364 : vector<8x50xi1>, vector<8x50xf32>
    %504 = tpu.concatenate %503, %391 in 1 : vector<8x50xf32>, vector<8x50xf32> -> vector<8x100xf32>
    %c1_111 = arith.constant 1 : index
    %c0_112 = arith.constant 0 : index
    %c0_113 = arith.constant 0 : index
    %505 = vector.load %arg8[%c1_111, %c0_112, %c0_113] : memref<4x100x200xf32, #tpu.memory_space<vmem>>, vector<1x100x200xf32>
    %506 = vector.shape_cast %505 : vector<1x100x200xf32> to vector<100x200xf32>
    %cst_114 = arith.constant dense<0.000000e+00> : vector<8x200xf32>
    %507 = tpu.matmul %504, %506, %cst_114 {dimension_numbers = #tpu.dot_dimension_numbers<[1], [0], [0], [1], [0, 0, 1, 1], [], []>} : vector<8x100xf32>, vector<100x200xf32>, vector<8x200xf32> -> vector<8x200xf32>
    %508 = arith.addf %507, %15 : vector<8x200xf32>
    %509 = vector.extract_strided_slice %508 {offsets = [0, 0], sizes = [8, 150], strides = [1, 1]} : vector<8x200xf32> to vector<8x150xf32>
    %510 = arith.negf %509 : vector<8x150xf32>
    %511 = math.exp %510 : vector<8x150xf32>
    %cst_115 = arith.constant 1.000000e+00 : f32
    %512 = vector.broadcast %cst_115 : f32 to vector<8x150xf32>
    %513 = arith.addf %512, %511 : vector<8x150xf32>
    %514 = arith.divf %512, %513 : vector<8x150xf32>
    %515 = vector.extract_strided_slice %508 {offsets = [0, 150], sizes = [8, 50], strides = [1, 1]} : vector<8x200xf32> to vector<8x50xf32>
    %516 = math.tanh %515 : vector<8x50xf32>
    %517 = vector.extract_strided_slice %514 {offsets = [0, 0], sizes = [8, 50], strides = [1, 1]} : vector<8x150xf32> to vector<8x50xf32>
    %518 = vector.extract_strided_slice %514 {offsets = [0, 50], sizes = [8, 50], strides = [1, 1]} : vector<8x150xf32> to vector<8x50xf32>
    %519 = vector.extract_strided_slice %514 {offsets = [0, 100], sizes = [8, 50], strides = [1, 1]} : vector<8x150xf32> to vector<8x50xf32>
    %520 = arith.mulf %518, %388 : vector<8x50xf32>
    %521 = arith.mulf %517, %516 : vector<8x50xf32>
    %522 = arith.addf %520, %521 : vector<8x50xf32>
    %523 = math.tanh %522 : vector<8x50xf32>
    %524 = arith.mulf %519, %523 : vector<8x50xf32>
    %525 = vector.shape_cast %447 : vector<8x1xi1> to vector<8x1xi1>
    %526 = vector.broadcast %525 : vector<8x1xi1> to vector<8x50xi1>
    %527 = arith.select %526, %522, %388 : vector<8x50xi1>, vector<8x50xf32>
    %528 = vector.shape_cast %447 : vector<8x1xi1> to vector<8x1xi1>
    %529 = vector.broadcast %528 : vector<8x1xi1> to vector<8x50xi1>
    %530 = arith.select %529, %524, %391 : vector<8x50xi1>, vector<8x50xf32>
    %531 = tpu.concatenate %530, %418 in 1 : vector<8x50xf32>, vector<8x50xf32> -> vector<8x100xf32>
    %c2_116 = arith.constant 2 : index
    %c0_117 = arith.constant 0 : index
    %c0_118 = arith.constant 0 : index
    %532 = vector.load %arg8[%c2_116, %c0_117, %c0_118] : memref<4x100x200xf32, #tpu.memory_space<vmem>>, vector<1x100x200xf32>
    %533 = vector.shape_cast %532 : vector<1x100x200xf32> to vector<100x200xf32>
    %cst_119 = arith.constant dense<0.000000e+00> : vector<8x200xf32>
    %534 = tpu.matmul %531, %533, %cst_119 {dimension_numbers = #tpu.dot_dimension_numbers<[1], [0], [0], [1], [0, 0, 1, 1], [], []>} : vector<8x100xf32>, vector<100x200xf32>, vector<8x200xf32> -> vector<8x200xf32>
    %535 = arith.addf %534, %19 : vector<8x200xf32>
    %536 = vector.extract_strided_slice %535 {offsets = [0, 0], sizes = [8, 150], strides = [1, 1]} : vector<8x200xf32> to vector<8x150xf32>
    %537 = arith.negf %536 : vector<8x150xf32>
    %538 = math.exp %537 : vector<8x150xf32>
    %cst_120 = arith.constant 1.000000e+00 : f32
    %539 = vector.broadcast %cst_120 : f32 to vector<8x150xf32>
    %540 = arith.addf %539, %538 : vector<8x150xf32>
    %541 = arith.divf %539, %540 : vector<8x150xf32>
    %542 = vector.extract_strided_slice %535 {offsets = [0, 150], sizes = [8, 50], strides = [1, 1]} : vector<8x200xf32> to vector<8x50xf32>
    %543 = math.tanh %542 : vector<8x50xf32>
    %544 = vector.extract_strided_slice %541 {offsets = [0, 0], sizes = [8, 50], strides = [1, 1]} : vector<8x150xf32> to vector<8x50xf32>
    %545 = vector.extract_strided_slice %541 {offsets = [0, 50], sizes = [8, 50], strides = [1, 1]} : vector<8x150xf32> to vector<8x50xf32>
    %546 = vector.extract_strided_slice %541 {offsets = [0, 100], sizes = [8, 50], strides = [1, 1]} : vector<8x150xf32> to vector<8x50xf32>
    %547 = arith.mulf %545, %415 : vector<8x50xf32>
    %548 = arith.mulf %544, %543 : vector<8x50xf32>
    %549 = arith.addf %547, %548 : vector<8x50xf32>
    %550 = math.tanh %549 : vector<8x50xf32>
    %551 = arith.mulf %546, %550 : vector<8x50xf32>
    %552 = vector.shape_cast %447 : vector<8x1xi1> to vector<8x1xi1>
    %553 = vector.broadcast %552 : vector<8x1xi1> to vector<8x50xi1>
    %554 = arith.select %553, %549, %415 : vector<8x50xi1>, vector<8x50xf32>
    %555 = vector.shape_cast %447 : vector<8x1xi1> to vector<8x1xi1>
    %556 = vector.broadcast %555 : vector<8x1xi1> to vector<8x50xi1>
    %557 = arith.select %556, %551, %418 : vector<8x50xi1>, vector<8x50xf32>
    %558 = tpu.concatenate %557, %445 in 1 : vector<8x50xf32>, vector<8x50xf32> -> vector<8x100xf32>
    %c3_121 = arith.constant 3 : index
    %c0_122 = arith.constant 0 : index
    %c0_123 = arith.constant 0 : index
    %559 = vector.load %arg8[%c3_121, %c0_122, %c0_123] : memref<4x100x200xf32, #tpu.memory_space<vmem>>, vector<1x100x200xf32>
    %560 = vector.shape_cast %559 : vector<1x100x200xf32> to vector<100x200xf32>
    %cst_124 = arith.constant dense<0.000000e+00> : vector<8x200xf32>
    %561 = tpu.matmul %558, %560, %cst_124 {dimension_numbers = #tpu.dot_dimension_numbers<[1], [0], [0], [1], [0, 0, 1, 1], [], []>} : vector<8x100xf32>, vector<100x200xf32>, vector<8x200xf32> -> vector<8x200xf32>
    %562 = arith.addf %561, %23 : vector<8x200xf32>
    %563 = vector.extract_strided_slice %562 {offsets = [0, 0], sizes = [8, 150], strides = [1, 1]} : vector<8x200xf32> to vector<8x150xf32>
    %564 = arith.negf %563 : vector<8x150xf32>
    %565 = math.exp %564 : vector<8x150xf32>
    %cst_125 = arith.constant 1.000000e+00 : f32
    %566 = vector.broadcast %cst_125 : f32 to vector<8x150xf32>
    %567 = arith.addf %566, %565 : vector<8x150xf32>
    %568 = arith.divf %566, %567 : vector<8x150xf32>
    %569 = vector.extract_strided_slice %562 {offsets = [0, 150], sizes = [8, 50], strides = [1, 1]} : vector<8x200xf32> to vector<8x50xf32>
    %570 = math.tanh %569 : vector<8x50xf32>
    %571 = vector.extract_strided_slice %568 {offsets = [0, 0], sizes = [8, 50], strides = [1, 1]} : vector<8x150xf32> to vector<8x50xf32>
    %572 = vector.extract_strided_slice %568 {offsets = [0, 50], sizes = [8, 50], strides = [1, 1]} : vector<8x150xf32> to vector<8x50xf32>
    %573 = vector.extract_strided_slice %568 {offsets = [0, 100], sizes = [8, 50], strides = [1, 1]} : vector<8x150xf32> to vector<8x50xf32>
    %574 = arith.mulf %572, %442 : vector<8x50xf32>
    %575 = arith.mulf %571, %570 : vector<8x50xf32>
    %576 = arith.addf %574, %575 : vector<8x50xf32>
    %577 = math.tanh %576 : vector<8x50xf32>
    %578 = arith.mulf %573, %577 : vector<8x50xf32>
    %579 = vector.shape_cast %447 : vector<8x1xi1> to vector<8x1xi1>
    %580 = vector.broadcast %579 : vector<8x1xi1> to vector<8x50xi1>
    %581 = arith.select %580, %576, %442 : vector<8x50xi1>, vector<8x50xf32>
    %582 = vector.shape_cast %447 : vector<8x1xi1> to vector<8x1xi1>
    %583 = vector.broadcast %582 : vector<8x1xi1> to vector<8x50xi1>
    %584 = arith.select %583, %578, %445 : vector<8x50xi1>, vector<8x50xf32>
    %c4_i32 = arith.constant 4 : i32
    %585 = vector.broadcast %c4_i32 : i32 to vector<8x1xi32>
    %586 = arith.cmpi slt, %585, %7 : vector<8x1xi32>
    %c8_i32_126 = arith.constant 8 : i32
    %587 = arith.muli %c4_i32, %c8_i32_126 : i32
    %588 = tpu.assume_multiple %587, 8 : i32
    %589 = arith.index_cast %588 : i32 to index
    %c0_127 = arith.constant 0 : index
    %590 = vector.load %arg17[%589, %c0_127] : memref<64x200xf32, #tpu.memory_space<vmem>>, vector<8x200xf32>
    %c0_128 = arith.constant 0 : index
    %c0_129 = arith.constant 0 : index
    %591 = vector.load %arg6[%c0_128, %c0_129] : memref<50x200xf32, #tpu.memory_space<vmem>>, vector<50x200xf32>
    %cst_130 = arith.constant dense<0.000000e+00> : vector<8x200xf32>
    %592 = tpu.matmul %476, %591, %cst_130 {dimension_numbers = #tpu.dot_dimension_numbers<[1], [0], [0], [1], [0, 0, 1, 1], [], []>} : vector<8x50xf32>, vector<50x200xf32>, vector<8x200xf32> -> vector<8x200xf32>
    %593 = arith.addf %590, %592 : vector<8x200xf32>
    %594 = vector.extract_strided_slice %593 {offsets = [0, 0], sizes = [8, 150], strides = [1, 1]} : vector<8x200xf32> to vector<8x150xf32>
    %595 = arith.negf %594 : vector<8x150xf32>
    %596 = math.exp %595 : vector<8x150xf32>
    %cst_131 = arith.constant 1.000000e+00 : f32
    %597 = vector.broadcast %cst_131 : f32 to vector<8x150xf32>
    %598 = arith.addf %597, %596 : vector<8x150xf32>
    %599 = arith.divf %597, %598 : vector<8x150xf32>
    %600 = vector.extract_strided_slice %593 {offsets = [0, 150], sizes = [8, 50], strides = [1, 1]} : vector<8x200xf32> to vector<8x50xf32>
    %601 = math.tanh %600 : vector<8x50xf32>
    %602 = vector.extract_strided_slice %599 {offsets = [0, 0], sizes = [8, 50], strides = [1, 1]} : vector<8x150xf32> to vector<8x50xf32>
    %603 = vector.extract_strided_slice %599 {offsets = [0, 50], sizes = [8, 50], strides = [1, 1]} : vector<8x150xf32> to vector<8x50xf32>
    %604 = vector.extract_strided_slice %599 {offsets = [0, 100], sizes = [8, 50], strides = [1, 1]} : vector<8x150xf32> to vector<8x50xf32>
    %605 = arith.mulf %603, %473 : vector<8x50xf32>
    %606 = arith.mulf %602, %601 : vector<8x50xf32>
    %607 = arith.addf %605, %606 : vector<8x50xf32>
    %608 = math.tanh %607 : vector<8x50xf32>
    %609 = arith.mulf %604, %608 : vector<8x50xf32>
    %610 = vector.shape_cast %586 : vector<8x1xi1> to vector<8x1xi1>
    %611 = vector.broadcast %610 : vector<8x1xi1> to vector<8x50xi1>
    %612 = arith.select %611, %607, %473 : vector<8x50xi1>, vector<8x50xf32>
    %613 = vector.shape_cast %586 : vector<8x1xi1> to vector<8x1xi1>
    %614 = vector.broadcast %613 : vector<8x1xi1> to vector<8x50xi1>
    %615 = arith.select %614, %609, %476 : vector<8x50xi1>, vector<8x50xf32>
    %616 = tpu.concatenate %615, %503 in 1 : vector<8x50xf32>, vector<8x50xf32> -> vector<8x100xf32>
    %c0_132 = arith.constant 0 : index
    %c0_133 = arith.constant 0 : index
    %c0_134 = arith.constant 0 : index
    %617 = vector.load %arg8[%c0_132, %c0_133, %c0_134] : memref<4x100x200xf32, #tpu.memory_space<vmem>>, vector<1x100x200xf32>
    %618 = vector.shape_cast %617 : vector<1x100x200xf32> to vector<100x200xf32>
    %cst_135 = arith.constant dense<0.000000e+00> : vector<8x200xf32>
    %619 = tpu.matmul %616, %618, %cst_135 {dimension_numbers = #tpu.dot_dimension_numbers<[1], [0], [0], [1], [0, 0, 1, 1], [], []>} : vector<8x100xf32>, vector<100x200xf32>, vector<8x200xf32> -> vector<8x200xf32>
    %620 = arith.addf %619, %11 : vector<8x200xf32>
    %621 = vector.extract_strided_slice %620 {offsets = [0, 0], sizes = [8, 150], strides = [1, 1]} : vector<8x200xf32> to vector<8x150xf32>
    %622 = arith.negf %621 : vector<8x150xf32>
    %623 = math.exp %622 : vector<8x150xf32>
    %cst_136 = arith.constant 1.000000e+00 : f32
    %624 = vector.broadcast %cst_136 : f32 to vector<8x150xf32>
    %625 = arith.addf %624, %623 : vector<8x150xf32>
    %626 = arith.divf %624, %625 : vector<8x150xf32>
    %627 = vector.extract_strided_slice %620 {offsets = [0, 150], sizes = [8, 50], strides = [1, 1]} : vector<8x200xf32> to vector<8x50xf32>
    %628 = math.tanh %627 : vector<8x50xf32>
    %629 = vector.extract_strided_slice %626 {offsets = [0, 0], sizes = [8, 50], strides = [1, 1]} : vector<8x150xf32> to vector<8x50xf32>
    %630 = vector.extract_strided_slice %626 {offsets = [0, 50], sizes = [8, 50], strides = [1, 1]} : vector<8x150xf32> to vector<8x50xf32>
    %631 = vector.extract_strided_slice %626 {offsets = [0, 100], sizes = [8, 50], strides = [1, 1]} : vector<8x150xf32> to vector<8x50xf32>
    %632 = arith.mulf %630, %500 : vector<8x50xf32>
    %633 = arith.mulf %629, %628 : vector<8x50xf32>
    %634 = arith.addf %632, %633 : vector<8x50xf32>
    %635 = math.tanh %634 : vector<8x50xf32>
    %636 = arith.mulf %631, %635 : vector<8x50xf32>
    %637 = vector.shape_cast %586 : vector<8x1xi1> to vector<8x1xi1>
    %638 = vector.broadcast %637 : vector<8x1xi1> to vector<8x50xi1>
    %639 = arith.select %638, %634, %500 : vector<8x50xi1>, vector<8x50xf32>
    %640 = vector.shape_cast %586 : vector<8x1xi1> to vector<8x1xi1>
    %641 = vector.broadcast %640 : vector<8x1xi1> to vector<8x50xi1>
    %642 = arith.select %641, %636, %503 : vector<8x50xi1>, vector<8x50xf32>
    %643 = tpu.concatenate %642, %530 in 1 : vector<8x50xf32>, vector<8x50xf32> -> vector<8x100xf32>
    %c1_137 = arith.constant 1 : index
    %c0_138 = arith.constant 0 : index
    %c0_139 = arith.constant 0 : index
    %644 = vector.load %arg8[%c1_137, %c0_138, %c0_139] : memref<4x100x200xf32, #tpu.memory_space<vmem>>, vector<1x100x200xf32>
    %645 = vector.shape_cast %644 : vector<1x100x200xf32> to vector<100x200xf32>
    %cst_140 = arith.constant dense<0.000000e+00> : vector<8x200xf32>
    %646 = tpu.matmul %643, %645, %cst_140 {dimension_numbers = #tpu.dot_dimension_numbers<[1], [0], [0], [1], [0, 0, 1, 1], [], []>} : vector<8x100xf32>, vector<100x200xf32>, vector<8x200xf32> -> vector<8x200xf32>
    %647 = arith.addf %646, %15 : vector<8x200xf32>
    %648 = vector.extract_strided_slice %647 {offsets = [0, 0], sizes = [8, 150], strides = [1, 1]} : vector<8x200xf32> to vector<8x150xf32>
    %649 = arith.negf %648 : vector<8x150xf32>
    %650 = math.exp %649 : vector<8x150xf32>
    %cst_141 = arith.constant 1.000000e+00 : f32
    %651 = vector.broadcast %cst_141 : f32 to vector<8x150xf32>
    %652 = arith.addf %651, %650 : vector<8x150xf32>
    %653 = arith.divf %651, %652 : vector<8x150xf32>
    %654 = vector.extract_strided_slice %647 {offsets = [0, 150], sizes = [8, 50], strides = [1, 1]} : vector<8x200xf32> to vector<8x50xf32>
    %655 = math.tanh %654 : vector<8x50xf32>
    %656 = vector.extract_strided_slice %653 {offsets = [0, 0], sizes = [8, 50], strides = [1, 1]} : vector<8x150xf32> to vector<8x50xf32>
    %657 = vector.extract_strided_slice %653 {offsets = [0, 50], sizes = [8, 50], strides = [1, 1]} : vector<8x150xf32> to vector<8x50xf32>
    %658 = vector.extract_strided_slice %653 {offsets = [0, 100], sizes = [8, 50], strides = [1, 1]} : vector<8x150xf32> to vector<8x50xf32>
    %659 = arith.mulf %657, %527 : vector<8x50xf32>
    %660 = arith.mulf %656, %655 : vector<8x50xf32>
    %661 = arith.addf %659, %660 : vector<8x50xf32>
    %662 = math.tanh %661 : vector<8x50xf32>
    %663 = arith.mulf %658, %662 : vector<8x50xf32>
    %664 = vector.shape_cast %586 : vector<8x1xi1> to vector<8x1xi1>
    %665 = vector.broadcast %664 : vector<8x1xi1> to vector<8x50xi1>
    %666 = arith.select %665, %661, %527 : vector<8x50xi1>, vector<8x50xf32>
    %667 = vector.shape_cast %586 : vector<8x1xi1> to vector<8x1xi1>
    %668 = vector.broadcast %667 : vector<8x1xi1> to vector<8x50xi1>
    %669 = arith.select %668, %663, %530 : vector<8x50xi1>, vector<8x50xf32>
    %670 = tpu.concatenate %669, %557 in 1 : vector<8x50xf32>, vector<8x50xf32> -> vector<8x100xf32>
    %c2_142 = arith.constant 2 : index
    %c0_143 = arith.constant 0 : index
    %c0_144 = arith.constant 0 : index
    %671 = vector.load %arg8[%c2_142, %c0_143, %c0_144] : memref<4x100x200xf32, #tpu.memory_space<vmem>>, vector<1x100x200xf32>
    %672 = vector.shape_cast %671 : vector<1x100x200xf32> to vector<100x200xf32>
    %cst_145 = arith.constant dense<0.000000e+00> : vector<8x200xf32>
    %673 = tpu.matmul %670, %672, %cst_145 {dimension_numbers = #tpu.dot_dimension_numbers<[1], [0], [0], [1], [0, 0, 1, 1], [], []>} : vector<8x100xf32>, vector<100x200xf32>, vector<8x200xf32> -> vector<8x200xf32>
    %674 = arith.addf %673, %19 : vector<8x200xf32>
    %675 = vector.extract_strided_slice %674 {offsets = [0, 0], sizes = [8, 150], strides = [1, 1]} : vector<8x200xf32> to vector<8x150xf32>
    %676 = arith.negf %675 : vector<8x150xf32>
    %677 = math.exp %676 : vector<8x150xf32>
    %cst_146 = arith.constant 1.000000e+00 : f32
    %678 = vector.broadcast %cst_146 : f32 to vector<8x150xf32>
    %679 = arith.addf %678, %677 : vector<8x150xf32>
    %680 = arith.divf %678, %679 : vector<8x150xf32>
    %681 = vector.extract_strided_slice %674 {offsets = [0, 150], sizes = [8, 50], strides = [1, 1]} : vector<8x200xf32> to vector<8x50xf32>
    %682 = math.tanh %681 : vector<8x50xf32>
    %683 = vector.extract_strided_slice %680 {offsets = [0, 0], sizes = [8, 50], strides = [1, 1]} : vector<8x150xf32> to vector<8x50xf32>
    %684 = vector.extract_strided_slice %680 {offsets = [0, 50], sizes = [8, 50], strides = [1, 1]} : vector<8x150xf32> to vector<8x50xf32>
    %685 = vector.extract_strided_slice %680 {offsets = [0, 100], sizes = [8, 50], strides = [1, 1]} : vector<8x150xf32> to vector<8x50xf32>
    %686 = arith.mulf %684, %554 : vector<8x50xf32>
    %687 = arith.mulf %683, %682 : vector<8x50xf32>
    %688 = arith.addf %686, %687 : vector<8x50xf32>
    %689 = math.tanh %688 : vector<8x50xf32>
    %690 = arith.mulf %685, %689 : vector<8x50xf32>
    %691 = vector.shape_cast %586 : vector<8x1xi1> to vector<8x1xi1>
    %692 = vector.broadcast %691 : vector<8x1xi1> to vector<8x50xi1>
    %693 = arith.select %692, %688, %554 : vector<8x50xi1>, vector<8x50xf32>
    %694 = vector.shape_cast %586 : vector<8x1xi1> to vector<8x1xi1>
    %695 = vector.broadcast %694 : vector<8x1xi1> to vector<8x50xi1>
    %696 = arith.select %695, %690, %557 : vector<8x50xi1>, vector<8x50xf32>
    %697 = tpu.concatenate %696, %584 in 1 : vector<8x50xf32>, vector<8x50xf32> -> vector<8x100xf32>
    %c3_147 = arith.constant 3 : index
    %c0_148 = arith.constant 0 : index
    %c0_149 = arith.constant 0 : index
    %698 = vector.load %arg8[%c3_147, %c0_148, %c0_149] : memref<4x100x200xf32, #tpu.memory_space<vmem>>, vector<1x100x200xf32>
    %699 = vector.shape_cast %698 : vector<1x100x200xf32> to vector<100x200xf32>
    %cst_150 = arith.constant dense<0.000000e+00> : vector<8x200xf32>
    %700 = tpu.matmul %697, %699, %cst_150 {dimension_numbers = #tpu.dot_dimension_numbers<[1], [0], [0], [1], [0, 0, 1, 1], [], []>} : vector<8x100xf32>, vector<100x200xf32>, vector<8x200xf32> -> vector<8x200xf32>
    %701 = arith.addf %700, %23 : vector<8x200xf32>
    %702 = vector.extract_strided_slice %701 {offsets = [0, 0], sizes = [8, 150], strides = [1, 1]} : vector<8x200xf32> to vector<8x150xf32>
    %703 = arith.negf %702 : vector<8x150xf32>
    %704 = math.exp %703 : vector<8x150xf32>
    %cst_151 = arith.constant 1.000000e+00 : f32
    %705 = vector.broadcast %cst_151 : f32 to vector<8x150xf32>
    %706 = arith.addf %705, %704 : vector<8x150xf32>
    %707 = arith.divf %705, %706 : vector<8x150xf32>
    %708 = vector.extract_strided_slice %701 {offsets = [0, 150], sizes = [8, 50], strides = [1, 1]} : vector<8x200xf32> to vector<8x50xf32>
    %709 = math.tanh %708 : vector<8x50xf32>
    %710 = vector.extract_strided_slice %707 {offsets = [0, 0], sizes = [8, 50], strides = [1, 1]} : vector<8x150xf32> to vector<8x50xf32>
    %711 = vector.extract_strided_slice %707 {offsets = [0, 50], sizes = [8, 50], strides = [1, 1]} : vector<8x150xf32> to vector<8x50xf32>
    %712 = vector.extract_strided_slice %707 {offsets = [0, 100], sizes = [8, 50], strides = [1, 1]} : vector<8x150xf32> to vector<8x50xf32>
    %713 = arith.mulf %711, %581 : vector<8x50xf32>
    %714 = arith.mulf %710, %709 : vector<8x50xf32>
    %715 = arith.addf %713, %714 : vector<8x50xf32>
    %716 = math.tanh %715 : vector<8x50xf32>
    %717 = arith.mulf %712, %716 : vector<8x50xf32>
    %718 = vector.shape_cast %586 : vector<8x1xi1> to vector<8x1xi1>
    %719 = vector.broadcast %718 : vector<8x1xi1> to vector<8x50xi1>
    %720 = arith.select %719, %715, %581 : vector<8x50xi1>, vector<8x50xf32>
    %721 = vector.shape_cast %586 : vector<8x1xi1> to vector<8x1xi1>
    %722 = vector.broadcast %721 : vector<8x1xi1> to vector<8x50xi1>
    %723 = arith.select %722, %717, %584 : vector<8x50xi1>, vector<8x50xf32>
    %c5_i32 = arith.constant 5 : i32
    %724 = vector.broadcast %c5_i32 : i32 to vector<8x1xi32>
    %725 = arith.cmpi slt, %724, %7 : vector<8x1xi32>
    %c8_i32_152 = arith.constant 8 : i32
    %726 = arith.muli %c5_i32, %c8_i32_152 : i32
    %727 = tpu.assume_multiple %726, 8 : i32
    %728 = arith.index_cast %727 : i32 to index
    %c0_153 = arith.constant 0 : index
    %729 = vector.load %arg17[%728, %c0_153] : memref<64x200xf32, #tpu.memory_space<vmem>>, vector<8x200xf32>
    %c0_154 = arith.constant 0 : index
    %c0_155 = arith.constant 0 : index
    %730 = vector.load %arg6[%c0_154, %c0_155] : memref<50x200xf32, #tpu.memory_space<vmem>>, vector<50x200xf32>
    %cst_156 = arith.constant dense<0.000000e+00> : vector<8x200xf32>
    %731 = tpu.matmul %615, %730, %cst_156 {dimension_numbers = #tpu.dot_dimension_numbers<[1], [0], [0], [1], [0, 0, 1, 1], [], []>} : vector<8x50xf32>, vector<50x200xf32>, vector<8x200xf32> -> vector<8x200xf32>
    %732 = arith.addf %729, %731 : vector<8x200xf32>
    %733 = vector.extract_strided_slice %732 {offsets = [0, 0], sizes = [8, 150], strides = [1, 1]} : vector<8x200xf32> to vector<8x150xf32>
    %734 = arith.negf %733 : vector<8x150xf32>
    %735 = math.exp %734 : vector<8x150xf32>
    %cst_157 = arith.constant 1.000000e+00 : f32
    %736 = vector.broadcast %cst_157 : f32 to vector<8x150xf32>
    %737 = arith.addf %736, %735 : vector<8x150xf32>
    %738 = arith.divf %736, %737 : vector<8x150xf32>
    %739 = vector.extract_strided_slice %732 {offsets = [0, 150], sizes = [8, 50], strides = [1, 1]} : vector<8x200xf32> to vector<8x50xf32>
    %740 = math.tanh %739 : vector<8x50xf32>
    %741 = vector.extract_strided_slice %738 {offsets = [0, 0], sizes = [8, 50], strides = [1, 1]} : vector<8x150xf32> to vector<8x50xf32>
    %742 = vector.extract_strided_slice %738 {offsets = [0, 50], sizes = [8, 50], strides = [1, 1]} : vector<8x150xf32> to vector<8x50xf32>
    %743 = vector.extract_strided_slice %738 {offsets = [0, 100], sizes = [8, 50], strides = [1, 1]} : vector<8x150xf32> to vector<8x50xf32>
    %744 = arith.mulf %742, %612 : vector<8x50xf32>
    %745 = arith.mulf %741, %740 : vector<8x50xf32>
    %746 = arith.addf %744, %745 : vector<8x50xf32>
    %747 = math.tanh %746 : vector<8x50xf32>
    %748 = arith.mulf %743, %747 : vector<8x50xf32>
    %749 = vector.shape_cast %725 : vector<8x1xi1> to vector<8x1xi1>
    %750 = vector.broadcast %749 : vector<8x1xi1> to vector<8x50xi1>
    %751 = arith.select %750, %746, %612 : vector<8x50xi1>, vector<8x50xf32>
    %752 = vector.shape_cast %725 : vector<8x1xi1> to vector<8x1xi1>
    %753 = vector.broadcast %752 : vector<8x1xi1> to vector<8x50xi1>
    %754 = arith.select %753, %748, %615 : vector<8x50xi1>, vector<8x50xf32>
    %755 = tpu.concatenate %754, %642 in 1 : vector<8x50xf32>, vector<8x50xf32> -> vector<8x100xf32>
    %c0_158 = arith.constant 0 : index
    %c0_159 = arith.constant 0 : index
    %c0_160 = arith.constant 0 : index
    %756 = vector.load %arg8[%c0_158, %c0_159, %c0_160] : memref<4x100x200xf32, #tpu.memory_space<vmem>>, vector<1x100x200xf32>
    %757 = vector.shape_cast %756 : vector<1x100x200xf32> to vector<100x200xf32>
    %cst_161 = arith.constant dense<0.000000e+00> : vector<8x200xf32>
    %758 = tpu.matmul %755, %757, %cst_161 {dimension_numbers = #tpu.dot_dimension_numbers<[1], [0], [0], [1], [0, 0, 1, 1], [], []>} : vector<8x100xf32>, vector<100x200xf32>, vector<8x200xf32> -> vector<8x200xf32>
    %759 = arith.addf %758, %11 : vector<8x200xf32>
    %760 = vector.extract_strided_slice %759 {offsets = [0, 0], sizes = [8, 150], strides = [1, 1]} : vector<8x200xf32> to vector<8x150xf32>
    %761 = arith.negf %760 : vector<8x150xf32>
    %762 = math.exp %761 : vector<8x150xf32>
    %cst_162 = arith.constant 1.000000e+00 : f32
    %763 = vector.broadcast %cst_162 : f32 to vector<8x150xf32>
    %764 = arith.addf %763, %762 : vector<8x150xf32>
    %765 = arith.divf %763, %764 : vector<8x150xf32>
    %766 = vector.extract_strided_slice %759 {offsets = [0, 150], sizes = [8, 50], strides = [1, 1]} : vector<8x200xf32> to vector<8x50xf32>
    %767 = math.tanh %766 : vector<8x50xf32>
    %768 = vector.extract_strided_slice %765 {offsets = [0, 0], sizes = [8, 50], strides = [1, 1]} : vector<8x150xf32> to vector<8x50xf32>
    %769 = vector.extract_strided_slice %765 {offsets = [0, 50], sizes = [8, 50], strides = [1, 1]} : vector<8x150xf32> to vector<8x50xf32>
    %770 = vector.extract_strided_slice %765 {offsets = [0, 100], sizes = [8, 50], strides = [1, 1]} : vector<8x150xf32> to vector<8x50xf32>
    %771 = arith.mulf %769, %639 : vector<8x50xf32>
    %772 = arith.mulf %768, %767 : vector<8x50xf32>
    %773 = arith.addf %771, %772 : vector<8x50xf32>
    %774 = math.tanh %773 : vector<8x50xf32>
    %775 = arith.mulf %770, %774 : vector<8x50xf32>
    %776 = vector.shape_cast %725 : vector<8x1xi1> to vector<8x1xi1>
    %777 = vector.broadcast %776 : vector<8x1xi1> to vector<8x50xi1>
    %778 = arith.select %777, %773, %639 : vector<8x50xi1>, vector<8x50xf32>
    %779 = vector.shape_cast %725 : vector<8x1xi1> to vector<8x1xi1>
    %780 = vector.broadcast %779 : vector<8x1xi1> to vector<8x50xi1>
    %781 = arith.select %780, %775, %642 : vector<8x50xi1>, vector<8x50xf32>
    %782 = tpu.concatenate %781, %669 in 1 : vector<8x50xf32>, vector<8x50xf32> -> vector<8x100xf32>
    %c1_163 = arith.constant 1 : index
    %c0_164 = arith.constant 0 : index
    %c0_165 = arith.constant 0 : index
    %783 = vector.load %arg8[%c1_163, %c0_164, %c0_165] : memref<4x100x200xf32, #tpu.memory_space<vmem>>, vector<1x100x200xf32>
    %784 = vector.shape_cast %783 : vector<1x100x200xf32> to vector<100x200xf32>
    %cst_166 = arith.constant dense<0.000000e+00> : vector<8x200xf32>
    %785 = tpu.matmul %782, %784, %cst_166 {dimension_numbers = #tpu.dot_dimension_numbers<[1], [0], [0], [1], [0, 0, 1, 1], [], []>} : vector<8x100xf32>, vector<100x200xf32>, vector<8x200xf32> -> vector<8x200xf32>
    %786 = arith.addf %785, %15 : vector<8x200xf32>
    %787 = vector.extract_strided_slice %786 {offsets = [0, 0], sizes = [8, 150], strides = [1, 1]} : vector<8x200xf32> to vector<8x150xf32>
    %788 = arith.negf %787 : vector<8x150xf32>
    %789 = math.exp %788 : vector<8x150xf32>
    %cst_167 = arith.constant 1.000000e+00 : f32
    %790 = vector.broadcast %cst_167 : f32 to vector<8x150xf32>
    %791 = arith.addf %790, %789 : vector<8x150xf32>
    %792 = arith.divf %790, %791 : vector<8x150xf32>
    %793 = vector.extract_strided_slice %786 {offsets = [0, 150], sizes = [8, 50], strides = [1, 1]} : vector<8x200xf32> to vector<8x50xf32>
    %794 = math.tanh %793 : vector<8x50xf32>
    %795 = vector.extract_strided_slice %792 {offsets = [0, 0], sizes = [8, 50], strides = [1, 1]} : vector<8x150xf32> to vector<8x50xf32>
    %796 = vector.extract_strided_slice %792 {offsets = [0, 50], sizes = [8, 50], strides = [1, 1]} : vector<8x150xf32> to vector<8x50xf32>
    %797 = vector.extract_strided_slice %792 {offsets = [0, 100], sizes = [8, 50], strides = [1, 1]} : vector<8x150xf32> to vector<8x50xf32>
    %798 = arith.mulf %796, %666 : vector<8x50xf32>
    %799 = arith.mulf %795, %794 : vector<8x50xf32>
    %800 = arith.addf %798, %799 : vector<8x50xf32>
    %801 = math.tanh %800 : vector<8x50xf32>
    %802 = arith.mulf %797, %801 : vector<8x50xf32>
    %803 = vector.shape_cast %725 : vector<8x1xi1> to vector<8x1xi1>
    %804 = vector.broadcast %803 : vector<8x1xi1> to vector<8x50xi1>
    %805 = arith.select %804, %800, %666 : vector<8x50xi1>, vector<8x50xf32>
    %806 = vector.shape_cast %725 : vector<8x1xi1> to vector<8x1xi1>
    %807 = vector.broadcast %806 : vector<8x1xi1> to vector<8x50xi1>
    %808 = arith.select %807, %802, %669 : vector<8x50xi1>, vector<8x50xf32>
    %809 = tpu.concatenate %808, %696 in 1 : vector<8x50xf32>, vector<8x50xf32> -> vector<8x100xf32>
    %c2_168 = arith.constant 2 : index
    %c0_169 = arith.constant 0 : index
    %c0_170 = arith.constant 0 : index
    %810 = vector.load %arg8[%c2_168, %c0_169, %c0_170] : memref<4x100x200xf32, #tpu.memory_space<vmem>>, vector<1x100x200xf32>
    %811 = vector.shape_cast %810 : vector<1x100x200xf32> to vector<100x200xf32>
    %cst_171 = arith.constant dense<0.000000e+00> : vector<8x200xf32>
    %812 = tpu.matmul %809, %811, %cst_171 {dimension_numbers = #tpu.dot_dimension_numbers<[1], [0], [0], [1], [0, 0, 1, 1], [], []>} : vector<8x100xf32>, vector<100x200xf32>, vector<8x200xf32> -> vector<8x200xf32>
    %813 = arith.addf %812, %19 : vector<8x200xf32>
    %814 = vector.extract_strided_slice %813 {offsets = [0, 0], sizes = [8, 150], strides = [1, 1]} : vector<8x200xf32> to vector<8x150xf32>
    %815 = arith.negf %814 : vector<8x150xf32>
    %816 = math.exp %815 : vector<8x150xf32>
    %cst_172 = arith.constant 1.000000e+00 : f32
    %817 = vector.broadcast %cst_172 : f32 to vector<8x150xf32>
    %818 = arith.addf %817, %816 : vector<8x150xf32>
    %819 = arith.divf %817, %818 : vector<8x150xf32>
    %820 = vector.extract_strided_slice %813 {offsets = [0, 150], sizes = [8, 50], strides = [1, 1]} : vector<8x200xf32> to vector<8x50xf32>
    %821 = math.tanh %820 : vector<8x50xf32>
    %822 = vector.extract_strided_slice %819 {offsets = [0, 0], sizes = [8, 50], strides = [1, 1]} : vector<8x150xf32> to vector<8x50xf32>
    %823 = vector.extract_strided_slice %819 {offsets = [0, 50], sizes = [8, 50], strides = [1, 1]} : vector<8x150xf32> to vector<8x50xf32>
    %824 = vector.extract_strided_slice %819 {offsets = [0, 100], sizes = [8, 50], strides = [1, 1]} : vector<8x150xf32> to vector<8x50xf32>
    %825 = arith.mulf %823, %693 : vector<8x50xf32>
    %826 = arith.mulf %822, %821 : vector<8x50xf32>
    %827 = arith.addf %825, %826 : vector<8x50xf32>
    %828 = math.tanh %827 : vector<8x50xf32>
    %829 = arith.mulf %824, %828 : vector<8x50xf32>
    %830 = vector.shape_cast %725 : vector<8x1xi1> to vector<8x1xi1>
    %831 = vector.broadcast %830 : vector<8x1xi1> to vector<8x50xi1>
    %832 = arith.select %831, %827, %693 : vector<8x50xi1>, vector<8x50xf32>
    %833 = vector.shape_cast %725 : vector<8x1xi1> to vector<8x1xi1>
    %834 = vector.broadcast %833 : vector<8x1xi1> to vector<8x50xi1>
    %835 = arith.select %834, %829, %696 : vector<8x50xi1>, vector<8x50xf32>
    %836 = tpu.concatenate %835, %723 in 1 : vector<8x50xf32>, vector<8x50xf32> -> vector<8x100xf32>
    %c3_173 = arith.constant 3 : index
    %c0_174 = arith.constant 0 : index
    %c0_175 = arith.constant 0 : index
    %837 = vector.load %arg8[%c3_173, %c0_174, %c0_175] : memref<4x100x200xf32, #tpu.memory_space<vmem>>, vector<1x100x200xf32>
    %838 = vector.shape_cast %837 : vector<1x100x200xf32> to vector<100x200xf32>
    %cst_176 = arith.constant dense<0.000000e+00> : vector<8x200xf32>
    %839 = tpu.matmul %836, %838, %cst_176 {dimension_numbers = #tpu.dot_dimension_numbers<[1], [0], [0], [1], [0, 0, 1, 1], [], []>} : vector<8x100xf32>, vector<100x200xf32>, vector<8x200xf32> -> vector<8x200xf32>
    %840 = arith.addf %839, %23 : vector<8x200xf32>
    %841 = vector.extract_strided_slice %840 {offsets = [0, 0], sizes = [8, 150], strides = [1, 1]} : vector<8x200xf32> to vector<8x150xf32>
    %842 = arith.negf %841 : vector<8x150xf32>
    %843 = math.exp %842 : vector<8x150xf32>
    %cst_177 = arith.constant 1.000000e+00 : f32
    %844 = vector.broadcast %cst_177 : f32 to vector<8x150xf32>
    %845 = arith.addf %844, %843 : vector<8x150xf32>
    %846 = arith.divf %844, %845 : vector<8x150xf32>
    %847 = vector.extract_strided_slice %840 {offsets = [0, 150], sizes = [8, 50], strides = [1, 1]} : vector<8x200xf32> to vector<8x50xf32>
    %848 = math.tanh %847 : vector<8x50xf32>
    %849 = vector.extract_strided_slice %846 {offsets = [0, 0], sizes = [8, 50], strides = [1, 1]} : vector<8x150xf32> to vector<8x50xf32>
    %850 = vector.extract_strided_slice %846 {offsets = [0, 50], sizes = [8, 50], strides = [1, 1]} : vector<8x150xf32> to vector<8x50xf32>
    %851 = vector.extract_strided_slice %846 {offsets = [0, 100], sizes = [8, 50], strides = [1, 1]} : vector<8x150xf32> to vector<8x50xf32>
    %852 = arith.mulf %850, %720 : vector<8x50xf32>
    %853 = arith.mulf %849, %848 : vector<8x50xf32>
    %854 = arith.addf %852, %853 : vector<8x50xf32>
    %855 = math.tanh %854 : vector<8x50xf32>
    %856 = arith.mulf %851, %855 : vector<8x50xf32>
    %857 = vector.shape_cast %725 : vector<8x1xi1> to vector<8x1xi1>
    %858 = vector.broadcast %857 : vector<8x1xi1> to vector<8x50xi1>
    %859 = arith.select %858, %854, %720 : vector<8x50xi1>, vector<8x50xf32>
    %860 = vector.shape_cast %725 : vector<8x1xi1> to vector<8x1xi1>
    %861 = vector.broadcast %860 : vector<8x1xi1> to vector<8x50xi1>
    %862 = arith.select %861, %856, %723 : vector<8x50xi1>, vector<8x50xf32>
    %c6_i32 = arith.constant 6 : i32
    %863 = vector.broadcast %c6_i32 : i32 to vector<8x1xi32>
    %864 = arith.cmpi slt, %863, %7 : vector<8x1xi32>
    %c8_i32_178 = arith.constant 8 : i32
    %865 = arith.muli %c6_i32, %c8_i32_178 : i32
    %866 = tpu.assume_multiple %865, 8 : i32
    %867 = arith.index_cast %866 : i32 to index
    %c0_179 = arith.constant 0 : index
    %868 = vector.load %arg17[%867, %c0_179] : memref<64x200xf32, #tpu.memory_space<vmem>>, vector<8x200xf32>
    %c0_180 = arith.constant 0 : index
    %c0_181 = arith.constant 0 : index
    %869 = vector.load %arg6[%c0_180, %c0_181] : memref<50x200xf32, #tpu.memory_space<vmem>>, vector<50x200xf32>
    %cst_182 = arith.constant dense<0.000000e+00> : vector<8x200xf32>
    %870 = tpu.matmul %754, %869, %cst_182 {dimension_numbers = #tpu.dot_dimension_numbers<[1], [0], [0], [1], [0, 0, 1, 1], [], []>} : vector<8x50xf32>, vector<50x200xf32>, vector<8x200xf32> -> vector<8x200xf32>
    %871 = arith.addf %868, %870 : vector<8x200xf32>
    %872 = vector.extract_strided_slice %871 {offsets = [0, 0], sizes = [8, 150], strides = [1, 1]} : vector<8x200xf32> to vector<8x150xf32>
    %873 = arith.negf %872 : vector<8x150xf32>
    %874 = math.exp %873 : vector<8x150xf32>
    %cst_183 = arith.constant 1.000000e+00 : f32
    %875 = vector.broadcast %cst_183 : f32 to vector<8x150xf32>
    %876 = arith.addf %875, %874 : vector<8x150xf32>
    %877 = arith.divf %875, %876 : vector<8x150xf32>
    %878 = vector.extract_strided_slice %871 {offsets = [0, 150], sizes = [8, 50], strides = [1, 1]} : vector<8x200xf32> to vector<8x50xf32>
    %879 = math.tanh %878 : vector<8x50xf32>
    %880 = vector.extract_strided_slice %877 {offsets = [0, 0], sizes = [8, 50], strides = [1, 1]} : vector<8x150xf32> to vector<8x50xf32>
    %881 = vector.extract_strided_slice %877 {offsets = [0, 50], sizes = [8, 50], strides = [1, 1]} : vector<8x150xf32> to vector<8x50xf32>
    %882 = vector.extract_strided_slice %877 {offsets = [0, 100], sizes = [8, 50], strides = [1, 1]} : vector<8x150xf32> to vector<8x50xf32>
    %883 = arith.mulf %881, %751 : vector<8x50xf32>
    %884 = arith.mulf %880, %879 : vector<8x50xf32>
    %885 = arith.addf %883, %884 : vector<8x50xf32>
    %886 = math.tanh %885 : vector<8x50xf32>
    %887 = arith.mulf %882, %886 : vector<8x50xf32>
    %888 = vector.shape_cast %864 : vector<8x1xi1> to vector<8x1xi1>
    %889 = vector.broadcast %888 : vector<8x1xi1> to vector<8x50xi1>
    %890 = arith.select %889, %885, %751 : vector<8x50xi1>, vector<8x50xf32>
    %891 = vector.shape_cast %864 : vector<8x1xi1> to vector<8x1xi1>
    %892 = vector.broadcast %891 : vector<8x1xi1> to vector<8x50xi1>
    %893 = arith.select %892, %887, %754 : vector<8x50xi1>, vector<8x50xf32>
    %894 = tpu.concatenate %893, %781 in 1 : vector<8x50xf32>, vector<8x50xf32> -> vector<8x100xf32>
    %c0_184 = arith.constant 0 : index
    %c0_185 = arith.constant 0 : index
    %c0_186 = arith.constant 0 : index
    %895 = vector.load %arg8[%c0_184, %c0_185, %c0_186] : memref<4x100x200xf32, #tpu.memory_space<vmem>>, vector<1x100x200xf32>
    %896 = vector.shape_cast %895 : vector<1x100x200xf32> to vector<100x200xf32>
    %cst_187 = arith.constant dense<0.000000e+00> : vector<8x200xf32>
    %897 = tpu.matmul %894, %896, %cst_187 {dimension_numbers = #tpu.dot_dimension_numbers<[1], [0], [0], [1], [0, 0, 1, 1], [], []>} : vector<8x100xf32>, vector<100x200xf32>, vector<8x200xf32> -> vector<8x200xf32>
    %898 = arith.addf %897, %11 : vector<8x200xf32>
    %899 = vector.extract_strided_slice %898 {offsets = [0, 0], sizes = [8, 150], strides = [1, 1]} : vector<8x200xf32> to vector<8x150xf32>
    %900 = arith.negf %899 : vector<8x150xf32>
    %901 = math.exp %900 : vector<8x150xf32>
    %cst_188 = arith.constant 1.000000e+00 : f32
    %902 = vector.broadcast %cst_188 : f32 to vector<8x150xf32>
    %903 = arith.addf %902, %901 : vector<8x150xf32>
    %904 = arith.divf %902, %903 : vector<8x150xf32>
    %905 = vector.extract_strided_slice %898 {offsets = [0, 150], sizes = [8, 50], strides = [1, 1]} : vector<8x200xf32> to vector<8x50xf32>
    %906 = math.tanh %905 : vector<8x50xf32>
    %907 = vector.extract_strided_slice %904 {offsets = [0, 0], sizes = [8, 50], strides = [1, 1]} : vector<8x150xf32> to vector<8x50xf32>
    %908 = vector.extract_strided_slice %904 {offsets = [0, 50], sizes = [8, 50], strides = [1, 1]} : vector<8x150xf32> to vector<8x50xf32>
    %909 = vector.extract_strided_slice %904 {offsets = [0, 100], sizes = [8, 50], strides = [1, 1]} : vector<8x150xf32> to vector<8x50xf32>
    %910 = arith.mulf %908, %778 : vector<8x50xf32>
    %911 = arith.mulf %907, %906 : vector<8x50xf32>
    %912 = arith.addf %910, %911 : vector<8x50xf32>
    %913 = math.tanh %912 : vector<8x50xf32>
    %914 = arith.mulf %909, %913 : vector<8x50xf32>
    %915 = vector.shape_cast %864 : vector<8x1xi1> to vector<8x1xi1>
    %916 = vector.broadcast %915 : vector<8x1xi1> to vector<8x50xi1>
    %917 = arith.select %916, %912, %778 : vector<8x50xi1>, vector<8x50xf32>
    %918 = vector.shape_cast %864 : vector<8x1xi1> to vector<8x1xi1>
    %919 = vector.broadcast %918 : vector<8x1xi1> to vector<8x50xi1>
    %920 = arith.select %919, %914, %781 : vector<8x50xi1>, vector<8x50xf32>
    %921 = tpu.concatenate %920, %808 in 1 : vector<8x50xf32>, vector<8x50xf32> -> vector<8x100xf32>
    %c1_189 = arith.constant 1 : index
    %c0_190 = arith.constant 0 : index
    %c0_191 = arith.constant 0 : index
    %922 = vector.load %arg8[%c1_189, %c0_190, %c0_191] : memref<4x100x200xf32, #tpu.memory_space<vmem>>, vector<1x100x200xf32>
    %923 = vector.shape_cast %922 : vector<1x100x200xf32> to vector<100x200xf32>
    %cst_192 = arith.constant dense<0.000000e+00> : vector<8x200xf32>
    %924 = tpu.matmul %921, %923, %cst_192 {dimension_numbers = #tpu.dot_dimension_numbers<[1], [0], [0], [1], [0, 0, 1, 1], [], []>} : vector<8x100xf32>, vector<100x200xf32>, vector<8x200xf32> -> vector<8x200xf32>
    %925 = arith.addf %924, %15 : vector<8x200xf32>
    %926 = vector.extract_strided_slice %925 {offsets = [0, 0], sizes = [8, 150], strides = [1, 1]} : vector<8x200xf32> to vector<8x150xf32>
    %927 = arith.negf %926 : vector<8x150xf32>
    %928 = math.exp %927 : vector<8x150xf32>
    %cst_193 = arith.constant 1.000000e+00 : f32
    %929 = vector.broadcast %cst_193 : f32 to vector<8x150xf32>
    %930 = arith.addf %929, %928 : vector<8x150xf32>
    %931 = arith.divf %929, %930 : vector<8x150xf32>
    %932 = vector.extract_strided_slice %925 {offsets = [0, 150], sizes = [8, 50], strides = [1, 1]} : vector<8x200xf32> to vector<8x50xf32>
    %933 = math.tanh %932 : vector<8x50xf32>
    %934 = vector.extract_strided_slice %931 {offsets = [0, 0], sizes = [8, 50], strides = [1, 1]} : vector<8x150xf32> to vector<8x50xf32>
    %935 = vector.extract_strided_slice %931 {offsets = [0, 50], sizes = [8, 50], strides = [1, 1]} : vector<8x150xf32> to vector<8x50xf32>
    %936 = vector.extract_strided_slice %931 {offsets = [0, 100], sizes = [8, 50], strides = [1, 1]} : vector<8x150xf32> to vector<8x50xf32>
    %937 = arith.mulf %935, %805 : vector<8x50xf32>
    %938 = arith.mulf %934, %933 : vector<8x50xf32>
    %939 = arith.addf %937, %938 : vector<8x50xf32>
    %940 = math.tanh %939 : vector<8x50xf32>
    %941 = arith.mulf %936, %940 : vector<8x50xf32>
    %942 = vector.shape_cast %864 : vector<8x1xi1> to vector<8x1xi1>
    %943 = vector.broadcast %942 : vector<8x1xi1> to vector<8x50xi1>
    %944 = arith.select %943, %939, %805 : vector<8x50xi1>, vector<8x50xf32>
    %945 = vector.shape_cast %864 : vector<8x1xi1> to vector<8x1xi1>
    %946 = vector.broadcast %945 : vector<8x1xi1> to vector<8x50xi1>
    %947 = arith.select %946, %941, %808 : vector<8x50xi1>, vector<8x50xf32>
    %948 = tpu.concatenate %947, %835 in 1 : vector<8x50xf32>, vector<8x50xf32> -> vector<8x100xf32>
    %c2_194 = arith.constant 2 : index
    %c0_195 = arith.constant 0 : index
    %c0_196 = arith.constant 0 : index
    %949 = vector.load %arg8[%c2_194, %c0_195, %c0_196] : memref<4x100x200xf32, #tpu.memory_space<vmem>>, vector<1x100x200xf32>
    %950 = vector.shape_cast %949 : vector<1x100x200xf32> to vector<100x200xf32>
    %cst_197 = arith.constant dense<0.000000e+00> : vector<8x200xf32>
    %951 = tpu.matmul %948, %950, %cst_197 {dimension_numbers = #tpu.dot_dimension_numbers<[1], [0], [0], [1], [0, 0, 1, 1], [], []>} : vector<8x100xf32>, vector<100x200xf32>, vector<8x200xf32> -> vector<8x200xf32>
    %952 = arith.addf %951, %19 : vector<8x200xf32>
    %953 = vector.extract_strided_slice %952 {offsets = [0, 0], sizes = [8, 150], strides = [1, 1]} : vector<8x200xf32> to vector<8x150xf32>
    %954 = arith.negf %953 : vector<8x150xf32>
    %955 = math.exp %954 : vector<8x150xf32>
    %cst_198 = arith.constant 1.000000e+00 : f32
    %956 = vector.broadcast %cst_198 : f32 to vector<8x150xf32>
    %957 = arith.addf %956, %955 : vector<8x150xf32>
    %958 = arith.divf %956, %957 : vector<8x150xf32>
    %959 = vector.extract_strided_slice %952 {offsets = [0, 150], sizes = [8, 50], strides = [1, 1]} : vector<8x200xf32> to vector<8x50xf32>
    %960 = math.tanh %959 : vector<8x50xf32>
    %961 = vector.extract_strided_slice %958 {offsets = [0, 0], sizes = [8, 50], strides = [1, 1]} : vector<8x150xf32> to vector<8x50xf32>
    %962 = vector.extract_strided_slice %958 {offsets = [0, 50], sizes = [8, 50], strides = [1, 1]} : vector<8x150xf32> to vector<8x50xf32>
    %963 = vector.extract_strided_slice %958 {offsets = [0, 100], sizes = [8, 50], strides = [1, 1]} : vector<8x150xf32> to vector<8x50xf32>
    %964 = arith.mulf %962, %832 : vector<8x50xf32>
    %965 = arith.mulf %961, %960 : vector<8x50xf32>
    %966 = arith.addf %964, %965 : vector<8x50xf32>
    %967 = math.tanh %966 : vector<8x50xf32>
    %968 = arith.mulf %963, %967 : vector<8x50xf32>
    %969 = vector.shape_cast %864 : vector<8x1xi1> to vector<8x1xi1>
    %970 = vector.broadcast %969 : vector<8x1xi1> to vector<8x50xi1>
    %971 = arith.select %970, %966, %832 : vector<8x50xi1>, vector<8x50xf32>
    %972 = vector.shape_cast %864 : vector<8x1xi1> to vector<8x1xi1>
    %973 = vector.broadcast %972 : vector<8x1xi1> to vector<8x50xi1>
    %974 = arith.select %973, %968, %835 : vector<8x50xi1>, vector<8x50xf32>
    %975 = tpu.concatenate %974, %862 in 1 : vector<8x50xf32>, vector<8x50xf32> -> vector<8x100xf32>
    %c3_199 = arith.constant 3 : index
    %c0_200 = arith.constant 0 : index
    %c0_201 = arith.constant 0 : index
    %976 = vector.load %arg8[%c3_199, %c0_200, %c0_201] : memref<4x100x200xf32, #tpu.memory_space<vmem>>, vector<1x100x200xf32>
    %977 = vector.shape_cast %976 : vector<1x100x200xf32> to vector<100x200xf32>
    %cst_202 = arith.constant dense<0.000000e+00> : vector<8x200xf32>
    %978 = tpu.matmul %975, %977, %cst_202 {dimension_numbers = #tpu.dot_dimension_numbers<[1], [0], [0], [1], [0, 0, 1, 1], [], []>} : vector<8x100xf32>, vector<100x200xf32>, vector<8x200xf32> -> vector<8x200xf32>
    %979 = arith.addf %978, %23 : vector<8x200xf32>
    %980 = vector.extract_strided_slice %979 {offsets = [0, 0], sizes = [8, 150], strides = [1, 1]} : vector<8x200xf32> to vector<8x150xf32>
    %981 = arith.negf %980 : vector<8x150xf32>
    %982 = math.exp %981 : vector<8x150xf32>
    %cst_203 = arith.constant 1.000000e+00 : f32
    %983 = vector.broadcast %cst_203 : f32 to vector<8x150xf32>
    %984 = arith.addf %983, %982 : vector<8x150xf32>
    %985 = arith.divf %983, %984 : vector<8x150xf32>
    %986 = vector.extract_strided_slice %979 {offsets = [0, 150], sizes = [8, 50], strides = [1, 1]} : vector<8x200xf32> to vector<8x50xf32>
    %987 = math.tanh %986 : vector<8x50xf32>
    %988 = vector.extract_strided_slice %985 {offsets = [0, 0], sizes = [8, 50], strides = [1, 1]} : vector<8x150xf32> to vector<8x50xf32>
    %989 = vector.extract_strided_slice %985 {offsets = [0, 50], sizes = [8, 50], strides = [1, 1]} : vector<8x150xf32> to vector<8x50xf32>
    %990 = vector.extract_strided_slice %985 {offsets = [0, 100], sizes = [8, 50], strides = [1, 1]} : vector<8x150xf32> to vector<8x50xf32>
    %991 = arith.mulf %989, %859 : vector<8x50xf32>
    %992 = arith.mulf %988, %987 : vector<8x50xf32>
    %993 = arith.addf %991, %992 : vector<8x50xf32>
    %994 = math.tanh %993 : vector<8x50xf32>
    %995 = arith.mulf %990, %994 : vector<8x50xf32>
    %996 = vector.shape_cast %864 : vector<8x1xi1> to vector<8x1xi1>
    %997 = vector.broadcast %996 : vector<8x1xi1> to vector<8x50xi1>
    %998 = arith.select %997, %993, %859 : vector<8x50xi1>, vector<8x50xf32>
    %999 = vector.shape_cast %864 : vector<8x1xi1> to vector<8x1xi1>
    %1000 = vector.broadcast %999 : vector<8x1xi1> to vector<8x50xi1>
    %1001 = arith.select %1000, %995, %862 : vector<8x50xi1>, vector<8x50xf32>
    %c7_i32 = arith.constant 7 : i32
    %1002 = vector.broadcast %c7_i32 : i32 to vector<8x1xi32>
    %1003 = arith.cmpi slt, %1002, %7 : vector<8x1xi32>
    %c8_i32_204 = arith.constant 8 : i32
    %1004 = arith.muli %c7_i32, %c8_i32_204 : i32
    %1005 = tpu.assume_multiple %1004, 8 : i32
    %1006 = arith.index_cast %1005 : i32 to index
    %c0_205 = arith.constant 0 : index
    %1007 = vector.load %arg17[%1006, %c0_205] : memref<64x200xf32, #tpu.memory_space<vmem>>, vector<8x200xf32>
    %c0_206 = arith.constant 0 : index
    %c0_207 = arith.constant 0 : index
    %1008 = vector.load %arg6[%c0_206, %c0_207] : memref<50x200xf32, #tpu.memory_space<vmem>>, vector<50x200xf32>
    %cst_208 = arith.constant dense<0.000000e+00> : vector<8x200xf32>
    %1009 = tpu.matmul %893, %1008, %cst_208 {dimension_numbers = #tpu.dot_dimension_numbers<[1], [0], [0], [1], [0, 0, 1, 1], [], []>} : vector<8x50xf32>, vector<50x200xf32>, vector<8x200xf32> -> vector<8x200xf32>
    %1010 = arith.addf %1007, %1009 : vector<8x200xf32>
    %1011 = vector.extract_strided_slice %1010 {offsets = [0, 0], sizes = [8, 150], strides = [1, 1]} : vector<8x200xf32> to vector<8x150xf32>
    %1012 = arith.negf %1011 : vector<8x150xf32>
    %1013 = math.exp %1012 : vector<8x150xf32>
    %cst_209 = arith.constant 1.000000e+00 : f32
    %1014 = vector.broadcast %cst_209 : f32 to vector<8x150xf32>
    %1015 = arith.addf %1014, %1013 : vector<8x150xf32>
    %1016 = arith.divf %1014, %1015 : vector<8x150xf32>
    %1017 = vector.extract_strided_slice %1010 {offsets = [0, 150], sizes = [8, 50], strides = [1, 1]} : vector<8x200xf32> to vector<8x50xf32>
    %1018 = math.tanh %1017 : vector<8x50xf32>
    %1019 = vector.extract_strided_slice %1016 {offsets = [0, 0], sizes = [8, 50], strides = [1, 1]} : vector<8x150xf32> to vector<8x50xf32>
    %1020 = vector.extract_strided_slice %1016 {offsets = [0, 50], sizes = [8, 50], strides = [1, 1]} : vector<8x150xf32> to vector<8x50xf32>
    %1021 = vector.extract_strided_slice %1016 {offsets = [0, 100], sizes = [8, 50], strides = [1, 1]} : vector<8x150xf32> to vector<8x50xf32>
    %1022 = arith.mulf %1020, %890 : vector<8x50xf32>
    %1023 = arith.mulf %1019, %1018 : vector<8x50xf32>
    %1024 = arith.addf %1022, %1023 : vector<8x50xf32>
    %1025 = math.tanh %1024 : vector<8x50xf32>
    %1026 = arith.mulf %1021, %1025 : vector<8x50xf32>
    %1027 = vector.shape_cast %1003 : vector<8x1xi1> to vector<8x1xi1>
    %1028 = vector.broadcast %1027 : vector<8x1xi1> to vector<8x50xi1>
    %1029 = arith.select %1028, %1024, %890 : vector<8x50xi1>, vector<8x50xf32>
    %1030 = vector.shape_cast %1003 : vector<8x1xi1> to vector<8x1xi1>
    %1031 = vector.broadcast %1030 : vector<8x1xi1> to vector<8x50xi1>
    %1032 = arith.select %1031, %1026, %893 : vector<8x50xi1>, vector<8x50xf32>
    %1033 = tpu.concatenate %1032, %920 in 1 : vector<8x50xf32>, vector<8x50xf32> -> vector<8x100xf32>
    %c0_210 = arith.constant 0 : index
    %c0_211 = arith.constant 0 : index
    %c0_212 = arith.constant 0 : index
    %1034 = vector.load %arg8[%c0_210, %c0_211, %c0_212] : memref<4x100x200xf32, #tpu.memory_space<vmem>>, vector<1x100x200xf32>
    %1035 = vector.shape_cast %1034 : vector<1x100x200xf32> to vector<100x200xf32>
    %cst_213 = arith.constant dense<0.000000e+00> : vector<8x200xf32>
    %1036 = tpu.matmul %1033, %1035, %cst_213 {dimension_numbers = #tpu.dot_dimension_numbers<[1], [0], [0], [1], [0, 0, 1, 1], [], []>} : vector<8x100xf32>, vector<100x200xf32>, vector<8x200xf32> -> vector<8x200xf32>
    %1037 = arith.addf %1036, %11 : vector<8x200xf32>
    %1038 = vector.extract_strided_slice %1037 {offsets = [0, 0], sizes = [8, 150], strides = [1, 1]} : vector<8x200xf32> to vector<8x150xf32>
    %1039 = arith.negf %1038 : vector<8x150xf32>
    %1040 = math.exp %1039 : vector<8x150xf32>
    %cst_214 = arith.constant 1.000000e+00 : f32
    %1041 = vector.broadcast %cst_214 : f32 to vector<8x150xf32>
    %1042 = arith.addf %1041, %1040 : vector<8x150xf32>
    %1043 = arith.divf %1041, %1042 : vector<8x150xf32>
    %1044 = vector.extract_strided_slice %1037 {offsets = [0, 150], sizes = [8, 50], strides = [1, 1]} : vector<8x200xf32> to vector<8x50xf32>
    %1045 = math.tanh %1044 : vector<8x50xf32>
    %1046 = vector.extract_strided_slice %1043 {offsets = [0, 0], sizes = [8, 50], strides = [1, 1]} : vector<8x150xf32> to vector<8x50xf32>
    %1047 = vector.extract_strided_slice %1043 {offsets = [0, 50], sizes = [8, 50], strides = [1, 1]} : vector<8x150xf32> to vector<8x50xf32>
    %1048 = vector.extract_strided_slice %1043 {offsets = [0, 100], sizes = [8, 50], strides = [1, 1]} : vector<8x150xf32> to vector<8x50xf32>
    %1049 = arith.mulf %1047, %917 : vector<8x50xf32>
    %1050 = arith.mulf %1046, %1045 : vector<8x50xf32>
    %1051 = arith.addf %1049, %1050 : vector<8x50xf32>
    %1052 = math.tanh %1051 : vector<8x50xf32>
    %1053 = arith.mulf %1048, %1052 : vector<8x50xf32>
    %1054 = vector.shape_cast %1003 : vector<8x1xi1> to vector<8x1xi1>
    %1055 = vector.broadcast %1054 : vector<8x1xi1> to vector<8x50xi1>
    %1056 = arith.select %1055, %1051, %917 : vector<8x50xi1>, vector<8x50xf32>
    %1057 = vector.shape_cast %1003 : vector<8x1xi1> to vector<8x1xi1>
    %1058 = vector.broadcast %1057 : vector<8x1xi1> to vector<8x50xi1>
    %1059 = arith.select %1058, %1053, %920 : vector<8x50xi1>, vector<8x50xf32>
    %1060 = tpu.concatenate %1059, %947 in 1 : vector<8x50xf32>, vector<8x50xf32> -> vector<8x100xf32>
    %c1_215 = arith.constant 1 : index
    %c0_216 = arith.constant 0 : index
    %c0_217 = arith.constant 0 : index
    %1061 = vector.load %arg8[%c1_215, %c0_216, %c0_217] : memref<4x100x200xf32, #tpu.memory_space<vmem>>, vector<1x100x200xf32>
    %1062 = vector.shape_cast %1061 : vector<1x100x200xf32> to vector<100x200xf32>
    %cst_218 = arith.constant dense<0.000000e+00> : vector<8x200xf32>
    %1063 = tpu.matmul %1060, %1062, %cst_218 {dimension_numbers = #tpu.dot_dimension_numbers<[1], [0], [0], [1], [0, 0, 1, 1], [], []>} : vector<8x100xf32>, vector<100x200xf32>, vector<8x200xf32> -> vector<8x200xf32>
    %1064 = arith.addf %1063, %15 : vector<8x200xf32>
    %1065 = vector.extract_strided_slice %1064 {offsets = [0, 0], sizes = [8, 150], strides = [1, 1]} : vector<8x200xf32> to vector<8x150xf32>
    %1066 = arith.negf %1065 : vector<8x150xf32>
    %1067 = math.exp %1066 : vector<8x150xf32>
    %cst_219 = arith.constant 1.000000e+00 : f32
    %1068 = vector.broadcast %cst_219 : f32 to vector<8x150xf32>
    %1069 = arith.addf %1068, %1067 : vector<8x150xf32>
    %1070 = arith.divf %1068, %1069 : vector<8x150xf32>
    %1071 = vector.extract_strided_slice %1064 {offsets = [0, 150], sizes = [8, 50], strides = [1, 1]} : vector<8x200xf32> to vector<8x50xf32>
    %1072 = math.tanh %1071 : vector<8x50xf32>
    %1073 = vector.extract_strided_slice %1070 {offsets = [0, 0], sizes = [8, 50], strides = [1, 1]} : vector<8x150xf32> to vector<8x50xf32>
    %1074 = vector.extract_strided_slice %1070 {offsets = [0, 50], sizes = [8, 50], strides = [1, 1]} : vector<8x150xf32> to vector<8x50xf32>
    %1075 = vector.extract_strided_slice %1070 {offsets = [0, 100], sizes = [8, 50], strides = [1, 1]} : vector<8x150xf32> to vector<8x50xf32>
    %1076 = arith.mulf %1074, %944 : vector<8x50xf32>
    %1077 = arith.mulf %1073, %1072 : vector<8x50xf32>
    %1078 = arith.addf %1076, %1077 : vector<8x50xf32>
    %1079 = math.tanh %1078 : vector<8x50xf32>
    %1080 = arith.mulf %1075, %1079 : vector<8x50xf32>
    %1081 = vector.shape_cast %1003 : vector<8x1xi1> to vector<8x1xi1>
    %1082 = vector.broadcast %1081 : vector<8x1xi1> to vector<8x50xi1>
    %1083 = arith.select %1082, %1078, %944 : vector<8x50xi1>, vector<8x50xf32>
    %1084 = vector.shape_cast %1003 : vector<8x1xi1> to vector<8x1xi1>
    %1085 = vector.broadcast %1084 : vector<8x1xi1> to vector<8x50xi1>
    %1086 = arith.select %1085, %1080, %947 : vector<8x50xi1>, vector<8x50xf32>
    %1087 = tpu.concatenate %1086, %974 in 1 : vector<8x50xf32>, vector<8x50xf32> -> vector<8x100xf32>
    %c2_220 = arith.constant 2 : index
    %c0_221 = arith.constant 0 : index
    %c0_222 = arith.constant 0 : index
    %1088 = vector.load %arg8[%c2_220, %c0_221, %c0_222] : memref<4x100x200xf32, #tpu.memory_space<vmem>>, vector<1x100x200xf32>
    %1089 = vector.shape_cast %1088 : vector<1x100x200xf32> to vector<100x200xf32>
    %cst_223 = arith.constant dense<0.000000e+00> : vector<8x200xf32>
    %1090 = tpu.matmul %1087, %1089, %cst_223 {dimension_numbers = #tpu.dot_dimension_numbers<[1], [0], [0], [1], [0, 0, 1, 1], [], []>} : vector<8x100xf32>, vector<100x200xf32>, vector<8x200xf32> -> vector<8x200xf32>
    %1091 = arith.addf %1090, %19 : vector<8x200xf32>
    %1092 = vector.extract_strided_slice %1091 {offsets = [0, 0], sizes = [8, 150], strides = [1, 1]} : vector<8x200xf32> to vector<8x150xf32>
    %1093 = arith.negf %1092 : vector<8x150xf32>
    %1094 = math.exp %1093 : vector<8x150xf32>
    %cst_224 = arith.constant 1.000000e+00 : f32
    %1095 = vector.broadcast %cst_224 : f32 to vector<8x150xf32>
    %1096 = arith.addf %1095, %1094 : vector<8x150xf32>
    %1097 = arith.divf %1095, %1096 : vector<8x150xf32>
    %1098 = vector.extract_strided_slice %1091 {offsets = [0, 150], sizes = [8, 50], strides = [1, 1]} : vector<8x200xf32> to vector<8x50xf32>
    %1099 = math.tanh %1098 : vector<8x50xf32>
    %1100 = vector.extract_strided_slice %1097 {offsets = [0, 0], sizes = [8, 50], strides = [1, 1]} : vector<8x150xf32> to vector<8x50xf32>
    %1101 = vector.extract_strided_slice %1097 {offsets = [0, 50], sizes = [8, 50], strides = [1, 1]} : vector<8x150xf32> to vector<8x50xf32>
    %1102 = vector.extract_strided_slice %1097 {offsets = [0, 100], sizes = [8, 50], strides = [1, 1]} : vector<8x150xf32> to vector<8x50xf32>
    %1103 = arith.mulf %1101, %971 : vector<8x50xf32>
    %1104 = arith.mulf %1100, %1099 : vector<8x50xf32>
    %1105 = arith.addf %1103, %1104 : vector<8x50xf32>
    %1106 = math.tanh %1105 : vector<8x50xf32>
    %1107 = arith.mulf %1102, %1106 : vector<8x50xf32>
    %1108 = vector.shape_cast %1003 : vector<8x1xi1> to vector<8x1xi1>
    %1109 = vector.broadcast %1108 : vector<8x1xi1> to vector<8x50xi1>
    %1110 = arith.select %1109, %1105, %971 : vector<8x50xi1>, vector<8x50xf32>
    %1111 = vector.shape_cast %1003 : vector<8x1xi1> to vector<8x1xi1>
    %1112 = vector.broadcast %1111 : vector<8x1xi1> to vector<8x50xi1>
    %1113 = arith.select %1112, %1107, %974 : vector<8x50xi1>, vector<8x50xf32>
    %1114 = tpu.concatenate %1113, %1001 in 1 : vector<8x50xf32>, vector<8x50xf32> -> vector<8x100xf32>
    %c3_225 = arith.constant 3 : index
    %c0_226 = arith.constant 0 : index
    %c0_227 = arith.constant 0 : index
    %1115 = vector.load %arg8[%c3_225, %c0_226, %c0_227] : memref<4x100x200xf32, #tpu.memory_space<vmem>>, vector<1x100x200xf32>
    %1116 = vector.shape_cast %1115 : vector<1x100x200xf32> to vector<100x200xf32>
    %cst_228 = arith.constant dense<0.000000e+00> : vector<8x200xf32>
    %1117 = tpu.matmul %1114, %1116, %cst_228 {dimension_numbers = #tpu.dot_dimension_numbers<[1], [0], [0], [1], [0, 0, 1, 1], [], []>} : vector<8x100xf32>, vector<100x200xf32>, vector<8x200xf32> -> vector<8x200xf32>
    %1118 = arith.addf %1117, %23 : vector<8x200xf32>
    %1119 = vector.extract_strided_slice %1118 {offsets = [0, 0], sizes = [8, 150], strides = [1, 1]} : vector<8x200xf32> to vector<8x150xf32>
    %1120 = arith.negf %1119 : vector<8x150xf32>
    %1121 = math.exp %1120 : vector<8x150xf32>
    %cst_229 = arith.constant 1.000000e+00 : f32
    %1122 = vector.broadcast %cst_229 : f32 to vector<8x150xf32>
    %1123 = arith.addf %1122, %1121 : vector<8x150xf32>
    %1124 = arith.divf %1122, %1123 : vector<8x150xf32>
    %1125 = vector.extract_strided_slice %1118 {offsets = [0, 150], sizes = [8, 50], strides = [1, 1]} : vector<8x200xf32> to vector<8x50xf32>
    %1126 = math.tanh %1125 : vector<8x50xf32>
    %1127 = vector.extract_strided_slice %1124 {offsets = [0, 0], sizes = [8, 50], strides = [1, 1]} : vector<8x150xf32> to vector<8x50xf32>
    %1128 = vector.extract_strided_slice %1124 {offsets = [0, 50], sizes = [8, 50], strides = [1, 1]} : vector<8x150xf32> to vector<8x50xf32>
    %1129 = vector.extract_strided_slice %1124 {offsets = [0, 100], sizes = [8, 50], strides = [1, 1]} : vector<8x150xf32> to vector<8x50xf32>
    %1130 = arith.mulf %1128, %998 : vector<8x50xf32>
    %1131 = arith.mulf %1127, %1126 : vector<8x50xf32>
    %1132 = arith.addf %1130, %1131 : vector<8x50xf32>
    %1133 = math.tanh %1132 : vector<8x50xf32>
    %1134 = arith.mulf %1129, %1133 : vector<8x50xf32>
    %1135 = vector.shape_cast %1003 : vector<8x1xi1> to vector<8x1xi1>
    %1136 = vector.broadcast %1135 : vector<8x1xi1> to vector<8x50xi1>
    %1137 = arith.select %1136, %1132, %998 : vector<8x50xi1>, vector<8x50xf32>
    %1138 = vector.shape_cast %1003 : vector<8x1xi1> to vector<8x1xi1>
    %1139 = vector.broadcast %1138 : vector<8x1xi1> to vector<8x50xi1>
    %1140 = arith.select %1139, %1134, %1001 : vector<8x50xi1>, vector<8x50xf32>
    %c8_i32_230 = arith.constant 8 : i32
    %c0_231 = arith.constant 0 : index
    %c0_232 = arith.constant 0 : index
    %1141 = vector.load %arg2[%c0_231, %c0_232] : memref<8x300xf32, #tpu.memory_space<vmem>>, vector<8x300xf32>
    %c0_233 = arith.constant 0 : index
    %c0_234 = arith.constant 0 : index
    %1142 = vector.load %arg10[%c0_233, %c0_234] : memref<300x50xf32, #tpu.memory_space<vmem>>, vector<300x50xf32>
    %cst_235 = arith.constant dense<0.000000e+00> : vector<8x50xf32>
    %1143 = tpu.matmul %1141, %1142, %cst_235 {dimension_numbers = #tpu.dot_dimension_numbers<[1], [0], [0], [1], [0, 0, 1, 1], [], []>} : vector<8x300xf32>, vector<300x50xf32>, vector<8x50xf32> -> vector<8x50xf32>
    %c0_236 = arith.constant 0 : index
    %c0_237 = arith.constant 0 : index
    %1144 = vector.load %arg11[%c0_236, %c0_237] : memref<1x50xf32, #tpu.memory_space<vmem>>, vector<1x50xf32>
    %1145 = vector.broadcast %1144 : vector<1x50xf32> to vector<8x50xf32>
    %1146 = arith.addf %1143, %1145 : vector<8x50xf32>
    %c0_238 = arith.constant 0 : index
    %c0_239 = arith.constant 0 : index
    %1147 = vector.load %arg3[%c0_238, %c0_239] : memref<8x300xf32, #tpu.memory_space<vmem>>, vector<8x300xf32>
    %c0_240 = arith.constant 0 : index
    %c0_241 = arith.constant 0 : index
    %1148 = vector.load %arg12[%c0_240, %c0_241] : memref<300x50xf32, #tpu.memory_space<vmem>>, vector<300x50xf32>
    %cst_242 = arith.constant dense<0.000000e+00> : vector<8x50xf32>
    %1149 = tpu.matmul %1147, %1148, %cst_242 {dimension_numbers = #tpu.dot_dimension_numbers<[1], [0], [0], [1], [0, 0, 1, 1], [], []>} : vector<8x300xf32>, vector<300x50xf32>, vector<8x50xf32> -> vector<8x50xf32>
    %c0_243 = arith.constant 0 : index
    %c0_244 = arith.constant 0 : index
    %1150 = vector.load %arg13[%c0_243, %c0_244] : memref<1x50xf32, #tpu.memory_space<vmem>>, vector<1x50xf32>
    %1151 = vector.broadcast %1150 : vector<1x50xf32> to vector<8x50xf32>
    %1152 = arith.addf %1149, %1151 : vector<8x50xf32>
    %c0_245 = arith.constant 0 : index
    %c0_246 = arith.constant 0 : index
    %1153 = vector.load %arg4[%c0_245, %c0_246] : memref<8x300xf32, #tpu.memory_space<vmem>>, vector<8x300xf32>
    %c0_247 = arith.constant 0 : index
    %c0_248 = arith.constant 0 : index
    %1154 = vector.load %arg14[%c0_247, %c0_248] : memref<300x50xf32, #tpu.memory_space<vmem>>, vector<300x50xf32>
    %cst_249 = arith.constant dense<0.000000e+00> : vector<8x50xf32>
    %1155 = tpu.matmul %1153, %1154, %cst_249 {dimension_numbers = #tpu.dot_dimension_numbers<[1], [0], [0], [1], [0, 0, 1, 1], [], []>} : vector<8x300xf32>, vector<300x50xf32>, vector<8x50xf32> -> vector<8x50xf32>
    %c0_250 = arith.constant 0 : index
    %c0_251 = arith.constant 0 : index
    %1156 = vector.load %arg15[%c0_250, %c0_251] : memref<1x50xf32, #tpu.memory_space<vmem>>, vector<1x50xf32>
    %1157 = vector.broadcast %1156 : vector<1x50xf32> to vector<8x50xf32>
    %1158 = arith.addf %1155, %1157 : vector<8x50xf32>
    %1159 = arith.mulf %1146, %1140 : vector<8x50xf32>
    %1160 = arith.mulf %1159, %1152 : vector<8x50xf32>
    %1161 = arith.mulf %1160, %1158 : vector<8x50xf32>
    %cst_252 = arith.constant dense<0.000000e+00> : vector<8xf32>
    %1162 = vector.multi_reduction <add>, %1161, %cst_252 [1] : vector<8x50xf32> to vector<8xf32>
    %1163 = vector.shape_cast %1162 : vector<8xf32> to vector<8x1xf32>
    %1164 = arith.negf %1163 : vector<8x1xf32>
    %1165 = math.exp %1164 : vector<8x1xf32>
    %cst_253 = arith.constant 1.000000e+00 : f32
    %1166 = vector.broadcast %cst_253 : f32 to vector<8x1xf32>
    %1167 = arith.addf %1166, %1165 : vector<8x1xf32>
    %1168 = arith.divf %1166, %1167 : vector<8x1xf32>
    %c0_254 = arith.constant 0 : index
    %c0_255 = arith.constant 0 : index
    %1169 = vector.load %arg16[%c0_254, %c0_255] : memref<8x1xf32, #tpu.memory_space<vmem>>, vector<8x1xf32>
    tpu.vector_store %arg16[%c0_254, %c0_255], %1168 {strides = array<i32>} : memref<8x1xf32, #tpu.memory_space<vmem>>, vector<8x1xf32>,
    return
  }
}

</mosaic_0001>

<bundles_post_ra>
// kernel: tpu_custom_call.1
= control target key start
LH: loop header
LB: loop body
LE: loop exit
PB: predicated region body
PF: predicated region fallthrough
CT: control target
= control target key end

     0   :  { %vm184_vm0 = vcmask 1043456   ;;  %vm12947_vm1 = vcmask 359424   ;;  %vm506_vm2 = vcmask 1041408   ;;  %vm438_vm3 = vcmask 588800   ;;  %s6942_s26 = smov 50   ;;  %s6945_s29 = smov 78   ;;  %s12787_s5 = inlined_call_operand.vmem [shape: f32[300,200], index: 5, kind: input, shape index: {}]   ;;  %s12788_s0 = inlined_call_operand.vmem [shape: f32[64,300], index: 0, kind: input, shape index: {}]   ;;  %s12789_s6 = inlined_call_operand.vmem [shape: f32[50,200], index: 6, kind: input, shape index: {}]   ;;  %s12790_s7 = inlined_call_operand.vmem [shape: f32[1,200], index: 7, kind: input, shape index: {}]   ;;  %s12791_s1 = inlined_call_operand.vmem [shape: s32[8,1], index: 1, kind: input, shape index: {}]   ;;  %s12792_s8 = inlined_call_operand.vmem [shape: f32[4,100,200], index: 8, kind: input, shape index: {}]   ;;  %s12793_s9 = inlined_call_operand.vmem [shape: f32[4,1,200], index: 9, kind: input, shape index: {}]   ;;  %s12794_s10 = inlined_call_operand.vmem [shape: f32[300,50], index: 10, kind: input, shape index: {}]   ;;  %s12795_s12 = inlined_call_operand.vmem [shape: f32[300,50], index: 12, kind: input, shape index: {}]   ;;  %s12796_s14 = inlined_call_operand.vmem [shape: f32[300,50], index: 14, kind: input, shape index: {}]   ;;  %s12797_s2 = inlined_call_operand.vmem [shape: f32[8,300], index: 2, kind: input, shape index: {}]   ;;  %s12798_s11 = inlined_call_operand.vmem [shape: f32[1,50], index: 11, kind: input, shape index: {}]   ;;  %s12799_s3 = inlined_call_operand.vmem [shape: f32[8,300], index: 3, kind: input, shape index: {}]   ;;  %s12800_s13 = inlined_call_operand.vmem [shape: f32[1,50], index: 13, kind: input, shape index: {}]   ;;  %s12801_s4 = inlined_call_operand.vmem [shape: f32[8,300], index: 4, kind: input, shape index: {}]   ;;  %s12802_s15 = inlined_call_operand.vmem [shape: f32[1,50], index: 15, kind: input, shape index: {}]   ;;  %s12803_s16 = inlined_call_operand.vmem [shape: f32[8,1], index: 16, kind: output, shape index: {}]  }
   0x1   :  { %13084 = sst [smem:[#allocation73_spill]] %s12787_s5  ;;  %v7103_v19 = vld [vmem:[%s12788_s0 + $0x10] sm:$0xff]  ;;  %v7161_v33 = vld [vmem:[%s12788_s0 + $0x28] sm:$0xff]  ;;  %v7228_v50 = vld [vmem:[%s12788_s0 + $0x40] sm:$0xff]  ;;  %s6944_s5 = smov 28   ;;  %vm626_vm14 = vcmask 228352  }
   0x2   :  { %s13085_s23 = sld [smem:[#allocation73_spill]]  ;;  %v53_v58 = vld [vmem:[%s12788_s0] sm:$0xff]  ;;  %vm502_vm15 = vcmask 408576  }
   0x8   :  { %v107_v0 = vld [vmem:[%s13085_s23 + $0xf0] sm:$0xff]  ;;  %v105_v2 = vld [vmem:[%s13085_s23 + $0xe0] sm:$0xff]  ;;  %v108_v11 = vld [vmem:[%s13085_s23 + $0xf8] sm:$0xff] }
   0x9   :  { %v151_v1 = vld [vmem:[%s13085_s23 + $0x250] sm:$0xf]  ;;  %191 = vmatpush.msra.mxu0 %v107_v0  ;;  %v149_v3 = vld [vmem:[%s13085_s23 + $0x240] sm:$0xff]  ;;  %314 = vmatpush.msra.mxu3 %v108_v11  ;;  %v106_v14 = vld [vmem:[%s13085_s23 + $0xe8] sm:$0xff] }
   0xa   :  { %5699 = vmatpush.msk.msra.mxu2 %vm184_vm0, %v151_v1  ;;  %v103_v4 = vld [vmem:[%s13085_s23 + $0xd0] sm:$0xff]  ;;  %v101_v7 = vld [vmem:[%s13085_s23 + $0xc0] sm:$0xff]  ;;  %v104_v16 = vld [vmem:[%s13085_s23 + $0xd8] sm:$0xff] }
   0xb   :  { %v147_v5 = vld [vmem:[%s13085_s23 + $0x230] sm:$0xff]  ;;  %192 = vmatpush.msra.mxu0 %v105_v2  ;;  %v145_v8 = vld [vmem:[%s13085_s23 + $0x220] sm:$0xff]  ;;  %315 = vmatpush.msra.mxu3 %v106_v14  ;;  %v102_v22 = vld [vmem:[%s13085_s23 + $0xc8] sm:$0xff] }
   0xc   :  { %284 = vmatpush.msra.mxu2 %v149_v3  ;;  %v7053_v6 = vld [vmem:[%s13085_s23 + $0x1f0] sm:$0xff]  ;;  %v7068_v10 = vld [vmem:[%s13085_s23 + $0x1e0] sm:$0xff]  ;;  %v100_v25 = vld [vmem:[%s13085_s23 + $0xb8] sm:$0xff] }
   0xd   :  { %6043 = vmatpush.msra.mxu1 %v7053_v6  ;;  %193 = vmatpush.msra.mxu0 %v103_v4  ;;  %v99_v9 = vld [vmem:[%s13085_s23 + $0xb0] sm:$0xff]  ;;  %v7088_v15 = vld [vmem:[%s13085_s23 + $0x1c0] sm:$0xff]  ;;  %v98_v28 = vld [vmem:[%s13085_s23 + $0xa8] sm:$0xff] }
   0xe   :  { %285 = vmatpush.msra.mxu2 %v147_v5  ;;  %v143_v12 = vld [vmem:[%s13085_s23 + $0x210] sm:$0xff]  ;;  %v97_v17 = vld [vmem:[%s13085_s23 + $0xa0] sm:$0xff]  ;;  %316 = vmatpush.msra.mxu3 %v104_v16  ;;  %v140_v30 = vld [vmem:[%s13085_s23 + $0x1f8] sm:$0xff] }
   0xf   :  { %6044 = vmatpush.msra.mxu1 %v7068_v10  ;;  %v7080_v13 = vld [vmem:[%s13085_s23 + $0x1d0] sm:$0xff]  ;;  %194 = vmatpush.msra.mxu0 %v101_v7  ;;  %v141_v18 = vld [vmem:[%s13085_s23 + $0x200] sm:$0xff]  ;;  %v96_v32 = vld [vmem:[%s13085_s23 + $0x98] sm:$0xff] }
  0x10   :  { %286 = vmatpush.msra.mxu2 %v145_v8  ;;  %v7108_v20 = vld [vmem:[%s13085_s23 + $0x1b0] sm:$0xff]  ;;  %v7120_v23 = vld [vmem:[%s13085_s23 + $0x1a0] sm:$0xff]  ;;  %317 = vmatpush.msra.mxu3 %v102_v22  ;;  %v138_v35 = vld [vmem:[%s13085_s23 + $0x1e8] sm:$0xff] }
  0x11   :  { %6045 = vmatpush.msra.mxu1 %v7080_v13  ;;  %195 = vmatpush.msra.mxu0 %v99_v9  ;;  %v95_v21 = vld [vmem:[%s13085_s23 + $0x90] sm:$0xff]  ;;  %v93_v24 = vld [vmem:[%s13085_s23 + $0x80] sm:$0xff]  ;;  %v94_v37 = vld [vmem:[%s13085_s23 + $0x88] sm:$0xff] }
  0x12   :  { %287 = vmatpush.msra.mxu2 %v143_v12  ;;  %v7134_v26 = vld [vmem:[%s13085_s23 + $0x190] sm:$0xff]  ;;  %318 = vmatpush.msra.mxu3 %v100_v25  ;;  %v7146_v29 = vld [vmem:[%s13085_s23 + $0x180] sm:$0xff]  ;;  %v136_v39 = vld [vmem:[%s13085_s23 + $0x1d8] sm:$0xff] }
  0x13   :  { %6046 = vmatpush.msra.mxu1 %v7088_v15  ;;  %196 = vmatpush.msra.mxu0 %v97_v17  ;;  %v91_v27 = vld [vmem:[%s13085_s23 + $0x70] sm:$0xff]  ;;  %v89_v31 = vld [vmem:[%s13085_s23 + $0x60] sm:$0xff]  ;;  %v92_v41 = vld [vmem:[%s13085_s23 + $0x78] sm:$0xff] }
  0x14   :  { %288 = vmatpush.msra.mxu2 %v141_v18  ;;  %319 = vmatpush.msra.mxu3 %v98_v28  ;;  %v7166_v34 = vld [vmem:[%s13085_s23 + $0x170] sm:$0xff]  ;;  %v7181_v38 = vld [vmem:[%s13085_s23 + $0x160] sm:$0xff]  ;;  %v134_v43 = vld [vmem:[%s13085_s23 + $0x1c8] sm:$0xff] }
  0x15   :  { %5700 = vmatmul.msk.f32.vlgmr.msra.gmra.mxu2 %vm12947_vm1, %v7103_v19  ;;  %6047 = vmatpush.msra.mxu1 %v7108_v20  ;;  %v87_v36 = vld [vmem:[%s13085_s23 + $0x50] sm:$0xff]  ;;  %v85_v40 = vld [vmem:[%s13085_s23 + $0x40] sm:$0xff]  ;;  %v90_v45 = vld [vmem:[%s13085_s23 + $0x68] sm:$0xff] }
  0x16   :  { %197 = vmatpush.msra.mxu0 %v95_v21  ;;  %355 = vmatpush.msrb.mxu2 %v140_v30  ;;  %v7198_v42 = vld [vmem:[%s13085_s23 + $0x150] sm:$0xff]  ;;  %v7213_v46 = vld [vmem:[%s13085_s23 + $0x140] sm:$0xff]  ;;  %v132_v47 = vld [vmem:[%s13085_s23 + $0x1b8] sm:$0xff] }
  0x17   :  { %6048 = vmatpush.msra.mxu1 %v7120_v23  ;;  %320 = vmatpush.msra.mxu3 %v96_v32  ;;  %v83_v44 = vld [vmem:[%s13085_s23 + $0x30] sm:$0xff]  ;;  %v81_v48 = vld [vmem:[%s13085_s23 + $0x20] sm:$0xff]  ;;  %v88_v49 = vld [vmem:[%s13085_s23 + $0x58] sm:$0xff] }
  0x18   :  { %198 = vmatpush.msra.mxu0 %v93_v24  ;;  %356 = vmatpush.msrb.mxu2 %v138_v35  ;;  %v7233_v51 = vld [vmem:[%s13085_s23 + $0x130] sm:$0xff]  ;;  %v86_v53 = vld [vmem:[%s13085_s23 + $0x48] sm:$0xff]  ;;  %v7245_v54 = vld [vmem:[%s13085_s23 + $0x120] sm:$0xff] }
  0x19   :  { %6049 = vmatpush.msra.mxu1 %v7134_v26  ;;  %321 = vmatpush.msra.mxu3 %v94_v37  ;;  %v79_v52 = vld [vmem:[%s13085_s23 + $0x10] sm:$0xff]  ;;  %v130_v55 = vld [vmem:[%s13085_s23 + $0x1a8] sm:$0xff]  ;;  %v77_v56 = vld [vmem:[%s13085_s23] sm:$0xff] }
  0x1a   :  { %199 = vmatpush.msra.mxu0 %v91_v27  ;;  %357 = vmatpush.msrb.mxu2 %v136_v39  ;;  %v84_v57 = vld [vmem:[%s13085_s23 + $0x38] sm:$0xff]  ;;  %v7265_v59 = vld [vmem:[%s13085_s23 + $0x110] sm:$0xff]  ;;  %v82_v60 = vld [vmem:[%s13085_s23 + $0x28] sm:$0xff] }
  0x1b   :  { %6050 = vmatpush.msra.mxu1 %v7146_v29  ;;  %322 = vmatpush.msra.mxu3 %v92_v41  ;;  %v7274_v61 = vld [vmem:[%s13085_s23 + $0x100] sm:$0xff]  ;;  %v128_v62 = vld [vmem:[%s13085_s23 + $0x198] sm:$0xff]  ;;  %v78_v2 = vld [vmem:[%s13085_s23 + $0x8] sm:$0xff] }
  0x1c   :  { %200 = vmatpush.msra.mxu0 %v89_v31  ;;  %358 = vmatpush.msrb.mxu2 %v134_v43  ;;  %v80_v63 = vld [vmem:[%s13085_s23 + $0x18] sm:$0xff]  ;;  %v7292_v1 = vld [vmem:[%s12788_s0 + $0x20] sm:$0xff]  ;;  %v126_v3 = vld [vmem:[%s13085_s23 + $0x188] sm:$0xff] }
  0x1d   :  { %5701 = vmatmul.msk.f32.gmra.mxu2 %vm12947_vm1, %v7161_v33  ;;  %6051 = vmatpush.msra.mxu1 %v7166_v34  ;;  %v7287_v0 = vld [vmem:[%s12788_s0 + $0x58] sm:$0xff]  ;;  %v501_v4 = vld [vmem:[%s12789_s6 + $0x68] sm:$0x3]  ;;  %v59_v14 = vld [vmem:[%s12788_s0 + $0x30] sm:$0xff] }
  0x1e   :  { %201 = vmatpush.msra.mxu0 %v87_v36  ;;  %323 = vmatpush.msra.mxu3 %v90_v45  ;;  %v56_v5 = vld [vmem:[%s12788_s0 + $0x18] sm:$0xff]  ;;  %v122_v8 = vld [vmem:[%s13085_s23 + $0x168] sm:$0xff]  ;;  %v7372_v21 = vld [vmem:[%s12788_s0 + $0x50] sm:$0xff] }
  0x1f   :  { %6052 = vmatpush.msra.mxu1 %v7181_v38  ;;  %359 = vmatpush.msrb.mxu2 %v132_v47  ;;  %v499_v7 = vld [vmem:[%s12789_s6 + $0x58] sm:$0xff]  ;;  %v497_v9 = vld [vmem:[%s12789_s6 + $0x48] sm:$0xff]  ;;  %v500_v25 = vld [vmem:[%s12789_s6 + $0x60] sm:$0x3] }
  0x20   :  { %202 = vmatpush.msra.mxu0 %v85_v40  ;;  %324 = vmatpush.msra.mxu3 %v88_v49  ;;  %v7335_v11 = vld [vmem:[%s12788_s0 + $0x38] sm:$0xff]  ;;  %v114_v17 = vld [vmem:[%s13085_s23 + $0x128] sm:$0xff]  ;;  %v498_v27 = vld [vmem:[%s12789_s6 + $0x50] sm:$0xff] }
  0x21   :  { %6053 = vmatpush.msra.mxu1 %v7198_v42  ;;  %360 = vmatpush.msrb.mxu2 %v130_v55  ;;  %v120_v12 = vld [vmem:[%s13085_s23 + $0x158] sm:$0xff]  ;;  %v493_v18 = vld [vmem:[%s12789_s6 + $0x28] sm:$0xff]  ;;  %v7403_v28 = vld [vmem:[%s12788_s0 + $0xa0] sm:$0xff] }
  0x22   :  { %203 = vmatpush.msra.mxu0 %v83_v44  ;;  %325 = vmatpush.msra.mxu3 %v86_v53  ;;  %v116_v16 = vld [vmem:[%s13085_s23 + $0x138] sm:$0xff]  ;;  %v62_v24 = vld [vmem:[%s12788_s0 + $0x48] sm:$0xff]  ;;  %v496_v30 = vld [vmem:[%s12789_s6 + $0x40] sm:$0xff]  ;;  %v6940_v53 = vmov 0.0  }
  0x23   :  { %6054 = vmatpush.msra.mxu1 %v7213_v46  ;;  %361 = vmatpush.msrb.mxu2 %v128_v62  ;;  %v112_v22 = vld [vmem:[%s13085_s23 + $0x118] sm:$0xff]  ;;  %v494_v31 = vld [vmem:[%s12789_s6 + $0x30] sm:$0xff]  ;;  %v65_v32 = vld [vmem:[%s12788_s0 + $0x60] sm:$0xff] }
  0x24   :  { %204 = vmatpush.msra.mxu0 %v81_v48  ;;  %326 = vmatpush.msra.mxu3 %v84_v57  ;;  %v492_v35 = vld [vmem:[%s12789_s6 + $0x20] sm:$0xff]  ;;  %v150_v36 = vld [vmem:[%s13085_s23 + $0x248] sm:$0xff]  ;;  %v148_v40 = vld [vmem:[%s13085_s23 + $0x238] sm:$0xff] }
  0x25   :  { %5702 = vmatmul.msk.f32.gmra.mxu2 %vm12947_vm1, %v7228_v50  ;;  %6055 = vmatpush.msra.mxu1 %v7233_v51  ;;  %v489_v37 = vld [vmem:[%s12789_s6 + $0x8] sm:$0xff]  ;;  %v69_v39 = vld [vmem:[%s12788_s0 + $0x80] sm:$0xff]  ;;  %v490_v41 = vld [vmem:[%s12789_s6 + $0x10] sm:$0xff] }
  0x26   :  { %205 = vmatpush.msra.mxu0 %v79_v52  ;;  %327 = vmatpush.msra.mxu3 %v82_v60  ;;  %v488_v43 = vld [vmem:[%s12789_s6] sm:$0xff]  ;;  %v68_v44 = vld [vmem:[%s12788_s0 + $0x78] sm:$0xff]  ;;  %v54_v47 = vld [vmem:[%s12788_s0 + $0x8] sm:$0xff] }
  0x27   :  { %6056 = vmatpush.msra.mxu1 %v7245_v54  ;;  %362 = vmatpush.msrb.mxu2 %v126_v3  ;;  %v144_v45 = vld [vmem:[%s13085_s23 + $0x218] sm:$0xff]  ;;  %v71_v49 = vld [vmem:[%s12788_s0 + $0x90] sm:$0xff]  ;;  %v74_v52 = vld [vmem:[%s12788_s0 + $0xa8] sm:$0xff] }
  0x28   :  { %206 = vmatpush.msra.mxu0 %v77_v56  ;;  %328 = vmatpush.msra.mxu3 %v80_v63  ;;  %v72_v48 = vld [vmem:[%s12788_s0 + $0x98] sm:$0xff] }
  0x29   :  { %207 = vmatmul.f32.vlgmr.msra.gmra.mxu0 %v53_v58  ;;  %6057 = vmatpush.msra.mxu1 %v7265_v59 }
  0x2a   :  { %232 = vmatpush.msrb.mxu0 %v7053_v6  ;;  %329 = vmatpush.msra.mxu3 %v78_v2  ;;  %v124_v6 = vld [vmem:[%s13085_s23 + $0x178] sm:$0xff] }
  0x2b   :  { %6058 = vmatpush.msra.mxu1 %v7274_v61  ;;  %330 = vmatmul.f32.vlgmr.msra.gmra.mxu3 %v53_v58 }
  0x2c   :  { %233 = vmatpush.msrb.mxu0 %v7068_v10  ;;  %251 = vmatmul.f32.vlgmr.msra.gmra.mxu1 %v7292_v1  ;;  %v7329_v10 = vld [vmem:[%s12788_s0 + $0x70] sm:$0xff] }
  0x2d   :  { %5703 = vmatmul.msk.f32.gmra.mxu2 %vm12947_vm1, %v7287_v0  ;;  %5721 = vmatpush.msk.msrb.mxu3 %vm506_vm2, %v501_v4 }
  0x2e   :  { %234 = vmatpush.msrb.mxu0 %v7080_v13  ;;  %363 = vmatpush.msrb.mxu2 %v124_v6  ;;  %v118_v13 = vld [vmem:[%s13085_s23 + $0x148] sm:$0xff] }
  0x2f   :  { %543 = vmatpush.msrb.mxu3 %v499_v7  ;;  %5720 = vmatpush.msk.msrb.mxu1 %vm506_vm2, %v500_v25 }
  0x30   :  { %235 = vmatpush.msrb.mxu0 %v7088_v15  ;;  %364 = vmatpush.msrb.mxu2 %v122_v8  ;;  %v495_v15 = vld [vmem:[%s12789_s6 + $0x38] sm:$0xff] }
  0x31   :  { %210 = vmatmul.f32.gmra.mxu0 %v56_v5  ;;  %544 = vmatpush.msrb.mxu3 %v497_v9 }
  0x32   :  { %236 = vmatpush.msrb.mxu0 %v7108_v20  ;;  %365 = vmatpush.msrb.mxu2 %v120_v12  ;;  %v7367_v20 = vld [vmem:[%s12788_s0 + $0x88] sm:$0xff] }
  0x33   :  { %333 = vmatmul.f32.gmra.mxu3 %v56_v5  ;;  %523 = vmatpush.msrb.mxu1 %v498_v27 }
  0x34   :  { %237 = vmatpush.msrb.mxu0 %v7120_v23  ;;  %254 = vmatmul.f32.gmra.mxu1 %v7335_v11  ;;  %v110_v23 = vld [vmem:[%s13085_s23 + $0x108] sm:$0xff] }
  0x35   :  { %5704 = vmatmul.msk.f32.gmra.mxu2 %vm12947_vm1, %v7329_v10  ;;  %545 = vmatpush.msrb.mxu3 %v495_v15 }
  0x36   :  { %238 = vmatpush.msrb.mxu0 %v7134_v26  ;;  %366 = vmatpush.msrb.mxu2 %v118_v13  ;;  %v491_v26 = vld [vmem:[%s12789_s6 + $0x18] sm:$0xff] }
  0x37   :  { %546 = vmatpush.msrb.mxu3 %v493_v18  ;;  %524 = vmatpush.msrb.mxu1 %v496_v30 }
  0x38   :  { %239 = vmatpush.msrb.mxu0 %v7146_v29  ;;  %367 = vmatpush.msrb.mxu2 %v116_v16  ;;  %v7408_v29 = vld [vmem:[%s12788_s0 + $0x68] sm:$0xff] }
  0x39   :  { %213 = vmatmul.f32.gmra.mxu0 %v59_v14  ;;  %547 = vmatpush.msrb.mxu3 %v491_v26 }
  0x3a   :  { %240 = vmatpush.msrb.mxu0 %v7166_v34  ;;  %368 = vmatpush.msrb.mxu2 %v114_v17  ;;  %v152_v34 = vld [vmem:[%s13085_s23 + $0x258] sm:$0xf] }
  0x3b   :  { %336 = vmatmul.f32.gmra.mxu3 %v59_v14  ;;  %525 = vmatpush.msrb.mxu1 %v494_v31 }
  0x3c   :  { %241 = vmatpush.msrb.mxu0 %v7181_v38  ;;  %257 = vmatmul.f32.gmra.mxu1 %v7372_v21  ;;  %v76_v38 = vld [vmem:[%s12788_s0 + $0xb8] sm:$0xff] }
  0x3d   :  { %5705 = vmatmul.msk.f32.gmra.mxu2 %vm12947_vm1, %v7367_v20  ;;  %548 = vmatpush.msrb.mxu3 %v489_v37 }
  0x3e   :  { %242 = vmatpush.msrb.mxu0 %v7198_v42  ;;  %369 = vmatpush.msrb.mxu2 %v112_v22  ;;  %v146_v42 = vld [vmem:[%s13085_s23 + $0x228] sm:$0xff] }
  0x3f   :  { %526 = vmatpush.msrb.mxu1 %v492_v35 }
  0x40   :  { %370 = vmatpush.msrb.mxu2 %v110_v23  ;;  %243 = vmatpush.msrb.mxu0 %v7213_v46  ;;  %v142_v46 = vld [vmem:[%s13085_s23 + $0x208] sm:$0xff] }
  0x41   :  { %216 = vmatmul.f32.gmra.mxu0 %v62_v24  ;;  %527 = vmatpush.msrb.mxu1 %v490_v41 }
  0x42   :  { %244 = vmatpush.msrb.mxu0 %v7233_v51  ;;  %v75_v51 = vld [vmem:[%s12788_s0 + $0xb0] sm:$0xff] }
  0x43   :  { %339 = vmatmul.f32.gmra.mxu3 %v62_v24  ;;  %528 = vmatpush.msrb.mxu1 %v488_v43 }
  0x44   :  { %245 = vmatpush.msrb.mxu0 %v7245_v54  ;;  %260 = vmatmul.f32.gmra.mxu1 %v7408_v29 }
  0x45   :  { %5706 = vmatmul.msk.f32.gmra.mxu2 %vm12947_vm1, %v7403_v28 }
  0x46   :  { %246 = vmatpush.msrb.mxu0 %v7265_v59 }
  0x48   :  { %247 = vmatpush.msrb.mxu0 %v7274_v61 }
  0x49   :  { %219 = vmatmul.f32.gmra.mxu0 %v65_v32 }
  0x4a   :  { %5708 = vmatpush.msk.msra.mxu0 %vm184_vm0, %v152_v34 }
  0x4b   :  { %342 = vmatmul.f32.gmra.mxu3 %v65_v32 }
  0x4c   :  { %407 = vmatpush.msra.mxu0 %v150_v36  ;;  %263 = vmatmul.f32.gmra.mxu1 %v69_v39 }
  0x4d   :  { %5707 = vmatmul.msk.f32.gmra.mxu2 %vm12947_vm1, %v76_v38 }
  0x4e   :  { %408 = vmatpush.msra.mxu0 %v148_v40 }
  0x50   :  { %409 = vmatpush.msra.mxu0 %v146_v42 }
  0x51   :  { %222 = vmatmul.f32.gmra.mxu0 %v68_v44 }
  0x52   :  { %410 = vmatpush.msra.mxu0 %v144_v45 }
  0x53   :  { %345 = vmatmul.f32.gmra.mxu3 %v68_v44 }
  0x54   :  { %411 = vmatpush.msra.mxu0 %v142_v46  ;;  %266 = vmatmul.f32.gmra.mxu1 %v72_v48 }
  0x55   :  { %371 = vmatmul.f32.vlgmr.msrb.gmra.mxu2 %v54_v47 }
  0x59   :  { %225 = vmatmul.f32.gmra.mxu0 %v71_v49 }
  0x5b   :  { %348 = vmatmul.f32.gmra.mxu3 %v71_v49 }
  0x5c   :  { %269 = vmatmul.f32.gmra.mxu1 %v75_v51 }
  0x5d   :  { %374 = vmatmul.f32.gmra.mxu2 %v7292_v1 }
  0x61   :  { %228 = vmatmul.f32.gmra.mxu0 %v74_v52 }
  0x63   :  { %351 = vmatmul.f32.gmra.mxu3 %v74_v52 }
  0x64   :  { %529 = vmatmul.f32.vlgmr.msrb.gmra.mxu1 %v6940_v53 }
  0x65   :  { %377 = vmatmul.f32.gmra.mxu2 %v7335_v11 }
  0x69   :  { %248 = vmatmul.f32.vlgmr.msrb.gmra.mxu0 %v54_v47 }
  0x6b   :  { %549 = vmatmul.f32.vlgmr.msrb.gmra.mxu3 %v6940_v53 }
  0x6d   :  { %380 = vmatmul.f32.gmra.mxu2 %v7372_v21 }
  0x71   :  { %5709 = vmatmul.msk.f32.vlgmr.msra.gmra.mxu0 %vm12947_vm1, %v7103_v19 }
  0x75   :  { %383 = vmatmul.f32.gmra.mxu2 %v7408_v29 }
  0x79   :  { %5710 = vmatmul.msk.f32.gmra.mxu0 %vm12947_vm1, %v7161_v33 }
  0x7d   :  { %386 = vmatmul.f32.gmra.mxu2 %v69_v39 }
  0x81   :  { %5711 = vmatmul.msk.f32.gmra.mxu0 %vm12947_vm1, %v7228_v50  ;;  %v153_v50 = vld [vmem:[%s12790_s7] sm:$0x3]  ;;  %s6941_s7 = smov 106  }
  0x82   :  { %v155_v57 = vperm.slane %v153_v50, 0  ;;  %v156_v46 = vperm.slane %v153_v50, 1 }
  0x85   :  { %389 = vmatmul.f32.gmra.mxu2 %v72_v48 }
  0x89   :  { %5712 = vmatmul.msk.f32.gmra.mxu0 %vm12947_vm1, %v7287_v0 }
  0x8d   :  { %392 = vmatmul.f32.gmra.mxu2 %v75_v51 }
  0x91   :  { %5713 = vmatmul.msk.f32.gmra.mxu0 %vm12947_vm1, %v7329_v10 }
  0x98   :  { %v7496_v54 = vpop.f32.mrf.mxu2 }
  0x99   :  { %5714 = vmatmul.msk.f32.gmra.mxu0 %vm12947_vm1, %v7367_v20 }
  0xa0   :  { %v293_v19 = vpop.f32.mrf.mxu2 }
  0xa1   :  { %5715 = vmatmul.msk.f32.gmra.mxu0 %vm12947_vm1, %v7403_v28 }
  0xa6   :  { %v208_v33 = vpop.f32.mrf.mxu0 }
  0xa7   :  { %v209_v43 = vadd.f32 %v208_v33, %v155_v57 }
  0xa8   :  { %v296_v55 = vpop.f32.mrf.mxu2 }
  0xa9   :  { %5716 = vmatmul.msk.f32.gmra.mxu0 %vm12947_vm1, %v76_v38  ;;  %v252_v56 = vpop.f32.mrf.mxu1 }
  0xae   :  { %v211_v58 = vpop.f32.mrf.mxu0  ;;  %v331_v63 = vpop.f32.mrf.mxu3 }
  0xaf   :  { %v212_v59 = vadd.f32 %v211_v58, %v155_v57  ;;  %v332_v49 = vadd.f32 %v331_v63, %v156_v46 }
  0xb0   :  { %v299_v60 = vpop.f32.mrf.mxu2 }
  0xb1   :  { %v253_v61 = vadd.f32 %v252_v56, %v212_v59  ;;  %v255_v62 = vpop.f32.mrf.mxu1 }
  0xb3   :  { %v294_v0 = vadd.f32 %v293_v19, %v253_v61 }
  0xb5   :  { %440 = vst [vmem:[#allocation2 + $0x10] sm:$0xff] %v294_v0 }
  0xb6   :  { %v214_v1 = vpop.f32.mrf.mxu0  ;;  %v334_v6 = vpop.f32.mrf.mxu3 }
  0xb7   :  { %v215_v2 = vadd.f32 %v214_v1, %v155_v57  ;;  %v335_v56 = vadd.f32 %v334_v6, %v156_v46 }
  0xb8   :  { %v302_v3 = vpop.f32.mrf.mxu2 }
  0xb9   :  { %v256_v4 = vadd.f32 %v255_v62, %v215_v2  ;;  %v258_v5 = vpop.f32.mrf.mxu1 }
  0xbb   :  { %v297_v7 = vadd.f32 %v296_v55, %v256_v4 }
  0xbd   :  { %442 = vst [vmem:[#allocation2 + $0x20] sm:$0xff] %v297_v7 }
  0xbe   :  { %v217_v8 = vpop.f32.mrf.mxu0  ;;  %v337_v13 = vpop.f32.mrf.mxu3 }
  0xbf   :  { %v218_v9 = vadd.f32 %v217_v8, %v155_v57  ;;  %v338_v61 = vadd.f32 %v337_v13, %v156_v46 }
  0xc0   :  { %v305_v10 = vpop.f32.mrf.mxu2 }
  0xc1   :  { %v259_v11 = vadd.f32 %v258_v5, %v218_v9  ;;  %v261_v12 = vpop.f32.mrf.mxu1 }
  0xc3   :  { %v300_v14 = vadd.f32 %v299_v60, %v259_v11 }
  0xc5   :  { %444 = vst [vmem:[#allocation2 + $0x30] sm:$0xff] %v300_v14 }
  0xc6   :  { %v220_v15 = vpop.f32.mrf.mxu0  ;;  %v340_v21 = vpop.f32.mrf.mxu3 }
  0xc7   :  { %v221_v16 = vadd.f32 %v220_v15, %v155_v57  ;;  %v341_v2 = vadd.f32 %v340_v21, %v156_v46 }
  0xc8   :  { %v308_v17 = vpop.f32.mrf.mxu2 }
  0xc9   :  { %v262_v18 = vadd.f32 %v261_v12, %v221_v16  ;;  %v264_v20 = vpop.f32.mrf.mxu1 }
  0xcb   :  { %v303_v22 = vadd.f32 %v302_v3, %v262_v18 }
  0xcd   :  { %446 = vst [vmem:[#allocation2 + $0x40] sm:$0xff] %v303_v22 }
  0xce   :  { %v223_v23 = vpop.f32.mrf.mxu0  ;;  %v343_v27 = vpop.f32.mrf.mxu3 }
  0xcf   :  { %v224_v24 = vadd.f32 %v223_v23, %v155_v57  ;;  %v344_v7 = vadd.f32 %v343_v27, %v156_v46 }
  0xd0   :  { %v311_v26 = vpop.f32.mrf.mxu2 }
  0xd1   :  { %v265_v25 = vadd.f32 %v264_v20, %v224_v24  ;;  %v267_v29 = vpop.f32.mrf.mxu1 }
  0xd3   :  { %v306_v28 = vadd.f32 %v305_v10, %v265_v25 }
  0xd5   :  { %448 = vst [vmem:[#allocation2 + $0x50] sm:$0xff] %v306_v28 }
  0xd6   :  { %v226_v30 = vpop.f32.mrf.mxu0  ;;  %v346_v34 = vpop.f32.mrf.mxu3 }
  0xd7   :  { %v227_v31 = vadd.f32 %v226_v30, %v155_v57  ;;  %v347_v12 = vadd.f32 %v346_v34, %v156_v46 }
  0xd8   :  { %v372_v36 = vpop.f32.mrf.mxu2 }
  0xd9   :  { %v268_v32 = vadd.f32 %v267_v29, %v227_v31  ;;  %v270_v38 = vpop.f32.mrf.mxu1  ;;  %v373_v52 = vadd.f32 %v372_v36, %v332_v49 }
  0xdb   :  { %v309_v35 = vadd.f32 %v308_v17, %v268_v32 }
  0xdd   :  { %450 = vst [vmem:[#allocation2 + $0x60] sm:$0xff] %v309_v35 }
  0xde   :  { %v229_v37 = vpop.f32.mrf.mxu0  ;;  %v349_v41 = vpop.f32.mrf.mxu3 }
  0xdf   :  { %v230_v39 = vadd.f32 %v229_v37, %v155_v57  ;;  %v350_v17 = vadd.f32 %v349_v41, %v156_v46 }
  0xe0   :  { %v375_v44 = vpop.f32.mrf.mxu2 }
  0xe1   :  { %v271_v40 = vadd.f32 %v270_v38, %v230_v39  ;;  %v376_v58 = vadd.f32 %v375_v44, %v335_v56  ;;  %v530_v27 = vpop.f32.mrf.mxu1  ;;  %v7542_v56 = vld [vmem:[%s12792_s8 + $0xc0] sm:$0xf] }
  0xe2   :  { %5724 = vmatpush.msk.msra.mxu1 %vm184_vm0, %v7542_v56 }
  0xe3   :  { %v312_v42 = vadd.f32 %v311_v26, %v271_v40 }
  0xe5   :  { %452 = vst [vmem:[#allocation2 + $0x70] sm:$0xff] %v312_v42 }
  0xe6   :  { %v249_v45 = vpop.f32.mrf.mxu0  ;;  %v352_v51 = vpop.f32.mrf.mxu3 }
  0xe7   :  { %v250_v47 = vadd.f32 %v249_v45, %v209_v43  ;;  %v353_v23 = vadd.f32 %v352_v51, %v156_v46  ;;  %v12805_v45 = vmov 0   ;;  %v7533_v51 = vld [vmem:[%s12791_s1] sm:$0xff] }
  0xe8   :  { %v378_v55 = vpop.f32.mrf.mxu2  ;;  %6065 = vset.pattern.permute.xlu1 %v12805_v45  ;;  %6066 = vset.pattern.permute.xlu0 %v12805_v45  ;;  %vm482_vm8 = vcmp.gt.s32.totalorder %v7533_v51, 0 }
  0xe9   :  { %v291_v48 = vadd.f32 %v7496_v54, %v250_v47  ;;  %v379_v62 = vadd.f32 %v378_v55, %v338_v61  ;;  %6067 = vset.pattern.permute.xlu2 %v12805_v45 }
  0xeb   :  { %v553_v28 = vadd.f32 %v530_v27, %v291_v48  ;;  %v635_v27 = vld [vmem:[%s12792_s8 + $0x28] sm:$0xff] }
  0xed   :  { %v5722_v29 = vmul.f32 -1.442695, %v553_v28  ;;  %v7658_v28 = vld [vmem:[%s12792_s8 + $0x10] sm:$0xff] }
  0xee   :  { %v413_v53 = vpop.f32.mrf.mxu0  ;;  %v550_v33 = vpop.f32.mrf.mxu3 }
  0xef   :  { %v414_v19 = vadd.f32 %v413_v53, %v373_v52  ;;  %v612_v52 = vsel %vm482_vm8, 1, %v12805_v45 }
  0xf0   :  { %v381_v54 = vpop.f32.mrf.mxu2 }
  0xf1   :  { %439 = vst.msk [vmem:[#allocation2 + $0x8] sm:$0xff] %vm438_vm3, %v414_v19  ;;  %v382_v4 = vadd.f32 %v381_v54, %v341_v2  ;;  %v649_v54 = vld [vmem:[%s12792_s8 + $0x98] sm:$0xff] }
  0xf6   :  { %v416_v59 = vpop.f32.mrf.mxu0 }
  0xf7   :  { %v417_v57 = vadd.f32 %v416_v59, %v376_v58  ;;  %v655_v58 = vld [vmem:[%s12792_s8 + $0xc8] sm:$0xf]  ;;  %v7550_v59 = vld [vmem:[%s12792_s8 + $0xb0] sm:$0xff] }
  0xf8   :  { %v487_v60 = vld [vmem:[#allocation2 + $0x8] sm:$0xff]  ;;  %v384_v3 = vpop.f32.mrf.mxu2  ;;  %5726 = vmatpush.msk.msra.mxu3 %vm184_vm0, %v655_v58  ;;  %670 = vmatpush.msra.mxu1 %v7550_v59 }
  0xf9   :  { %441 = vst.msk [vmem:[#allocation2 + $0x18] sm:$0xff] %vm438_vm3, %v417_v57  ;;  %v7509_v50 = vadd.f32 %v550_v33, %v487_v60  ;;  %v385_v8 = vadd.f32 %v384_v3, %v344_v7  ;;  %v653_v33 = vld [vmem:[%s12792_s8 + $0xb8] sm:$0xff]  ;;  %v7561_v57 = vld [vmem:[%s12792_s8 + $0xa0] sm:$0xff]  ;;  %v651_v60 = vld [vmem:[%s12792_s8 + $0xa8] sm:$0xff] }
  0xfa   :  { %690 = vmatpush.msra.mxu3 %v653_v33  ;;  %671 = vmatpush.msra.mxu1 %v7561_v57  ;;  %v7597_v3 = vld [vmem:[%s12792_s8 + $0x60] sm:$0xff] }
  0xfb   :  { %6071 = vtanh.f32 %v7509_v50  ;;  %v5723_v53 = vmul.f32 -1.442695, %v7509_v50  ;;  %v7570_v50 = vld [vmem:[%s12792_s8 + $0x90] sm:$0xff] }
  0xfc   :  { %6073 = vpow2.f32 %v5722_v29  ;;  %691 = vmatpush.msra.mxu3 %v651_v60  ;;  %672 = vmatpush.msra.mxu1 %v7570_v50  ;;  %v633_v29 = vld [vmem:[%s12792_s8 + $0x18] sm:$0xff] }
  0xfe   :  { %v419_v63 = vpop.f32.mrf.mxu0  ;;  %692 = vmatpush.msra.mxu3 %v649_v54 }
  0xff   :  { %v420_v0 = vadd.f32 %v419_v63, %v379_v62  ;;  %v7579_v62 = vld [vmem:[%s12792_s8 + $0x80] sm:$0xff]  ;;  %v647_v63 = vld [vmem:[%s12792_s8 + $0x88] sm:$0xff] }
 0x100   :  { %v387_v9 = vpop.f32.mrf.mxu2  ;;  %673 = vmatpush.msra.mxu1 %v7579_v62  ;;  %693 = vmatpush.msra.mxu3 %v647_v63 }
 0x101   :  { %v6072_v1 = vpop.eup %6071  ;;  %443 = vst.msk [vmem:[#allocation2 + $0x28] sm:$0xff] %vm438_vm3, %v420_v0  ;;  %v388_v13 = vadd.f32 %v387_v9, %v347_v12  ;;  %v7588_v0 = vld [vmem:[%s12792_s8 + $0x70] sm:$0xff] }
 0x102   :  { %596 = vrot.lane.b32.xlu0 %v6072_v1, %s6941_s7  ;;  %v6074_v30 = vpop.eup %6073  ;;  %v645_v1 = vld [vmem:[%s12792_s8 + $0x78] sm:$0xff]  ;;  %674 = vmatpush.msra.mxu1 %v7588_v0 }
 0x103   :  { %v561_v31 = vadd.f32 1.0, %v6074_v30  ;;  %694 = vmatpush.msra.mxu3 %v645_v1  ;;  %v7668_v30 = vld [vmem:[%s12792_s8] sm:$0xff] }
 0x104   :  { %675 = vmatpush.msra.mxu1 %v7597_v3 }
 0x105   :  { %6075 = vrcp.f32 %v561_v31  ;;  %v574_v38 = vand.u32 2147483648, %v561_v31  ;;  %vm568_vm5 = vweird.f32 %v561_v31  ;;  %v572_v39 = vand.u32 2147483647, %v561_v31 }
 0x106   :  { %v422_v5 = vpop.f32.mrf.mxu0 }
 0x107   :  { %v423_v6 = vadd.f32 %v422_v5, %v382_v4  ;;  %v575_v41 = vor.u32 1.1754944e-38, %v574_v38  ;;  %vm573_vm7 = vcmp.eq.f32.partialorder %v572_v39, 8.507059e+37  ;;  %v643_v4 = vld [vmem:[%s12792_s8 + $0x68] sm:$0xff]  ;;  %v7606_v5 = vld [vmem:[%s12792_s8 + $0x50] sm:$0xff] }
 0x108   :  { %v390_v16 = vpop.f32.mrf.mxu2  ;;  %695 = vmatpush.msra.mxu3 %v643_v4  ;;  %676 = vmatpush.msra.mxu1 %v7606_v5 }
 0x109   :  { %445 = vst.msk [vmem:[#allocation2 + $0x38] sm:$0xff] %vm438_vm3, %v423_v6  ;;  %v391_v18 = vadd.f32 %v390_v16, %v350_v17  ;;  %v641_v6 = vld [vmem:[%s12792_s8 + $0x58] sm:$0xff] }
 0x10a   :  { %696 = vmatpush.msra.mxu3 %v641_v6 }
 0x10b   :  { %v6076_v32 = vpop.eup %6075 }
 0x10c   :  { %v564_v34 = vmul.f32 %v6076_v32, %v561_v31  ;;  %vm569_vm4 = vweird.f32 %v6076_v32  ;;  %v631_v31 = vld [vmem:[%s12792_s8 + $0x8] sm:$0xff] }
 0x10d   :  { %vm570_vm6 = vmor %vm568_vm5, %vm569_vm4 }
 0x10e   :  { %v425_v10 = vpop.f32.mrf.mxu0  ;;  %v565_v35 = vsub.f32 1.0, %v564_v34 }
 0x10f   :  { %v426_v11 = vadd.f32 %v425_v10, %v385_v8 }
 0x110   :  { %v393_v22 = vpop.f32.mrf.mxu2  ;;  %v566_v36 = vmul.f32 %v6076_v32, %v565_v35 }
 0x111   :  { %447 = vst.msk [vmem:[#allocation2 + $0x48] sm:$0xff] %vm438_vm3, %v426_v11  ;;  %v394_v24 = vadd.f32 %v393_v22, %v353_v23  ;;  %v7632_v22 = vld [vmem:[%s12792_s8 + $0x40] sm:$0xff]  ;;  %v639_v23 = vld [vmem:[%s12792_s8 + $0x48] sm:$0xff] }
 0x112   :  { %v567_v37 = vadd.f32 %v6076_v32, %v566_v36  ;;  %677 = vmatpush.msra.mxu1 %v7632_v22  ;;  %697 = vmatpush.msra.mxu3 %v639_v23  ;;  %v7739_v23 = vld [vmem:[%s12792_s8 + $0x160] sm:$0xff] }
 0x114   :  { %v571_v40 = vsel %vm570_vm6, %v6076_v32, %v567_v37  ;;  %v455_v37 = vld [vmem:[%s12793_s9] sm:$0x3] }
 0x115   :  { %v7519_v43 = vsel %vm573_vm7, %v575_v41, %v571_v40  ;;  %v7684_v38 = vperm.slane %v455_v37, 1 }
 0x116   :  { %v428_v14 = vpop.f32.mrf.mxu0  ;;  %v594_v46 = vmul.f32 0.0, %v7519_v43 }
 0x117   :  { %v429_v15 = vadd.f32 %v428_v14, %v388_v13  ;;  %13086 = vst [vmem:[#allocation3_spill] sm:$0xff] %v7684_v38 }
 0x119   :  { %449 = vst.msk [vmem:[#allocation2 + $0x58] sm:$0xff] %vm438_vm3, %v429_v15 }
 0x11e   :  { %v431_v20 = vpop.f32.mrf.mxu0 }
 0x11f   :  { %v432_v21 = vadd.f32 %v431_v20, %v391_v18 }
 0x121   :  { %451 = vst.msk [vmem:[#allocation2 + $0x68] sm:$0xff] %vm438_vm3, %v432_v21 }
 0x126   :  { %v434_v25 = vpop.f32.mrf.mxu0 }
 0x127   :  { %v435_v26 = vadd.f32 %v434_v25, %v394_v24  ;;  %v7640_v24 = vld [vmem:[%s12792_s8 + $0x30] sm:$0xff]  ;;  %v637_v25 = vld [vmem:[%s12792_s8 + $0x38] sm:$0xff] }
 0x128   :  { %678 = vmatpush.msra.mxu1 %v7640_v24  ;;  %698 = vmatpush.msra.mxu3 %v637_v25  ;;  %v7744_v25 = vld [vmem:[%s12792_s8 + $0x168] sm:$0xff] }
 0x129   :  { %453 = vst.msk [vmem:[#allocation2 + $0x78] sm:$0xff] %vm438_vm3, %v435_v26  ;;  %v7649_v26 = vld [vmem:[%s12792_s8 + $0x20] sm:$0xff]  ;;  %vm656_vm3 = vcmask 818176  }
 0x12a   :  { %679 = vmatpush.msra.mxu1 %v7649_v26  ;;  %699 = vmatpush.msra.mxu3 %v635_v27 }
 0x12c   :  { %680 = vmatpush.msra.mxu1 %v7658_v28  ;;  %700 = vmatpush.msra.mxu3 %v633_v29  ;;  %v7751_v29 = vld [vmem:[%s12792_s8 + $0x150] sm:$0xff] }
 0x12e   :  { %681 = vmatpush.msra.mxu1 %v7668_v30  ;;  %701 = vmatpush.msra.mxu3 %v631_v31  ;;  %v7756_v31 = vld [vmem:[%s12792_s8 + $0x158] sm:$0xff] }
 0x174   :  { %v597_v42 = vpop.permute.xlu0 %596 }
 0x175   :  { %v599_v44 = vmul.f32 %v597_v42, %v7519_v43  ;;  %v7688_v42 = vperm.slane %v455_v37, 0  ;;  %v7775_v37 = vld [vmem:[%s12792_s8 + $0x130] sm:$0xff] }
 0x177   :  { %601 = vrot.lane.b32.xlu0 %v599_v44, %s6942_s26  ;;  %13087 = vst [vmem:[#allocation4_spill] sm:$0xff] %v7688_v42 }
 0x1e9   :  { %v602_v47 = vpop.permute.xlu0 %601 }
 0x1ea   :  { %v7527_v48 = vadd.f32 %v602_v47, %v594_v46 }
 0x1ec   :  { %6077 = vtanh.f32 %v7527_v48 }
 0x1ed   :  { %6079 = vpow2.f32 %v5723_v53 }
 0x1f2   :  { %v6078_v49 = vpop.eup %6077 }
 0x1f3   :  { %607 = vrot.lane.b32.xlu1 %v6078_v49, %s6942_s26  ;;  %v6080_v19 = vpop.eup %6079 }
 0x1f4   :  { %v562_v55 = vadd.f32 1.0, %v6080_v19 }
 0x1f6   :  { %6081 = vrcp.f32 %v562_v55  ;;  %v589_v13 = vand.u32 2147483648, %v562_v55  ;;  %vm583_vm11 = vweird.f32 %v562_v55  ;;  %v587_v14 = vand.u32 2147483647, %v562_v55 }
 0x1f8   :  { %v590_v17 = vor.u32 1.1754944e-38, %v589_v13  ;;  %vm588_vm13 = vcmp.eq.f32.partialorder %v587_v14, 8.507059e+37  ;;  %v7703_v13 = vld [vmem:[%s12792_s8 + $0x190] sm:$0xf]  ;;  %v7708_v14 = vld [vmem:[%s12792_s8 + $0x198] sm:$0xf] }
 0x1f9   :  { %5756 = vmatpush.msk.msra.mxu2 %vm184_vm0, %v7703_v13  ;;  %5758 = vmatpush.msk.msrb.mxu1 %vm184_vm0, %v7708_v14 }
 0x1fb   :  { %614 = vperm.xlu1 %6065, %v612_v52  }
 0x1fc   :  { %v6082_v61 = vpop.eup %6081 }
 0x1fd   :  { %v579_v2 = vmul.f32 %v6082_v61, %v562_v55  ;;  %vm584_vm9 = vweird.f32 %v6082_v61 }
 0x1fe   :  { %vm585_vm12 = vmor %vm583_vm11, %vm584_vm9 }
 0x1ff   :  { %v580_v7 = vsub.f32 1.0, %v579_v2 }
 0x201   :  { %v581_v9 = vmul.f32 %v6082_v61, %v580_v7 }
 0x203   :  { %v582_v10 = vadd.f32 %v6082_v61, %v581_v9 }
 0x205   :  { %v586_v16 = vsel %vm585_vm12, %v6082_v61, %v582_v10 }
 0x206   :  { %v591_v18 = vsel %vm588_vm13, %v590_v17, %v586_v16  ;;  %v7713_v16 = vld [vmem:[%s12792_s8 + $0x180] sm:$0xff]  ;;  %v7722_v17 = vld [vmem:[%s12792_s8 + $0x188] sm:$0xff] }
 0x207   :  { %815 = vmatpush.msra.mxu2 %v7713_v16  ;;  %835 = vmatpush.msrb.mxu1 %v7722_v17 }
 0x265   :  { %v608_v8 = vpop.permute.xlu1 %607 }
 0x266   :  { %v610_v12 = vmul.f32 %v608_v8, %v7519_v43  ;;  %v611_v20 = vmul.f32 %v608_v8, %v591_v18  ;;  %v7727_v18 = vld [vmem:[%s12792_s8 + $0x170] sm:$0xff] }
 0x267   :  { %816 = vmatpush.msra.mxu2 %v7727_v18 }
 0x269   :  { %817 = vmatpush.msra.mxu2 %v7739_v23 }
 0x26b   :  { %818 = vmatpush.msra.mxu2 %v7751_v29 }
 0x26d   :  { %v7613_v11 = vpop.permute.xlu1 %614 }
 0x26e   :  { %vm616_vm10 = vcmp.eq.s32.totalorder %v7613_v11, 1 }
 0x26f   :  { %v7619_v15 = vsel %vm616_vm10, %v610_v12, 0.0  ;;  %v7625_v21 = vsel %vm616_vm10, %v611_v20, 0.0  ;;  %v7732_v20 = vld [vmem:[%s12792_s8 + $0x178] sm:$0xff] }
 0x270   :  { %622 = vrot.lane.b32.xlu2 %v7619_v15, %s6944_s5  ;;  %836 = vmatpush.msrb.mxu1 %v7732_v20 }
 0x272   :  { %837 = vmatpush.msrb.mxu1 %v7744_v25 }
 0x274   :  { %838 = vmatpush.msrb.mxu1 %v7756_v31 }
 0x278   :  { %624 = vrot.lane.b32.xlu2 %v7625_v21, %s6944_s5 }
 0x2ca   :  { %v623_v32 = vpop.permute.xlu2 %622 }
 0x2d2   :  { %v625_v34 = vpop.permute.xlu2 %624 }
 0x2d3   :  { %v7675_v35 = vsel %vm626_vm14, %v623_v32, %v625_v34  ;;  %v7763_v32 = vld [vmem:[%s12792_s8 + $0x140] sm:$0xff]  ;;  %v7768_v34 = vld [vmem:[%s12792_s8 + $0x148] sm:$0xff] }
 0x2d4   :  { %v629_v36 = vsel %vm502_vm15, %v7675_v35, 0.0  ;;  %819 = vmatpush.msra.mxu2 %v7763_v32  ;;  %839 = vmatpush.msrb.mxu1 %v7768_v34 }
 0x2d5   :  { %5725 = vmatmul.msk.f32.vlgmr.msra.gmra.mxu1 %vm656_vm3, %v629_v36  ;;  %5727 = vmatmul.msk.f32.vlgmr.msra.gmra.mxu3 %vm656_vm3, %v629_v36 }
 0x2d6   :  { %820 = vmatpush.msra.mxu2 %v7775_v37 }
 0x352   :  { %v683_v43 = vpop.f32.mrf.mxu1 }
 0x353   :  { %v684_v44 = vadd.f32 %v683_v43, %v7688_v42 }
 0x355   :  { %v5728_v46 = vmul.f32 -1.442695, %v684_v44  ;;  %v7799_v44 = vld [vmem:[%s12792_s8 + $0x110] sm:$0xff] }
 0x358   :  { %v703_v39 = vpop.f32.mrf.mxu3 }
 0x359   :  { %v704_v40 = vadd.f32 %v703_v39, %v7684_v38  ;;  %v7780_v39 = vld [vmem:[%s12792_s8 + $0x138] sm:$0xff] }
 0x35a   :  { %840 = vmatpush.msrb.mxu1 %v7780_v39 }
 0x35b   :  { %6083 = vtanh.f32 %v704_v40  ;;  %v5729_v9 = vmul.f32 -1.442695, %v704_v40  ;;  %v7787_v40 = vld [vmem:[%s12792_s8 + $0x120] sm:$0xff] }
 0x35c   :  { %6085 = vpow2.f32 %v5728_v46  ;;  %v7804_v46 = vld [vmem:[%s12792_s8 + $0x118] sm:$0xff]  ;;  %821 = vmatpush.msra.mxu2 %v7787_v40 }
 0x35e   :  { %822 = vmatpush.msra.mxu2 %v7799_v44 }
 0x361   :  { %v6084_v41 = vpop.eup %6083 }
 0x362   :  { %747 = vrot.lane.b32.xlu0 %v6084_v41, %s6941_s7  ;;  %v6086_v47 = vpop.eup %6085  ;;  %v7792_v41 = vld [vmem:[%s12792_s8 + $0x128] sm:$0xff] }
 0x363   :  { %v712_v49 = vadd.f32 1.0, %v6086_v47  ;;  %841 = vmatpush.msrb.mxu1 %v7792_v41  ;;  %v7811_v47 = vld [vmem:[%s12792_s8 + $0x100] sm:$0xff] }
 0x364   :  { %823 = vmatpush.msra.mxu2 %v7811_v47 }
 0x365   :  { %6087 = vrcp.f32 %v712_v49  ;;  %v725_v33 = vand.u32 2147483648, %v712_v49  ;;  %vm719_vm5 = vweird.f32 %v712_v49  ;;  %v723_v60 = vand.u32 2147483647, %v712_v49  ;;  %842 = vmatpush.msrb.mxu1 %v7804_v46 }
 0x367   :  { %v726_v61 = vor.u32 1.1754944e-38, %v725_v33  ;;  %vm724_vm7 = vcmp.eq.f32.partialorder %v723_v60, 8.507059e+37 }
 0x36b   :  { %v6088_v52 = vpop.eup %6087 }
 0x36c   :  { %v715_v53 = vmul.f32 %v6088_v52, %v712_v49  ;;  %vm720_vm4 = vweird.f32 %v6088_v52  ;;  %v7816_v49 = vld [vmem:[%s12792_s8 + $0x108] sm:$0xff] }
 0x36d   :  { %vm721_vm6 = vmor %vm719_vm5, %vm720_vm4  ;;  %843 = vmatpush.msrb.mxu1 %v7816_v49 }
 0x36e   :  { %v716_v19 = vsub.f32 1.0, %v715_v53  ;;  %v7823_v53 = vld [vmem:[%s12792_s8 + $0xf0] sm:$0xff] }
 0x36f   :  { %824 = vmatpush.msra.mxu2 %v7823_v53 }
 0x370   :  { %v717_v55 = vmul.f32 %v6088_v52, %v716_v19  ;;  %v7828_v19 = vld [vmem:[%s12792_s8 + $0xf8] sm:$0xff] }
 0x371   :  { %844 = vmatpush.msrb.mxu1 %v7828_v19 }
 0x372   :  { %v718_v58 = vadd.f32 %v6088_v52, %v717_v55  ;;  %v7835_v55 = vld [vmem:[%s12792_s8 + $0xe0] sm:$0xff] }
 0x373   :  { %825 = vmatpush.msra.mxu2 %v7835_v55 }
 0x374   :  { %v722_v54 = vsel %vm721_vm6, %v6088_v52, %v718_v58  ;;  %v7840_v58 = vld [vmem:[%s12792_s8 + $0xe8] sm:$0xff] }
 0x375   :  { %v7691_v1 = vsel %vm724_vm7, %v726_v61, %v722_v54  ;;  %13089 = vst [vmem:[#allocation6_spill] sm:$0xff] %v7840_v58  ;;  %845 = vmatpush.msrb.mxu1 %v7840_v58 }
 0x376   :  { %v745_v4 = vmul.f32 0.0, %v7691_v1 }
 0x3d4   :  { %v748_v63 = vpop.permute.xlu0 %747 }
 0x3d5   :  { %v750_v2 = vmul.f32 %v748_v63, %v7691_v1 }
 0x3d7   :  { %752 = vrot.lane.b32.xlu1 %v750_v2, %s6942_s26 }
 0x449   :  { %v753_v6 = vpop.permute.xlu1 %752 }
 0x44a   :  { %v7696_v7 = vadd.f32 %v753_v6, %v745_v4 }
 0x44c   :  { %13088 = vst [vmem:[#allocation5_spill] sm:$0xff] %v7696_v7  ;;  %6089 = vtanh.f32 %v7696_v7 }
 0x44d   :  { %6091 = vpow2.f32 %v5729_v9 }
 0x452   :  { %v6090_v8 = vpop.eup %6089 }
 0x453   :  { %758 = vrot.lane.b32.xlu2 %v6090_v8, %s6942_s26  ;;  %v6092_v10 = vpop.eup %6091 }
 0x454   :  { %v713_v12 = vadd.f32 1.0, %v6092_v10 }
 0x456   :  { %6093 = vrcp.f32 %v713_v12  ;;  %v740_v60 = vand.u32 2147483648, %v713_v12  ;;  %vm734_vm9 = vweird.f32 %v713_v12  ;;  %v738_v54 = vand.u32 2147483647, %v713_v12 }
 0x458   :  { %v741_v63 = vor.u32 1.1754944e-38, %v740_v60  ;;  %vm739_vm12 = vcmp.eq.f32.partialorder %v738_v54, 8.507059e+37 }
 0x45c   :  { %v6094_v27 = vpop.eup %6093 }
 0x45d   :  { %v730_v36 = vmul.f32 %v6094_v27, %v713_v12  ;;  %vm735_vm8 = vweird.f32 %v6094_v27  ;;  %v7862_v12 = vld [vmem:[%s12792_s8 + $0xd0] sm:$0xff] }
 0x45e   :  { %vm736_vm11 = vmor %vm734_vm9, %vm735_vm8  ;;  %826 = vmatpush.msra.mxu2 %v7862_v12 }
 0x45f   :  { %v731_v43 = vsub.f32 1.0, %v730_v36 }
 0x461   :  { %v732_v52 = vmul.f32 %v6094_v27, %v731_v43 }
 0x463   :  { %v733_v33 = vadd.f32 %v6094_v27, %v732_v52 }
 0x465   :  { %v737_v61 = vsel %vm736_vm11, %v6094_v27, %v733_v33  ;;  %v5717_v33 = vld [vmem:[%s12793_s9 + $0x2] sm:$0x3] }
 0x466   :  { %v742_v2 = vsel %vm739_vm12, %v741_v63, %v737_v61  ;;  %v7878_v60 = vperm.slane %v5717_v33, 1 }
 0x468   :  { %13091 = vst [vmem:[#allocation8_spill] sm:$0xff] %v7878_v60 }
 0x4ad   :  { %v759_v4 = vpop.permute.xlu2 %758 }
 0x4ae   :  { %v761_v6 = vmul.f32 %v759_v4, %v7691_v1  ;;  %v762_v8 = vmul.f32 %v759_v4, %v742_v2  ;;  %v7867_v1 = vld [vmem:[%s12792_s8 + $0xd8] sm:$0xff]  ;;  %v7882_v2 = vperm.slane %v5717_v33, 0 }
 0x4af   :  { %13090 = vst [vmem:[#allocation7_spill] sm:$0xff] %v7867_v1  ;;  %846 = vmatpush.msrb.mxu1 %v7867_v1 }
 0x4b0   :  { %v7849_v9 = vsel %vm616_vm10, %v762_v8, 0.0  ;;  %v7853_v10 = vsel %vm616_vm10, %v761_v6, 0.0  ;;  %13092 = vst [vmem:[#allocation9_spill] sm:$0xff] %v7882_v2 }
 0x4b1   :  { %770 = vrot.lane.b32.xlu1 %v7849_v9, %s6944_s5  ;;  %768 = vrot.lane.b32.xlu0 %v7853_v10, %s6944_s5 }
 0x523   :  { %v771_v27 = vpop.permute.xlu1 %770  ;;  %v769_v36 = vpop.permute.xlu0 %768 }
 0x524   :  { %v772_v43 = vsel %vm626_vm14, %v769_v36, %v771_v27 }
 0x525   :  { %v774_v52 = vsel %vm502_vm15, %v772_v43, 0.0 }
 0x526   :  { %5757 = vmatmul.msk.f32.vlgmr.msra.gmra.mxu2 %vm656_vm3, %v774_v52  ;;  %5759 = vmatmul.msk.f32.vlgmr.msrb.gmra.mxu1 %vm656_vm3, %v774_v52 }
 0x5a3   :  { %v848_v54 = vpop.f32.mrf.mxu1 }
 0x5a4   :  { %v849_v61 = vadd.f32 %v848_v54, %v7878_v60 }
 0x5a6   :  { %6095 = vtanh.f32 %v849_v61 }
 0x5a9   :  { %v828_v4 = vpop.f32.mrf.mxu2 }
 0x5aa   :  { %v829_v6 = vadd.f32 %v828_v4, %v7882_v2 }
 0x5ac   :  { %v6096_v63 = vpop.eup %6095  ;;  %v5760_v8 = vmul.f32 -1.442695, %v829_v6 }
 0x5ad   :  { %892 = vrot.lane.b32.xlu2 %v6096_v63, %s6941_s7 }
 0x5ae   :  { %6097 = vpow2.f32 %v5760_v8 }
 0x5b4   :  { %v6098_v27 = vpop.eup %6097 }
 0x5b5   :  { %v857_v36 = vadd.f32 1.0, %v6098_v27 }
 0x5b7   :  { %6099 = vrcp.f32 %v857_v36  ;;  %v870_v54 = vand.u32 2147483648, %v857_v36  ;;  %vm864_vm4 = vweird.f32 %v857_v36  ;;  %v868_v60 = vand.u32 2147483647, %v857_v36 }
 0x5b9   :  { %v871_v63 = vor.u32 1.1754944e-38, %v870_v54  ;;  %vm869_vm6 = vcmp.eq.f32.partialorder %v868_v60, 8.507059e+37  ;;  %v7898_v60 = vld [vmem:[%s12792_s8 + $0x258] sm:$0xff] }
 0x5ba   :  { %13095 = vst [vmem:[#allocation12_spill] sm:$0xff] %v7898_v60  ;;  %v7923_v54 = vld [vmem:[%s12792_s8 + $0x238] sm:$0xff] }
 0x5bb   :  { %13097 = vst [vmem:[#allocation14_spill] sm:$0xff] %v7923_v54 }
 0x5bd   :  { %v6100_v43 = vpop.eup %6099 }
 0x5be   :  { %v860_v52 = vmul.f32 %v6100_v43, %v857_v36  ;;  %vm865_vm13 = vweird.f32 %v6100_v43 }
 0x5bf   :  { %vm866_vm5 = vmor %vm864_vm4, %vm865_vm13 }
 0x5c0   :  { %v861_v45 = vsub.f32 1.0, %v860_v52  ;;  %v7918_v52 = vld [vmem:[%s12792_s8 + $0x250] sm:$0xff] }
 0x5c2   :  { %v862_v7 = vmul.f32 %v6100_v43, %v861_v45 }
 0x5c4   :  { %v863_v42 = vadd.f32 %v6100_v43, %v862_v7  ;;  %v5761_v7 = vmul.f32 -1.442695, %v849_v61  ;;  %v7905_v61 = vld [vmem:[%s12792_s8 + $0x248] sm:$0xff] }
 0x5c5   :  { %13096 = vst [vmem:[#allocation13_spill] sm:$0xff] %v7905_v61 }
 0x5c6   :  { %v867_v33 = vsel %vm866_vm5, %v6100_v43, %v863_v42  ;;  %v7910_v43 = vld [vmem:[%s12792_s8 + $0x260] sm:$0xf] }
 0x5c7   :  { %v872_v4 = vsel %vm869_vm6, %v871_v63, %v867_v33  ;;  %5788 = vmatpush.msk.msrb.mxu3 %vm184_vm0, %v7910_v43  ;;  %v7930_v63 = vld [vmem:[%s12792_s8 + $0x228] sm:$0xff]  ;;  %vm1201_vm6 = vcmp.gt.s32.totalorder %v7533_v51, 1  ;;  %v8223_v51 = vsel %vm616_vm10, %v7527_v48, 0.0 }
 0x5c8   :  { %v890_v8 = vmul.f32 0.0, %v872_v4  ;;  %13098 = vst [vmem:[#allocation15_spill] sm:$0xff] %v7930_v63 }
 0x5c9   :  { %960 = vmatpush.msrb.mxu3 %v7918_v52  ;;  %13124 = vst [vmem:[#allocation40_spill] sm:$0xff] %v8223_v51 }
 0x607   :  { %v893_v38 = vpop.permute.xlu2 %892 }
 0x608   :  { %v895_v6 = vmul.f32 %v893_v38, %v872_v4  ;;  %v7893_v38 = vld [vmem:[%s12792_s8 + $0x268] sm:$0xf] }
 0x609   :  { %13094 = vst [vmem:[#allocation11_spill] sm:$0xff] %v7893_v38  ;;  %5790 = vmatpush.msk.msrb.mxu0 %vm184_vm0, %v7893_v38 }
 0x60a   :  { %897 = vrot.lane.b32.xlu0 %v895_v6, %s6942_s26  ;;  %v7936_v6 = vld [vmem:[%s12792_s8 + $0x218] sm:$0xff] }
 0x60b   :  { %980 = vmatpush.msrb.mxu0 %v7898_v60  ;;  %13099 = vst [vmem:[#allocation16_spill] sm:$0xff] %v7936_v6 }
 0x60d   :  { %981 = vmatpush.msrb.mxu0 %v7905_v61 }
 0x60f   :  { %982 = vmatpush.msrb.mxu0 %v7923_v54 }
 0x611   :  { %983 = vmatpush.msrb.mxu0 %v7930_v63 }
 0x613   :  { %984 = vmatpush.msrb.mxu0 %v7936_v6 }
 0x67c   :  { %v898_v27 = vpop.permute.xlu0 %897 }
 0x67d   :  { %v7886_v2 = vadd.f32 %v898_v27, %v890_v8  ;;  %v7942_v27 = vld [vmem:[%s12792_s8 + $0x208] sm:$0xff] }
 0x67e   :  { %13100 = vst [vmem:[#allocation17_spill] sm:$0xff] %v7942_v27  ;;  %985 = vmatpush.msrb.mxu0 %v7942_v27 }
 0x67f   :  { %13093 = vst [vmem:[#allocation10_spill] sm:$0xff] %v7886_v2  ;;  %6101 = vtanh.f32 %v7886_v2 }
 0x680   :  { %6103 = vpow2.f32 %v5761_v7 }
 0x685   :  { %v6102_v45 = vpop.eup %6101 }
 0x686   :  { %903 = vrot.lane.b32.xlu1 %v6102_v45, %s6942_s26  ;;  %v6104_v36 = vpop.eup %6103  ;;  %v7948_v45 = vld [vmem:[%s12792_s8 + $0x1f8] sm:$0xff] }
 0x687   :  { %v858_v42 = vadd.f32 1.0, %v6104_v36  ;;  %13101 = vst [vmem:[#allocation18_spill] sm:$0xff] %v7948_v45  ;;  %986 = vmatpush.msrb.mxu0 %v7948_v45 }
 0x689   :  { %6105 = vrcp.f32 %v858_v42  ;;  %v885_v63 = vand.u32 2147483648, %v858_v42  ;;  %vm879_vm8 = vweird.f32 %v858_v42  ;;  %v883_v54 = vand.u32 2147483647, %v858_v42 }
 0x68b   :  { %v886_v60 = vor.u32 1.1754944e-38, %v885_v63  ;;  %vm884_vm11 = vcmp.eq.f32.partialorder %v883_v54, 8.507059e+37  ;;  %v8013_v54 = vld [vmem:[%s12792_s8 + $0x200] sm:$0xff]  ;;  %v8025_v63 = vld [vmem:[%s12792_s8 + $0x1f0] sm:$0xff] }
 0x68f   :  { %v6106_v33 = vpop.eup %6105 }
 0x690   :  { %v875_v8 = vmul.f32 %v6106_v33, %v858_v42  ;;  %vm880_vm7 = vweird.f32 %v6106_v33  ;;  %v7989_v42 = vld [vmem:[%s12792_s8 + $0x220] sm:$0xff] }
 0x691   :  { %vm881_vm9 = vmor %vm879_vm8, %vm880_vm7 }
 0x692   :  { %v876_v7 = vsub.f32 1.0, %v875_v8 }
 0x694   :  { %v877_v36 = vmul.f32 %v6106_v33, %v876_v7 }
 0x696   :  { %v878_v2 = vadd.f32 %v6106_v33, %v877_v36  ;;  %v8037_v36 = vld [vmem:[%s12789_s6 + $0x68] sm:$0x3] }
 0x697   :  { %13109 = vst [vmem:[#allocation26_spill] sm:$0xff] %v8037_v36 }
 0x698   :  { %v882_v61 = vsel %vm881_vm9, %v6106_v33, %v878_v2  ;;  %v7967_v2 = vld [vmem:[%s12792_s8 + $0x240] sm:$0xff]  ;;  %v8018_v33 = vld [vmem:[%s12792_s8 + $0x1a8] sm:$0xff] }
 0x699   :  { %v887_v6 = vsel %vm884_vm11, %v886_v60, %v882_v61  ;;  %961 = vmatpush.msrb.mxu3 %v7967_v2  ;;  %v8001_v60 = vld [vmem:[%s12792_s8 + $0x210] sm:$0xff]  ;;  %v8006_v61 = vld [vmem:[%s12792_s8 + $0x1b8] sm:$0xff]  ;;  %13108 = vst [vmem:[#allocation25_spill] sm:$0xff] %v8018_v33 }
 0x69a   :  { %13107 = vst [vmem:[#allocation24_spill] sm:$0xff] %v8006_v61 }
 0x6f8   :  { %v904_v38 = vpop.permute.xlu1 %903 }
 0x6f9   :  { %v906_v1 = vmul.f32 %v904_v38, %v872_v4  ;;  %v907_v58 = vmul.f32 %v904_v38, %v887_v6  ;;  %v7984_v4 = vld [vmem:[%s12792_s8 + $0x1d8] sm:$0xff]  ;;  %v7996_v38 = vld [vmem:[%s12792_s8 + $0x1c8] sm:$0xff]  ;;  %v8032_v6 = vld [vmem:[%s12792_s8 + $0x1e0] sm:$0xff] }
 0x6fa   :  { %13105 = vst [vmem:[#allocation22_spill] sm:$0xff] %v7984_v4 }
 0x6fb   :  { %v7954_v8 = vsel %vm616_vm10, %v907_v58, 0.0  ;;  %v7958_v7 = vsel %vm616_vm10, %v906_v1, 0.0  ;;  %v7972_v58 = vld [vmem:[%s12792_s8 + $0x230] sm:$0xff]  ;;  %v7977_v1 = vld [vmem:[%s12792_s8 + $0x1e8] sm:$0xff]  ;;  %13106 = vst [vmem:[#allocation23_spill] sm:$0xff] %v7996_v38 }
 0x6fc   :  { %13102 = vst [vmem:[#allocation19_spill] sm:$0xff] %v7954_v8  ;;  %915 = vrot.lane.b32.xlu0 %v7954_v8, %s6944_s5  ;;  %913 = vrot.lane.b32.xlu2 %v7958_v7, %s6944_s5  ;;  %v8045_v8 = vld [vmem:[%s12792_s8 + $0x1d0] sm:$0xff] }
 0x6fd   :  { %13103 = vst [vmem:[#allocation20_spill] sm:$0xff] %v7958_v7  ;;  %987 = vmatpush.msrb.mxu0 %v7977_v1  ;;  %962 = vmatpush.msrb.mxu3 %v7972_v58  ;;  %v8050_v7 = vld [vmem:[%s12789_s6 + $0x58] sm:$0xff] }
 0x6fe   :  { %13104 = vst [vmem:[#allocation21_spill] sm:$0xff] %v7977_v1  ;;  %v8119_v1 = vld [vmem:[%s12789_s6 + $0x40] sm:$0xff] }
 0x6ff   :  { %988 = vmatpush.msrb.mxu0 %v7984_v4  ;;  %963 = vmatpush.msrb.mxu3 %v7989_v42  ;;  %13110 = vst [vmem:[#allocation27_spill] sm:$0xff] %v8050_v7  ;;  %v8100_v4 = vld [vmem:[%s12789_s6 + $0x60] sm:$0x3] }
 0x700   :  { %13115 = vst [vmem:[#allocation32_spill] sm:$0xff] %v8100_v4 }
 0x701   :  { %989 = vmatpush.msrb.mxu0 %v7996_v38  ;;  %964 = vmatpush.msrb.mxu3 %v8001_v60  ;;  %v8086_v38 = vld [vmem:[%s12789_s6 + $0x28] sm:$0xff]  ;;  %13118 = vst [vmem:[#allocation35_spill] sm:$0xff] %v8119_v1 }
 0x702   :  { %13113 = vst [vmem:[#allocation30_spill] sm:$0xff] %v8086_v38 }
 0x703   :  { %990 = vmatpush.msrb.mxu0 %v8006_v61  ;;  %965 = vmatpush.msrb.mxu3 %v8013_v54  ;;  %v8074_v61 = vld [vmem:[%s12789_s6 + $0x38] sm:$0xff] }
 0x704   :  { %13112 = vst [vmem:[#allocation29_spill] sm:$0xff] %v8074_v61 }
 0x705   :  { %991 = vmatpush.msrb.mxu0 %v8018_v33  ;;  %966 = vmatpush.msrb.mxu3 %v8025_v63  ;;  %v8062_v33 = vld [vmem:[%s12789_s6 + $0x48] sm:$0xff] }
 0x706   :  { %13111 = vst [vmem:[#allocation28_spill] sm:$0xff] %v8062_v33 }
 0x707   :  { %5828 = vmatpush.msk.msra.mxu0 %vm506_vm2, %v8037_v36  ;;  %967 = vmatpush.msrb.mxu3 %v8032_v6  ;;  %v8057_v36 = vld [vmem:[%s12792_s8 + $0x1c0] sm:$0xff] }
 0x709   :  { %1239 = vmatpush.msra.mxu0 %v8050_v7  ;;  %968 = vmatpush.msrb.mxu3 %v8045_v8  ;;  %v8069_v7 = vld [vmem:[%s12792_s8 + $0x1b0] sm:$0xff] }
 0x70b   :  { %1240 = vmatpush.msra.mxu0 %v8062_v33  ;;  %969 = vmatpush.msrb.mxu3 %v8057_v36  ;;  %v8081_v33 = vld [vmem:[%s12792_s8 + $0x1a0] sm:$0xff] }
 0x70d   :  { %1241 = vmatpush.msra.mxu0 %v8074_v61  ;;  %970 = vmatpush.msrb.mxu3 %v8069_v7  ;;  %v8093_v61 = vld [vmem:[%s12789_s6 + $0x18] sm:$0xff] }
 0x70e   :  { %13114 = vst [vmem:[#allocation31_spill] sm:$0xff] %v8093_v61 }
 0x70f   :  { %1242 = vmatpush.msra.mxu0 %v8086_v38  ;;  %971 = vmatpush.msrb.mxu3 %v8081_v33  ;;  %v8107_v38 = vld [vmem:[%s12789_s6 + $0x8] sm:$0xff] }
 0x710   :  { %13116 = vst [vmem:[#allocation33_spill] sm:$0xff] %v8107_v38 }
 0x711   :  { %1243 = vmatpush.msra.mxu0 %v8093_v61  ;;  %5826 = vmatpush.msk.msra.mxu3 %vm506_vm2, %v8100_v4  ;;  %v8113_v61 = vld [vmem:[%s12789_s6 + $0x50] sm:$0xff] }
 0x712   :  { %13117 = vst [vmem:[#allocation34_spill] sm:$0xff] %v8113_v61  ;;  %v8125_v4 = vld [vmem:[%s12789_s6 + $0x30] sm:$0xff] }
 0x713   :  { %1244 = vmatpush.msra.mxu0 %v8107_v38  ;;  %1219 = vmatpush.msra.mxu3 %v8113_v61  ;;  %13119 = vst [vmem:[#allocation36_spill] sm:$0xff] %v8125_v4  ;;  %v8131_v38 = vld [vmem:[%s12789_s6 + $0x20] sm:$0xff]  ;;  %v8137_v61 = vld [vmem:[%s12789_s6 + $0x10] sm:$0xff] }
 0x714   :  { %13120 = vst [vmem:[#allocation37_spill] sm:$0xff] %v8131_v38 }
 0x715   :  { %1220 = vmatpush.msra.mxu3 %v8119_v1  ;;  %v8143_v1 = vld [vmem:[%s12789_s6] sm:$0xff] }
 0x717   :  { %1221 = vmatpush.msra.mxu3 %v8125_v4 }
 0x719   :  { %1222 = vmatpush.msra.mxu3 %v8131_v38 }
 0x71b   :  { %1223 = vmatpush.msra.mxu3 %v8137_v61 }
 0x71d   :  { %1224 = vmatpush.msra.mxu3 %v8143_v1 }
 0x756   :  { %v914_v4 = vpop.permute.xlu2 %913 }
 0x76e   :  { %v916_v45 = vpop.permute.xlu0 %915 }
 0x76f   :  { %v917_v27 = vsel %vm626_vm14, %v914_v4, %v916_v45 }
 0x770   :  { %v919_v38 = vsel %vm502_vm15, %v917_v27, 0.0 }
 0x771   :  { %5789 = vmatmul.msk.f32.vlgmr.msrb.gmra.mxu3 %vm656_vm3, %v919_v38  ;;  %5791 = vmatmul.msk.f32.vlgmr.msrb.gmra.mxu0 %vm656_vm3, %v919_v38  ;;  %v13123_v38 = vmov 0  }
 0x772   :  { %5832 = vmatpush.msk.msrb.mxu3 %vm184_vm0, %v7542_v56  ;;  %5838 = vmatpush.msk.msrb.mxu0 %vm184_vm0, %v7703_v13  ;;  %v5718_v56 = vld [vmem:[%s12793_s9 + $0x4] sm:$0x3] }
 0x773   :  { %v8210_v13 = vperm.slane %v5718_v56, 0 }
 0x774   :  { %1339 = vmatpush.msrb.mxu3 %v7550_v59  ;;  %1457 = vmatpush.msrb.mxu0 %v7713_v16  ;;  %v8199_v59 = vperm.slane %v5718_v56, 1 }
 0x775   :  { %13122 = vst [vmem:[#allocation39_spill] sm:$0xff] %v8210_v13 }
 0x776   :  { %1340 = vmatpush.msrb.mxu3 %v7561_v57  ;;  %1458 = vmatpush.msrb.mxu0 %v7727_v18  ;;  %13121 = vst [vmem:[#allocation38_spill] sm:$0xff] %v8199_v59 }
 0x778   :  { %1341 = vmatpush.msrb.mxu3 %v7570_v50  ;;  %1459 = vmatpush.msrb.mxu0 %v7739_v23 }
 0x779   :  { %5827 = vmatmul.msk.f32.vlgmr.msra.gmra.mxu3 %vm502_vm15, %v7675_v35  ;;  %5829 = vmatmul.msk.f32.vlgmr.msra.gmra.mxu0 %vm502_vm15, %v7675_v35 }
 0x77a   :  { %1342 = vmatpush.msrb.mxu3 %v7579_v62  ;;  %1460 = vmatpush.msrb.mxu0 %v7751_v29  ;;  %v1206_v62 = vld [vmem:[#allocation2 + $0x18] sm:$0xff] }
 0x77c   :  { %1343 = vmatpush.msrb.mxu3 %v7588_v0  ;;  %1461 = vmatpush.msrb.mxu0 %v7763_v32 }
 0x77e   :  { %1344 = vmatpush.msrb.mxu3 %v7597_v3  ;;  %1462 = vmatpush.msrb.mxu0 %v7775_v37 }
 0x780   :  { %1345 = vmatpush.msrb.mxu3 %v7606_v5  ;;  %1463 = vmatpush.msrb.mxu0 %v7787_v40 }
 0x782   :  { %1346 = vmatpush.msrb.mxu3 %v7632_v22  ;;  %1464 = vmatpush.msrb.mxu0 %v7799_v44 }
 0x784   :  { %1347 = vmatpush.msrb.mxu3 %v7640_v24  ;;  %1465 = vmatpush.msrb.mxu0 %v7811_v47 }
 0x786   :  { %1348 = vmatpush.msrb.mxu3 %v7649_v26  ;;  %1466 = vmatpush.msrb.mxu0 %v7823_v53 }
 0x788   :  { %1349 = vmatpush.msrb.mxu3 %v7658_v28  ;;  %1467 = vmatpush.msrb.mxu0 %v7835_v55  ;;  %v6569_v28 = vld [vmem:[#allocation2 + $0x10] sm:$0xff] }
 0x78a   :  { %1350 = vmatpush.msrb.mxu3 %v7668_v30  ;;  %1468 = vmatpush.msrb.mxu0 %v7862_v12 }
 0x78c   :  { %5844 = vmatpush.msk.msra.mxu3 %vm184_vm0, %v7910_v43 }
 0x78e   :  { %1575 = vmatpush.msra.mxu3 %v7918_v52 }
 0x790   :  { %1576 = vmatpush.msra.mxu3 %v7967_v2 }
 0x792   :  { %1577 = vmatpush.msra.mxu3 %v7972_v58 }
 0x794   :  { %1578 = vmatpush.msra.mxu3 %v7989_v42 }
 0x796   :  { %1579 = vmatpush.msra.mxu3 %v8001_v60  ;;  %v1308_v60 = vsel %vm1201_vm6, 1, %v13123_v38 }
 0x798   :  { %1580 = vmatpush.msra.mxu3 %v8013_v54 }
 0x79a   :  { %1581 = vmatpush.msra.mxu3 %v8025_v63 }
 0x79c   :  { %1582 = vmatpush.msra.mxu3 %v8032_v6 }
 0x79e   :  { %1583 = vmatpush.msra.mxu3 %v8045_v8 }
 0x7a0   :  { %1584 = vmatpush.msra.mxu3 %v8057_v36 }
 0x7a2   :  { %1585 = vmatpush.msra.mxu3 %v8069_v7 }
 0x7a4   :  { %1586 = vmatpush.msra.mxu3 %v8081_v33 }
 0x7ee   :  { %v993_v57 = vpop.f32.mrf.mxu0 }
 0x7ef   :  { %v8202_v50 = vadd.f32 %v993_v57, %v8199_v59 }
 0x7f1   :  { %6107 = vtanh.f32 %v8202_v50  ;;  %v5793_v48 = vmul.f32 -1.442695, %v8202_v50  ;;  %v8245_v50 = vld [vmem:[%s12792_s8 + $0x320] sm:$0xff] }
 0x7f4   :  { %v973_v24 = vpop.f32.mrf.mxu3 }
 0x7f5   :  { %v974_v18 = vadd.f32 %v973_v24, %v8210_v13 }
 0x7f6   :  { %v1246_v0 = vpop.f32.mrf.mxu0 }
 0x7f7   :  { %v6108_v3 = vpop.eup %6107  ;;  %v8205_v5 = vadd.f32 %v1246_v0, %v1206_v62  ;;  %v5792_v29 = vmul.f32 -1.442695, %v974_v18 }
 0x7f8   :  { %1037 = vrot.lane.b32.xlu1 %v6108_v3, %s6941_s7 }
 0x7f9   :  { %6109 = vtanh.f32 %v8205_v5 }
 0x7fc   :  { %v1226_v26 = vpop.f32.mrf.mxu3 }
 0x7fd   :  { %v1249_v30 = vadd.f32 %v6569_v28, %v1226_v26 }
 0x7ff   :  { %v6110_v22 = vpop.eup %6109  ;;  %v5830_v35 = vmul.f32 -1.442695, %v1249_v30 }
 0x800   :  { %1292 = vrot.lane.b32.xlu2 %v6110_v22, %s6941_s7 }
 0x801   :  { %6111 = vpow2.f32 %v5830_v35 }
 0x807   :  { %v6112_v16 = vpop.eup %6111 }
 0x808   :  { %v1257_v23 = vadd.f32 1.0, %v6112_v16  ;;  %v5831_v16 = vmul.f32 -1.442695, %v8205_v5 }
 0x80a   :  { %6113 = vrcp.f32 %v1257_v23  ;;  %v1270_v43 = vand.u32 2147483648, %v1257_v23  ;;  %vm1264_vm13 = vweird.f32 %v1257_v23  ;;  %v1268_v52 = vand.u32 2147483647, %v1257_v23 }
 0x80b   :  { %6115 = vpow2.f32 %v5792_v29 }
 0x80c   :  { %v1271_v8 = vor.u32 1.1754944e-38, %v1270_v43  ;;  %vm1269_vm5 = vcmp.eq.f32.partialorder %v1268_v52, 8.507059e+37  ;;  %v8261_v52 = vld [vmem:[%s12792_s8 + $0x300] sm:$0xff] }
 0x810   :  { %v6114_v32 = vpop.eup %6113 }
 0x811   :  { %v6116_v37 = vpop.eup %6115  ;;  %v1260_v40 = vmul.f32 %v6114_v32, %v1257_v23  ;;  %vm1265_vm12 = vweird.f32 %v6114_v32 }
 0x812   :  { %v1002_v44 = vadd.f32 1.0, %v6116_v37  ;;  %vm1266_vm4 = vmor %vm1264_vm13, %vm1265_vm12 }
 0x813   :  { %v1261_v47 = vsub.f32 1.0, %v1260_v40 }
 0x814   :  { %6117 = vrcp.f32 %v1002_v44  ;;  %v1015_v33 = vand.u32 2147483648, %v1002_v44  ;;  %vm1009_vm8 = vweird.f32 %v1002_v44  ;;  %v1013_v63 = vand.u32 2147483647, %v1002_v44 }
 0x815   :  { %v1262_v53 = vmul.f32 %v6114_v32, %v1261_v47 }
 0x816   :  { %v1016_v36 = vor.u32 1.1754944e-38, %v1015_v33  ;;  %vm1014_vm11 = vcmp.eq.f32.partialorder %v1013_v63, 8.507059e+37 }
 0x817   :  { %v1263_v12 = vadd.f32 %v6114_v32, %v1262_v53 }
 0x819   :  { %v1267_v45 = vsel %vm1266_vm4, %v6114_v32, %v1263_v12  ;;  %v8254_v12 = vld [vmem:[%s12792_s8 + $0x310] sm:$0xff] }
 0x81a   :  { %v6118_v55 = vpop.eup %6117  ;;  %v8213_v2 = vsel %vm1269_vm5, %v1271_v8, %v1267_v45 }
 0x81b   :  { %v1005_v27 = vmul.f32 %v6118_v55, %v1002_v44  ;;  %vm1010_vm7 = vweird.f32 %v6118_v55  ;;  %v1290_v0 = vmul.f32 %v8213_v2, %v8223_v51 }
 0x81c   :  { %vm1011_vm9 = vmor %vm1009_vm8, %vm1010_vm7 }
 0x81d   :  { %v1006_v58 = vsub.f32 1.0, %v1005_v27 }
 0x81f   :  { %v1007_v42 = vmul.f32 %v6118_v55, %v1006_v58 }
 0x821   :  { %v1008_v54 = vadd.f32 %v6118_v55, %v1007_v42 }
 0x823   :  { %v1012_v6 = vsel %vm1011_vm9, %v6118_v55, %v1008_v54  ;;  %v8240_v55 = vld [vmem:[%s12792_s8 + $0x330] sm:$0xf] }
 0x824   :  { %v1017_v57 = vsel %vm1014_vm11, %v1016_v36, %v1012_v6  ;;  %5820 = vmatpush.msk.msrb.mxu2 %vm184_vm0, %v8240_v55  ;;  %5850 = vmatpush.msk.msra.mxu0 %vm184_vm0, %v8240_v55 }
 0x825   :  { %v1035_v26 = vmul.f32 0.0, %v1017_v57 }
 0x826   :  { %1105 = vmatpush.msrb.mxu2 %v8245_v50  ;;  %1695 = vmatpush.msra.mxu0 %v8245_v50 }
 0x828   :  { %1106 = vmatpush.msrb.mxu2 %v8254_v12  ;;  %1696 = vmatpush.msra.mxu0 %v8254_v12 }
 0x82a   :  { %1107 = vmatpush.msrb.mxu2 %v8261_v52  ;;  %1697 = vmatpush.msra.mxu0 %v8261_v52 }
 0x85a   :  { %v1293_v7 = vpop.permute.xlu2 %1292 }
 0x85b   :  { %v1295_v4 = vmul.f32 %v1293_v7, %v8213_v2 }
 0x85d   :  { %1297 = vrot.lane.b32.xlu1 %v1295_v4, %s6942_s26 }
 0x865   :  { %1310 = vperm.xlu1 %6065, %v1308_v60  }
 0x86a   :  { %v1038_v56 = vpop.permute.xlu1 %1037 }
 0x86b   :  { %v1040_v62 = vmul.f32 %v1038_v56, %v1017_v57 }
 0x86d   :  { %1042 = vrot.lane.b32.xlu0 %v1040_v62, %s6942_s26 }
 0x8cf   :  { %v1298_v3 = vpop.permute.xlu1 %1297 }
 0x8d0   :  { %v8227_v22 = vadd.f32 %v1298_v3, %v1290_v0 }
 0x8d2   :  { %13125 = vst [vmem:[#allocation41_spill] sm:$0xff] %v8227_v22  ;;  %6119 = vtanh.f32 %v8227_v22 }
 0x8d7   :  { %v8279_v3 = vpop.permute.xlu1 %1310 }
 0x8d8   :  { %v6120_v24 = vpop.eup %6119  ;;  %vm1312_vm11 = vcmp.eq.s32.totalorder %v8279_v3, 1  ;;  %v10263_v3 = vld [vmem:[%s12791_s1] sm:$0xff] }
 0x8d9   :  { %1303 = vrot.lane.b32.xlu0 %v6120_v24, %s6942_s26 }
 0x8df   :  { %v1043_v28 = vpop.permute.xlu0 %1042 }
 0x8e0   :  { %v8231_v30 = vadd.f32 %v1043_v28, %v1035_v26 }
 0x8e2   :  { %13126 = vst [vmem:[#allocation42_spill] sm:$0xff] %v8231_v30  ;;  %6121 = vtanh.f32 %v8231_v30 }
 0x8e3   :  { %6123 = vpow2.f32 %v5793_v48 }
 0x8e4   :  { %6125 = vpow2.f32 %v5831_v16 }
 0x8e8   :  { %v6122_v35 = vpop.eup %6121 }
 0x8e9   :  { %1048 = vrot.lane.b32.xlu2 %v6122_v35, %s6942_s26  ;;  %v6124_v18 = vpop.eup %6123 }
 0x8ea   :  { %v1003_v23 = vadd.f32 1.0, %v6124_v18  ;;  %v6126_v29 = vpop.eup %6125  ;;  %v8322_v18 = vld [vmem:[%s12792_s8 + $0x328] sm:$0xff] }
 0x8eb   :  { %v1258_v32 = vadd.f32 1.0, %v6126_v29  ;;  %v8332_v29 = vld [vmem:[%s12792_s8 + $0x318] sm:$0xff] }
 0x8ec   :  { %6127 = vrcp.f32 %v1003_v23  ;;  %v1030_v27 = vand.u32 2147483648, %v1003_v23  ;;  %vm1024_vm13 = vweird.f32 %v1003_v23  ;;  %v1028_v8 = vand.u32 2147483647, %v1003_v23 }
 0x8ed   :  { %6129 = vrcp.f32 %v1258_v32  ;;  %v1285_v56 = vand.u32 2147483648, %v1258_v32  ;;  %vm1279_vm7 = vweird.f32 %v1258_v32 }
 0x8ee   :  { %v1031_v58 = vor.u32 1.1754944e-38, %v1030_v27  ;;  %vm1029_vm5 = vcmp.eq.f32.partialorder %v1028_v8, 8.507059e+37  ;;  %v8392_v27 = vld [vmem:[%s12792_s8 + $0x280] sm:$0xff]  ;;  %v8405_v8 = vld [vmem:[%s12792_s8 + $0x270] sm:$0xff] }
 0x8ef   :  { %v1286_v0 = vor.u32 1.1754944e-38, %v1285_v56  ;;  %v8465_v56 = vld [vmem:[%s12792_s8 + $0x278] sm:$0xff] }
 0x8f2   :  { %v6128_v37 = vpop.eup %6127 }
 0x8f3   :  { %v1020_v40 = vmul.f32 %v6128_v37, %v1003_v23  ;;  %v6130_v47 = vpop.eup %6129  ;;  %vm1025_vm12 = vweird.f32 %v6128_v37  ;;  %v8327_v23 = vld [vmem:[%s12792_s8 + $0x2d0] sm:$0xff] }
 0x8f4   :  { %v1275_v5 = vmul.f32 %v6130_v47, %v1258_v32  ;;  %vm1026_vm4 = vmor %vm1024_vm13, %vm1025_vm12  ;;  %vm1280_vm6 = vweird.f32 %v6130_v47  ;;  %vm1328_vm12 = vcmask 637952  }
 0x8f5   :  { %v1021_v44 = vsub.f32 1.0, %v1020_v40  ;;  %vm1281_vm8 = vmor %vm1279_vm7, %vm1280_vm6  ;;  %v8357_v40 = vld [vmem:[%s12792_s8 + $0x2b0] sm:$0xff] }
 0x8f6   :  { %v1276_v45 = vsub.f32 1.0, %v1275_v5  ;;  %v8379_v5 = vld [vmem:[%s12792_s8 + $0x290] sm:$0xff] }
 0x8f7   :  { %v1022_v53 = vmul.f32 %v6128_v37, %v1021_v44  ;;  %v8362_v44 = vld [vmem:[%s12792_s8 + $0x2f8] sm:$0xff] }
 0x8f8   :  { %v1277_v4 = vmul.f32 %v6130_v47, %v1276_v45  ;;  %v8397_v45 = vld [vmem:[%s12792_s8 + $0x2c8] sm:$0xff] }
 0x8f9   :  { %v1023_v43 = vadd.f32 %v6128_v37, %v1022_v53  ;;  %v8374_v53 = vld [vmem:[%s12792_s8 + $0x2e8] sm:$0xff] }
 0x8fa   :  { %v1278_v63 = vadd.f32 %v6130_v47, %v1277_v4  ;;  %v8426_v4 = vld [vmem:[%s12792_s8 + $0xc8] sm:$0xf] }
 0x8fb   :  { %v1027_v7 = vsel %vm1026_vm4, %v6128_v37, %v1023_v43  ;;  %v8345_v37 = vld [vmem:[%s12792_s8 + $0x308] sm:$0xff]  ;;  %v8384_v43 = vld [vmem:[%s12792_s8 + $0x2d8] sm:$0xff] }
 0x8fc   :  { %v1032_v42 = vsel %vm1029_vm5, %v1031_v58, %v1027_v7  ;;  %v1282_v62 = vsel %vm1281_vm8, %v6130_v47, %v1278_v63  ;;  %v8367_v47 = vld [vmem:[%s12792_s8 + $0x2a0] sm:$0xff]  ;;  %v8410_v7 = vld [vmem:[%s12792_s8 + $0x2b8] sm:$0xff]  ;;  %v8418_v58 = vld [vmem:[%s12792_s8 + $0x2a8] sm:$0xff] }
 0x8fd   :  { %v8459_v63 = vld [vmem:[%s12792_s8 + $0x98] sm:$0xff] }
 0x943   :  { %v1049_v60 = vpop.permute.xlu2 %1048 }
 0x944   :  { %v1051_v54 = vmul.f32 %v1049_v60, %v1017_v57  ;;  %v1052_v33 = vmul.f32 %v1049_v60, %v1032_v42  ;;  %v1283_v57 = vand.u32 2147483647, %v1258_v32  ;;  %v8340_v32 = vld [vmem:[%s12792_s8 + $0x2c0] sm:$0xff]  ;;  %v8433_v42 = vld [vmem:[%s12792_s8 + $0x298] sm:$0xff] }
 0x945   :  { %v8440_v60 = vld [vmem:[%s12792_s8 + $0xb8] sm:$0xff] }
 0x946   :  { %v8269_v6 = vsel %vm616_vm10, %v1051_v54, 0.0  ;;  %v8273_v36 = vsel %vm616_vm10, %v1052_v33, 0.0  ;;  %vm1284_vm9 = vcmp.eq.f32.partialorder %v1283_v57, 8.507059e+37  ;;  %v8446_v54 = vld [vmem:[%s12792_s8 + $0x288] sm:$0xff] }
 0x947   :  { %1058 = vrot.lane.b32.xlu2 %v8269_v6, %s6944_s5  ;;  %1060 = vrot.lane.b32.xlu0 %v8273_v36, %s6944_s5  ;;  %v1287_v24 = vsel %vm1284_vm9, %v1286_v0, %v1282_v62  ;;  %v8452_v33 = vld [vmem:[%s12792_s8 + $0xa8] sm:$0xff]  ;;  %v8479_v62 = vld [vmem:[%s12792_s8 + $0x78] sm:$0xff] }
 0x948   :  { %v8471_v57 = vld [vmem:[%s12792_s8 + $0x88] sm:$0xff] }
 0x949   :  { %v8486_v0 = vld [vmem:[%s12792_s8 + $0x68] sm:$0xff] }
 0x94b   :  { %v1304_v26 = vpop.permute.xlu0 %1303 }
 0x94c   :  { %v1306_v28 = vmul.f32 %v1304_v26, %v8213_v2  ;;  %v1307_v35 = vmul.f32 %v1304_v26, %v1287_v24  ;;  %v8304_v2 = vld [vmem:[%s12792_s8 + $0x2f0] sm:$0xff]  ;;  %v13130_v24 = vld [vmem:[#allocation7_spill] sm:$0xff] }
 0x94d   :  { %1108 = vmatpush.msrb.mxu2 %v8304_v2  ;;  %1698 = vmatpush.msra.mxu0 %v8304_v2 }
 0x94e   :  { %v8288_v48 = vsel %vm1312_vm11, %v1307_v35, %v7625_v21  ;;  %v8293_v16 = vsel %vm1312_vm11, %v1306_v28, %v7619_v15  ;;  %v8309_v21 = vld [vmem:[%s12792_s8 + $0x338] sm:$0xf]  ;;  %v8314_v15 = vld [vmem:[%s12792_s8 + $0x2e0] sm:$0xff] }
 0x94f   :  { %1324 = vrot.lane.b32.xlu0 %v7853_v10, %s6945_s29  ;;  %13127 = vst [vmem:[#allocation43_spill] sm:$0xff] %v8288_v48  ;;  %1320 = vrot.lane.b32.xlu2 %v8288_v48, %s6944_s5 }
 0x950   :  { %13128 = vst [vmem:[#allocation44_spill] sm:$0xff] %v8293_v16  ;;  %1318 = vrot.lane.b32.xlu1 %v8293_v16, %s6944_s5  ;;  %5822 = vmatpush.msk.msra.mxu1 %vm184_vm0, %v8309_v21  ;;  %v13131_v16 = vld [vmem:[#allocation11_spill] sm:$0xff] }
 0x951   :  { %1109 = vmatpush.msrb.mxu2 %v8314_v15  ;;  %1699 = vmatpush.msra.mxu0 %v8314_v15 }
 0x952   :  { %1125 = vmatpush.msra.mxu1 %v8322_v18 }
 0x953   :  { %1110 = vmatpush.msrb.mxu2 %v8327_v23  ;;  %1700 = vmatpush.msra.mxu0 %v8327_v23 }
 0x954   :  { %1126 = vmatpush.msra.mxu1 %v8332_v29 }
 0x955   :  { %1111 = vmatpush.msrb.mxu2 %v8340_v32  ;;  %1701 = vmatpush.msra.mxu0 %v8340_v32 }
 0x956   :  { %1127 = vmatpush.msra.mxu1 %v8345_v37 }
 0x957   :  { %1112 = vmatpush.msrb.mxu2 %v8357_v40  ;;  %1702 = vmatpush.msra.mxu0 %v8357_v40 }
 0x958   :  { %1326 = vrot.lane.b32.xlu1 %v7849_v9, %s6945_s29  ;;  %1128 = vmatpush.msra.mxu1 %v8362_v44 }
 0x959   :  { %1113 = vmatpush.msrb.mxu2 %v8367_v47  ;;  %1703 = vmatpush.msra.mxu0 %v8367_v47 }
 0x95a   :  { %1129 = vmatpush.msra.mxu1 %v8374_v53 }
 0x95b   :  { %1114 = vmatpush.msrb.mxu2 %v8379_v5  ;;  %1704 = vmatpush.msra.mxu0 %v8379_v5 }
 0x95c   :  { %1130 = vmatpush.msra.mxu1 %v8384_v43 }
 0x95d   :  { %1115 = vmatpush.msrb.mxu2 %v8392_v27  ;;  %1705 = vmatpush.msra.mxu0 %v8392_v27 }
 0x95e   :  { %1131 = vmatpush.msra.mxu1 %v8397_v45 }
 0x95f   :  { %1116 = vmatpush.msrb.mxu2 %v8405_v8  ;;  %1706 = vmatpush.msra.mxu0 %v8405_v8 }
 0x960   :  { %1132 = vmatpush.msra.mxu1 %v8410_v7 }
 0x961   :  { %5834 = vmatpush.msk.msra.mxu2 %vm184_vm0, %v8426_v4 }
 0x962   :  { %1133 = vmatpush.msra.mxu1 %v8418_v58 }
 0x963   :  { %1359 = vmatpush.msra.mxu2 %v8440_v60 }
 0x964   :  { %1134 = vmatpush.msra.mxu1 %v8433_v42 }
 0x965   :  { %1360 = vmatpush.msra.mxu2 %v8452_v33 }
 0x966   :  { %1135 = vmatpush.msra.mxu1 %v8446_v54 }
 0x967   :  { %1361 = vmatpush.msra.mxu2 %v8459_v63 }
 0x968   :  { %1136 = vmatpush.msra.mxu1 %v8465_v56 }
 0x969   :  { %1362 = vmatpush.msra.mxu2 %v8471_v57 }
 0x96a   :  { %5840 = vmatpush.msk.msrb.mxu1 %vm184_vm0, %v7708_v14  ;;  %v8493_v14 = vld [vmem:[%s12792_s8 + $0x58] sm:$0xff] }
 0x96b   :  { %1363 = vmatpush.msra.mxu2 %v8479_v62 }
 0x96c   :  { %1477 = vmatpush.msrb.mxu1 %v7722_v17  ;;  %v8500_v17 = vld [vmem:[%s12792_s8 + $0x48] sm:$0xff] }
 0x96d   :  { %1364 = vmatpush.msra.mxu2 %v8486_v0 }
 0x96e   :  { %1478 = vmatpush.msrb.mxu1 %v7732_v20  ;;  %v8507_v20 = vld [vmem:[%s12792_s8 + $0x38] sm:$0xff] }
 0x96f   :  { %1365 = vmatpush.msra.mxu2 %v8493_v14 }
 0x970   :  { %1479 = vmatpush.msrb.mxu1 %v7744_v25  ;;  %v8514_v25 = vld [vmem:[%s12792_s8 + $0x28] sm:$0xff] }
 0x971   :  { %1366 = vmatpush.msra.mxu2 %v8500_v17 }
 0x972   :  { %1480 = vmatpush.msrb.mxu1 %v7756_v31  ;;  %v8521_v31 = vld [vmem:[%s12792_s8 + $0x18] sm:$0xff] }
 0x973   :  { %1367 = vmatpush.msra.mxu2 %v8507_v20 }
 0x974   :  { %1481 = vmatpush.msrb.mxu1 %v7768_v34  ;;  %v8528_v34 = vld [vmem:[%s12792_s8 + $0x8] sm:$0xff] }
 0x975   :  { %1368 = vmatpush.msra.mxu2 %v8514_v25 }
 0x976   :  { %1482 = vmatpush.msrb.mxu1 %v7780_v39  ;;  %v13129_v39 = vld [vmem:[#allocation6_spill] sm:$0xff] }
 0x977   :  { %1369 = vmatpush.msra.mxu2 %v8521_v31 }
 0x978   :  { %1483 = vmatpush.msrb.mxu1 %v7792_v41 }
 0x979   :  { %1370 = vmatpush.msra.mxu2 %v8528_v34 }
 0x97a   :  { %1484 = vmatpush.msrb.mxu1 %v7804_v46  ;;  %v13132_v46 = vld [vmem:[#allocation12_spill] sm:$0xff] }
 0x97c   :  { %1485 = vmatpush.msrb.mxu1 %v7816_v49  ;;  %v13133_v49 = vld [vmem:[#allocation13_spill] sm:$0xff] }
 0x97e   :  { %1486 = vmatpush.msrb.mxu1 %v7828_v19 }
 0x980   :  { %1487 = vmatpush.msrb.mxu1 %v13129_v39  ;;  %v13134_v39 = vld [vmem:[#allocation14_spill] sm:$0xff] }
 0x982   :  { %1488 = vmatpush.msrb.mxu1 %v13130_v24  ;;  %v13135_v24 = vld [vmem:[#allocation15_spill] sm:$0xff] }
 0x9a1   :  { %v1059_v26 = vpop.permute.xlu2 %1058 }
 0x9b9   :  { %v1061_v28 = vpop.permute.xlu0 %1060 }
 0x9ba   :  { %v1062_v41 = vsel %vm626_vm14, %v1059_v26, %v1061_v28  ;;  %v1321_v26 = vpop.permute.xlu2 %1320  ;;  %v13137_v28 = vld [vmem:[#allocation17_spill] sm:$0xff] }
 0x9bb   :  { %v1064_v35 = vsel %vm502_vm15, %v1062_v41, 0.0 }
 0x9bc   :  { %5821 = vmatmul.msk.f32.vlgmr.msrb.gmra.mxu2 %vm656_vm3, %v1064_v35  ;;  %5823 = vmatmul.msk.f32.vlgmr.msra.gmra.mxu1 %vm656_vm3, %v1064_v35 }
 0x9bd   :  { %5846 = vmatpush.msk.msrb.mxu2 %vm184_vm0, %v13131_v16  ;;  %5852 = vmatpush.msk.msra.mxu1 %vm184_vm0, %v8309_v21  ;;  %v13136_v16 = vld [vmem:[#allocation16_spill] sm:$0xff] }
 0x9bf   :  { %1595 = vmatpush.msrb.mxu2 %v13132_v46  ;;  %1715 = vmatpush.msra.mxu1 %v8322_v18 }
 0x9c1   :  { %1596 = vmatpush.msrb.mxu2 %v13133_v49  ;;  %1716 = vmatpush.msra.mxu1 %v8332_v29  ;;  %v1325_v41 = vpop.permute.xlu0 %1324 }
 0x9c2   :  { %v1319_v19 = vpop.permute.xlu1 %1318 }
 0x9c3   :  { %1597 = vmatpush.msrb.mxu2 %v13134_v39  ;;  %1717 = vmatpush.msra.mxu1 %v8345_v37  ;;  %v8557_v46 = vsel %vm626_vm14, %v1319_v19, %v1321_v26  ;;  %v13138_v39 = vld [vmem:[#allocation18_spill] sm:$0xff] }
 0x9c4   :  { %v13141_v19 = vld [vmem:[#allocation22_spill] sm:$0xff] }
 0x9c5   :  { %1598 = vmatpush.msrb.mxu2 %v13135_v24  ;;  %1718 = vmatpush.msra.mxu1 %v8362_v44  ;;  %v13142_v26 = vld [vmem:[#allocation34_spill] sm:$0xff] }
 0x9c7   :  { %1599 = vmatpush.msrb.mxu2 %v13136_v16  ;;  %1719 = vmatpush.msra.mxu1 %v8374_v53  ;;  %v13139_v16 = vld [vmem:[#allocation21_spill] sm:$0xff] }
 0x9c9   :  { %1600 = vmatpush.msrb.mxu2 %v13137_v28  ;;  %1720 = vmatpush.msra.mxu1 %v8384_v43  ;;  %v13140_v28 = vld [vmem:[#allocation32_spill] sm:$0xff] }
 0x9ca   :  { %v1327_v35 = vpop.permute.xlu1 %1326 }
 0x9cb   :  { %v1329_v49 = vsel %vm1328_vm12, %v1325_v41, %v1327_v35  ;;  %1601 = vmatpush.msrb.mxu2 %v13138_v39  ;;  %1721 = vmatpush.msra.mxu1 %v8397_v45  ;;  %v13143_v41 = vld [vmem:[#allocation23_spill] sm:$0xff]  ;;  %v13146_v39 = vld [vmem:[#allocation36_spill] sm:$0xff] }
 0x9cc   :  { %v1331_v24 = vsel %vm502_vm15, %v8557_v46, %v1329_v49  ;;  %v13144_v35 = vld [vmem:[#allocation35_spill] sm:$0xff]  ;;  %v13145_v49 = vld [vmem:[#allocation24_spill] sm:$0xff] }
 0x9cd   :  { %5833 = vmatmul.msk.f32.vlgmr.msrb.gmra.mxu3 %vm656_vm3, %v1331_v24  ;;  %5835 = vmatmul.msk.f32.vlgmr.msra.gmra.mxu2 %vm656_vm3, %v1331_v24  ;;  %v13147_v24 = vld [vmem:[#allocation25_spill] sm:$0xff] }
 0x9ce   :  { %1602 = vmatpush.msrb.mxu2 %v13139_v16  ;;  %5856 = vmatpush.msk.msrb.mxu3 %vm506_vm2, %v13140_v28  ;;  %v13148_v16 = vld [vmem:[#allocation37_spill] sm:$0xff]  ;;  %v13149_v28 = vld [vmem:[#allocation26_spill] sm:$0xff] }
 0x9cf   :  { %1722 = vmatpush.msra.mxu1 %v8410_v7 }
 0x9d0   :  { %1603 = vmatpush.msrb.mxu2 %v13141_v19  ;;  %1809 = vmatpush.msrb.mxu3 %v13142_v26  ;;  %v13150_v19 = vld [vmem:[#allocation27_spill] sm:$0xff]  ;;  %v13151_v26 = vld [vmem:[#allocation28_spill] sm:$0xff] }
 0x9d1   :  { %1723 = vmatpush.msra.mxu1 %v8418_v58 }
 0x9d2   :  { %1604 = vmatpush.msrb.mxu2 %v13143_v41  ;;  %1810 = vmatpush.msrb.mxu3 %v13144_v35  ;;  %v13152_v41 = vld [vmem:[#allocation29_spill] sm:$0xff]  ;;  %v13153_v35 = vld [vmem:[#allocation30_spill] sm:$0xff] }
 0x9d3   :  { %1724 = vmatpush.msra.mxu1 %v8433_v42 }
 0x9d4   :  { %1605 = vmatpush.msrb.mxu2 %v13145_v49  ;;  %1811 = vmatpush.msrb.mxu3 %v13146_v39  ;;  %v13154_v49 = vld [vmem:[#allocation31_spill] sm:$0xff]  ;;  %v13155_v39 = vld [vmem:[#allocation33_spill] sm:$0xff] }
 0x9d5   :  { %1725 = vmatpush.msra.mxu1 %v8446_v54 }
 0x9d6   :  { %1606 = vmatpush.msrb.mxu2 %v13147_v24  ;;  %1812 = vmatpush.msrb.mxu3 %v13148_v16 }
 0x9d7   :  { %1726 = vmatpush.msra.mxu1 %v8465_v56 }
 0x9d8   :  { %5858 = vmatpush.msk.msra.mxu2 %vm506_vm2, %v13149_v28  ;;  %1813 = vmatpush.msrb.mxu3 %v8137_v61  ;;  %v13156_v28 = vld [vmem:[#allocation3_spill] sm:$0xff] }
 0x9da   :  { %1829 = vmatpush.msra.mxu2 %v13150_v19  ;;  %1814 = vmatpush.msrb.mxu3 %v8143_v1  ;;  %v13157_v19 = vld [vmem:[#allocation4_spill] sm:$0xff] }
 0x9dc   :  { %1830 = vmatpush.msra.mxu2 %v13151_v26 }
 0x9de   :  { %1831 = vmatpush.msra.mxu2 %v13152_v41 }
 0x9e0   :  { %1832 = vmatpush.msra.mxu2 %v13153_v35 }
 0x9e2   :  { %1833 = vmatpush.msra.mxu2 %v13154_v49 }
 0x9e4   :  { %1834 = vmatpush.msra.mxu2 %v13155_v39 }
 0xa3f   :  { %v8592_v24 = vpop.f32.mrf.mxu2 }
 0xa50   :  { %v1372_v16 = vpop.f32.mrf.mxu2  ;;  %v1352_v1 = vpop.f32.mrf.mxu3 }
 0xa51   :  { %v1373_v48 = vadd.f32 %v1372_v16, %v13156_v28  ;;  %v1353_v26 = vadd.f32 %v1352_v1, %v13157_v19 }
 0xa53   :  { %6131 = vtanh.f32 %v1373_v48  ;;  %v5836_v22 = vmul.f32 -1.442695, %v1353_v26 }
 0xa55   :  { %6133 = vpow2.f32 %v5836_v22  ;;  %v13158_v22 = vld [vmem:[#allocation5_spill] sm:$0xff] }
 0xa59   :  { %v6132_v61 = vpop.eup %6131 }
 0xa5a   :  { %1416 = vrot.lane.b32.xlu2 %v6132_v61, %s6941_s7 }
 0xa5b   :  { %v6134_v41 = vpop.eup %6133 }
 0xa5c   :  { %v1381_v35 = vadd.f32 1.0, %v6134_v41  ;;  %v8601_v41 = vsel %vm616_vm10, %v13158_v22, 0.0 }
 0xa5d   :  { %13159 = vst [vmem:[#allocation6_spill] sm:$0xff] %v8601_v41 }
 0xa5e   :  { %6135 = vrcp.f32 %v1381_v35  ;;  %v1394_v59 = vand.u32 2147483648, %v1381_v35  ;;  %vm1388_vm4 = vweird.f32 %v1381_v35  ;;  %v1392_v16 = vand.u32 2147483647, %v1381_v35 }
 0xa60   :  { %v1395_v61 = vor.u32 1.1754944e-38, %v1394_v59  ;;  %vm1393_vm6 = vcmp.eq.f32.partialorder %v1392_v16, 8.507059e+37  ;;  %v13161_v59 = vld [vmem:[#allocation20_spill] sm:$0xff] }
 0xa64   :  { %v6136_v49 = vpop.eup %6135 }
 0xa65   :  { %v1384_v51 = vmul.f32 %v6136_v49, %v1381_v35  ;;  %vm1389_vm13 = vweird.f32 %v6136_v49 }
 0xa66   :  { %vm1390_vm5 = vmor %vm1388_vm4, %vm1389_vm13 }
 0xa67   :  { %v1385_v39 = vsub.f32 1.0, %v1384_v51 }
 0xa69   :  { %v1386_v30 = vmul.f32 %v6136_v49, %v1385_v39 }
 0xa6b   :  { %v1387_v13 = vadd.f32 %v6136_v49, %v1386_v30 }
 0xa6d   :  { %v1391_v28 = vsel %vm1390_vm5, %v6136_v49, %v1387_v13 }
 0xa6e   :  { %v1396_v1 = vsel %vm1393_vm6, %v1395_v61, %v1391_v28 }
 0xa6f   :  { %v1414_v51 = vmul.f32 %v1396_v1, %v8601_v41 }
 0xab4   :  { %v1417_v38 = vpop.permute.xlu2 %1416 }
 0xab5   :  { %v1419_v26 = vmul.f32 %v1417_v38, %v1396_v1  ;;  %v5837_v38 = vmul.f32 -1.442695, %v1373_v48 }
 0xab7   :  { %1421 = vrot.lane.b32.xlu0 %v1419_v26, %s6942_s26 }
 0xb29   :  { %v1422_v30 = vpop.permute.xlu0 %1421 }
 0xb2a   :  { %v8604_v39 = vadd.f32 %v1422_v30, %v1414_v51 }
 0xb2c   :  { %13160 = vst [vmem:[#allocation7_spill] sm:$0xff] %v8604_v39  ;;  %6137 = vtanh.f32 %v8604_v39 }
 0xb2d   :  { %6139 = vpow2.f32 %v5837_v38 }
 0xb32   :  { %v6138_v13 = vpop.eup %6137 }
 0xb33   :  { %1427 = vrot.lane.b32.xlu1 %v6138_v13, %s6942_s26  ;;  %v6140_v28 = vpop.eup %6139 }
 0xb34   :  { %v1382_v35 = vadd.f32 1.0, %v6140_v28 }
 0xb36   :  { %6141 = vrcp.f32 %v1382_v35  ;;  %v1409_v51 = vand.u32 2147483648, %v1382_v35  ;;  %vm1403_vm8 = vweird.f32 %v1382_v35  ;;  %v1407_v30 = vand.u32 2147483647, %v1382_v35 }
 0xb38   :  { %v1410_v13 = vor.u32 1.1754944e-38, %v1409_v51  ;;  %vm1408_vm13 = vcmp.eq.f32.partialorder %v1407_v30, 8.507059e+37  ;;  %v1138_v51 = vpop.f32.mrf.mxu1  ;;  %v13166_v30 = vld [vmem:[#allocation8_spill] sm:$0xff] }
 0xb3b   :  { %1443 = vrot.lane.b32.xlu1 %v13161_v59, %s6945_s29 }
 0xb3c   :  { %v6142_v49 = vpop.eup %6141 }
 0xb3d   :  { %v1399_v16 = vmul.f32 %v6142_v49, %v1382_v35  ;;  %vm1404_vm7 = vweird.f32 %v6142_v49 }
 0xb3e   :  { %vm1405_vm9 = vmor %vm1403_vm8, %vm1404_vm7 }
 0xb3f   :  { %v1400_v61 = vsub.f32 1.0, %v1399_v16 }
 0xb41   :  { %v1401_v26 = vmul.f32 %v6142_v49, %v1400_v61  ;;  %v8634_v61 = vld [vmem:[%s12792_s8 + $0xc0] sm:$0xf] }
 0xb43   :  { %v1402_v22 = vadd.f32 %v6142_v49, %v1401_v26  ;;  %v8643_v26 = vld [vmem:[%s12792_s8 + $0xb0] sm:$0xff] }
 0xb45   :  { %v1406_v39 = vsel %vm1405_vm9, %v6142_v49, %v1402_v22  ;;  %v8650_v22 = vld [vmem:[%s12792_s8 + $0xa0] sm:$0xff] }
 0xb46   :  { %v1411_v41 = vsel %vm1408_vm13, %v1410_v13, %v1406_v39  ;;  %v13162_v39 = vld [vmem:[#allocation19_spill] sm:$0xff] }
 0xba5   :  { %v1428_v19 = vpop.permute.xlu1 %1427 }
 0xba6   :  { %v1430_v48 = vmul.f32 %v1428_v19, %v1396_v1  ;;  %v1431_v38 = vmul.f32 %v1428_v19, %v1411_v41 }
 0xba8   :  { %v8613_v28 = vsel %vm1312_vm11, %v1431_v38, %v7849_v9  ;;  %v8618_v16 = vsel %vm1312_vm11, %v1430_v48, %v7853_v10 }
 0xba9   :  { %1439 = vrot.lane.b32.xlu0 %v8613_v28, %s6944_s5  ;;  %1437 = vrot.lane.b32.xlu2 %v8618_v16, %s6944_s5 }
 0xbad   :  { %v1444_v41 = vpop.permute.xlu1 %1443 }
 0xbb1   :  { %1445 = vrot.lane.b32.xlu2 %v13162_v39, %s6945_s29 }
 0xc03   :  { %v1438_v19 = vpop.permute.xlu2 %1437 }
 0xc0b   :  { %v1446_v1 = vpop.permute.xlu2 %1445 }
 0xc0c   :  { %v1447_v9 = vsel %vm1328_vm12, %v1444_v41, %v1446_v1 }
 0xc1b   :  { %v1440_v35 = vpop.permute.xlu0 %1439 }
 0xc1c   :  { %v1441_v49 = vsel %vm626_vm14, %v1438_v19, %v1440_v35  ;;  %v13167_v19 = vld [vmem:[#allocation9_spill] sm:$0xff] }
 0xc1d   :  { %v1449_v10 = vsel %vm502_vm15, %v1441_v49, %v1447_v9 }
 0xc1e   :  { %5839 = vmatmul.msk.f32.vlgmr.msrb.gmra.mxu0 %vm656_vm3, %v1449_v10  ;;  %5841 = vmatmul.msk.f32.vlgmr.msrb.gmra.mxu1 %vm656_vm3, %v1449_v10 }
 0xc1f   :  { %5862 = vmatpush.msk.msrb.mxu0 %vm184_vm0, %v8634_v61  ;;  %5864 = vmatpush.msk.msrb.mxu1 %vm184_vm0, %v8426_v4  ;;  %v8657_v4 = vld [vmem:[%s12792_s8 + $0x90] sm:$0xff] }
 0xc21   :  { %1928 = vmatpush.msrb.mxu0 %v8643_v26  ;;  %1948 = vmatpush.msrb.mxu1 %v8440_v60  ;;  %v8664_v60 = vld [vmem:[%s12792_s8 + $0x80] sm:$0xff] }
 0xc23   :  { %1929 = vmatpush.msrb.mxu0 %v8650_v22  ;;  %1949 = vmatpush.msrb.mxu1 %v8452_v33  ;;  %v8671_v33 = vld [vmem:[%s12792_s8 + $0x70] sm:$0xff] }
 0xc25   :  { %1930 = vmatpush.msrb.mxu0 %v8657_v4  ;;  %1950 = vmatpush.msrb.mxu1 %v8459_v63  ;;  %v8678_v63 = vld [vmem:[%s12792_s8 + $0x60] sm:$0xff] }
 0xc27   :  { %1931 = vmatpush.msrb.mxu0 %v8664_v60  ;;  %1951 = vmatpush.msrb.mxu1 %v8471_v57  ;;  %v8685_v57 = vld [vmem:[%s12792_s8 + $0x50] sm:$0xff] }
 0xc29   :  { %1932 = vmatpush.msrb.mxu0 %v8671_v33  ;;  %1952 = vmatpush.msrb.mxu1 %v8479_v62  ;;  %v8692_v62 = vld [vmem:[%s12792_s8 + $0x40] sm:$0xff] }
 0xc2b   :  { %1933 = vmatpush.msrb.mxu0 %v8678_v63  ;;  %1953 = vmatpush.msrb.mxu1 %v8486_v0  ;;  %v8699_v0 = vld [vmem:[%s12792_s8 + $0x30] sm:$0xff] }
 0xc2d   :  { %1934 = vmatpush.msrb.mxu0 %v8685_v57  ;;  %1954 = vmatpush.msrb.mxu1 %v8493_v14  ;;  %v8706_v14 = vld [vmem:[%s12792_s8 + $0x20] sm:$0xff] }
 0xc2e   :  { %13163 = vst [vmem:[#allocation11_spill] sm:$0xff] %v8706_v14 }
 0xc2f   :  { %1935 = vmatpush.msrb.mxu0 %v8692_v62  ;;  %1955 = vmatpush.msrb.mxu1 %v8500_v17  ;;  %v8713_v17 = vld [vmem:[%s12792_s8 + $0x10] sm:$0xff] }
 0xc30   :  { %13164 = vst [vmem:[#allocation12_spill] sm:$0xff] %v8713_v17 }
 0xc31   :  { %1936 = vmatpush.msrb.mxu0 %v8699_v0  ;;  %1956 = vmatpush.msrb.mxu1 %v8507_v20  ;;  %v8720_v20 = vld [vmem:[%s12792_s8] sm:$0xff] }
 0xc32   :  { %13165 = vst [vmem:[#allocation13_spill] sm:$0xff] %v8720_v20 }
 0xc33   :  { %1937 = vmatpush.msrb.mxu0 %v8706_v14  ;;  %1957 = vmatpush.msrb.mxu1 %v8514_v25 }
 0xc35   :  { %1938 = vmatpush.msrb.mxu0 %v8713_v17  ;;  %1958 = vmatpush.msrb.mxu1 %v8521_v31 }
 0xc37   :  { %1939 = vmatpush.msrb.mxu0 %v8720_v20  ;;  %1959 = vmatpush.msrb.mxu1 %v8528_v34 }
 0xc9b   :  { %v1490_v25 = vpop.f32.mrf.mxu1  ;;  %v1470_v38 = vpop.f32.mrf.mxu0 }
 0xc9c   :  { %v1491_v13 = vadd.f32 %v1490_v25, %v13166_v30  ;;  %v1471_v31 = vadd.f32 %v1470_v38, %v13167_v19 }
 0xc9e   :  { %6143 = vtanh.f32 %v1491_v13  ;;  %v5842_v1 = vmul.f32 -1.442695, %v1471_v31 }
 0xca0   :  { %6145 = vpow2.f32 %v5842_v1  ;;  %v13168_v1 = vld [vmem:[#allocation10_spill] sm:$0xff] }
 0xca4   :  { %v6144_v48 = vpop.eup %6143 }
 0xca5   :  { %1534 = vrot.lane.b32.xlu0 %v6144_v48, %s6941_s7 }
 0xca6   :  { %v6146_v41 = vpop.eup %6145 }
 0xca7   :  { %v1499_v35 = vadd.f32 1.0, %v6146_v41  ;;  %v8731_v41 = vsel %vm616_vm10, %v13168_v1, 0.0  ;;  %v5719_v1 = vld [vmem:[%s12793_s9 + $0x6] sm:$0x3] }
 0xca8   :  { %13169 = vst [vmem:[#allocation14_spill] sm:$0xff] %v8731_v41 }
 0xca9   :  { %6147 = vrcp.f32 %v1499_v35  ;;  %v1512_v17 = vand.u32 2147483648, %v1499_v35  ;;  %vm1506_vm5 = vweird.f32 %v1499_v35  ;;  %v1510_v25 = vand.u32 2147483647, %v1499_v35 }
 0xcab   :  { %v1513_v48 = vor.u32 1.1754944e-38, %v1512_v17  ;;  %vm1511_vm7 = vcmp.eq.f32.partialorder %v1510_v25, 8.507059e+37 }
 0xcaf   :  { %v6148_v9 = vpop.eup %6147 }
 0xcb0   :  { %v1502_v49 = vmul.f32 %v6148_v9, %v1499_v35  ;;  %vm1507_vm4 = vweird.f32 %v6148_v9 }
 0xcb1   :  { %vm1508_vm6 = vmor %vm1506_vm5, %vm1507_vm4 }
 0xcb2   :  { %v1503_v10 = vsub.f32 1.0, %v1502_v49 }
 0xcb4   :  { %v1504_v34 = vmul.f32 %v6148_v9, %v1503_v10 }
 0xcb6   :  { %v1505_v20 = vadd.f32 %v6148_v9, %v1504_v34 }
 0xcb8   :  { %v1509_v30 = vsel %vm1508_vm6, %v6148_v9, %v1505_v20 }
 0xcb9   :  { %v1514_v38 = vsel %vm1511_vm7, %v1513_v48, %v1509_v30 }
 0xcba   :  { %v1532_v49 = vmul.f32 %v1514_v38, %v8731_v41 }
 0xd17   :  { %v1535_v14 = vpop.permute.xlu0 %1534 }
 0xd18   :  { %v1537_v31 = vmul.f32 %v1535_v14, %v1514_v38  ;;  %v5843_v14 = vmul.f32 -1.442695, %v1491_v13 }
 0xd1a   :  { %1539 = vrot.lane.b32.xlu1 %v1537_v31, %s6942_s26 }
 0xd8c   :  { %v1540_v10 = vpop.permute.xlu1 %1539 }
 0xd8d   :  { %v8734_v34 = vadd.f32 %v1540_v10, %v1532_v49 }
 0xd8f   :  { %13170 = vst [vmem:[#allocation15_spill] sm:$0xff] %v8734_v34  ;;  %6149 = vtanh.f32 %v8734_v34 }
 0xd90   :  { %6151 = vpow2.f32 %v5843_v14 }
 0xd95   :  { %v6150_v20 = vpop.eup %6149 }
 0xd96   :  { %1545 = vrot.lane.b32.xlu2 %v6150_v20, %s6942_s26  ;;  %v6152_v17 = vpop.eup %6151  ;;  %v8743_v20 = vperm.slane %v5719_v1, 1 }
 0xd97   :  { %v1500_v30 = vadd.f32 1.0, %v6152_v17 }
 0xd98   :  { %13171 = vst [vmem:[#allocation16_spill] sm:$0xff] %v8743_v20 }
 0xd99   :  { %6153 = vrcp.f32 %v1500_v30  ;;  %v1527_v49 = vand.u32 2147483648, %v1500_v30  ;;  %vm1521_vm9 = vweird.f32 %v1500_v30  ;;  %v1525_v10 = vand.u32 2147483647, %v1500_v30 }
 0xd9b   :  { %v1528_v14 = vor.u32 1.1754944e-38, %v1527_v49  ;;  %vm1526_vm4 = vcmp.eq.f32.partialorder %v1525_v10, 8.507059e+37 }
 0xd9e   :  { %1561 = vrot.lane.b32.xlu2 %v8269_v6, %s6945_s29 }
 0xd9f   :  { %v6154_v35 = vpop.eup %6153 }
 0xda0   :  { %v1517_v9 = vmul.f32 %v6154_v35, %v1500_v30  ;;  %vm1522_vm8 = vweird.f32 %v6154_v35 }
 0xda1   :  { %vm1523_vm13 = vmor %vm1521_vm9, %vm1522_vm8 }
 0xda2   :  { %v1518_v25 = vsub.f32 1.0, %v1517_v9  ;;  %v8746_v9 = vadd.f32 %v1138_v51, %v8743_v20 }
 0xda4   :  { %v1519_v48 = vmul.f32 %v6154_v35, %v1518_v25  ;;  %6155 = vtanh.f32 %v8746_v9 }
 0xda6   :  { %v1520_v31 = vadd.f32 %v6154_v35, %v1519_v48 }
 0xda8   :  { %v1524_v13 = vsel %vm1523_vm13, %v6154_v35, %v1520_v31 }
 0xda9   :  { %v1529_v17 = vsel %vm1526_vm4, %v1528_v14, %v1524_v13 }
 0xdaa   :  { %v6156_v51 = vpop.eup %6155 }
 0xdf0   :  { %v1546_v34 = vpop.permute.xlu2 %1545 }
 0xdf1   :  { %v1548_v25 = vmul.f32 %v1546_v34, %v1514_v38  ;;  %v1549_v48 = vmul.f32 %v1546_v34, %v1529_v17 }
 0xdf3   :  { %v8751_v41 = vsel %vm1312_vm11, %v1549_v48, %v13162_v39  ;;  %v8756_v30 = vsel %vm1312_vm11, %v1548_v25, %v13161_v59  ;;  %v8766_v39 = vperm.slane %v5719_v1, 0 }
 0xdf4   :  { %1557 = vrot.lane.b32.xlu1 %v8751_v41, %s6944_s5  ;;  %1555 = vrot.lane.b32.xlu0 %v8756_v30, %s6944_s5 }
 0xdf5   :  { %13172 = vst [vmem:[#allocation17_spill] sm:$0xff] %v8766_v39  ;;  %v1119_v59 = vadd.f32 %v8592_v24, %v8766_v39 }
 0xdf7   :  { %v5824_v38 = vmul.f32 -1.442695, %v1119_v59 }
 0xdf8   :  { %v1562_v24 = vpop.permute.xlu2 %1561 }
 0xdf9   :  { %6157 = vpow2.f32 %v5824_v38 }
 0xdfc   :  { %1182 = vrot.lane.b32.xlu1 %v6156_v51, %s6941_s7  ;;  %1563 = vrot.lane.b32.xlu0 %v8273_v36, %s6945_s29 }
 0xdff   :  { %v6158_v34 = vpop.eup %6157 }
 0xe00   :  { %v1147_v35 = vadd.f32 1.0, %v6158_v34 }
 0xe02   :  { %6159 = vrcp.f32 %v1147_v35  ;;  %v1160_v48 = vand.u32 2147483648, %v1147_v35  ;;  %vm1154_vm6 = vweird.f32 %v1147_v35  ;;  %v1158_v1 = vand.u32 2147483647, %v1147_v35 }
 0xe04   :  { %v1161_v20 = vor.u32 1.1754944e-38, %v1160_v48  ;;  %vm1159_vm8 = vcmp.eq.f32.partialorder %v1158_v1, 8.507059e+37  ;;  %v8828_v48 = vld [vmem:[%s12792_s8 + $0x168] sm:$0xff]  ;;  %v8836_v1 = vld [vmem:[%s12792_s8 + $0x150] sm:$0xff] }
 0xe08   :  { %v6160_v31 = vpop.eup %6159 }
 0xe09   :  { %v1150_v49 = vmul.f32 %v6160_v31, %v1147_v35  ;;  %vm1155_vm5 = vweird.f32 %v6160_v31  ;;  %v8789_v35 = vld [vmem:[%s12792_s8 + $0x198] sm:$0xf] }
 0xe0a   :  { %vm1156_vm7 = vmor %vm1154_vm6, %vm1155_vm5 }
 0xe0b   :  { %v1151_v10 = vsub.f32 1.0, %v1150_v49 }
 0xe0d   :  { %v1152_v13 = vmul.f32 %v6160_v31, %v1151_v10 }
 0xe0f   :  { %v1153_v25 = vadd.f32 %v6160_v31, %v1152_v13 }
 0xe11   :  { %v1157_v51 = vsel %vm1156_vm7, %v6160_v31, %v1153_v25  ;;  %v8802_v31 = vld [vmem:[%s12792_s8 + $0x188] sm:$0xff]  ;;  %v8820_v25 = vld [vmem:[%s12792_s8 + $0x160] sm:$0xff] }
 0xe12   :  { %v8770_v59 = vsel %vm1159_vm8, %v1161_v20, %v1157_v51  ;;  %v8782_v20 = vld [vmem:[%s12792_s8 + $0x190] sm:$0xf]  ;;  %v8842_v51 = vld [vmem:[%s12792_s8 + $0x158] sm:$0xff] }
 0xe66   :  { %v1558_v14 = vpop.permute.xlu1 %1557  ;;  %v1556_v17 = vpop.permute.xlu0 %1555 }
 0xe67   :  { %v1559_v39 = vsel %vm626_vm14, %v1556_v17, %v1558_v14  ;;  %v8808_v14 = vld [vmem:[%s12792_s8 + $0x170] sm:$0xff]  ;;  %v8814_v17 = vld [vmem:[%s12792_s8 + $0x178] sm:$0xff] }
 0xe6e   :  { %v1183_v38 = vpop.permute.xlu1 %1182  ;;  %v1564_v34 = vpop.permute.xlu0 %1563 }
 0xe6f   :  { %v1185_v49 = vmul.f32 %v1183_v38, %v8770_v59  ;;  %v1565_v10 = vsel %vm1328_vm12, %v1562_v24, %v1564_v34  ;;  %v8848_v24 = vld [vmem:[%s12792_s8 + $0x140] sm:$0xff]  ;;  %v8860_v38 = vld [vmem:[%s12792_s8 + $0x130] sm:$0xff]  ;;  %v8866_v34 = vld [vmem:[%s12792_s8 + $0x138] sm:$0xff] }
 0xe70   :  { %v1567_v13 = vsel %vm502_vm15, %v1559_v39, %v1565_v10  ;;  %v8796_v39 = vld [vmem:[%s12792_s8 + $0x180] sm:$0xff]  ;;  %13173 = vst [vmem:[#allocation18_spill] sm:$0xff] %v8866_v34  ;;  %v8878_v10 = vld [vmem:[%s12792_s8 + $0x128] sm:$0xff] }
 0xe71   :  { %1187 = vrot.lane.b32.xlu1 %v1185_v49, %s6942_s26  ;;  %5845 = vmatmul.msk.f32.vlgmr.msra.gmra.mxu3 %vm656_vm3, %v1567_v13  ;;  %v8872_v49 = vld [vmem:[%s12792_s8 + $0x120] sm:$0xff]  ;;  %13175 = vst [vmem:[#allocation32_spill] sm:$0xff] %v8878_v10 }
 0xe72   :  { %5847 = vmatmul.msk.f32.vlgmr.msrb.gmra.mxu2 %vm656_vm3, %v1567_v13  ;;  %5868 = vmatpush.msk.msra.mxu3 %vm184_vm0, %v8782_v20  ;;  %13174 = vst [vmem:[#allocation21_spill] sm:$0xff] %v8872_v49  ;;  %v8884_v13 = vld [vmem:[%s12792_s8 + $0x110] sm:$0xff] }
 0xe73   :  { %5870 = vmatpush.msk.msrb.mxu2 %vm184_vm0, %v8789_v35  ;;  %13176 = vst [vmem:[#allocation22_spill] sm:$0xff] %v8884_v13 }
 0xe74   :  { %2046 = vmatpush.msra.mxu3 %v8796_v39 }
 0xe75   :  { %2066 = vmatpush.msrb.mxu2 %v8802_v31 }
 0xe76   :  { %2047 = vmatpush.msra.mxu3 %v8808_v14 }
 0xe77   :  { %2067 = vmatpush.msrb.mxu2 %v8814_v17 }
 0xe78   :  { %2048 = vmatpush.msra.mxu3 %v8820_v25 }
 0xe79   :  { %5857 = vmatmul.msk.f32.vlgmr.msrb.gmra.mxu3 %vm502_vm15, %v8557_v46  ;;  %2068 = vmatpush.msrb.mxu2 %v8828_v48 }
 0xe7a   :  { %5859 = vmatmul.msk.f32.vlgmr.msra.gmra.mxu2 %vm502_vm15, %v8557_v46  ;;  %2049 = vmatpush.msra.mxu3 %v8836_v1  ;;  %v8854_v46 = vld [vmem:[%s12792_s8 + $0x148] sm:$0xff] }
 0xe7b   :  { %2069 = vmatpush.msrb.mxu2 %v8842_v51 }
 0xe7c   :  { %2050 = vmatpush.msra.mxu3 %v8848_v24 }
 0xe7d   :  { %2070 = vmatpush.msrb.mxu2 %v8854_v46 }
 0xe7e   :  { %2051 = vmatpush.msra.mxu3 %v8860_v38 }
 0xe7f   :  { %2071 = vmatpush.msrb.mxu2 %v8866_v34  ;;  %v8890_v34 = vld [vmem:[%s12792_s8 + $0x118] sm:$0xff] }
 0xe80   :  { %2052 = vmatpush.msra.mxu3 %v8872_v49  ;;  %13177 = vst [vmem:[#allocation34_spill] sm:$0xff] %v8890_v34  ;;  %v8896_v49 = vld [vmem:[%s12792_s8 + $0x100] sm:$0xff] }
 0xe81   :  { %2072 = vmatpush.msrb.mxu2 %v8878_v10  ;;  %13178 = vst [vmem:[#allocation23_spill] sm:$0xff] %v8896_v49  ;;  %v8902_v10 = vld [vmem:[%s12792_s8 + $0x108] sm:$0xff] }
 0xe82   :  { %2053 = vmatpush.msra.mxu3 %v8884_v13  ;;  %13179 = vst [vmem:[#allocation35_spill] sm:$0xff] %v8902_v10  ;;  %v8908_v13 = vld [vmem:[%s12792_s8 + $0xf0] sm:$0xff] }
 0xe83   :  { %2073 = vmatpush.msrb.mxu2 %v8890_v34  ;;  %13180 = vst [vmem:[#allocation24_spill] sm:$0xff] %v8908_v13  ;;  %v8914_v34 = vld [vmem:[%s12792_s8 + $0xf8] sm:$0xff] }
 0xe84   :  { %2054 = vmatpush.msra.mxu3 %v8896_v49  ;;  %13181 = vst [vmem:[#allocation36_spill] sm:$0xff] %v8914_v34  ;;  %v8920_v49 = vld [vmem:[%s12792_s8 + $0xe0] sm:$0xff] }
 0xe85   :  { %2074 = vmatpush.msrb.mxu2 %v8902_v10  ;;  %v8926_v10 = vld [vmem:[%s12792_s8 + $0xe8] sm:$0xff] }
 0xe86   :  { %2055 = vmatpush.msra.mxu3 %v8908_v13  ;;  %v8932_v13 = vld [vmem:[%s12792_s8 + $0xd0] sm:$0xff] }
 0xe87   :  { %2075 = vmatpush.msrb.mxu2 %v8914_v34  ;;  %v8938_v34 = vld [vmem:[%s12792_s8 + $0xd8] sm:$0xff] }
 0xe88   :  { %2056 = vmatpush.msra.mxu3 %v8920_v49 }
 0xe89   :  { %2076 = vmatpush.msrb.mxu2 %v8926_v10 }
 0xe8a   :  { %2057 = vmatpush.msra.mxu3 %v8932_v13 }
 0xe8b   :  { %2077 = vmatpush.msrb.mxu2 %v8938_v34 }
 0xe8c   :  { %5880 = vmatpush.msk.msrb.mxu3 %vm184_vm0, %v8240_v55  ;;  %v1180_v55 = vmul.f32 0.0, %v8770_v59 }
 0xe8d   :  { %5882 = vmatpush.msk.msra.mxu2 %vm184_vm0, %v8309_v21  ;;  %v13182_v21 = vmov 0  }
 0xe8e   :  { %2284 = vmatpush.msrb.mxu3 %v8245_v50 }
 0xe8f   :  { %2304 = vmatpush.msra.mxu2 %v8322_v18 }
 0xe90   :  { %2285 = vmatpush.msrb.mxu3 %v8254_v12 }
 0xe91   :  { %2305 = vmatpush.msra.mxu2 %v8332_v29 }
 0xe92   :  { %2286 = vmatpush.msrb.mxu3 %v8261_v52 }
 0xe93   :  { %2306 = vmatpush.msra.mxu2 %v8345_v37 }
 0xe94   :  { %2287 = vmatpush.msrb.mxu3 %v8304_v2  ;;  %v8977_v2 = vld [vmem:[%s12791_s1] sm:$0xff] }
 0xe95   :  { %2307 = vmatpush.msra.mxu2 %v8362_v44  ;;  %vm1791_vm9 = vcmp.gt.s32.totalorder %v8977_v2, 2 }
 0xe96   :  { %2288 = vmatpush.msrb.mxu3 %v8314_v15  ;;  %v1898_v15 = vsel %vm1791_vm9, 1, %v13182_v21 }
 0xe97   :  { %2308 = vmatpush.msra.mxu2 %v8374_v53 }
 0xe98   :  { %2289 = vmatpush.msrb.mxu3 %v8327_v23  ;;  %v13183_v23 = vld [vmem:[#allocation38_spill] sm:$0xff] }
 0xe99   :  { %2309 = vmatpush.msra.mxu2 %v8384_v43 }
 0xe9a   :  { %2290 = vmatpush.msrb.mxu3 %v8340_v32  ;;  %v1796_v32 = vld [vmem:[#allocation2 + $0x28] sm:$0xff] }
 0xe9b   :  { %2310 = vmatpush.msra.mxu2 %v8397_v45 }
 0xe9c   :  { %2291 = vmatpush.msrb.mxu3 %v8357_v40 }
 0xe9d   :  { %2311 = vmatpush.msra.mxu2 %v8410_v7 }
 0xe9e   :  { %2292 = vmatpush.msrb.mxu3 %v8367_v47 }
 0xe9f   :  { %2312 = vmatpush.msra.mxu2 %v8418_v58 }
 0xea0   :  { %2293 = vmatpush.msrb.mxu3 %v8379_v5  ;;  %v13184_v5 = vld [vmem:[#allocation39_spill] sm:$0xff] }
 0xea1   :  { %2313 = vmatpush.msra.mxu2 %v8433_v42 }
 0xea2   :  { %2294 = vmatpush.msrb.mxu3 %v8392_v27 }
 0xea3   :  { %2314 = vmatpush.msra.mxu2 %v8446_v54  ;;  %v1795_v54 = vld [vmem:[#allocation2 + $0x20] sm:$0xff] }
 0xea4   :  { %2295 = vmatpush.msrb.mxu3 %v8405_v8 }
 0xea5   :  { %2315 = vmatpush.msra.mxu2 %v8465_v56 }
 0xee3   :  { %v1188_v50 = vpop.permute.xlu1 %1187 }
 0xee4   :  { %v8970_v12 = vadd.f32 %v1188_v50, %v1180_v55 }
 0xee6   :  { %6161 = vtanh.f32 %v8970_v12 }
 0xeec   :  { %v6162_v52 = vpop.eup %6161 }
 0xeed   :  { %1193 = vrot.lane.b32.xlu1 %v6162_v52, %s6942_s26 }
 0xef4   :  { %v1588_v53 = vpop.f32.mrf.mxu3 }
 0xef5   :  { %v1608_v18 = vpop.f32.mrf.mxu2  ;;  %1900 = vperm.xlu1 %6065, %v1898_v15   ;;  %v1589_v43 = vadd.f32 %v1588_v53, %v13184_v5 }
 0xef6   :  { %v8982_v29 = vadd.f32 %v1608_v18, %v13183_v23 }
 0xef7   :  { %v5848_v27 = vmul.f32 -1.442695, %v1589_v43 }
 0xef8   :  { %6163 = vtanh.f32 %v8982_v29 }
 0xefc   :  { %v1816_v58 = vpop.f32.mrf.mxu3 }
 0xefd   :  { %v1836_v37 = vpop.f32.mrf.mxu2  ;;  %v1839_v56 = vadd.f32 %v1816_v58, %v1795_v54 }
 0xefe   :  { %v6164_v40 = vpop.eup %6163  ;;  %v8985_v44 = vadd.f32 %v1836_v37, %v1796_v32 }
 0xeff   :  { %1652 = vrot.lane.b32.xlu2 %v6164_v40, %s6941_s7  ;;  %v5860_v50 = vmul.f32 -1.442695, %v1839_v56 }
 0xf00   :  { %6165 = vtanh.f32 %v8985_v44 }
 0xf01   :  { %6167 = vpow2.f32 %v5848_v27 }
 0xf06   :  { %v6166_v47 = vpop.eup %6165 }
 0xf07   :  { %1882 = vrot.lane.b32.xlu0 %v6166_v47, %s6941_s7  ;;  %v6168_v45 = vpop.eup %6167 }
 0xf08   :  { %v1617_v8 = vadd.f32 1.0, %v6168_v45 }
 0xf0a   :  { %6169 = vrcp.f32 %v1617_v8  ;;  %v1630_v18 = vand.u32 2147483648, %v1617_v8  ;;  %vm1624_vm4 = vweird.f32 %v1617_v8  ;;  %v1628_v32 = vand.u32 2147483647, %v1617_v8 }
 0xf0b   :  { %6171 = vpow2.f32 %v5860_v50 }
 0xf0c   :  { %v1631_v47 = vor.u32 1.1754944e-38, %v1630_v18  ;;  %vm1629_vm6 = vcmp.eq.f32.partialorder %v1628_v32, 8.507059e+37 }
 0xf10   :  { %v6170_v7 = vpop.eup %6169 }
 0xf11   :  { %v1620_v42 = vmul.f32 %v6170_v7, %v1617_v8  ;;  %vm1625_vm13 = vweird.f32 %v6170_v7  ;;  %v6172_v37 = vpop.eup %6171 }
 0xf12   :  { %vm1626_vm5 = vmor %vm1624_vm4, %vm1625_vm13  ;;  %v1847_v53 = vadd.f32 1.0, %v6172_v37 }
 0xf13   :  { %v1621_v55 = vsub.f32 1.0, %v1620_v42 }
 0xf14   :  { %6173 = vrcp.f32 %v1847_v53  ;;  %vm1854_vm8 = vweird.f32 %v1847_v53 }
 0xf15   :  { %v1622_v52 = vmul.f32 %v6170_v7, %v1621_v55 }
 0xf17   :  { %v1623_v15 = vadd.f32 %v6170_v7, %v1622_v52  ;;  %v1860_v52 = vand.u32 2147483648, %v1847_v53 }
 0xf19   :  { %v1627_v40 = vsel %vm1626_vm5, %v6170_v7, %v1623_v15  ;;  %v1858_v15 = vand.u32 2147483647, %v1847_v53  ;;  %v1861_v32 = vor.u32 1.1754944e-38, %v1860_v52 }
 0xf1a   :  { %v8991_v27 = vsel %vm1629_vm6, %v1631_v47, %v1627_v40  ;;  %v6174_v54 = vpop.eup %6173  ;;  %v5825_v47 = vmul.f32 -1.442695, %v8746_v9 }
 0xf1b   :  { %v1850_v7 = vmul.f32 %v6174_v54, %v1847_v53  ;;  %vm1855_vm7 = vweird.f32 %v6174_v54  ;;  %vm1859_vm13 = vcmp.eq.f32.partialorder %v1858_v15, 8.507059e+37 }
 0xf1c   :  { %vm1856_vm9 = vmor %vm1854_vm8, %vm1855_vm7  ;;  %6175 = vpow2.f32 %v5825_v47 }
 0xf1d   :  { %v1851_v56 = vsub.f32 1.0, %v1850_v7 }
 0xf1f   :  { %v1852_v55 = vmul.f32 %v6174_v54, %v1851_v56  ;;  %v13186_v56 = vld [vmem:[#allocation42_spill] sm:$0xff] }
 0xf21   :  { %v1853_v50 = vadd.f32 %v6174_v54, %v1852_v55 }
 0xf23   :  { %v1857_v18 = vsel %vm1856_vm9, %v6174_v54, %v1853_v50  ;;  %v9010_v54 = vsel %vm616_vm10, %v13186_v56, 0.0  ;;  %v5849_v56 = vmul.f32 -1.442695, %v8982_v29 }
 0xf24   :  { %v9002_v37 = vsel %vm1859_vm13, %v1861_v32, %v1857_v18  ;;  %13187 = vst [vmem:[#allocation37_spill] sm:$0xff] %v9010_v54  ;;  %v1650_v55 = vmul.f32 %v8991_v27, %v9010_v54 }
 0xf59   :  { %v1653_v43 = vpop.permute.xlu2 %1652 }
 0xf5a   :  { %v1655_v45 = vmul.f32 %v1653_v43, %v8991_v27  ;;  %v6176_v43 = vpop.eup %6175 }
 0xf5c   :  { %1657 = vrot.lane.b32.xlu2 %v1655_v45, %s6942_s26  ;;  %v1148_v45 = vadd.f32 1.0, %v6176_v43 }
 0xf5e   :  { %6177 = vrcp.f32 %v1148_v45  ;;  %v1175_v18 = vand.u32 2147483648, %v1148_v45  ;;  %vm1169_vm5 = vweird.f32 %v1148_v45  ;;  %v1173_v32 = vand.u32 2147483647, %v1148_v45 }
 0xf5f   :  { %v1194_v58 = vpop.permute.xlu1 %1193 }
 0xf60   :  { %v1196_v42 = vmul.f32 %v1194_v58, %v8770_v59  ;;  %v1176_v47 = vor.u32 1.1754944e-38, %v1175_v18  ;;  %vm1174_vm7 = vcmp.eq.f32.partialorder %v1173_v32, 8.507059e+37 }
 0xf62   :  { %v8998_v8 = vsel %vm616_vm10, %v1196_v42, 0.0 }
 0xf63   :  { %13185 = vst [vmem:[#allocation25_spill] sm:$0xff] %v8998_v8  ;;  %1681 = vrot.lane.b32.xlu1 %v8998_v8, %s6945_s29 }
 0xf64   :  { %v6178_v42 = vpop.eup %6177 }
 0xf65   :  { %v1165_v7 = vmul.f32 %v6178_v42, %v1148_v45  ;;  %vm1170_vm4 = vweird.f32 %v6178_v42  ;;  %v13191_v45 = vld [vmem:[#allocation41_spill] sm:$0xff] }
 0xf66   :  { %vm1171_vm6 = vmor %vm1169_vm5, %vm1170_vm4 }
 0xf67   :  { %v1166_v53 = vsub.f32 1.0, %v1165_v7 }
 0xf69   :  { %v1167_v52 = vmul.f32 %v6178_v42, %v1166_v53 }
 0xf6b   :  { %v1168_v9 = vadd.f32 %v6178_v42, %v1167_v52 }
 0xf79   :  { %v1883_v59 = vpop.permute.xlu0 %1882 }
 0xf7a   :  { %v1885_v40 = vmul.f32 %v1883_v59, %v9002_v37 }
 0xf7c   :  { %1887 = vrot.lane.b32.xlu0 %v1885_v40, %s6942_s26  ;;  %v1172_v40 = vsel %vm1171_vm6, %v6178_v42, %v1168_v9 }
 0xf7d   :  { %v1177_v43 = vsel %vm1174_vm7, %v1176_v47, %v1172_v40 }
 0xf7e   :  { %v1197_v7 = vmul.f32 %v1194_v58, %v1177_v43 }
 0xf80   :  { %v9020_v53 = vsel %vm616_vm10, %v1197_v7, 0.0 }
 0xf81   :  { %13189 = vst [vmem:[#allocation27_spill] sm:$0xff] %v9020_v53 }
 0xfb6   :  { %v1658_v50 = vpop.permute.xlu2 %1657 }
 0xfb7   :  { %v9014_v15 = vadd.f32 %v1658_v50, %v1650_v55  ;;  %v13190_v55 = vld [vmem:[#allocation40_spill] sm:$0xff] }
 0xfb8   :  { %v9029_v42 = vsel %vm1312_vm11, %v13191_v45, %v13190_v55 }
 0xfb9   :  { %13188 = vst [vmem:[#allocation26_spill] sm:$0xff] %v9014_v15  ;;  %6179 = vtanh.f32 %v9014_v15  ;;  %v1880_v50 = vmul.f32 %v9002_v37, %v9029_v42 }
 0xfba   :  { %6181 = vpow2.f32 %v5849_v56 }
 0xfbf   :  { %v6180_v59 = vpop.eup %6179 }
 0xfc0   :  { %1663 = vrot.lane.b32.xlu2 %v6180_v59, %s6942_s26  ;;  %v6182_v9 = vpop.eup %6181 }
 0xfc1   :  { %v1618_v29 = vadd.f32 1.0, %v6182_v9 }
 0xfc3   :  { %v1645_v7 = vand.u32 2147483648, %v1618_v29  ;;  %vm1639_vm9 = vweird.f32 %v1618_v29  ;;  %v1643_v55 = vand.u32 2147483647, %v1618_v29 }
 0xfc5   :  { %v1646_v56 = vor.u32 1.1754944e-38, %v1645_v7  ;;  %vm1644_vm4 = vcmp.eq.f32.partialorder %v1643_v55, 8.507059e+37 }
 0xfc8   :  { %1683 = vrot.lane.b32.xlu2 %v9020_v53, %s6945_s29 }
 0xfee   :  { %v1888_v52 = vpop.permute.xlu0 %1887 }
 0xfef   :  { %v9033_v58 = vadd.f32 %v1888_v52, %v1880_v50 }
 0xff1   :  { %6183 = vtanh.f32 %v9033_v58 }
 0xff2   :  { %6185 = vrcp.f32 %v1618_v29 }
 0xff7   :  { %v6184_v18 = vpop.eup %6183 }
 0xff8   :  { %1893 = vrot.lane.b32.xlu0 %v6184_v18, %s6942_s26  ;;  %v6186_v32 = vpop.eup %6185 }
 0xff9   :  { %v1635_v59 = vmul.f32 %v6186_v32, %v1618_v29  ;;  %vm1640_vm8 = vweird.f32 %v6186_v32 }
 0xffa   :  { %vm1641_vm13 = vmor %vm1639_vm9, %vm1640_vm8 }
 0xffb   :  { %v1636_v40 = vsub.f32 1.0, %v1635_v59 }
 0xffd   :  { %v1637_v47 = vmul.f32 %v6186_v32, %v1636_v40 }
 0xfff   :  { %v1638_v43 = vadd.f32 %v6186_v32, %v1637_v47 }
0x1001   :  { %v1642_v45 = vsel %vm1641_vm13, %v6186_v32, %v1638_v43 }
0x1002   :  { %v1647_v50 = vsel %vm1644_vm4, %v1646_v56, %v1642_v45  ;;  %v9055_v56 = vpop.permute.xlu1 %1900 }
0x1003   :  { %vm1902_vm9 = vcmp.eq.s32.totalorder %v9055_v56, 1 }
0x101a   :  { %v1664_v52 = vpop.permute.xlu2 %1663 }
0x101b   :  { %v1666_v8 = vmul.f32 %v1664_v52, %v8991_v27  ;;  %v1667_v18 = vmul.f32 %v1664_v52, %v1647_v50  ;;  %v5861_v27 = vmul.f32 -1.442695, %v8985_v44 }
0x101d   :  { %v9041_v9 = vsel %vm1312_vm11, %v1667_v18, %v8273_v36  ;;  %v9046_v59 = vsel %vm1312_vm11, %v1666_v8, %v8269_v6  ;;  %6187 = vpow2.f32 %v5861_v27  ;;  %v13192_v27 = vld [vmem:[#allocation43_spill] sm:$0xff] }
0x101e   :  { %1675 = vrot.lane.b32.xlu0 %v9041_v9, %s6944_s5  ;;  %1673 = vrot.lane.b32.xlu2 %v9046_v59, %s6944_s5 }
0x1023   :  { %v6188_v29 = vpop.eup %6187 }
0x1024   :  { %v1848_v36 = vadd.f32 1.0, %v6188_v29 }
0x1026   :  { %1914 = vrot.lane.b32.xlu2 %v8618_v16, %s6945_s29  ;;  %6189 = vrcp.f32 %v1848_v36  ;;  %v1875_v43 = vand.u32 2147483648, %v1848_v36  ;;  %vm1869_vm6 = vweird.f32 %v1848_v36  ;;  %v1873_v7 = vand.u32 2147483647, %v1848_v36 }
0x1028   :  { %v1876_v45 = vor.u32 1.1754944e-38, %v1875_v43  ;;  %vm1874_vm8 = vcmp.eq.f32.partialorder %v1873_v7, 8.507059e+37 }
0x102c   :  { %v6190_v32 = vpop.eup %6189 }
0x102d   :  { %v1865_v40 = vmul.f32 %v6190_v32, %v1848_v36  ;;  %vm1870_vm5 = vweird.f32 %v6190_v32 }
0x102e   :  { %vm1871_vm7 = vmor %vm1869_vm6, %vm1870_vm5 }
0x102f   :  { %v1866_v47 = vsub.f32 1.0, %v1865_v40  ;;  %v13194_v40 = vld [vmem:[#allocation44_spill] sm:$0xff] }
0x1031   :  { %v1867_v6 = vmul.f32 %v6190_v32, %v1866_v47 }
0x1033   :  { %v1868_v8 = vadd.f32 %v6190_v32, %v1867_v6 }
0x1035   :  { %v1872_v55 = vsel %vm1871_vm7, %v6190_v32, %v1868_v8  ;;  %v1682_v32 = vpop.permute.xlu1 %1681 }
0x1036   :  { %v1877_v44 = vsel %vm1874_vm8, %v1876_v45, %v1872_v55  ;;  %v9083_v55 = vld [vmem:[%s12792_s8 + $0x260] sm:$0xf]  ;;  %v9090_v45 = vld [vmem:[%s12792_s8 + $0x268] sm:$0xf] }
0x1037   :  { %13196 = vst [vmem:[#allocation30_spill] sm:$0xff] %v9083_v55 }
0x1038   :  { %13197 = vst [vmem:[#allocation31_spill] sm:$0xff] %v9090_v45 }
0x106a   :  { %v1894_v50 = vpop.permute.xlu0 %1893 }
0x106b   :  { %v1896_v52 = vmul.f32 %v1894_v50, %v9002_v37  ;;  %v1897_v18 = vmul.f32 %v1894_v50, %v1877_v44  ;;  %v1684_v37 = vpop.permute.xlu2 %1683  ;;  %v9097_v44 = vld [vmem:[%s12792_s8 + $0x250] sm:$0xff]  ;;  %v9103_v50 = vld [vmem:[%s12792_s8 + $0x258] sm:$0xff] }
0x106c   :  { %v1685_v8 = vsel %vm1328_vm12, %v1682_v32, %v1684_v37  ;;  %13198 = vst [vmem:[#allocation33_spill] sm:$0xff] %v9097_v44  ;;  %v9133_v37 = vld [vmem:[%s12792_s8 + $0x220] sm:$0xff]  ;;  %v9139_v32 = vld [vmem:[%s12792_s8 + $0x228] sm:$0xff] }
0x106d   :  { %v9062_v29 = vsel %vm1902_vm9, %v1897_v18, %v13192_v27  ;;  %v9067_v36 = vsel %vm1902_vm9, %v1896_v52, %v13194_v40  ;;  %13199 = vst [vmem:[#allocation5_spill] sm:$0xff] %v9103_v50  ;;  %v9109_v52 = vld [vmem:[%s12792_s8 + $0x240] sm:$0xff]  ;;  %v9115_v18 = vld [vmem:[%s12792_s8 + $0x248] sm:$0xff]  ;;  %v9121_v27 = vld [vmem:[%s12792_s8 + $0x230] sm:$0xff] }
0x106e   :  { %13193 = vst [vmem:[#allocation28_spill] sm:$0xff] %v9062_v29  ;;  %1910 = vrot.lane.b32.xlu1 %v9062_v29, %s6944_s5  ;;  %1908 = vrot.lane.b32.xlu0 %v9067_v36, %s6944_s5  ;;  %v9127_v40 = vld [vmem:[%s12792_s8 + $0x238] sm:$0xff] }
0x106f   :  { %13195 = vst [vmem:[#allocation29_spill] sm:$0xff] %v9067_v36 }
0x1070   :  { %13200 = vst [vmem:[#allocation20_spill] sm:$0xff] %v9109_v52 }
0x1071   :  { %13201 = vst [vmem:[#allocation19_spill] sm:$0xff] %v9115_v18 }
0x1072   :  { %13202 = vst [vmem:[#allocation10_spill] sm:$0xff] %v9121_v27 }
0x1073   :  { %13203 = vst [vmem:[#allocation42_spill] sm:$0xff] %v9127_v40 }
0x1074   :  { %13204 = vst [vmem:[#allocation40_spill] sm:$0xff] %v9133_v37 }
0x1075   :  { %13205 = vst [vmem:[#allocation41_spill] sm:$0xff] %v9139_v32 }
0x1076   :  { %1916 = vrot.lane.b32.xlu0 %v8613_v28, %s6945_s29 }
0x1078   :  { %v1674_v47 = vpop.permute.xlu2 %1673 }
0x1090   :  { %v1676_v6 = vpop.permute.xlu0 %1675 }
0x1091   :  { %v1677_v43 = vsel %vm626_vm14, %v1674_v47, %v1676_v6  ;;  %v9145_v47 = vld [vmem:[%s12792_s8 + $0x210] sm:$0xff]  ;;  %v9151_v6 = vld [vmem:[%s12792_s8 + $0x218] sm:$0xff] }
0x1092   :  { %v1687_v7 = vsel %vm502_vm15, %v1677_v43, %v1685_v8  ;;  %13206 = vst [vmem:[#allocation43_spill] sm:$0xff] %v9145_v47  ;;  %v9157_v8 = vld [vmem:[%s12792_s8 + $0x200] sm:$0xff]  ;;  %v9163_v43 = vld [vmem:[%s12792_s8 + $0x208] sm:$0xff] }
0x1093   :  { %5851 = vmatmul.msk.f32.vlgmr.msra.gmra.mxu0 %vm656_vm3, %v1687_v7  ;;  %5853 = vmatmul.msk.f32.vlgmr.msra.gmra.mxu1 %vm656_vm3, %v1687_v7  ;;  %13207 = vst [vmem:[#allocation44_spill] sm:$0xff] %v9151_v6  ;;  %v9169_v7 = vld [vmem:[%s12792_s8 + $0x1f0] sm:$0xff] }
0x1094   :  { %5874 = vmatpush.msk.msra.mxu0 %vm184_vm0, %v9083_v55  ;;  %5876 = vmatpush.msk.msra.mxu1 %vm184_vm0, %v9090_v45  ;;  %13208 = vst [vmem:[#allocation45_spill] sm:$0xff] %v9157_v8 }
0x1095   :  { %13209 = vst [vmem:[#allocation46_spill] sm:$0xff] %v9163_v43 }
0x1096   :  { %2164 = vmatpush.msra.mxu0 %v9097_v44  ;;  %2184 = vmatpush.msra.mxu1 %v9103_v50  ;;  %13210 = vst [vmem:[#allocation47_spill] sm:$0xff] %v9169_v7 }
0x1098   :  { %2165 = vmatpush.msra.mxu0 %v9109_v52  ;;  %2185 = vmatpush.msra.mxu1 %v9115_v18 }
0x109a   :  { %2166 = vmatpush.msra.mxu0 %v9121_v27  ;;  %2186 = vmatpush.msra.mxu1 %v9127_v40 }
0x109c   :  { %2167 = vmatpush.msra.mxu0 %v9133_v37  ;;  %2187 = vmatpush.msra.mxu1 %v9139_v32  ;;  %v1915_v32 = vpop.permute.xlu2 %1914 }
0x109e   :  { %2168 = vmatpush.msra.mxu0 %v9145_v47  ;;  %2188 = vmatpush.msra.mxu1 %v9151_v6  ;;  %v9175_v6 = vld [vmem:[%s12792_s8 + $0x1f8] sm:$0xff] }
0x109f   :  { %13211 = vst [vmem:[#allocation48_spill] sm:$0xff] %v9175_v6 }
0x10a0   :  { %2169 = vmatpush.msra.mxu0 %v9157_v8  ;;  %2189 = vmatpush.msra.mxu1 %v9163_v43  ;;  %v9181_v8 = vld [vmem:[%s12792_s8 + $0x1e0] sm:$0xff]  ;;  %v9187_v43 = vld [vmem:[%s12792_s8 + $0x1e8] sm:$0xff] }
0x10a1   :  { %13212 = vst [vmem:[#allocation49_spill] sm:$0xff] %v9181_v8 }
0x10a2   :  { %2170 = vmatpush.msra.mxu0 %v9169_v7  ;;  %2190 = vmatpush.msra.mxu1 %v9175_v6  ;;  %13213 = vst [vmem:[#allocation50_spill] sm:$0xff] %v9187_v43  ;;  %v9193_v7 = vld [vmem:[%s12792_s8 + $0x1d0] sm:$0xff]  ;;  %v9199_v6 = vld [vmem:[%s12792_s8 + $0x1d8] sm:$0xff] }
0x10a3   :  { %13214 = vst [vmem:[#allocation51_spill] sm:$0xff] %v9193_v7 }
0x10a4   :  { %2171 = vmatpush.msra.mxu0 %v9181_v8  ;;  %2191 = vmatpush.msra.mxu1 %v9187_v43  ;;  %13215 = vst [vmem:[#allocation52_spill] sm:$0xff] %v9199_v6  ;;  %v9205_v8 = vld [vmem:[%s12792_s8 + $0x1c0] sm:$0xff]  ;;  %v9211_v43 = vld [vmem:[%s12792_s8 + $0x1c8] sm:$0xff] }
0x10a5   :  { %13216 = vst [vmem:[#allocation53_spill] sm:$0xff] %v9205_v8 }
0x10a6   :  { %2172 = vmatpush.msra.mxu0 %v9193_v7  ;;  %2192 = vmatpush.msra.mxu1 %v9199_v6  ;;  %13217 = vst [vmem:[#allocation54_spill] sm:$0xff] %v9211_v43  ;;  %v9217_v7 = vld [vmem:[%s12792_s8 + $0x1b0] sm:$0xff]  ;;  %v9223_v6 = vld [vmem:[%s12792_s8 + $0x1b8] sm:$0xff] }
0x10a7   :  { %13218 = vst [vmem:[#allocation55_spill] sm:$0xff] %v9217_v7 }
0x10a8   :  { %2173 = vmatpush.msra.mxu0 %v9205_v8  ;;  %2193 = vmatpush.msra.mxu1 %v9211_v43  ;;  %13219 = vst [vmem:[#allocation56_spill] sm:$0xff] %v9223_v6  ;;  %v9229_v8 = vld [vmem:[%s12792_s8 + $0x1a0] sm:$0xff]  ;;  %v9235_v43 = vld [vmem:[%s12792_s8 + $0x1a8] sm:$0xff] }
0x10a9   :  { %13220 = vst [vmem:[#allocation57_spill] sm:$0xff] %v9229_v8 }
0x10aa   :  { %2174 = vmatpush.msra.mxu0 %v9217_v7  ;;  %2194 = vmatpush.msra.mxu1 %v9223_v6  ;;  %13221 = vst [vmem:[#allocation58_spill] sm:$0xff] %v9235_v43 }
0x10ac   :  { %2175 = vmatpush.msra.mxu0 %v9229_v8  ;;  %2195 = vmatpush.msra.mxu1 %v9235_v43  ;;  %v9249_v43 = vld [vmem:[%s12789_s6 + $0x60] sm:$0x3] }
0x10ad   :  { %13222 = vst [vmem:[#allocation59_spill] sm:$0xff] %v9249_v43 }
0x10e0   :  { %v1909_v7 = vpop.permute.xlu0 %1908  ;;  %v1911_v47 = vpop.permute.xlu1 %1910 }
0x10e1   :  { %v9239_v6 = vsel %vm626_vm14, %v1909_v7, %v1911_v47  ;;  %v9256_v47 = vld [vmem:[%s12789_s6 + $0x68] sm:$0x3]  ;;  %v9287_v7 = vld [vmem:[%s12789_s6 + $0x30] sm:$0xff] }
0x10e2   :  { %13223 = vst [vmem:[#allocation60_spill] sm:$0xff] %v9256_v47 }
0x10e3   :  { %13228 = vst [vmem:[#allocation65_spill] sm:$0xff] %v9287_v7 }
0x10e8   :  { %v1917_v37 = vpop.permute.xlu0 %1916 }
0x10e9   :  { %v1918_v40 = vsel %vm1328_vm12, %v1915_v32, %v1917_v37  ;;  %v9275_v37 = vld [vmem:[%s12789_s6 + $0x40] sm:$0xff]  ;;  %v9281_v32 = vld [vmem:[%s12789_s6 + $0x48] sm:$0xff] }
0x10ea   :  { %v1920_v27 = vsel %vm502_vm15, %v9239_v6, %v1918_v40  ;;  %v9269_v40 = vld [vmem:[%s12789_s6 + $0x58] sm:$0xff]  ;;  %13226 = vst [vmem:[#allocation63_spill] sm:$0xff] %v9275_v37 }
0x10eb   :  { %5863 = vmatmul.msk.f32.vlgmr.msrb.gmra.mxu0 %vm656_vm3, %v1920_v27  ;;  %5865 = vmatmul.msk.f32.vlgmr.msrb.gmra.mxu1 %vm656_vm3, %v1920_v27  ;;  %v9263_v27 = vld [vmem:[%s12789_s6 + $0x50] sm:$0xff]  ;;  %13225 = vst [vmem:[#allocation62_spill] sm:$0xff] %v9269_v40 }
0x10ec   :  { %5886 = vmatpush.msk.msrb.mxu0 %vm506_vm2, %v9249_v43  ;;  %5888 = vmatpush.msk.msrb.mxu1 %vm506_vm2, %v9256_v47  ;;  %13224 = vst [vmem:[#allocation61_spill] sm:$0xff] %v9263_v27  ;;  %v13236_v47 = vld [vmem:[#allocation3_spill] sm:$0xff] }
0x10ed   :  { %13227 = vst [vmem:[#allocation64_spill] sm:$0xff] %v9281_v32 }
0x10ee   :  { %2398 = vmatpush.msrb.mxu0 %v9263_v27  ;;  %2418 = vmatpush.msrb.mxu1 %v9269_v40  ;;  %v9293_v40 = vld [vmem:[%s12789_s6 + $0x38] sm:$0xff] }
0x10ef   :  { %13229 = vst [vmem:[#allocation66_spill] sm:$0xff] %v9293_v40 }
0x10f0   :  { %2399 = vmatpush.msrb.mxu0 %v9275_v37  ;;  %2419 = vmatpush.msrb.mxu1 %v9281_v32  ;;  %v9299_v37 = vld [vmem:[%s12789_s6 + $0x20] sm:$0xff]  ;;  %v9305_v32 = vld [vmem:[%s12789_s6 + $0x28] sm:$0xff] }
0x10f1   :  { %13230 = vst [vmem:[#allocation67_spill] sm:$0xff] %v9299_v37 }
0x10f2   :  { %2400 = vmatpush.msrb.mxu0 %v9287_v7  ;;  %2420 = vmatpush.msrb.mxu1 %v9293_v40  ;;  %13231 = vst [vmem:[#allocation68_spill] sm:$0xff] %v9305_v32  ;;  %v9311_v7 = vld [vmem:[%s12789_s6 + $0x10] sm:$0xff]  ;;  %v9317_v40 = vld [vmem:[%s12789_s6 + $0x18] sm:$0xff] }
0x10f3   :  { %13232 = vst [vmem:[#allocation69_spill] sm:$0xff] %v9311_v7 }
0x10f4   :  { %2401 = vmatpush.msrb.mxu0 %v9299_v37  ;;  %2421 = vmatpush.msrb.mxu1 %v9305_v32  ;;  %13233 = vst [vmem:[#allocation70_spill] sm:$0xff] %v9317_v40  ;;  %v9323_v37 = vld [vmem:[%s12789_s6] sm:$0xff]  ;;  %v9329_v32 = vld [vmem:[%s12789_s6 + $0x8] sm:$0xff] }
0x10f5   :  { %13234 = vst [vmem:[#allocation71_spill] sm:$0xff] %v9323_v37 }
0x10f6   :  { %2402 = vmatpush.msrb.mxu0 %v9311_v7  ;;  %2422 = vmatpush.msrb.mxu1 %v9317_v40  ;;  %13235 = vst [vmem:[#allocation72_spill] sm:$0xff] %v9329_v32 }
0x10f8   :  { %2403 = vmatpush.msrb.mxu0 %v9323_v37  ;;  %2423 = vmatpush.msrb.mxu1 %v9329_v32  ;;  %v13237_v37 = vld [vmem:[#allocation4_spill] sm:$0xff] }
0x1110   :  { %v9332_v7 = vpop.f32.mrf.mxu1  ;;  %v9336_v8 = vpop.f32.mrf.mxu0 }
0x1168   :  { %v1961_v27 = vpop.f32.mrf.mxu1  ;;  %v1941_v18 = vpop.f32.mrf.mxu0 }
0x1169   :  { %v1962_v43 = vadd.f32 %v1961_v27, %v13236_v47  ;;  %v1942_v52 = vadd.f32 %v1941_v18, %v13237_v37 }
0x116b   :  { %6191 = vtanh.f32 %v1962_v43  ;;  %v5866_v50 = vmul.f32 -1.442695, %v1942_v52 }
0x116d   :  { %6193 = vpow2.f32 %v5866_v50  ;;  %v13239_v50 = vld [vmem:[#allocation7_spill] sm:$0xff] }
0x1171   :  { %v6192_v40 = vpop.eup %6191 }
0x1172   :  { %2005 = vrot.lane.b32.xlu1 %v6192_v40, %s6941_s7 }
0x1173   :  { %v6194_v44 = vpop.eup %6193 }
0x1174   :  { %v1970_v45 = vadd.f32 1.0, %v6194_v44  ;;  %v13238_v44 = vld [vmem:[#allocation6_spill] sm:$0xff] }
0x1176   :  { %6195 = vrcp.f32 %v1970_v45  ;;  %v1983_v27 = vand.u32 2147483648, %v1970_v45  ;;  %vm1977_vm4 = vweird.f32 %v1970_v45  ;;  %v1981_v47 = vand.u32 2147483647, %v1970_v45 }
0x1178   :  { %v1984_v54 = vor.u32 1.1754944e-38, %v1983_v27  ;;  %vm1982_vm6 = vcmp.eq.f32.partialorder %v1981_v47, 8.507059e+37 }
0x117c   :  { %v6196_v32 = vpop.eup %6195 }
0x117d   :  { %v1973_v55 = vmul.f32 %v6196_v32, %v1970_v45  ;;  %vm1978_vm13 = vweird.f32 %v6196_v32 }
0x117e   :  { %vm1979_vm5 = vmor %vm1977_vm4, %vm1978_vm13 }
0x117f   :  { %v1974_v29 = vsub.f32 1.0, %v1973_v55  ;;  %v9344_v55 = vsel %vm1312_vm11, %v13239_v50, %v13238_v44 }
0x1181   :  { %v1975_v36 = vmul.f32 %v6196_v32, %v1974_v29 }
0x1183   :  { %v1976_v15 = vadd.f32 %v6196_v32, %v1975_v36 }
0x1185   :  { %v1980_v40 = vsel %vm1979_vm5, %v6196_v32, %v1976_v15 }
0x1186   :  { %v1985_v18 = vsel %vm1982_vm6, %v1984_v54, %v1980_v40  ;;  %v5867_v54 = vmul.f32 -1.442695, %v1962_v43 }
0x1187   :  { %v2003_v29 = vmul.f32 %v1985_v18, %v9344_v55 }
0x11e4   :  { %v2006_v53 = vpop.permute.xlu1 %2005 }
0x11e5   :  { %v2008_v52 = vmul.f32 %v2006_v53, %v1985_v18 }
0x11e7   :  { %2010 = vrot.lane.b32.xlu2 %v2008_v52, %s6942_s26 }
0x1241   :  { %v2011_v36 = vpop.permute.xlu2 %2010 }
0x1242   :  { %v9347_v37 = vadd.f32 %v2011_v36, %v2003_v29 }
0x1244   :  { %13240 = vst [vmem:[#allocation6_spill] sm:$0xff] %v9347_v37  ;;  %6197 = vtanh.f32 %v9347_v37 }
0x1245   :  { %6199 = vpow2.f32 %v5867_v54 }
0x124a   :  { %v6198_v15 = vpop.eup %6197 }
0x124b   :  { %2016 = vrot.lane.b32.xlu0 %v6198_v15, %s6942_s26  ;;  %v6200_v53 = vpop.eup %6199 }
0x124c   :  { %v1971_v45 = vadd.f32 1.0, %v6200_v53 }
0x124e   :  { %6201 = vrcp.f32 %v1971_v45  ;;  %v1998_v44 = vand.u32 2147483648, %v1971_v45  ;;  %vm1992_vm8 = vweird.f32 %v1971_v45  ;;  %v1996_v50 = vand.u32 2147483647, %v1971_v45 }
0x1250   :  { %v1999_v36 = vor.u32 1.1754944e-38, %v1998_v44  ;;  %vm1997_vm4 = vcmp.eq.f32.partialorder %v1996_v50, 8.507059e+37  ;;  %v13241_v44 = vld [vmem:[#allocation11_spill] sm:$0xff]  ;;  %v13243_v50 = vld [vmem:[#allocation12_spill] sm:$0xff] }
0x1253   :  { %2032 = vrot.lane.b32.xlu0 %v8756_v30, %s6945_s29 }
0x1254   :  { %v6202_v47 = vpop.eup %6201 }
0x1255   :  { %v1988_v32 = vmul.f32 %v6202_v47, %v1971_v45  ;;  %vm1993_vm7 = vweird.f32 %v6202_v47 }
0x1256   :  { %vm1994_vm13 = vmor %vm1992_vm8, %vm1993_vm7 }
0x1257   :  { %v1989_v27 = vsub.f32 1.0, %v1988_v32 }
0x1259   :  { %v1990_v40 = vmul.f32 %v6202_v47, %v1989_v27 }
0x125b   :  { %v1991_v52 = vadd.f32 %v6202_v47, %v1990_v40  ;;  %v9379_v40 = vld [vmem:[%s12792_s8 + $0xc8] sm:$0xf] }
0x125d   :  { %v1995_v29 = vsel %vm1994_vm13, %v6202_v47, %v1991_v52  ;;  %v9387_v52 = vld [vmem:[%s12792_s8 + $0xb8] sm:$0xff] }
0x125e   :  { %v2000_v15 = vsel %vm1997_vm4, %v1999_v36, %v1995_v29  ;;  %v13245_v29 = vld [vmem:[#allocation13_spill] sm:$0xff]  ;;  %v9464_v36 = vld [vmem:[%s12792_s8 + $0x8] sm:$0xff] }
0x125f   :  { %13246 = vst [vmem:[#allocation12_spill] sm:$0xff] %v9464_v36 }
0x12bd   :  { %v2017_v37 = vpop.permute.xlu0 %2016 }
0x12be   :  { %v2019_v43 = vmul.f32 %v2017_v37, %v1985_v18  ;;  %v2020_v54 = vmul.f32 %v2017_v37, %v2000_v15 }
0x12c0   :  { %v9356_v53 = vsel %vm1902_vm9, %v2020_v54, %v8613_v28  ;;  %v9361_v32 = vsel %vm1902_vm9, %v2019_v43, %v8618_v16  ;;  %v13247_v43 = vld [vmem:[#allocation8_spill] sm:$0xff] }
0x12c1   :  { %2028 = vrot.lane.b32.xlu2 %v9356_v53, %s6944_s5  ;;  %2026 = vrot.lane.b32.xlu1 %v9361_v32, %s6944_s5 }
0x12c5   :  { %v2033_v18 = vpop.permute.xlu0 %2032 }
0x12c9   :  { %2034 = vrot.lane.b32.xlu1 %v8751_v41, %s6945_s29 }
0x131b   :  { %v2029_v45 = vpop.permute.xlu2 %2028 }
0x1333   :  { %v2027_v37 = vpop.permute.xlu1 %2026 }
0x1334   :  { %v2030_v28 = vsel %vm626_vm14, %v2027_v37, %v2029_v45 }
0x133b   :  { %v2035_v47 = vpop.permute.xlu1 %2034 }
0x133c   :  { %v2036_v27 = vsel %vm1328_vm12, %v2033_v18, %v2035_v47 }
0x133d   :  { %v2038_v16 = vsel %vm502_vm15, %v2030_v28, %v2036_v27 }
0x133e   :  { %5869 = vmatmul.msk.f32.vlgmr.msra.gmra.mxu3 %vm656_vm3, %v2038_v16  ;;  %5871 = vmatmul.msk.f32.vlgmr.msrb.gmra.mxu2 %vm656_vm3, %v2038_v16 }
0x133f   :  { %5892 = vmatpush.msk.msra.mxu3 %vm184_vm0, %v8634_v61  ;;  %5894 = vmatpush.msk.msrb.mxu2 %vm184_vm0, %v9379_v40  ;;  %v9394_v61 = vld [vmem:[%s12792_s8 + $0xa8] sm:$0xff] }
0x1341   :  { %2517 = vmatpush.msra.mxu3 %v8643_v26  ;;  %2537 = vmatpush.msrb.mxu2 %v9387_v52  ;;  %v9401_v26 = vld [vmem:[%s12792_s8 + $0x98] sm:$0xff] }
0x1343   :  { %2518 = vmatpush.msra.mxu3 %v8650_v22  ;;  %2538 = vmatpush.msrb.mxu2 %v9394_v61  ;;  %v9408_v22 = vld [vmem:[%s12792_s8 + $0x88] sm:$0xff] }
0x1345   :  { %2519 = vmatpush.msra.mxu3 %v8657_v4  ;;  %2539 = vmatpush.msrb.mxu2 %v9401_v26  ;;  %v9415_v4 = vld [vmem:[%s12792_s8 + $0x78] sm:$0xff] }
0x1347   :  { %2520 = vmatpush.msra.mxu3 %v8664_v60  ;;  %2540 = vmatpush.msrb.mxu2 %v9408_v22  ;;  %v9422_v60 = vld [vmem:[%s12792_s8 + $0x68] sm:$0xff] }
0x1349   :  { %2521 = vmatpush.msra.mxu3 %v8671_v33  ;;  %2541 = vmatpush.msrb.mxu2 %v9415_v4  ;;  %v9429_v33 = vld [vmem:[%s12792_s8 + $0x58] sm:$0xff] }
0x134b   :  { %2522 = vmatpush.msra.mxu3 %v8678_v63  ;;  %2542 = vmatpush.msrb.mxu2 %v9422_v60  ;;  %v9436_v63 = vld [vmem:[%s12792_s8 + $0x48] sm:$0xff] }
0x134d   :  { %2523 = vmatpush.msra.mxu3 %v8685_v57  ;;  %2543 = vmatpush.msrb.mxu2 %v9429_v33  ;;  %v9443_v57 = vld [vmem:[%s12792_s8 + $0x38] sm:$0xff] }
0x134f   :  { %2524 = vmatpush.msra.mxu3 %v8692_v62  ;;  %2544 = vmatpush.msrb.mxu2 %v9436_v63  ;;  %v9450_v62 = vld [vmem:[%s12792_s8 + $0x28] sm:$0xff] }
0x1350   :  { %13242 = vst [vmem:[#allocation7_spill] sm:$0xff] %v9450_v62 }
0x1351   :  { %2525 = vmatpush.msra.mxu3 %v8699_v0  ;;  %2545 = vmatpush.msrb.mxu2 %v9443_v57  ;;  %v9457_v0 = vld [vmem:[%s12792_s8 + $0x18] sm:$0xff] }
0x1352   :  { %13244 = vst [vmem:[#allocation11_spill] sm:$0xff] %v9457_v0 }
0x1353   :  { %2526 = vmatpush.msra.mxu3 %v13241_v44  ;;  %2546 = vmatpush.msrb.mxu2 %v9450_v62 }
0x1355   :  { %2527 = vmatpush.msra.mxu3 %v13243_v50  ;;  %2547 = vmatpush.msrb.mxu2 %v9457_v0 }
0x1357   :  { %2528 = vmatpush.msra.mxu3 %v13245_v29  ;;  %2548 = vmatpush.msrb.mxu2 %v9464_v36 }
0x13c1   :  { %v2079_v15 = vpop.f32.mrf.mxu2  ;;  %v2059_v18 = vpop.f32.mrf.mxu3 }
0x13c2   :  { %v2080_v54 = vadd.f32 %v2079_v15, %v13247_v43  ;;  %v2060_v45 = vadd.f32 %v2059_v18, %v13167_v19 }
0x13c4   :  { %6203 = vtanh.f32 %v2080_v54  ;;  %v5872_v47 = vmul.f32 -1.442695, %v2060_v45 }
0x13c6   :  { %6205 = vpow2.f32 %v5872_v47  ;;  %v13248_v47 = vld [vmem:[#allocation14_spill] sm:$0xff] }
0x13ca   :  { %v6204_v37 = vpop.eup %6203 }
0x13cb   :  { %2123 = vrot.lane.b32.xlu2 %v6204_v37, %s6941_s7 }
0x13cc   :  { %v6206_v28 = vpop.eup %6205 }
0x13cd   :  { %v2088_v27 = vadd.f32 1.0, %v6206_v28  ;;  %v13249_v28 = vld [vmem:[#allocation15_spill] sm:$0xff] }
0x13cf   :  { %6207 = vrcp.f32 %v2088_v27  ;;  %v2101_v0 = vand.u32 2147483648, %v2088_v27  ;;  %vm2095_vm6 = vweird.f32 %v2088_v27  ;;  %v2099_v15 = vand.u32 2147483647, %v2088_v27 }
0x13d1   :  { %v2102_v37 = vor.u32 1.1754944e-38, %v2101_v0  ;;  %vm2100_vm8 = vcmp.eq.f32.partialorder %v2099_v15, 8.507059e+37 }
0x13d5   :  { %v6208_v16 = vpop.eup %6207 }
0x13d6   :  { %v2091_v44 = vmul.f32 %v6208_v16, %v2088_v27  ;;  %vm2096_vm5 = vweird.f32 %v6208_v16 }
0x13d7   :  { %vm2097_vm7 = vmor %vm2095_vm6, %vm2096_vm5 }
0x13d8   :  { %v2092_v50 = vsub.f32 1.0, %v2091_v44  ;;  %v9475_v44 = vsel %vm1312_vm11, %v13249_v28, %v13248_v47 }
0x13d9   :  { %13250 = vst [vmem:[#allocation13_spill] sm:$0xff] %v9475_v44 }
0x13da   :  { %v2093_v29 = vmul.f32 %v6208_v16, %v2092_v50 }
0x13dc   :  { %v2094_v36 = vadd.f32 %v6208_v16, %v2093_v29 }
0x13de   :  { %v2098_v43 = vsel %vm2097_vm7, %v6208_v16, %v2094_v36 }
0x13df   :  { %v2103_v18 = vsel %vm2100_vm8, %v2102_v37, %v2098_v43 }
0x13e0   :  { %v2121_v50 = vmul.f32 %v2103_v18, %v9475_v44 }
0x1425   :  { %v2124_v62 = vpop.permute.xlu2 %2123 }
0x1426   :  { %v2126_v45 = vmul.f32 %v2124_v62, %v2103_v18  ;;  %v5873_v62 = vmul.f32 -1.442695, %v2080_v54  ;;  %v13252_v54 = vld [vmem:[#allocation16_spill] sm:$0xff] }
0x1428   :  { %2128 = vrot.lane.b32.xlu0 %v2126_v45, %s6942_s26 }
0x149a   :  { %v2129_v29 = vpop.permute.xlu0 %2128 }
0x149b   :  { %v9478_v19 = vadd.f32 %v2129_v29, %v2121_v50 }
0x149d   :  { %13251 = vst [vmem:[#allocation14_spill] sm:$0xff] %v9478_v19  ;;  %6209 = vtanh.f32 %v9478_v19 }
0x149e   :  { %6211 = vpow2.f32 %v5873_v62  ;;  %v9486_v62 = vadd.f32 %v9332_v7, %v13252_v54 }
0x14a3   :  { %v6210_v0 = vpop.eup %6209 }
0x14a4   :  { %2134 = vrot.lane.b32.xlu1 %v6210_v0, %s6942_s26  ;;  %v6212_v36 = vpop.eup %6211 }
0x14a5   :  { %v2089_v43 = vadd.f32 1.0, %v6212_v36 }
0x14a7   :  { %6213 = vrcp.f32 %v2089_v43  ;;  %v2116_v47 = vand.u32 2147483648, %v2089_v43  ;;  %vm2110_vm4 = vweird.f32 %v2089_v43  ;;  %v2114_v28 = vand.u32 2147483647, %v2089_v43 }
0x14a8   :  { %6215 = vtanh.f32 %v9486_v62 }
0x14a9   :  { %v2117_v29 = vor.u32 1.1754944e-38, %v2116_v47  ;;  %vm2115_vm6 = vcmp.eq.f32.partialorder %v2114_v28, 8.507059e+37 }
0x14ac   :  { %2150 = vrot.lane.b32.xlu1 %v9046_v59, %s6945_s29 }
0x14ad   :  { %v6214_v27 = vpop.eup %6213 }
0x14ae   :  { %v2106_v16 = vmul.f32 %v6214_v27, %v2089_v43  ;;  %vm2111_vm13 = vweird.f32 %v6214_v27  ;;  %v6216_v7 = vpop.eup %6215 }
0x14af   :  { %vm2112_vm5 = vmor %vm2110_vm4, %vm2111_vm13 }
0x14b0   :  { %v2107_v15 = vsub.f32 1.0, %v2106_v16 }
0x14b2   :  { %v2108_v37 = vmul.f32 %v6214_v27, %v2107_v15 }
0x14b4   :  { %v2109_v45 = vadd.f32 %v6214_v27, %v2108_v37 }
0x14b6   :  { %v2113_v50 = vsel %vm2112_vm5, %v6214_v27, %v2109_v45 }
0x14b7   :  { %v2118_v0 = vsel %vm2115_vm6, %v2117_v29, %v2113_v50 }
0x1516   :  { %v2135_v19 = vpop.permute.xlu1 %2134 }
0x1517   :  { %v2137_v36 = vmul.f32 %v2135_v19, %v2103_v18  ;;  %v2138_v44 = vmul.f32 %v2135_v19, %v2118_v0  ;;  %v13253_v19 = vld [vmem:[#allocation17_spill] sm:$0xff] }
0x1519   :  { %v9491_v16 = vsel %vm1902_vm9, %v2138_v44, %v8751_v41  ;;  %v9496_v43 = vsel %vm1902_vm9, %v2137_v36, %v8756_v30  ;;  %v1709_v41 = vadd.f32 %v9336_v8, %v13253_v19 }
0x151a   :  { %2146 = vrot.lane.b32.xlu0 %v9491_v16, %s6944_s5  ;;  %2144 = vrot.lane.b32.xlu2 %v9496_v43, %s6944_s5 }
0x151b   :  { %v5854_v18 = vmul.f32 -1.442695, %v1709_v41 }
0x151d   :  { %6217 = vpow2.f32 %v5854_v18 }
0x151e   :  { %v2151_v50 = vpop.permute.xlu1 %2150 }
0x1522   :  { %1772 = vrot.lane.b32.xlu0 %v6216_v7, %s6941_s7  ;;  %2152 = vrot.lane.b32.xlu2 %v9041_v9, %s6945_s29 }
0x1523   :  { %v6218_v30 = vpop.eup %6217 }
0x1524   :  { %v1737_v44 = vadd.f32 1.0, %v6218_v30 }
0x1526   :  { %6219 = vrcp.f32 %v1737_v44  ;;  %v1750_v41 = vand.u32 2147483648, %v1737_v44  ;;  %vm1744_vm8 = vweird.f32 %v1737_v44  ;;  %v1748_v18 = vand.u32 2147483647, %v1737_v44 }
0x1528   :  { %vm1749_vm4 = vcmp.eq.f32.partialorder %v1748_v18, 8.507059e+37  ;;  %v9668_v18 = vld [vmem:[%s12792_s8 + $0x2a8] sm:$0xff] }
0x1529   :  { %13265 = vst [vmem:[#allocation17_spill] sm:$0xff] %v9668_v18 }
0x152c   :  { %v6220_v27 = vpop.eup %6219 }
0x152d   :  { %v1740_v37 = vmul.f32 %v6220_v27, %v1737_v44  ;;  %vm1745_vm7 = vweird.f32 %v6220_v27 }
0x152e   :  { %vm1746_vm13 = vmor %vm1744_vm8, %vm1745_vm7 }
0x152f   :  { %v1741_v45 = vsub.f32 1.0, %v1740_v37 }
0x1531   :  { %v1742_v47 = vmul.f32 %v6220_v27, %v1741_v45 }
0x1533   :  { %v1743_v7 = vadd.f32 %v6220_v27, %v1742_v47  ;;  %v9614_v47 = vld [vmem:[%s12792_s8 + $0x2e0] sm:$0xff] }
0x1535   :  { %v1747_v30 = vsel %vm1746_vm13, %v6220_v27, %v1743_v7  ;;  %v9608_v27 = vld [vmem:[%s12792_s8 + $0x2f8] sm:$0xff]  ;;  %v9650_v7 = vld [vmem:[%s12792_s8 + $0x2b0] sm:$0xff] }
0x1574   :  { %v2145_v15 = vpop.permute.xlu2 %2144 }
0x157c   :  { %v2153_v28 = vpop.permute.xlu2 %2152 }
0x157d   :  { %v2154_v0 = vsel %vm1328_vm12, %v2151_v50, %v2153_v28  ;;  %v9620_v28 = vld [vmem:[%s12792_s8 + $0x2e8] sm:$0xff]  ;;  %v9626_v50 = vld [vmem:[%s12792_s8 + $0x2d0] sm:$0xff] }
0x158c   :  { %v2147_v29 = vpop.permute.xlu0 %2146 }
0x158d   :  { %v2148_v36 = vsel %vm626_vm14, %v2145_v15, %v2147_v29  ;;  %v1751_v15 = vor.u32 1.1754944e-38, %v1750_v41  ;;  %v9632_v29 = vld [vmem:[%s12792_s8 + $0x2d8] sm:$0xff]  ;;  %v9662_v41 = vld [vmem:[%s12792_s8 + $0x2a0] sm:$0xff] }
0x158e   :  { %v2156_v8 = vsel %vm502_vm15, %v2148_v36, %v2154_v0  ;;  %v9638_v0 = vld [vmem:[%s12792_s8 + $0x2c0] sm:$0xff]  ;;  %v9644_v36 = vld [vmem:[%s12792_s8 + $0x2c8] sm:$0xff]  ;;  %13264 = vst [vmem:[#allocation16_spill] sm:$0xff] %v9662_v41 }
0x158f   :  { %5875 = vmatmul.msk.f32.vlgmr.msra.gmra.mxu0 %vm656_vm3, %v2156_v8  ;;  %5877 = vmatmul.msk.f32.vlgmr.msra.gmra.mxu1 %vm656_vm3, %v2156_v8  ;;  %v9519_v37 = vsel %vm1749_vm4, %v1751_v15, %v1747_v30  ;;  %v9656_v8 = vld [vmem:[%s12792_s8 + $0x2b8] sm:$0xff]  ;;  %v9674_v30 = vld [vmem:[%s12792_s8 + $0x290] sm:$0xff] }
0x1590   :  { %5898 = vmatpush.msk.msra.mxu0 %vm184_vm0, %v8782_v20  ;;  %5900 = vmatpush.msk.msra.mxu1 %vm184_vm0, %v8789_v35  ;;  %v13254_v20 = vld [vmem:[#allocation18_spill] sm:$0xff]  ;;  %v13255_v35 = vld [vmem:[#allocation21_spill] sm:$0xff]  ;;  %13263 = vst [vmem:[#allocation15_spill] sm:$0xff] %v9656_v8 }
0x1591   :  { %13266 = vst [vmem:[#allocation18_spill] sm:$0xff] %v9674_v30  ;;  %v9680_v15 = vld [vmem:[%s12792_s8 + $0x298] sm:$0xff] }
0x1592   :  { %2635 = vmatpush.msra.mxu0 %v8796_v39  ;;  %2655 = vmatpush.msra.mxu1 %v8802_v31  ;;  %v13256_v39 = vld [vmem:[#allocation32_spill] sm:$0xff]  ;;  %v13257_v31 = vld [vmem:[#allocation22_spill] sm:$0xff]  ;;  %13267 = vst [vmem:[#allocation21_spill] sm:$0xff] %v9680_v15 }
0x1594   :  { %v1773_v45 = vpop.permute.xlu0 %1772  ;;  %2636 = vmatpush.msra.mxu0 %v8808_v14  ;;  %2656 = vmatpush.msra.mxu1 %v8814_v17  ;;  %v13258_v14 = vld [vmem:[#allocation34_spill] sm:$0xff]  ;;  %v13259_v17 = vld [vmem:[#allocation23_spill] sm:$0xff] }
0x1595   :  { %v1775_v44 = vmul.f32 %v1773_v45, %v9519_v37  ;;  %v9686_v45 = vld [vmem:[%s12792_s8 + $0x280] sm:$0xff] }
0x1596   :  { %2637 = vmatpush.msra.mxu0 %v8820_v25  ;;  %2657 = vmatpush.msra.mxu1 %v8828_v48  ;;  %v13260_v25 = vld [vmem:[#allocation35_spill] sm:$0xff]  ;;  %v13261_v48 = vld [vmem:[#allocation24_spill] sm:$0xff]  ;;  %13268 = vst [vmem:[#allocation32_spill] sm:$0xff] %v9686_v45 }
0x1597   :  { %1777 = vrot.lane.b32.xlu0 %v1775_v44, %s6942_s26  ;;  %5887 = vmatmul.msk.f32.vlgmr.msrb.gmra.mxu0 %vm502_vm15, %v9239_v6  ;;  %v9692_v44 = vld [vmem:[%s12792_s8 + $0x288] sm:$0xff] }
0x1598   :  { %5889 = vmatmul.msk.f32.vlgmr.msrb.gmra.mxu1 %vm502_vm15, %v9239_v6  ;;  %2638 = vmatpush.msra.mxu0 %v8836_v1  ;;  %v13262_v1 = vld [vmem:[#allocation36_spill] sm:$0xff]  ;;  %v9602_v6 = vld [vmem:[%s12792_s8 + $0x2f0] sm:$0xff]  ;;  %13269 = vst [vmem:[#allocation22_spill] sm:$0xff] %v9692_v44 }
0x1599   :  { %2658 = vmatpush.msra.mxu1 %v8842_v51  ;;  %v9552_v51 = vld [vmem:[%s12792_s8 + $0x330] sm:$0xf] }
0x159a   :  { %2639 = vmatpush.msra.mxu0 %v8848_v24  ;;  %v9559_v24 = vld [vmem:[%s12792_s8 + $0x338] sm:$0xf] }
0x159b   :  { %2659 = vmatpush.msra.mxu1 %v8854_v46  ;;  %v9566_v46 = vld [vmem:[%s12792_s8 + $0x320] sm:$0xff] }
0x159c   :  { %2640 = vmatpush.msra.mxu0 %v8860_v38  ;;  %v9572_v38 = vld [vmem:[%s12792_s8 + $0x328] sm:$0xff] }
0x159d   :  { %2660 = vmatpush.msra.mxu1 %v13254_v20  ;;  %v9698_v20 = vld [vmem:[%s12792_s8 + $0x270] sm:$0xff] }
0x159e   :  { %2641 = vmatpush.msra.mxu0 %v13255_v35  ;;  %13270 = vst [vmem:[#allocation34_spill] sm:$0xff] %v9698_v20  ;;  %v9704_v35 = vld [vmem:[%s12792_s8 + $0x278] sm:$0xff] }
0x159f   :  { %2661 = vmatpush.msra.mxu1 %v13256_v39  ;;  %13271 = vst [vmem:[#allocation23_spill] sm:$0xff] %v9704_v35  ;;  %v9710_v39 = vsel %vm616_vm10, %v8970_v12, 0.0  ;;  %v2385_v12 = vld [vmem:[#allocation2 + $0x38] sm:$0xff]  ;;  %vm2380_vm10 = vcmp.gt.s32.totalorder %v8977_v2, 3 }
0x15a0   :  { %2642 = vmatpush.msra.mxu0 %v13257_v31  ;;  %13272 = vst [vmem:[#allocation35_spill] sm:$0xff] %v9710_v39  ;;  %v1770_v31 = vmul.f32 %v9519_v37, %v9710_v39 }
0x15a1   :  { %2662 = vmatpush.msra.mxu1 %v13258_v14 }
0x15a2   :  { %2643 = vmatpush.msra.mxu0 %v13259_v17 }
0x15a3   :  { %2663 = vmatpush.msra.mxu1 %v13260_v25 }
0x15a4   :  { %2644 = vmatpush.msra.mxu0 %v13261_v48 }
0x15a5   :  { %2664 = vmatpush.msra.mxu1 %v13262_v1 }
0x15a6   :  { %2645 = vmatpush.msra.mxu0 %v8920_v49  ;;  %v9584_v49 = vld [vmem:[%s12792_s8 + $0x318] sm:$0xff] }
0x15a7   :  { %2665 = vmatpush.msra.mxu1 %v8926_v10  ;;  %v9590_v10 = vld [vmem:[%s12792_s8 + $0x300] sm:$0xff] }
0x15a8   :  { %2646 = vmatpush.msra.mxu0 %v8932_v13  ;;  %v9596_v13 = vld [vmem:[%s12792_s8 + $0x308] sm:$0xff] }
0x15a9   :  { %2666 = vmatpush.msra.mxu1 %v8938_v34  ;;  %v9578_v34 = vld [vmem:[%s12792_s8 + $0x310] sm:$0xff] }
0x15aa   :  { %5910 = vmatpush.msk.msrb.mxu0 %vm184_vm0, %v9552_v51 }
0x15ab   :  { %5912 = vmatpush.msk.msrb.mxu1 %vm184_vm0, %v9559_v24 }
0x15ac   :  { %2873 = vmatpush.msrb.mxu0 %v9566_v46 }
0x15ad   :  { %2893 = vmatpush.msrb.mxu1 %v9572_v38 }
0x15ae   :  { %2874 = vmatpush.msrb.mxu0 %v9578_v34 }
0x15af   :  { %2894 = vmatpush.msrb.mxu1 %v9584_v49 }
0x15b0   :  { %2875 = vmatpush.msrb.mxu0 %v9590_v10 }
0x15b1   :  { %2895 = vmatpush.msrb.mxu1 %v9596_v13 }
0x15b2   :  { %2876 = vmatpush.msrb.mxu0 %v9602_v6 }
0x15b3   :  { %2896 = vmatpush.msrb.mxu1 %v9608_v27 }
0x15b4   :  { %2877 = vmatpush.msrb.mxu0 %v9614_v47 }
0x15b5   :  { %2897 = vmatpush.msrb.mxu1 %v9620_v28 }
0x15b6   :  { %2878 = vmatpush.msrb.mxu0 %v9626_v50 }
0x15b7   :  { %2898 = vmatpush.msrb.mxu1 %v9632_v29 }
0x15b8   :  { %2879 = vmatpush.msrb.mxu0 %v9638_v0 }
0x15b9   :  { %2899 = vmatpush.msrb.mxu1 %v9644_v36 }
0x15ba   :  { %2880 = vmatpush.msrb.mxu0 %v9650_v7 }
0x15bb   :  { %2900 = vmatpush.msrb.mxu1 %v9656_v8 }
0x15bc   :  { %2881 = vmatpush.msrb.mxu0 %v9662_v41 }
0x15bd   :  { %2901 = vmatpush.msrb.mxu1 %v9668_v18 }
0x15be   :  { %2882 = vmatpush.msrb.mxu0 %v9674_v30 }
0x15bf   :  { %2902 = vmatpush.msrb.mxu1 %v9680_v15 }
0x15c0   :  { %2883 = vmatpush.msrb.mxu0 %v9686_v45 }
0x15c1   :  { %2903 = vmatpush.msrb.mxu1 %v9692_v44 }
0x15c2   :  { %2884 = vmatpush.msrb.mxu0 %v9698_v20 }
0x15c3   :  { %2904 = vmatpush.msrb.mxu1 %v9704_v35 }
0x1609   :  { %v1778_v14 = vpop.permute.xlu0 %1777 }
0x160a   :  { %v9714_v17 = vadd.f32 %v1778_v14, %v1770_v31  ;;  %v2487_v31 = vsel %vm2380_vm10, 1, %v13182_v21 }
0x160c   :  { %13273 = vst [vmem:[#allocation24_spill] sm:$0xff] %v9714_v17  ;;  %6221 = vtanh.f32 %v9714_v17  ;;  %v2197_v25 = vpop.f32.mrf.mxu1 }
0x160d   :  { %v9718_v48 = vadd.f32 %v2197_v25, %v13183_v23  ;;  %v2177_v25 = vpop.f32.mrf.mxu0 }
0x160e   :  { %v2178_v2 = vadd.f32 %v2177_v25, %v13184_v5 }
0x160f   :  { %6223 = vtanh.f32 %v9718_v48 }
0x1612   :  { %v6222_v1 = vpop.eup %6221 }
0x1613   :  { %1783 = vrot.lane.b32.xlu0 %v6222_v1, %s6942_s26  ;;  %v2384_v1 = vld [vmem:[#allocation2 + $0x30] sm:$0xff] }
0x1615   :  { %v6224_v11 = vpop.eup %6223  ;;  %v2425_v35 = vpop.f32.mrf.mxu1 }
0x1616   :  { %v9723_v39 = vadd.f32 %v2425_v35, %v2385_v12  ;;  %2241 = vrot.lane.b32.xlu1 %v6224_v11, %s6941_s7  ;;  %v2405_v23 = vpop.f32.mrf.mxu0  ;;  %v5878_v12 = vmul.f32 -1.442695, %v2178_v2 }
0x1617   :  { %v2428_v17 = vadd.f32 %v2405_v23, %v2384_v1 }
0x1618   :  { %6225 = vtanh.f32 %v9723_v39 }
0x1619   :  { %v5890_v20 = vmul.f32 -1.442695, %v2428_v17 }
0x161b   :  { %2489 = vperm.xlu0 %6066, %v2487_v31   ;;  %6227 = vpow2.f32 %v5890_v20 }
0x161e   :  { %v6226_v14 = vpop.eup %6225 }
0x161f   :  { %2471 = vrot.lane.b32.xlu2 %v6226_v14, %s6941_s7 }
0x1621   :  { %v6228_v44 = vpop.eup %6227 }
0x1622   :  { %v2436_v35 = vadd.f32 1.0, %v6228_v44 }
0x1624   :  { %6229 = vrcp.f32 %v2436_v35  ;;  %v2449_v23 = vand.u32 2147483648, %v2436_v35  ;;  %vm2443_vm6 = vweird.f32 %v2436_v35  ;;  %v2447_v20 = vand.u32 2147483647, %v2436_v35 }
0x1625   :  { %6231 = vpow2.f32 %v5878_v12 }
0x1626   :  { %v2450_v44 = vor.u32 1.1754944e-38, %v2449_v23  ;;  %vm2448_vm8 = vcmp.eq.f32.partialorder %v2447_v20, 8.507059e+37  ;;  %v5855_v23 = vmul.f32 -1.442695, %v9486_v62 }
0x162a   :  { %v6230_v11 = vpop.eup %6229 }
0x162b   :  { %v6232_v45 = vpop.eup %6231  ;;  %v2439_v21 = vmul.f32 %v6230_v11, %v2436_v35  ;;  %vm2444_vm5 = vweird.f32 %v6230_v11 }
0x162c   :  { %v2206_v31 = vadd.f32 1.0, %v6232_v45  ;;  %vm2445_vm7 = vmor %vm2443_vm6, %vm2444_vm5 }
0x162d   :  { %v2440_v15 = vsub.f32 1.0, %v2439_v21 }
0x162e   :  { %6233 = vrcp.f32 %v2206_v31  ;;  %vm2213_vm4 = vweird.f32 %v2206_v31 }
0x162f   :  { %v2441_v14 = vmul.f32 %v6230_v11, %v2440_v15  ;;  %v2219_v15 = vand.u32 2147483648, %v2206_v31  ;;  %6235 = vpow2.f32 %v5855_v23 }
0x1631   :  { %v2442_v18 = vadd.f32 %v6230_v11, %v2441_v14  ;;  %v2217_v14 = vand.u32 2147483647, %v2206_v31  ;;  %v2220_v35 = vor.u32 1.1754944e-38, %v2219_v15 }
0x1633   :  { %v2446_v25 = vsel %vm2445_vm7, %v6230_v11, %v2442_v18  ;;  %vm2218_vm5 = vcmp.eq.f32.partialorder %v2217_v14, 8.507059e+37 }
0x1634   :  { %v6234_v30 = vpop.eup %6233  ;;  %v2451_v2 = vsel %vm2448_vm8, %v2450_v44, %v2446_v25 }
0x1635   :  { %v2209_v17 = vmul.f32 %v6234_v30, %v2206_v31  ;;  %vm2214_vm13 = vweird.f32 %v6234_v30 }
0x1636   :  { %vm2215_vm10 = vmor %vm2213_vm4, %vm2214_vm13 }
0x1637   :  { %v2210_v12 = vsub.f32 1.0, %v2209_v17 }
0x1639   :  { %v2211_v21 = vmul.f32 %v6234_v30, %v2210_v12 }
0x163b   :  { %v2212_v45 = vadd.f32 %v6234_v30, %v2211_v21 }
0x163d   :  { %v2216_v41 = vsel %vm2215_vm10, %v6234_v30, %v2212_v45  ;;  %v9740_v30 = vsel %vm1902_vm9, %v9033_v58, %v9029_v42 }
0x163e   :  { %v9731_v18 = vsel %vm2218_vm5, %v2220_v35, %v2216_v41  ;;  %v2469_v41 = vmul.f32 %v2451_v2, %v9740_v30 }
0x1679   :  { %v2472_v1 = vpop.permute.xlu2 %2471 }
0x167a   :  { %v2474_v5 = vmul.f32 %v2472_v1, %v2451_v2 }
0x167c   :  { %2476 = vrot.lane.b32.xlu2 %v2474_v5, %s6942_s26  ;;  %v6236_v5 = vpop.eup %6235 }
0x167d   :  { %v1738_v20 = vadd.f32 1.0, %v6236_v5  ;;  %v13276_v5 = vld [vmem:[#allocation37_spill] sm:$0xff] }
0x167f   :  { %6237 = vrcp.f32 %v1738_v20  ;;  %v1765_v12 = vand.u32 2147483648, %v1738_v20  ;;  %vm1759_vm7 = vweird.f32 %v1738_v20  ;;  %v1763_v21 = vand.u32 2147483647, %v1738_v20 }
0x1681   :  { %v1766_v14 = vor.u32 1.1754944e-38, %v1765_v12  ;;  %vm1764_vm13 = vcmp.eq.f32.partialorder %v1763_v21, 8.507059e+37 }
0x1685   :  { %v6238_v17 = vpop.eup %6237  ;;  %v1784_v35 = vpop.permute.xlu0 %1783 }
0x1686   :  { %v1755_v25 = vmul.f32 %v6238_v17, %v1738_v20  ;;  %vm1760_vm6 = vweird.f32 %v6238_v17  ;;  %v13277_v20 = vld [vmem:[#allocation26_spill] sm:$0xff] }
0x1687   :  { %vm1761_vm8 = vmor %vm1759_vm7, %vm1760_vm6 }
0x1688   :  { %v2242_v8 = vpop.permute.xlu1 %2241  ;;  %v1756_v31 = vsub.f32 1.0, %v1755_v25 }
0x1689   :  { %v2244_v11 = vmul.f32 %v2242_v8, %v9731_v18 }
0x168a   :  { %v1757_v44 = vmul.f32 %v6238_v17, %v1756_v31 }
0x168b   :  { %2246 = vrot.lane.b32.xlu1 %v2244_v11, %s6942_s26  ;;  %v13274_v11 = vld [vmem:[#allocation27_spill] sm:$0xff] }
0x168c   :  { %v1758_v62 = vadd.f32 %v6238_v17, %v1757_v44  ;;  %v1786_v44 = vmul.f32 %v1784_v35, %v9519_v37  ;;  %v5879_v37 = vmul.f32 -1.442695, %v9718_v48 }
0x168d   :  { %v9774_v21 = vpop.permute.xlu0 %2489 }
0x168e   :  { %v1762_v15 = vsel %vm1761_vm8, %v6238_v17, %v1758_v62  ;;  %v9758_v17 = vsel %vm1312_vm11, %v13277_v20, %v13276_v5  ;;  %v13279_v62 = vld [vmem:[#allocation25_spill] sm:$0xff]  ;;  %vm2491_vm4 = vcmp.eq.s32.totalorder %v9774_v21, 1  ;;  %v13557_v21 = vmov 0  }
0x168f   :  { %v1767_v42 = vsel %vm1764_vm13, %v1766_v14, %v1762_v15  ;;  %v2239_v25 = vmul.f32 %v9731_v18, %v9758_v17  ;;  %v9770_v12 = vsel %vm1312_vm11, %v1786_v44, %v13279_v62  ;;  %v13280_v14 = vld [vmem:[#allocation29_spill] sm:$0xff] }
0x1690   :  { %v1787_v58 = vmul.f32 %v1784_v35, %v1767_v42  ;;  %v5891_v35 = vmul.f32 -1.442695, %v9723_v39 }
0x1692   :  { %v9750_v23 = vsel %vm1312_vm11, %v1787_v58, %v13274_v11 }
0x1693   :  { %13275 = vst [vmem:[#allocation36_spill] sm:$0xff] %v9750_v23 }
0x16d6   :  { %v2477_v8 = vpop.permute.xlu2 %2476 }
0x16d7   :  { %v9743_v1 = vadd.f32 %v2477_v8, %v2469_v41 }
0x16d9   :  { %6239 = vtanh.f32 %v9743_v1 }
0x16df   :  { %v6240_v45 = vpop.eup %6239 }
0x16e0   :  { %2482 = vrot.lane.b32.xlu2 %v6240_v45, %s6942_s26 }
0x16e8   :  { %2272 = vrot.lane.b32.xlu2 %v9750_v23, %s6945_s29 }
0x16fd   :  { %v2247_v31 = vpop.permute.xlu1 %2246 }
0x16fe   :  { %v9762_v41 = vadd.f32 %v2247_v31, %v2239_v25 }
0x1700   :  { %13278 = vst [vmem:[#allocation27_spill] sm:$0xff] %v9762_v41  ;;  %6241 = vtanh.f32 %v9762_v41 }
0x1701   :  { %6243 = vpow2.f32 %v5879_v37 }
0x1702   :  { %6245 = vpow2.f32 %v5891_v35 }
0x1706   :  { %v6242_v8 = vpop.eup %6241 }
0x1707   :  { %2252 = vrot.lane.b32.xlu1 %v6242_v8, %s6942_s26  ;;  %v6244_v58 = vpop.eup %6243 }
0x1708   :  { %v6246_v11 = vpop.eup %6245 }
0x1709   :  { %v2437_v5 = vadd.f32 1.0, %v6246_v11 }
0x170b   :  { %v2464_v11 = vand.u32 2147483648, %v2437_v5  ;;  %vm2458_vm13 = vweird.f32 %v2437_v5 }
0x170f   :  { %2270 = vrot.lane.b32.xlu1 %v9770_v12, %s6945_s29 }
0x173a   :  { %v2483_v45 = vpop.permute.xlu2 %2482 }
0x173b   :  { %v2485_v15 = vmul.f32 %v2483_v45, %v2451_v2  ;;  %v2207_v2 = vadd.f32 1.0, %v6244_v58 }
0x173d   :  { %v9780_v42 = vsel %vm2491_vm4, %v2485_v15, %v13280_v14  ;;  %6247 = vrcp.f32 %v2207_v2  ;;  %v2234_v48 = vand.u32 2147483648, %v2207_v2  ;;  %vm2228_vm5 = vweird.f32 %v2207_v2 }
0x173e   :  { %13281 = vst [vmem:[#allocation37_spill] sm:$0xff] %v9780_v42  ;;  %2497 = vrot.lane.b32.xlu0 %v9780_v42, %s6944_s5  ;;  %6249 = vrcp.f32 %v2437_v5  ;;  %v2232_v39 = vand.u32 2147483647, %v2207_v2 }
0x173f   :  { %v2235_v58 = vor.u32 1.1754944e-38, %v2234_v48 }
0x1740   :  { %vm2233_vm8 = vcmp.eq.f32.partialorder %v2232_v39, 8.507059e+37  ;;  %v13283_v39 = vld [vmem:[#allocation30_spill] sm:$0xff] }
0x1743   :  { %v6248_v20 = vpop.eup %6247 }
0x1744   :  { %v2224_v25 = vmul.f32 %v6248_v20, %v2207_v2  ;;  %v6250_v31 = vpop.eup %6249  ;;  %vm2229_vm10 = vweird.f32 %v6248_v20 }
0x1745   :  { %v2454_v44 = vmul.f32 %v6250_v31, %v2437_v5  ;;  %vm2230_vm6 = vmor %vm2228_vm5, %vm2229_vm10  ;;  %vm2459_vm7 = vweird.f32 %v6250_v31 }
0x1746   :  { %2505 = vrot.lane.b32.xlu0 %v9356_v53, %s6945_s29  ;;  %v2225_v8 = vsub.f32 1.0, %v2224_v25  ;;  %v2462_v25 = vand.u32 2147483647, %v2437_v5  ;;  %vm2460_vm1 = vmor %vm2458_vm13, %vm2459_vm7 }
0x1747   :  { %v2455_v15 = vsub.f32 1.0, %v2454_v44 }
0x1748   :  { %v2226_v62 = vmul.f32 %v6248_v20, %v2225_v8  ;;  %vm2463_vm10 = vcmp.eq.f32.partialorder %v2462_v25, 8.507059e+37  ;;  %v13286_v25 = vld [vmem:[#allocation5_spill] sm:$0xff] }
0x1749   :  { %v2456_v37 = vmul.f32 %v6250_v31, %v2455_v15  ;;  %v2465_v15 = vor.u32 1.1754944e-38, %v2464_v11  ;;  %v13285_v11 = vld [vmem:[#allocation33_spill] sm:$0xff] }
0x174a   :  { %v2227_v14 = vadd.f32 %v6248_v20, %v2226_v62 }
0x174b   :  { %v2457_v42 = vadd.f32 %v6250_v31, %v2456_v37 }
0x174c   :  { %v2231_v35 = vsel %vm2230_vm6, %v6248_v20, %v2227_v14 }
0x174d   :  { %v2236_v23 = vsel %vm2233_vm8, %v2235_v58, %v2231_v35  ;;  %v2461_v62 = vsel %vm2460_vm1, %v6250_v31, %v2457_v42  ;;  %v13284_v35 = vld [vmem:[#allocation31_spill] sm:$0xff] }
0x1779   :  { %v2253_v41 = vpop.permute.xlu1 %2252 }
0x177a   :  { %v2255_v8 = vmul.f32 %v2253_v41, %v9731_v18  ;;  %v2256_v44 = vmul.f32 %v2253_v41, %v2236_v23  ;;  %v2466_v18 = vsel %vm2463_vm10, %v2465_v15, %v2461_v62  ;;  %v13282_v41 = vld [vmem:[#allocation28_spill] sm:$0xff]  ;;  %v13288_v15 = vld [vmem:[#allocation19_spill] sm:$0xff] }
0x177b   :  { %v2486_v23 = vmul.f32 %v2483_v45, %v2466_v18  ;;  %v13287_v62 = vld [vmem:[#allocation20_spill] sm:$0xff] }
0x177c   :  { %v9792_v2 = vsel %vm1902_vm9, %v2256_v44, %v9041_v9  ;;  %v9797_v20 = vsel %vm1902_vm9, %v2255_v8, %v9046_v59  ;;  %v2273_v59 = vpop.permute.xlu2 %2272 }
0x177d   :  { %2264 = vrot.lane.b32.xlu2 %v9792_v2, %s6944_s5  ;;  %2262 = vrot.lane.b32.xlu1 %v9797_v20, %s6944_s5  ;;  %v9806_v9 = vsel %vm2491_vm4, %v2486_v23, %v13282_v41 }
0x1781   :  { %v2271_v42 = vpop.permute.xlu1 %2270 }
0x1782   :  { %v2274_v48 = vsel %vm1328_vm12, %v2271_v42, %v2273_v59  ;;  %v13289_v59 = vld [vmem:[#allocation10_spill] sm:$0xff] }
0x1783   :  { %v13290_v42 = vld [vmem:[#allocation42_spill] sm:$0xff] }
0x1785   :  { %2503 = vrot.lane.b32.xlu2 %v9361_v32, %s6945_s29  ;;  %2499 = vrot.lane.b32.xlu1 %v9806_v9, %s6944_s5 }
0x17b0   :  { %v2498_v31 = vpop.permute.xlu0 %2497 }
0x17b8   :  { %v2506_v8 = vpop.permute.xlu0 %2505 }
0x17d7   :  { %v2265_v5 = vpop.permute.xlu2 %2264 }
0x17df   :  { %v2504_v58 = vpop.permute.xlu2 %2503 }
0x17e0   :  { %v2507_v18 = vsel %vm1328_vm12, %v2504_v58, %v2506_v8  ;;  %v13299_v58 = vld [vmem:[#allocation49_spill] sm:$0xff]  ;;  %v13302_v8 = vld [vmem:[#allocation52_spill] sm:$0xff] }
0x17ef   :  { %v2263_v14 = vpop.permute.xlu1 %2262 }
0x17f0   :  { %v2266_v45 = vsel %vm626_vm14, %v2263_v14, %v2265_v5  ;;  %v13291_v5 = vld [vmem:[#allocation40_spill] sm:$0xff]  ;;  %v13292_v14 = vld [vmem:[#allocation41_spill] sm:$0xff] }
0x17f1   :  { %v2276_v37 = vsel %vm502_vm15, %v2266_v45, %v2274_v48  ;;  %v13293_v48 = vld [vmem:[#allocation43_spill] sm:$0xff]  ;;  %v13294_v45 = vld [vmem:[#allocation44_spill] sm:$0xff] }
0x17f2   :  { %5881 = vmatmul.msk.f32.vlgmr.msrb.gmra.mxu3 %vm656_vm3, %v2276_v37  ;;  %5883 = vmatmul.msk.f32.vlgmr.msra.gmra.mxu2 %vm656_vm3, %v2276_v37  ;;  %v13296_v37 = vld [vmem:[#allocation46_spill] sm:$0xff] }
0x17f3   :  { %5904 = vmatpush.msk.msrb.mxu3 %vm184_vm0, %v13283_v39  ;;  %5906 = vmatpush.msk.msra.mxu2 %vm184_vm0, %v13284_v35  ;;  %v13297_v39 = vld [vmem:[#allocation47_spill] sm:$0xff]  ;;  %v13298_v35 = vld [vmem:[#allocation48_spill] sm:$0xff] }
0x17f5   :  { %2753 = vmatpush.msrb.mxu3 %v13285_v11  ;;  %2773 = vmatpush.msra.mxu2 %v13286_v25  ;;  %v13300_v11 = vld [vmem:[#allocation50_spill] sm:$0xff]  ;;  %v13301_v25 = vld [vmem:[#allocation51_spill] sm:$0xff] }
0x17f6   :  { %13367 = vst [vmem:[#allocation51_spill] sm:$0xff] %v10263_v3 }
0x17f7   :  { %v2500_v44 = vpop.permute.xlu1 %2499  ;;  %2754 = vmatpush.msrb.mxu3 %v13287_v62  ;;  %2774 = vmatpush.msra.mxu2 %v13288_v15  ;;  %v13304_v62 = vld [vmem:[#allocation54_spill] sm:$0xff]  ;;  %v13305_v15 = vld [vmem:[#allocation55_spill] sm:$0xff] }
0x17f8   :  { %v9827_v23 = vsel %vm626_vm14, %v2498_v31, %v2500_v44  ;;  %v13295_v31 = vld [vmem:[#allocation45_spill] sm:$0xff] }
0x17f9   :  { %v2509_v41 = vsel %vm502_vm15, %v9827_v23, %v2507_v18  ;;  %2755 = vmatpush.msrb.mxu3 %v13289_v59  ;;  %2775 = vmatpush.msra.mxu2 %v13290_v42  ;;  %v13303_v44 = vld [vmem:[#allocation53_spill] sm:$0xff]  ;;  %v13306_v18 = vld [vmem:[#allocation56_spill] sm:$0xff]  ;;  %v13308_v59 = vld [vmem:[#allocation58_spill] sm:$0xff] }
0x17fa   :  { %5893 = vmatmul.msk.f32.vlgmr.msra.gmra.mxu3 %vm656_vm3, %v2509_v41  ;;  %5895 = vmatmul.msk.f32.vlgmr.msrb.gmra.mxu2 %vm656_vm3, %v2509_v41  ;;  %v13307_v41 = vld [vmem:[#allocation57_spill] sm:$0xff]  ;;  %v13309_v42 = vld [vmem:[#allocation59_spill] sm:$0xff] }
0x17fb   :  { %2756 = vmatpush.msrb.mxu3 %v13291_v5  ;;  %2776 = vmatpush.msra.mxu2 %v13292_v14  ;;  %v13310_v5 = vld [vmem:[#allocation60_spill] sm:$0xff]  ;;  %v13311_v14 = vld [vmem:[#allocation61_spill] sm:$0xff] }
0x17fd   :  { %2757 = vmatpush.msrb.mxu3 %v13293_v48  ;;  %2777 = vmatpush.msra.mxu2 %v13294_v45  ;;  %v13312_v48 = vld [vmem:[#allocation62_spill] sm:$0xff]  ;;  %v13313_v45 = vld [vmem:[#allocation63_spill] sm:$0xff] }
0x17ff   :  { %2758 = vmatpush.msrb.mxu3 %v13295_v31  ;;  %2778 = vmatpush.msra.mxu2 %v13296_v37  ;;  %v13314_v31 = vld [vmem:[#allocation64_spill] sm:$0xff]  ;;  %v13315_v37 = vld [vmem:[#allocation65_spill] sm:$0xff] }
0x1801   :  { %2759 = vmatpush.msrb.mxu3 %v13297_v39  ;;  %2779 = vmatpush.msra.mxu2 %v13298_v35  ;;  %v13316_v39 = vld [vmem:[#allocation66_spill] sm:$0xff]  ;;  %v13317_v35 = vld [vmem:[#allocation67_spill] sm:$0xff] }
0x1803   :  { %2760 = vmatpush.msrb.mxu3 %v13299_v58  ;;  %2780 = vmatpush.msra.mxu2 %v13300_v11  ;;  %v13318_v58 = vld [vmem:[#allocation68_spill] sm:$0xff]  ;;  %v13319_v11 = vld [vmem:[#allocation69_spill] sm:$0xff] }
0x1805   :  { %2761 = vmatpush.msrb.mxu3 %v13301_v25  ;;  %2781 = vmatpush.msra.mxu2 %v13302_v8  ;;  %v13320_v25 = vld [vmem:[#allocation70_spill] sm:$0xff]  ;;  %v13321_v8 = vld [vmem:[#allocation71_spill] sm:$0xff] }
0x1807   :  { %2762 = vmatpush.msrb.mxu3 %v13303_v44  ;;  %2782 = vmatpush.msra.mxu2 %v13304_v62  ;;  %v13322_v44 = vld [vmem:[#allocation72_spill] sm:$0xff] }
0x1809   :  { %2763 = vmatpush.msrb.mxu3 %v13305_v15  ;;  %2783 = vmatpush.msra.mxu2 %v13306_v18  ;;  %v13323_v18 = vld [vmem:[#allocation3_spill] sm:$0xff] }
0x180b   :  { %2764 = vmatpush.msrb.mxu3 %v13307_v41  ;;  %2784 = vmatpush.msra.mxu2 %v13308_v59 }
0x180d   :  { %5916 = vmatpush.msk.msra.mxu3 %vm506_vm2, %v13309_v42  ;;  %5918 = vmatpush.msk.msrb.mxu2 %vm506_vm2, %v13310_v5 }
0x180f   :  { %2987 = vmatpush.msra.mxu3 %v13311_v14  ;;  %3007 = vmatpush.msrb.mxu2 %v13312_v48  ;;  %v13324_v14 = vld [vmem:[#allocation4_spill] sm:$0xff] }
0x1811   :  { %2988 = vmatpush.msra.mxu3 %v13313_v45  ;;  %3008 = vmatpush.msrb.mxu2 %v13314_v31 }
0x1813   :  { %2989 = vmatpush.msra.mxu3 %v13315_v37  ;;  %3009 = vmatpush.msrb.mxu2 %v13316_v39 }
0x1815   :  { %2990 = vmatpush.msra.mxu3 %v13317_v35  ;;  %3010 = vmatpush.msrb.mxu2 %v13318_v58 }
0x1817   :  { %2991 = vmatpush.msra.mxu3 %v13319_v11  ;;  %3011 = vmatpush.msrb.mxu2 %v13320_v25 }
0x1819   :  { %2992 = vmatpush.msra.mxu3 %v13321_v8  ;;  %3012 = vmatpush.msrb.mxu2 %v13322_v44 }
0x1875   :  { %v9869_v62 = vpop.f32.mrf.mxu2  ;;  %v9873_v42 = vpop.f32.mrf.mxu3 }
0x187d   :  { %v2550_v15 = vpop.f32.mrf.mxu2  ;;  %v2530_v5 = vpop.f32.mrf.mxu3 }
0x187e   :  { %v2551_v41 = vadd.f32 %v2550_v15, %v13323_v18  ;;  %v2531_v48 = vadd.f32 %v2530_v5, %v13324_v14 }
0x1880   :  { %6251 = vtanh.f32 %v2551_v41  ;;  %v5896_v45 = vmul.f32 -1.442695, %v2531_v48 }
0x1882   :  { %6253 = vpow2.f32 %v5896_v45  ;;  %v13325_v45 = vld [vmem:[#allocation6_spill] sm:$0xff] }
0x1886   :  { %v6252_v59 = vpop.eup %6251 }
0x1887   :  { %2594 = vrot.lane.b32.xlu1 %v6252_v59, %s6941_s7 }
0x1888   :  { %v6254_v31 = vpop.eup %6253 }
0x1889   :  { %v2559_v37 = vadd.f32 1.0, %v6254_v31  ;;  %v9881_v31 = vsel %vm1902_vm9, %v13325_v45, %v9344_v55 }
0x188b   :  { %6255 = vrcp.f32 %v2559_v37  ;;  %v2572_v8 = vand.u32 2147483648, %v2559_v37  ;;  %vm2566_vm5 = vweird.f32 %v2559_v37  ;;  %v2570_v44 = vand.u32 2147483647, %v2559_v37 }
0x188d   :  { %v2573_v59 = vor.u32 1.1754944e-38, %v2572_v8  ;;  %vm2571_vm7 = vcmp.eq.f32.partialorder %v2570_v44, 8.507059e+37 }
0x1891   :  { %v6256_v39 = vpop.eup %6255 }
0x1892   :  { %v2562_v35 = vmul.f32 %v6256_v39, %v2559_v37  ;;  %vm2567_vm1 = vweird.f32 %v6256_v39 }
0x1893   :  { %vm2568_vm6 = vmor %vm2566_vm5, %vm2567_vm1 }
0x1894   :  { %v2563_v58 = vsub.f32 1.0, %v2562_v35 }
0x1896   :  { %v2564_v11 = vmul.f32 %v6256_v39, %v2563_v58 }
0x1898   :  { %v2565_v25 = vadd.f32 %v6256_v39, %v2564_v11 }
0x189a   :  { %v2569_v15 = vsel %vm2568_vm6, %v6256_v39, %v2565_v25 }
0x189b   :  { %v2574_v5 = vsel %vm2571_vm7, %v2573_v59, %v2569_v15 }
0x189c   :  { %v2592_v35 = vmul.f32 %v2574_v5, %v9881_v31 }
0x18f9   :  { %v2595_v18 = vpop.permute.xlu1 %2594 }
0x18fa   :  { %v2597_v48 = vmul.f32 %v2595_v18, %v2574_v5  ;;  %v5897_v18 = vmul.f32 -1.442695, %v2551_v41 }
0x18fc   :  { %2599 = vrot.lane.b32.xlu2 %v2597_v48, %s6942_s26 }
0x1956   :  { %v2600_v58 = vpop.permute.xlu2 %2599 }
0x1957   :  { %v9884_v11 = vadd.f32 %v2600_v58, %v2592_v35 }
0x1959   :  { %13326 = vst [vmem:[#allocation26_spill] sm:$0xff] %v9884_v11  ;;  %6257 = vtanh.f32 %v9884_v11 }
0x195a   :  { %6259 = vpow2.f32 %v5897_v18 }
0x195f   :  { %v6258_v37 = vpop.eup %6257 }
0x1960   :  { %2605 = vrot.lane.b32.xlu0 %v6258_v37, %s6942_s26  ;;  %v6260_v39 = vpop.eup %6259 }
0x1961   :  { %v2560_v25 = vadd.f32 1.0, %v6260_v39 }
0x1963   :  { %6261 = vrcp.f32 %v2560_v25  ;;  %v2587_v48 = vand.u32 2147483648, %v2560_v25  ;;  %vm2581_vm13 = vweird.f32 %v2560_v25  ;;  %v2585_v45 = vand.u32 2147483647, %v2560_v25 }
0x1965   :  { %v2588_v58 = vor.u32 1.1754944e-38, %v2587_v48  ;;  %vm2586_vm1 = vcmp.eq.f32.partialorder %v2585_v45, 8.507059e+37  ;;  %v9930_v48 = vld [vmem:[%s12792_s8 + $0xa0] sm:$0xff] }
0x1966   :  { %v13329_v45 = vld [vmem:[#allocation7_spill] sm:$0xff] }
0x1968   :  { %2621 = vrot.lane.b32.xlu0 %v9496_v43, %s6945_s29 }
0x1969   :  { %v6262_v55 = vpop.eup %6261 }
0x196a   :  { %v2577_v8 = vmul.f32 %v6262_v55, %v2560_v25  ;;  %vm2582_vm8 = vweird.f32 %v6262_v55 }
0x196b   :  { %vm2583_vm10 = vmor %vm2581_vm13, %vm2582_vm8 }
0x196c   :  { %v2578_v44 = vsub.f32 1.0, %v2577_v8 }
0x196e   :  { %v2579_v15 = vmul.f32 %v6262_v55, %v2578_v44 }
0x1970   :  { %v2580_v59 = vadd.f32 %v6262_v55, %v2579_v15  ;;  %v9914_v15 = vld [vmem:[%s12792_s8 + $0xc0] sm:$0xf] }
0x1972   :  { %v2584_v35 = vsel %vm2583_vm10, %v6262_v55, %v2580_v59  ;;  %v9923_v59 = vld [vmem:[%s12792_s8 + $0xb0] sm:$0xff] }
0x1973   :  { %v2589_v37 = vsel %vm2586_vm1, %v2588_v58, %v2584_v35  ;;  %v13331_v35 = vld [vmem:[#allocation11_spill] sm:$0xff]  ;;  %v13333_v58 = vld [vmem:[#allocation12_spill] sm:$0xff] }
0x19d2   :  { %v2606_v11 = vpop.permute.xlu0 %2605 }
0x19d3   :  { %v2608_v41 = vmul.f32 %v2606_v11, %v2574_v5  ;;  %v2609_v18 = vmul.f32 %v2606_v11, %v2589_v37 }
0x19d5   :  { %v9893_v39 = vsel %vm2491_vm4, %v2609_v18, %v9356_v53  ;;  %v9898_v8 = vsel %vm2491_vm4, %v2608_v41, %v9361_v32  ;;  %v13334_v41 = vld [vmem:[#allocation8_spill] sm:$0xff] }
0x19d6   :  { %2617 = vrot.lane.b32.xlu2 %v9893_v39, %s6944_s5  ;;  %2615 = vrot.lane.b32.xlu1 %v9898_v8, %s6944_s5 }
0x19da   :  { %v2622_v11 = vpop.permute.xlu0 %2621 }
0x19de   :  { %2623 = vrot.lane.b32.xlu1 %v9491_v16, %s6945_s29 }
0x1a30   :  { %v2618_v25 = vpop.permute.xlu2 %2617 }
0x1a48   :  { %v2616_v5 = vpop.permute.xlu1 %2615 }
0x1a49   :  { %v2619_v53 = vsel %vm626_vm14, %v2616_v5, %v2618_v25  ;;  %v13335_v25 = vld [vmem:[#allocation9_spill] sm:$0xff] }
0x1a50   :  { %v2624_v55 = vpop.permute.xlu1 %2623 }
0x1a51   :  { %v2625_v44 = vsel %vm1328_vm12, %v2622_v11, %v2624_v55 }
0x1a52   :  { %v2627_v32 = vsel %vm502_vm15, %v2619_v53, %v2625_v44 }
0x1a53   :  { %5899 = vmatmul.msk.f32.vlgmr.msra.gmra.mxu0 %vm656_vm3, %v2627_v32  ;;  %5901 = vmatmul.msk.f32.vlgmr.msra.gmra.mxu1 %vm656_vm3, %v2627_v32 }
0x1a54   :  { %5922 = vmatpush.msk.msra.mxu0 %vm184_vm0, %v9914_v15  ;;  %5924 = vmatpush.msk.msra.mxu1 %vm184_vm0, %v9379_v40  ;;  %v9937_v40 = vld [vmem:[%s12792_s8 + $0x90] sm:$0xff] }
0x1a56   :  { %3106 = vmatpush.msra.mxu0 %v9923_v59  ;;  %3126 = vmatpush.msra.mxu1 %v9387_v52  ;;  %v9944_v52 = vld [vmem:[%s12792_s8 + $0x80] sm:$0xff] }
0x1a58   :  { %3107 = vmatpush.msra.mxu0 %v9930_v48  ;;  %3127 = vmatpush.msra.mxu1 %v9394_v61  ;;  %v9951_v61 = vld [vmem:[%s12792_s8 + $0x70] sm:$0xff] }
0x1a5a   :  { %3108 = vmatpush.msra.mxu0 %v9937_v40  ;;  %3128 = vmatpush.msra.mxu1 %v9401_v26  ;;  %v9958_v26 = vld [vmem:[%s12792_s8 + $0x60] sm:$0xff] }
0x1a5c   :  { %3109 = vmatpush.msra.mxu0 %v9944_v52  ;;  %3129 = vmatpush.msra.mxu1 %v9408_v22  ;;  %v9965_v22 = vld [vmem:[%s12792_s8 + $0x50] sm:$0xff] }
0x1a5e   :  { %3110 = vmatpush.msra.mxu0 %v9951_v61  ;;  %3130 = vmatpush.msra.mxu1 %v9415_v4  ;;  %v9972_v4 = vld [vmem:[%s12792_s8 + $0x40] sm:$0xff] }
0x1a60   :  { %3111 = vmatpush.msra.mxu0 %v9958_v26  ;;  %3131 = vmatpush.msra.mxu1 %v9422_v60  ;;  %v9979_v60 = vld [vmem:[%s12792_s8 + $0x30] sm:$0xff] }
0x1a61   :  { %13327 = vst [vmem:[#allocation25_spill] sm:$0xff] %v9979_v60 }
0x1a62   :  { %3112 = vmatpush.msra.mxu0 %v9965_v22  ;;  %3132 = vmatpush.msra.mxu1 %v9429_v33  ;;  %v9986_v33 = vld [vmem:[%s12792_s8 + $0x20] sm:$0xff] }
0x1a63   :  { %13328 = vst [vmem:[#allocation29_spill] sm:$0xff] %v9986_v33 }
0x1a64   :  { %3113 = vmatpush.msra.mxu0 %v9972_v4  ;;  %3133 = vmatpush.msra.mxu1 %v9436_v63  ;;  %v9993_v63 = vld [vmem:[%s12792_s8 + $0x10] sm:$0xff] }
0x1a65   :  { %13330 = vst [vmem:[#allocation28_spill] sm:$0xff] %v9993_v63 }
0x1a66   :  { %3114 = vmatpush.msra.mxu0 %v9979_v60  ;;  %3134 = vmatpush.msra.mxu1 %v9443_v57  ;;  %v10000_v57 = vld [vmem:[%s12792_s8] sm:$0xff] }
0x1a67   :  { %13332 = vst [vmem:[#allocation30_spill] sm:$0xff] %v10000_v57 }
0x1a68   :  { %3115 = vmatpush.msra.mxu0 %v9986_v33  ;;  %3135 = vmatpush.msra.mxu1 %v13329_v45 }
0x1a6a   :  { %3116 = vmatpush.msra.mxu0 %v9993_v63  ;;  %3136 = vmatpush.msra.mxu1 %v13331_v35 }
0x1a6c   :  { %3117 = vmatpush.msra.mxu0 %v10000_v57  ;;  %3137 = vmatpush.msra.mxu1 %v13333_v58 }
0x1ad0   :  { %v2668_v37 = vpop.f32.mrf.mxu1  ;;  %v2648_v11 = vpop.f32.mrf.mxu0 }
0x1ad1   :  { %v2669_v18 = vadd.f32 %v2668_v37, %v13334_v41  ;;  %v2649_v55 = vadd.f32 %v2648_v11, %v13335_v25 }
0x1ad3   :  { %6263 = vtanh.f32 %v2669_v18  ;;  %v5902_v53 = vmul.f32 -1.442695, %v2649_v55 }
0x1ad5   :  { %6265 = vpow2.f32 %v5902_v53  ;;  %v13336_v53 = vld [vmem:[#allocation13_spill] sm:$0xff] }
0x1ad9   :  { %v6264_v5 = vpop.eup %6263 }
0x1ada   :  { %2712 = vrot.lane.b32.xlu2 %v6264_v5, %s6941_s7 }
0x1adb   :  { %v6266_v44 = vpop.eup %6265 }
0x1adc   :  { %v2677_v32 = vadd.f32 1.0, %v6266_v44  ;;  %v13337_v44 = vld [vmem:[#allocation14_spill] sm:$0xff] }
0x1ade   :  { %6267 = vrcp.f32 %v2677_v32  ;;  %v2690_v33 = vand.u32 2147483648, %v2677_v32  ;;  %vm2684_vm6 = vweird.f32 %v2677_v32  ;;  %v2688_v37 = vand.u32 2147483647, %v2677_v32 }
0x1ae0   :  { %v2691_v5 = vor.u32 1.1754944e-38, %v2690_v33  ;;  %vm2689_vm8 = vcmp.eq.f32.partialorder %v2688_v37, 8.507059e+37 }
0x1ae4   :  { %v6268_v45 = vpop.eup %6267 }
0x1ae5   :  { %v2680_v35 = vmul.f32 %v6268_v45, %v2677_v32  ;;  %vm2685_vm5 = vweird.f32 %v6268_v45 }
0x1ae6   :  { %vm2686_vm7 = vmor %vm2684_vm6, %vm2685_vm5 }
0x1ae7   :  { %v2681_v57 = vsub.f32 1.0, %v2680_v35  ;;  %v10012_v35 = vsel %vm1902_vm9, %v13337_v44, %v13336_v53 }
0x1ae9   :  { %v2682_v63 = vmul.f32 %v6268_v45, %v2681_v57 }
0x1aeb   :  { %v2683_v58 = vadd.f32 %v6268_v45, %v2682_v63 }
0x1aed   :  { %v2687_v41 = vsel %vm2686_vm7, %v6268_v45, %v2683_v58 }
0x1aee   :  { %v2692_v11 = vsel %vm2689_vm8, %v2691_v5, %v2687_v41 }
0x1aef   :  { %v2710_v63 = vmul.f32 %v2692_v11, %v10012_v35 }
0x1b34   :  { %v2713_v60 = vpop.permute.xlu2 %2712 }
0x1b35   :  { %v2715_v55 = vmul.f32 %v2713_v60, %v2692_v11  ;;  %v5903_v60 = vmul.f32 -1.442695, %v2669_v18  ;;  %v10023_v18 = vadd.f32 %v9869_v62, %v13252_v54 }
0x1b37   :  { %2717 = vrot.lane.b32.xlu0 %v2715_v55, %s6942_s26 }
0x1ba9   :  { %v2718_v57 = vpop.permute.xlu0 %2717 }
0x1baa   :  { %v10015_v25 = vadd.f32 %v2718_v57, %v2710_v63 }
0x1bac   :  { %13338 = vst [vmem:[#allocation31_spill] sm:$0xff] %v10015_v25  ;;  %6269 = vtanh.f32 %v10015_v25 }
0x1bad   :  { %6271 = vpow2.f32 %v5903_v60 }
0x1bb2   :  { %v6270_v33 = vpop.eup %6269 }
0x1bb3   :  { %2723 = vrot.lane.b32.xlu1 %v6270_v33, %s6942_s26  ;;  %v6272_v41 = vpop.eup %6271 }
0x1bb4   :  { %v2678_v32 = vadd.f32 1.0, %v6272_v41 }
0x1bb6   :  { %6273 = vrcp.f32 %v2678_v32  ;;  %v2705_v53 = vand.u32 2147483648, %v2678_v32  ;;  %vm2699_vm10 = vweird.f32 %v2678_v32  ;;  %v2703_v44 = vand.u32 2147483647, %v2678_v32 }
0x1bb7   :  { %6275 = vtanh.f32 %v10023_v18 }
0x1bb8   :  { %v2706_v57 = vor.u32 1.1754944e-38, %v2705_v53  ;;  %vm2704_vm5 = vcmp.eq.f32.partialorder %v2703_v44, 8.507059e+37 }
0x1bbb   :  { %2739 = vrot.lane.b32.xlu1 %v9797_v20, %s6945_s29 }
0x1bbc   :  { %v6274_v45 = vpop.eup %6273 }
0x1bbd   :  { %v2695_v58 = vmul.f32 %v6274_v45, %v2678_v32  ;;  %vm2700_vm13 = vweird.f32 %v6274_v45  ;;  %v6276_v62 = vpop.eup %6275 }
0x1bbe   :  { %vm2701_vm1 = vmor %vm2699_vm10, %vm2700_vm13 }
0x1bbf   :  { %v2696_v37 = vsub.f32 1.0, %v2695_v58 }
0x1bc1   :  { %v2697_v5 = vmul.f32 %v6274_v45, %v2696_v37 }
0x1bc3   :  { %v2698_v55 = vadd.f32 %v6274_v45, %v2697_v5 }
0x1bc5   :  { %v2702_v63 = vsel %vm2701_vm1, %v6274_v45, %v2698_v55 }
0x1bc6   :  { %v2707_v33 = vsel %vm2704_vm5, %v2706_v57, %v2702_v63 }
0x1c25   :  { %v2724_v25 = vpop.permute.xlu1 %2723 }
0x1c26   :  { %v2726_v60 = vmul.f32 %v2724_v25, %v2692_v11  ;;  %v2727_v41 = vmul.f32 %v2724_v25, %v2707_v33 }
0x1c28   :  { %v10028_v58 = vsel %vm2491_vm4, %v2727_v41, %v9491_v16  ;;  %v10033_v32 = vsel %vm2491_vm4, %v2726_v60, %v9496_v43  ;;  %v2298_v16 = vadd.f32 %v9873_v42, %v13253_v19 }
0x1c29   :  { %2735 = vrot.lane.b32.xlu0 %v10028_v58, %s6944_s5  ;;  %2733 = vrot.lane.b32.xlu2 %v10033_v32, %s6944_s5 }
0x1c2a   :  { %v5884_v25 = vmul.f32 -1.442695, %v2298_v16 }
0x1c2c   :  { %6277 = vpow2.f32 %v5884_v25  ;;  %v10053_v25 = vld [vmem:[%s12792_s8 + $0x190] sm:$0xf] }
0x1c2d   :  { %v2740_v63 = vpop.permute.xlu1 %2739 }
0x1c31   :  { %2361 = vrot.lane.b32.xlu0 %v6276_v62, %s6941_s7  ;;  %2741 = vrot.lane.b32.xlu2 %v9792_v2, %s6945_s29 }
0x1c32   :  { %v6278_v43 = vpop.eup %6277 }
0x1c33   :  { %v2326_v11 = vadd.f32 1.0, %v6278_v43  ;;  %v10060_v43 = vld [vmem:[%s12792_s8 + $0x198] sm:$0xf] }
0x1c35   :  { %6279 = vrcp.f32 %v2326_v11  ;;  %v2339_v62 = vand.u32 2147483648, %v2326_v11  ;;  %vm2333_vm7 = vweird.f32 %v2326_v11  ;;  %v2337_v16 = vand.u32 2147483647, %v2326_v11 }
0x1c37   :  { %vm2338_vm13 = vcmp.eq.f32.partialorder %v2337_v16, 8.507059e+37  ;;  %v10135_v16 = vld [vmem:[%s12792_s8 + $0x130] sm:$0xff] }
0x1c38   :  { %13339 = vst [vmem:[#allocation33_spill] sm:$0xff] %v10135_v16 }
0x1c3b   :  { %v6280_v45 = vpop.eup %6279 }
0x1c3c   :  { %v2329_v5 = vmul.f32 %v6280_v45, %v2326_v11  ;;  %vm2334_vm6 = vweird.f32 %v6280_v45  ;;  %v10067_v11 = vld [vmem:[%s12792_s8 + $0x180] sm:$0xff] }
0x1c3d   :  { %vm2335_vm8 = vmor %vm2333_vm7, %vm2334_vm6 }
0x1c3e   :  { %v2330_v55 = vsub.f32 1.0, %v2329_v5  ;;  %v2340_v5 = vor.u32 1.1754944e-38, %v2339_v62  ;;  %v10123_v62 = vld [vmem:[%s12792_s8 + $0x140] sm:$0xff] }
0x1c40   :  { %v2331_v53 = vmul.f32 %v6280_v45, %v2330_v55  ;;  %v10073_v55 = vld [vmem:[%s12792_s8 + $0x188] sm:$0xff] }
0x1c42   :  { %v2332_v41 = vadd.f32 %v6280_v45, %v2331_v53 }
0x1c83   :  { %v2734_v37 = vpop.permute.xlu2 %2733 }
0x1c8b   :  { %v2742_v44 = vpop.permute.xlu2 %2741 }
0x1c8c   :  { %v2743_v33 = vsel %vm1328_vm12, %v2740_v63, %v2742_v44  ;;  %v10087_v63 = vld [vmem:[%s12792_s8 + $0x178] sm:$0xff] }
0x1c9b   :  { %v2736_v57 = vpop.permute.xlu0 %2735 }
0x1c9c   :  { %v2737_v60 = vsel %vm626_vm14, %v2734_v37, %v2736_v57  ;;  %v2336_v37 = vsel %vm2335_vm8, %v6280_v45, %v2332_v41  ;;  %v10081_v45 = vld [vmem:[%s12792_s8 + $0x170] sm:$0xff] }
0x1c9d   :  { %v2745_v42 = vsel %vm502_vm15, %v2737_v60, %v2743_v33  ;;  %v10076_v53 = vsel %vm2338_vm13, %v2340_v5, %v2336_v37  ;;  %v10094_v33 = vld [vmem:[%s12792_s8 + $0x160] sm:$0xff]  ;;  %v10100_v60 = vld [vmem:[%s12792_s8 + $0x168] sm:$0xff]  ;;  %v10111_v41 = vld [vmem:[%s12792_s8 + $0x150] sm:$0xff] }
0x1c9e   :  { %5905 = vmatmul.msk.f32.vlgmr.msrb.gmra.mxu3 %vm656_vm3, %v2745_v42  ;;  %5907 = vmatmul.msk.f32.vlgmr.msra.gmra.mxu2 %vm656_vm3, %v2745_v42  ;;  %v10117_v42 = vld [vmem:[%s12792_s8 + $0x158] sm:$0xff]  ;;  %v10147_v5 = vld [vmem:[%s12792_s8 + $0x120] sm:$0xff] }
0x1c9f   :  { %5928 = vmatpush.msk.msrb.mxu3 %vm184_vm0, %v10053_v25  ;;  %5930 = vmatpush.msk.msra.mxu2 %vm184_vm0, %v10060_v43  ;;  %v10141_v37 = vld [vmem:[%s12792_s8 + $0x138] sm:$0xff]  ;;  %13341 = vst [vmem:[#allocation20_spill] sm:$0xff] %v10147_v5 }
0x1ca0   :  { %13340 = vst [vmem:[#allocation5_spill] sm:$0xff] %v10141_v37 }
0x1ca1   :  { %3224 = vmatpush.msrb.mxu3 %v10067_v11  ;;  %3244 = vmatpush.msra.mxu2 %v10073_v55 }
0x1ca3   :  { %v2362_v44 = vpop.permute.xlu0 %2361  ;;  %3225 = vmatpush.msrb.mxu3 %v10081_v45  ;;  %3245 = vmatpush.msra.mxu2 %v10087_v63 }
0x1ca4   :  { %v2364_v57 = vmul.f32 %v2362_v44, %v10076_v53  ;;  %v10153_v44 = vld [vmem:[%s12792_s8 + $0x128] sm:$0xff] }
0x1ca5   :  { %3226 = vmatpush.msrb.mxu3 %v10094_v33  ;;  %3246 = vmatpush.msra.mxu2 %v10100_v60  ;;  %13342 = vst [vmem:[#allocation19_spill] sm:$0xff] %v10153_v44 }
0x1ca6   :  { %2366 = vrot.lane.b32.xlu0 %v2364_v57, %s6942_s26  ;;  %5917 = vmatmul.msk.f32.vlgmr.msra.gmra.mxu3 %vm502_vm15, %v9827_v23  ;;  %v10159_v57 = vld [vmem:[%s12792_s8 + $0x110] sm:$0xff] }
0x1ca7   :  { %5919 = vmatmul.msk.f32.vlgmr.msrb.gmra.mxu2 %vm502_vm15, %v9827_v23  ;;  %3227 = vmatpush.msrb.mxu3 %v10111_v41  ;;  %v10129_v23 = vld [vmem:[%s12792_s8 + $0x148] sm:$0xff]  ;;  %13343 = vst [vmem:[#allocation10_spill] sm:$0xff] %v10159_v57 }
0x1ca8   :  { %3247 = vmatpush.msra.mxu2 %v10117_v42 }
0x1ca9   :  { %3228 = vmatpush.msrb.mxu3 %v10123_v62 }
0x1caa   :  { %3248 = vmatpush.msra.mxu2 %v10129_v23 }
0x1cab   :  { %3229 = vmatpush.msrb.mxu3 %v10135_v16 }
0x1cac   :  { %3249 = vmatpush.msra.mxu2 %v10141_v37  ;;  %v10165_v37 = vld [vmem:[%s12792_s8 + $0x118] sm:$0xff] }
0x1cad   :  { %3230 = vmatpush.msrb.mxu3 %v10147_v5  ;;  %13344 = vst [vmem:[#allocation42_spill] sm:$0xff] %v10165_v37  ;;  %v10171_v5 = vld [vmem:[%s12792_s8 + $0x100] sm:$0xff] }
0x1cae   :  { %3250 = vmatpush.msra.mxu2 %v10153_v44  ;;  %13345 = vst [vmem:[#allocation40_spill] sm:$0xff] %v10171_v5  ;;  %v10177_v44 = vld [vmem:[%s12792_s8 + $0x108] sm:$0xff] }
0x1caf   :  { %3231 = vmatpush.msrb.mxu3 %v10159_v57  ;;  %13346 = vst [vmem:[#allocation41_spill] sm:$0xff] %v10177_v44  ;;  %v10183_v57 = vld [vmem:[%s12792_s8 + $0xf0] sm:$0xff] }
0x1cb0   :  { %3251 = vmatpush.msra.mxu2 %v10165_v37  ;;  %13347 = vst [vmem:[#allocation43_spill] sm:$0xff] %v10183_v57  ;;  %v10189_v37 = vld [vmem:[%s12792_s8 + $0xf8] sm:$0xff] }
0x1cb1   :  { %3232 = vmatpush.msrb.mxu3 %v10171_v5  ;;  %13348 = vst [vmem:[#allocation44_spill] sm:$0xff] %v10189_v37  ;;  %v10195_v5 = vld [vmem:[%s12792_s8 + $0xe0] sm:$0xff] }
0x1cb2   :  { %3252 = vmatpush.msra.mxu2 %v10177_v44  ;;  %13349 = vst [vmem:[#allocation45_spill] sm:$0xff] %v10195_v5  ;;  %v10201_v44 = vld [vmem:[%s12792_s8 + $0xe8] sm:$0xff] }
0x1cb3   :  { %3233 = vmatpush.msrb.mxu3 %v10183_v57  ;;  %13350 = vst [vmem:[#allocation46_spill] sm:$0xff] %v10201_v44  ;;  %v10207_v57 = vld [vmem:[%s12792_s8 + $0xd0] sm:$0xff] }
0x1cb4   :  { %3253 = vmatpush.msra.mxu2 %v10189_v37  ;;  %13351 = vst [vmem:[#allocation47_spill] sm:$0xff] %v10207_v57  ;;  %v10213_v37 = vld [vmem:[%s12792_s8 + $0xd8] sm:$0xff] }
0x1cb5   :  { %3234 = vmatpush.msrb.mxu3 %v10195_v5  ;;  %13352 = vst [vmem:[#allocation48_spill] sm:$0xff] %v10213_v37 }
0x1cb6   :  { %3254 = vmatpush.msra.mxu2 %v10201_v44 }
0x1cb7   :  { %3235 = vmatpush.msrb.mxu3 %v10207_v57 }
0x1cb8   :  { %3255 = vmatpush.msra.mxu2 %v10213_v37 }
0x1cb9   :  { %5940 = vmatpush.msk.msra.mxu3 %vm184_vm0, %v9552_v51  ;;  %v13353_v51 = vld [vmem:[#allocation15_spill] sm:$0xff] }
0x1cba   :  { %5942 = vmatpush.msk.msrb.mxu2 %vm184_vm0, %v9559_v24  ;;  %v13354_v24 = vld [vmem:[#allocation16_spill] sm:$0xff] }
0x1cbb   :  { %3462 = vmatpush.msra.mxu3 %v9566_v46  ;;  %v13355_v46 = vld [vmem:[#allocation17_spill] sm:$0xff] }
0x1cbc   :  { %3482 = vmatpush.msrb.mxu2 %v9572_v38  ;;  %v13356_v38 = vld [vmem:[#allocation18_spill] sm:$0xff] }
0x1cbd   :  { %3463 = vmatpush.msra.mxu3 %v9578_v34  ;;  %v13357_v34 = vld [vmem:[#allocation21_spill] sm:$0xff] }
0x1cbe   :  { %3483 = vmatpush.msrb.mxu2 %v9584_v49  ;;  %v13358_v49 = vld [vmem:[#allocation32_spill] sm:$0xff] }
0x1cbf   :  { %3464 = vmatpush.msra.mxu3 %v9590_v10  ;;  %v13359_v10 = vld [vmem:[#allocation22_spill] sm:$0xff] }
0x1cc0   :  { %3484 = vmatpush.msrb.mxu2 %v9596_v13  ;;  %v13360_v13 = vld [vmem:[#allocation34_spill] sm:$0xff] }
0x1cc1   :  { %3465 = vmatpush.msra.mxu3 %v9602_v6  ;;  %v13361_v6 = vld [vmem:[#allocation23_spill] sm:$0xff] }
0x1cc2   :  { %3485 = vmatpush.msrb.mxu2 %v9608_v27  ;;  %v13362_v27 = vld [vmem:[#allocation35_spill] sm:$0xff] }
0x1cc3   :  { %3466 = vmatpush.msra.mxu3 %v9614_v47  ;;  %v13363_v47 = vld [vmem:[#allocation24_spill] sm:$0xff] }
0x1cc4   :  { %3486 = vmatpush.msrb.mxu2 %v9620_v28  ;;  %v10248_v28 = vsel %vm1312_vm11, %v13363_v47, %v13362_v27  ;;  %vm2969_vm11 = vcmp.gt.s32.totalorder %v10263_v3, 4 }
0x1cc5   :  { %3467 = vmatpush.msra.mxu3 %v9626_v50  ;;  %13364 = vst [vmem:[#allocation49_spill] sm:$0xff] %v10248_v28  ;;  %v2359_v50 = vmul.f32 %v10076_v53, %v10248_v28 }
0x1cc6   :  { %3487 = vmatpush.msrb.mxu2 %v9632_v29 }
0x1cc7   :  { %3468 = vmatpush.msra.mxu3 %v9638_v0 }
0x1cc8   :  { %3488 = vmatpush.msrb.mxu2 %v9644_v36 }
0x1cc9   :  { %3469 = vmatpush.msra.mxu3 %v9650_v7 }
0x1cca   :  { %3489 = vmatpush.msrb.mxu2 %v13353_v51  ;;  %v13366_v51 = vld [vmem:[#allocation38_spill] sm:$0xff] }
0x1ccb   :  { %3470 = vmatpush.msra.mxu3 %v13354_v24 }
0x1ccc   :  { %3490 = vmatpush.msrb.mxu2 %v13355_v46  ;;  %v13368_v46 = vmov 0  }
0x1ccd   :  { %3471 = vmatpush.msra.mxu3 %v13356_v38  ;;  %v3076_v38 = vsel %vm2969_vm11, 1, %v13368_v46 }
0x1cce   :  { %3491 = vmatpush.msrb.mxu2 %v13357_v34 }
0x1ccf   :  { %3472 = vmatpush.msra.mxu3 %v13358_v49  ;;  %v2974_v49 = vld [vmem:[#allocation2 + $0x48] sm:$0xff] }
0x1cd0   :  { %3492 = vmatpush.msrb.mxu2 %v13359_v10 }
0x1cd1   :  { %3473 = vmatpush.msra.mxu3 %v13360_v13 }
0x1cd2   :  { %3493 = vmatpush.msrb.mxu2 %v13361_v6 }
0x1d18   :  { %v2367_v29 = vpop.permute.xlu0 %2366 }
0x1d19   :  { %v10252_v0 = vadd.f32 %v2367_v29, %v2359_v50  ;;  %v2973_v50 = vld [vmem:[#allocation2 + $0x40] sm:$0xff] }
0x1d1b   :  { %13365 = vst [vmem:[#allocation50_spill] sm:$0xff] %v10252_v0  ;;  %6281 = vtanh.f32 %v10252_v0 }
0x1d21   :  { %v6282_v36 = vpop.eup %6281  ;;  %v2786_v7 = vpop.f32.mrf.mxu2 }
0x1d22   :  { %v10256_v24 = vadd.f32 %v2786_v7, %v13366_v51  ;;  %2372 = vrot.lane.b32.xlu0 %v6282_v36, %s6942_s26  ;;  %v2766_v27 = vpop.f32.mrf.mxu3  ;;  %v5885_v7 = vmul.f32 -1.442695, %v10023_v18 }
0x1d24   :  { %6283 = vtanh.f32 %v10256_v24 }
0x1d2a   :  { %v6284_v34 = vpop.eup %6283  ;;  %v3014_v10 = vpop.f32.mrf.mxu2  ;;  %3078 = vperm.xlu0 %6066, %v3076_v38   ;;  %v13369_v38 = vld [vmem:[#allocation39_spill] sm:$0xff] }
0x1d2b   :  { %v10267_v13 = vadd.f32 %v3014_v10, %v2974_v49  ;;  %2830 = vrot.lane.b32.xlu1 %v6284_v34, %s6941_s7  ;;  %v2994_v47 = vpop.f32.mrf.mxu3  ;;  %v2767_v49 = vadd.f32 %v2766_v27, %v13369_v38 }
0x1d2c   :  { %v3017_v29 = vadd.f32 %v2994_v47, %v2973_v50 }
0x1d2d   :  { %6285 = vtanh.f32 %v10267_v13  ;;  %v5908_v46 = vmul.f32 -1.442695, %v2767_v49 }
0x1d2e   :  { %v5920_v36 = vmul.f32 -1.442695, %v3017_v29 }
0x1d30   :  { %6287 = vpow2.f32 %v5920_v36 }
0x1d31   :  { %6289 = vpow2.f32 %v5885_v7 }
0x1d33   :  { %v6286_v6 = vpop.eup %6285 }
0x1d34   :  { %3060 = vrot.lane.b32.xlu2 %v6286_v6, %s6941_s7 }
0x1d36   :  { %v6288_v51 = vpop.eup %6287 }
0x1d37   :  { %v3025_v10 = vadd.f32 1.0, %v6288_v51  ;;  %v6290_v34 = vpop.eup %6289 }
0x1d38   :  { %v2327_v3 = vadd.f32 1.0, %v6290_v34 }
0x1d39   :  { %6291 = vrcp.f32 %v3025_v10  ;;  %v3038_v51 = vand.u32 2147483648, %v3025_v10  ;;  %vm3032_vm1 = vweird.f32 %v3025_v10  ;;  %v3036_v27 = vand.u32 2147483647, %v3025_v10 }
0x1d3a   :  { %6293 = vpow2.f32 %v5908_v46  ;;  %v2354_v5 = vand.u32 2147483648, %v2327_v3  ;;  %vm2348_vm8 = vweird.f32 %v2327_v3 }
0x1d3b   :  { %6295 = vrcp.f32 %v2327_v3  ;;  %v3039_v38 = vor.u32 1.1754944e-38, %v3038_v51  ;;  %vm3037_vm6 = vcmp.eq.f32.partialorder %v3036_v27, 8.507059e+37 }
0x1d3f   :  { %v6292_v0 = vpop.eup %6291 }
0x1d40   :  { %v6294_v6 = vpop.eup %6293  ;;  %v3028_v28 = vmul.f32 %v6292_v0, %v3025_v10  ;;  %vm3033_vm10 = vweird.f32 %v6292_v0 }
0x1d41   :  { %v2795_v37 = vadd.f32 1.0, %v6294_v6  ;;  %v6296_v47 = vpop.eup %6295  ;;  %vm3034_vm5 = vmor %vm3032_vm1, %vm3033_vm10 }
0x1d42   :  { %v3029_v50 = vsub.f32 1.0, %v3028_v28  ;;  %v2344_v29 = vmul.f32 %v6296_v47, %v2327_v3  ;;  %vm2349_vm7 = vweird.f32 %v6296_v47 }
0x1d43   :  { %6297 = vrcp.f32 %v2795_v37  ;;  %vm2350_vm13 = vmor %vm2348_vm8, %vm2349_vm7  ;;  %vm2802_vm1 = vweird.f32 %v2795_v37 }
0x1d44   :  { %v3030_v18 = vmul.f32 %v6292_v0, %v3029_v50  ;;  %v2345_v36 = vsub.f32 1.0, %v2344_v29 }
0x1d46   :  { %v3031_v57 = vadd.f32 %v6292_v0, %v3030_v18  ;;  %v2346_v49 = vmul.f32 %v6296_v47, %v2345_v36  ;;  %v2352_v18 = vand.u32 2147483647, %v2327_v3  ;;  %v2355_v36 = vor.u32 1.1754944e-38, %v2354_v5 }
0x1d47   :  { %v2808_v3 = vand.u32 2147483648, %v2795_v37  ;;  %v2806_v5 = vand.u32 2147483647, %v2795_v37 }
0x1d48   :  { %v3035_v34 = vsel %vm3034_vm5, %v6292_v0, %v3031_v57  ;;  %v2347_v44 = vadd.f32 %v6296_v47, %v2346_v49  ;;  %vm2353_vm11 = vcmp.eq.f32.partialorder %v2352_v18, 8.507059e+37 }
0x1d49   :  { %v6298_v7 = vpop.eup %6297  ;;  %v10274_v28 = vsel %vm3037_vm6, %v3039_v38, %v3035_v34  ;;  %vm2807_vm6 = vcmp.eq.f32.partialorder %v2806_v5, 8.507059e+37 }
0x1d4a   :  { %v2798_v46 = vmul.f32 %v6298_v7, %v2795_v37  ;;  %v2351_v10 = vsel %vm2350_vm13, %v6296_v47, %v2347_v44  ;;  %vm2803_vm10 = vweird.f32 %v6298_v7  ;;  %v2809_v47 = vor.u32 1.1754944e-38, %v2808_v3 }
0x1d4b   :  { %v2356_v57 = vsel %vm2353_vm11, %v2355_v36, %v2351_v10  ;;  %vm2804_vm5 = vmor %vm2802_vm1, %vm2803_vm10  ;;  %v5921_v36 = vmul.f32 -1.442695, %v10267_v13 }
0x1d4c   :  { %v2799_v50 = vsub.f32 1.0, %v2798_v46 }
0x1d4e   :  { %v2800_v16 = vmul.f32 %v6298_v7, %v2799_v50  ;;  %v13370_v50 = vld [vmem:[#allocation27_spill] sm:$0xff] }
0x1d50   :  { %v2801_v38 = vadd.f32 %v6298_v7, %v2800_v16 }
0x1d52   :  { %v2805_v44 = vsel %vm2804_vm5, %v6298_v7, %v2801_v38 }
0x1d8e   :  { %v3061_v6 = vpop.permute.xlu2 %3060 }
0x1d8f   :  { %v3063_v29 = vmul.f32 %v3061_v6, %v10274_v28 }
0x1d91   :  { %3065 = vrot.lane.b32.xlu2 %v3063_v29, %s6942_s26  ;;  %v10306_v29 = vsel %vm1902_vm9, %v13370_v50, %v9758_v17 }
0x1d94   :  { %v2373_v0 = vpop.permute.xlu0 %2372 }
0x1d95   :  { %v2375_v51 = vmul.f32 %v2373_v0, %v10076_v53  ;;  %v2376_v27 = vmul.f32 %v2373_v0, %v2356_v57  ;;  %v10286_v53 = vsel %vm2807_vm6, %v2809_v47, %v2805_v44  ;;  %v13371_v57 = vld [vmem:[#allocation36_spill] sm:$0xff] }
0x1d97   :  { %v10282_v49 = vsel %vm1902_vm9, %v2375_v51, %v9770_v12  ;;  %v10294_v12 = vsel %vm2491_vm4, %v9743_v1, %v9740_v30  ;;  %v2828_v30 = vmul.f32 %v10286_v53, %v10306_v29  ;;  %v10318_v0 = vsel %vm1902_vm9, %v2376_v27, %v13371_v57 }
0x1d98   :  { %2859 = vrot.lane.b32.xlu0 %v10282_v49, %s6945_s29  ;;  %v3058_v37 = vmul.f32 %v10274_v28, %v10294_v12 }
0x1d9d   :  { %v2831_v46 = vpop.permute.xlu1 %2830 }
0x1d9e   :  { %v2833_v16 = vmul.f32 %v2831_v46, %v10286_v53 }
0x1da0   :  { %2835 = vrot.lane.b32.xlu1 %v2833_v16, %s6942_s26 }
0x1deb   :  { %v3066_v34 = vpop.permute.xlu2 %3065 }
0x1dec   :  { %v10298_v7 = vadd.f32 %v3066_v34, %v3058_v37  ;;  %v10322_v37 = vpop.permute.xlu0 %3078 }
0x1ded   :  { %vm3080_vm10 = vcmp.eq.s32.totalorder %v10322_v37, 1 }
0x1dee   :  { %6299 = vtanh.f32 %v10298_v7 }
0x1df4   :  { %v6300_v6 = vpop.eup %6299 }
0x1df5   :  { %3071 = vrot.lane.b32.xlu2 %v6300_v6, %s6942_s26 }
0x1e12   :  { %v2836_v1 = vpop.permute.xlu1 %2835 }
0x1e13   :  { %v10310_v18 = vadd.f32 %v2836_v1, %v2828_v30  ;;  %v5909_v1 = vmul.f32 -1.442695, %v10256_v24 }
0x1e15   :  { %6301 = vtanh.f32 %v10310_v18 }
0x1e16   :  { %6303 = vpow2.f32 %v5921_v36 }
0x1e1b   :  { %v6302_v10 = vpop.eup %6301 }
0x1e1c   :  { %2841 = vrot.lane.b32.xlu1 %v6302_v10, %s6942_s26  ;;  %v6304_v17 = vpop.eup %6303 }
0x1e1d   :  { %v3026_v51 = vadd.f32 1.0, %v6304_v17 }
0x1e1f   :  { %6305 = vrcp.f32 %v3026_v51  ;;  %v3053_v46 = vand.u32 2147483648, %v3026_v51  ;;  %vm3047_vm8 = vweird.f32 %v3026_v51  ;;  %v3051_v13 = vand.u32 2147483647, %v3026_v51 }
0x1e20   :  { %6307 = vpow2.f32 %v5909_v1 }
0x1e21   :  { %v3054_v27 = vor.u32 1.1754944e-38, %v3053_v46  ;;  %vm3052_vm11 = vcmp.eq.f32.partialorder %v3051_v13, 8.507059e+37 }
0x1e24   :  { %2861 = vrot.lane.b32.xlu1 %v10318_v0, %s6945_s29 }
0x1e25   :  { %v6306_v38 = vpop.eup %6305 }
0x1e26   :  { %v3043_v3 = vmul.f32 %v6306_v38, %v3026_v51  ;;  %vm3048_vm7 = vweird.f32 %v6306_v38  ;;  %v6308_v10 = vpop.eup %6307 }
0x1e27   :  { %vm3049_vm13 = vmor %vm3047_vm8, %vm3048_vm7  ;;  %v2796_v36 = vadd.f32 1.0, %v6308_v10 }
0x1e28   :  { %v3044_v5 = vsub.f32 1.0, %v3043_v3 }
0x1e29   :  { %6309 = vrcp.f32 %v2796_v36  ;;  %vm2817_vm5 = vweird.f32 %v2796_v36 }
0x1e2a   :  { %v3045_v44 = vmul.f32 %v6306_v38, %v3044_v5  ;;  %v2823_v5 = vand.u32 2147483648, %v2796_v36 }
0x1e2c   :  { %v3046_v47 = vadd.f32 %v6306_v38, %v3045_v44  ;;  %v2821_v44 = vand.u32 2147483647, %v2796_v36 }
0x1e2e   :  { %v3050_v16 = vsel %vm3049_vm13, %v6306_v38, %v3046_v47  ;;  %v2824_v47 = vor.u32 1.1754944e-38, %v2823_v5  ;;  %vm2822_vm7 = vcmp.eq.f32.partialorder %v2821_v44, 8.507059e+37  ;;  %v10388_v5 = vld [vmem:[%s12792_s8 + $0x258] sm:$0xff] }
0x1e2f   :  { %v3055_v34 = vsel %vm3052_vm11, %v3054_v27, %v3050_v16  ;;  %v6310_v57 = vpop.eup %6309  ;;  %13374 = vst [vmem:[#allocation53_spill] sm:$0xff] %v10388_v5 }
0x1e30   :  { %v2813_v17 = vmul.f32 %v6310_v57, %v2796_v36  ;;  %vm2818_vm1 = vweird.f32 %v6310_v57  ;;  %v2860_v36 = vpop.permute.xlu0 %2859 }
0x1e31   :  { %vm2819_vm6 = vmor %vm2817_vm5, %vm2818_vm1 }
0x1e32   :  { %v2814_v51 = vsub.f32 1.0, %v2813_v17 }
0x1e34   :  { %v2815_v38 = vmul.f32 %v6310_v57, %v2814_v51  ;;  %v10368_v51 = vld [vmem:[%s12792_s8 + $0x260] sm:$0xf] }
0x1e36   :  { %v2816_v3 = vadd.f32 %v6310_v57, %v2815_v38  ;;  %v10375_v38 = vld [vmem:[%s12792_s8 + $0x268] sm:$0xf] }
0x1e4f   :  { %v3072_v6 = vpop.permute.xlu2 %3071 }
0x1e50   :  { %v3075_v50 = vmul.f32 %v3072_v6, %v3055_v34 }
0x1e52   :  { %v10328_v30 = vsel %vm3080_vm10, %v3075_v50, %v9806_v9  ;;  %v2820_v9 = vsel %vm2819_vm6, %v6310_v57, %v2816_v3  ;;  %v3074_v50 = vmul.f32 %v3072_v6, %v10274_v28  ;;  %v10382_v3 = vld [vmem:[%s12792_s8 + $0x250] sm:$0xff] }
0x1e53   :  { %3088 = vrot.lane.b32.xlu0 %v10328_v30, %s6944_s5  ;;  %v2825_v46 = vsel %vm2822_vm7, %v2824_v47, %v2820_v9  ;;  %13373 = vst [vmem:[#allocation52_spill] sm:$0xff] %v10382_v3 }
0x1e8e   :  { %v2842_v13 = vpop.permute.xlu1 %2841 }
0x1e8f   :  { %v2844_v24 = vmul.f32 %v2842_v13, %v10286_v53  ;;  %v2845_v16 = vmul.f32 %v2842_v13, %v2825_v46  ;;  %v13372_v53 = vld [vmem:[#allocation37_spill] sm:$0xff]  ;;  %v10394_v46 = vld [vmem:[%s12792_s8 + $0x240] sm:$0xff]  ;;  %v10400_v13 = vld [vmem:[%s12792_s8 + $0x248] sm:$0xff] }
0x1e90   :  { %v10352_v1 = vsel %vm3080_vm10, %v3074_v50, %v13372_v53  ;;  %13375 = vst [vmem:[#allocation54_spill] sm:$0xff] %v10394_v46  ;;  %v10412_v53 = vld [vmem:[%s12792_s8 + $0x230] sm:$0xff] }
0x1e91   :  { %v10337_v27 = vsel %vm2491_vm4, %v2845_v16, %v9792_v2  ;;  %v10342_v34 = vsel %vm2491_vm4, %v2844_v24, %v9797_v20  ;;  %13376 = vst [vmem:[#allocation55_spill] sm:$0xff] %v10400_v13 }
0x1e92   :  { %2853 = vrot.lane.b32.xlu2 %v10337_v27, %s6944_s5  ;;  %2851 = vrot.lane.b32.xlu1 %v10342_v34, %s6944_s5  ;;  %13377 = vst [vmem:[#allocation56_spill] sm:$0xff] %v10412_v53 }
0x1e96   :  { %v2862_v20 = vpop.permute.xlu1 %2861 }
0x1e97   :  { %v2863_v28 = vsel %vm1328_vm12, %v2860_v36, %v2862_v20  ;;  %v10426_v20 = vld [vmem:[%s12792_s8 + $0x220] sm:$0xff]  ;;  %v10438_v36 = vld [vmem:[%s12792_s8 + $0x210] sm:$0xff] }
0x1e98   :  { %13379 = vst [vmem:[#allocation58_spill] sm:$0xff] %v10426_v20 }
0x1e99   :  { %13381 = vst [vmem:[#allocation60_spill] sm:$0xff] %v10438_v36 }
0x1e9a   :  { %3086 = vrot.lane.b32.xlu2 %v10352_v1, %s6944_s5  ;;  %3092 = vrot.lane.b32.xlu1 %v9898_v8, %s6945_s29 }
0x1ea2   :  { %3094 = vrot.lane.b32.xlu2 %v9893_v39, %s6945_s29 }
0x1ec5   :  { %v3089_v44 = vpop.permute.xlu0 %3088 }
0x1eec   :  { %v2854_v2 = vpop.permute.xlu2 %2853 }
0x1ef4   :  { %v3087_v10 = vpop.permute.xlu2 %3086 }
0x1ef5   :  { %v10404_v24 = vsel %vm626_vm14, %v3087_v10, %v3089_v44  ;;  %v10432_v10 = vld [vmem:[%s12792_s8 + $0x228] sm:$0xff]  ;;  %v10468_v44 = vld [vmem:[%s12792_s8 + $0x1f8] sm:$0xff] }
0x1ef6   :  { %13380 = vst [vmem:[#allocation59_spill] sm:$0xff] %v10432_v10 }
0x1ef7   :  { %13386 = vst [vmem:[#allocation65_spill] sm:$0xff] %v10468_v44 }
0x1efc   :  { %v3095_v9 = vpop.permute.xlu2 %3094 }
0x1f04   :  { %v2852_v57 = vpop.permute.xlu1 %2851 }
0x1f05   :  { %v2855_v6 = vsel %vm626_vm14, %v2852_v57, %v2854_v2  ;;  %v10418_v2 = vld [vmem:[%s12792_s8 + $0x238] sm:$0xff] }
0x1f06   :  { %v2865_v17 = vsel %vm502_vm15, %v2855_v6, %v2863_v28  ;;  %13378 = vst [vmem:[#allocation57_spill] sm:$0xff] %v10418_v2  ;;  %v10444_v57 = vld [vmem:[%s12792_s8 + $0x218] sm:$0xff]  ;;  %v10450_v28 = vld [vmem:[%s12792_s8 + $0x200] sm:$0xff]  ;;  %v10456_v6 = vld [vmem:[%s12792_s8 + $0x208] sm:$0xff] }
0x1f07   :  { %5911 = vmatmul.msk.f32.vlgmr.msrb.gmra.mxu0 %vm656_vm3, %v2865_v17  ;;  %5913 = vmatmul.msk.f32.vlgmr.msrb.gmra.mxu1 %vm656_vm3, %v2865_v17  ;;  %13382 = vst [vmem:[#allocation61_spill] sm:$0xff] %v10444_v57  ;;  %v10462_v17 = vld [vmem:[%s12792_s8 + $0x1f0] sm:$0xff] }
0x1f08   :  { %5934 = vmatpush.msk.msrb.mxu0 %vm184_vm0, %v10368_v51  ;;  %5936 = vmatpush.msk.msrb.mxu1 %vm184_vm0, %v10375_v38  ;;  %13383 = vst [vmem:[#allocation62_spill] sm:$0xff] %v10450_v28 }
0x1f09   :  { %13384 = vst [vmem:[#allocation63_spill] sm:$0xff] %v10456_v6 }
0x1f0a   :  { %3342 = vmatpush.msrb.mxu0 %v10382_v3  ;;  %3362 = vmatpush.msrb.mxu1 %v10388_v5  ;;  %13385 = vst [vmem:[#allocation64_spill] sm:$0xff] %v10462_v17 }
0x1f0c   :  { %v3093_v47 = vpop.permute.xlu1 %3092  ;;  %3343 = vmatpush.msrb.mxu0 %v10394_v46  ;;  %3363 = vmatpush.msrb.mxu1 %v10400_v13 }
0x1f0d   :  { %v3096_v16 = vsel %vm1328_vm12, %v3093_v47, %v3095_v9  ;;  %v10474_v9 = vld [vmem:[%s12792_s8 + $0x1e0] sm:$0xff]  ;;  %v10480_v47 = vld [vmem:[%s12792_s8 + $0x1e8] sm:$0xff] }
0x1f0e   :  { %v3098_v50 = vsel %vm502_vm15, %v10404_v24, %v3096_v16  ;;  %3344 = vmatpush.msrb.mxu0 %v10412_v53  ;;  %3364 = vmatpush.msrb.mxu1 %v10418_v2  ;;  %13387 = vst [vmem:[#allocation66_spill] sm:$0xff] %v10474_v9  ;;  %v10486_v16 = vld [vmem:[%s12792_s8 + $0x1d0] sm:$0xff] }
0x1f0f   :  { %5923 = vmatmul.msk.f32.vlgmr.msra.gmra.mxu0 %vm656_vm3, %v3098_v50  ;;  %5925 = vmatmul.msk.f32.vlgmr.msra.gmra.mxu1 %vm656_vm3, %v3098_v50  ;;  %13388 = vst [vmem:[#allocation67_spill] sm:$0xff] %v10480_v47  ;;  %v10492_v50 = vld [vmem:[%s12792_s8 + $0x1d8] sm:$0xff] }
0x1f10   :  { %3345 = vmatpush.msrb.mxu0 %v10426_v20  ;;  %3365 = vmatpush.msrb.mxu1 %v10432_v10  ;;  %13389 = vst [vmem:[#allocation68_spill] sm:$0xff] %v10486_v16 }
0x1f11   :  { %13390 = vst [vmem:[#allocation69_spill] sm:$0xff] %v10492_v50 }
0x1f12   :  { %3346 = vmatpush.msrb.mxu0 %v10438_v36  ;;  %3366 = vmatpush.msrb.mxu1 %v10444_v57 }
0x1f14   :  { %3347 = vmatpush.msrb.mxu0 %v10450_v28  ;;  %3367 = vmatpush.msrb.mxu1 %v10456_v6 }
0x1f16   :  { %3348 = vmatpush.msrb.mxu0 %v10462_v17  ;;  %3368 = vmatpush.msrb.mxu1 %v10468_v44  ;;  %v13411_v17 = vld [vmem:[#allocation3_spill] sm:$0xff] }
0x1f18   :  { %3349 = vmatpush.msrb.mxu0 %v10474_v9  ;;  %3369 = vmatpush.msrb.mxu1 %v10480_v47  ;;  %v10498_v9 = vld [vmem:[%s12792_s8 + $0x1c0] sm:$0xff]  ;;  %v10504_v47 = vld [vmem:[%s12792_s8 + $0x1c8] sm:$0xff] }
0x1f19   :  { %13391 = vst [vmem:[#allocation70_spill] sm:$0xff] %v10498_v9 }
0x1f1a   :  { %3350 = vmatpush.msrb.mxu0 %v10486_v16  ;;  %3370 = vmatpush.msrb.mxu1 %v10492_v50  ;;  %13392 = vst [vmem:[#allocation71_spill] sm:$0xff] %v10504_v47  ;;  %v10510_v16 = vld [vmem:[%s12792_s8 + $0x1b0] sm:$0xff]  ;;  %v10516_v50 = vld [vmem:[%s12792_s8 + $0x1b8] sm:$0xff] }
0x1f1b   :  { %13393 = vst [vmem:[#allocation72_spill] sm:$0xff] %v10510_v16 }
0x1f1c   :  { %3351 = vmatpush.msrb.mxu0 %v10498_v9  ;;  %3371 = vmatpush.msrb.mxu1 %v10504_v47  ;;  %13394 = vst [vmem:[#allocation4_spill] sm:$0xff] %v10516_v50  ;;  %v10522_v9 = vld [vmem:[%s12792_s8 + $0x1a0] sm:$0xff]  ;;  %v10528_v47 = vld [vmem:[%s12792_s8 + $0x1a8] sm:$0xff] }
0x1f1d   :  { %13395 = vst [vmem:[#allocation6_spill] sm:$0xff] %v10522_v9 }
0x1f1e   :  { %3352 = vmatpush.msrb.mxu0 %v10510_v16  ;;  %3372 = vmatpush.msrb.mxu1 %v10516_v50  ;;  %13396 = vst [vmem:[#allocation7_spill] sm:$0xff] %v10528_v47  ;;  %v10534_v16 = vld [vmem:[%s12789_s6 + $0x60] sm:$0x3]  ;;  %v10541_v50 = vld [vmem:[%s12789_s6 + $0x68] sm:$0x3] }
0x1f1f   :  { %13397 = vst [vmem:[#allocation11_spill] sm:$0xff] %v10534_v16 }
0x1f20   :  { %3353 = vmatpush.msrb.mxu0 %v10522_v9  ;;  %3373 = vmatpush.msrb.mxu1 %v10528_v47  ;;  %13398 = vst [vmem:[#allocation12_spill] sm:$0xff] %v10541_v50  ;;  %v10548_v47 = vld [vmem:[%s12789_s6 + $0x50] sm:$0xff]  ;;  %v10554_v9 = vld [vmem:[%s12789_s6 + $0x58] sm:$0xff] }
0x1f21   :  { %13399 = vst [vmem:[#allocation13_spill] sm:$0xff] %v10548_v47 }
0x1f22   :  { %5946 = vmatpush.msk.msra.mxu0 %vm506_vm2, %v10534_v16  ;;  %5948 = vmatpush.msk.msra.mxu1 %vm506_vm2, %v10541_v50  ;;  %13400 = vst [vmem:[#allocation14_spill] sm:$0xff] %v10554_v9  ;;  %v10560_v16 = vld [vmem:[%s12789_s6 + $0x40] sm:$0xff]  ;;  %v10566_v50 = vld [vmem:[%s12789_s6 + $0x48] sm:$0xff] }
0x1f23   :  { %13401 = vst [vmem:[#allocation15_spill] sm:$0xff] %v10560_v16 }
0x1f24   :  { %3576 = vmatpush.msra.mxu0 %v10548_v47  ;;  %3596 = vmatpush.msra.mxu1 %v10554_v9  ;;  %13402 = vst [vmem:[#allocation16_spill] sm:$0xff] %v10566_v50  ;;  %v10572_v47 = vld [vmem:[%s12789_s6 + $0x30] sm:$0xff]  ;;  %v10578_v9 = vld [vmem:[%s12789_s6 + $0x38] sm:$0xff] }
0x1f25   :  { %13403 = vst [vmem:[#allocation17_spill] sm:$0xff] %v10572_v47 }
0x1f26   :  { %3577 = vmatpush.msra.mxu0 %v10560_v16  ;;  %3597 = vmatpush.msra.mxu1 %v10566_v50  ;;  %13404 = vst [vmem:[#allocation18_spill] sm:$0xff] %v10578_v9  ;;  %v10584_v16 = vld [vmem:[%s12789_s6 + $0x20] sm:$0xff]  ;;  %v10590_v50 = vld [vmem:[%s12789_s6 + $0x28] sm:$0xff] }
0x1f27   :  { %13405 = vst [vmem:[#allocation21_spill] sm:$0xff] %v10584_v16 }
0x1f28   :  { %3578 = vmatpush.msra.mxu0 %v10572_v47  ;;  %3598 = vmatpush.msra.mxu1 %v10578_v9  ;;  %13406 = vst [vmem:[#allocation32_spill] sm:$0xff] %v10590_v50  ;;  %v10596_v47 = vld [vmem:[%s12789_s6 + $0x10] sm:$0xff]  ;;  %v10602_v9 = vld [vmem:[%s12789_s6 + $0x18] sm:$0xff] }
0x1f29   :  { %13407 = vst [vmem:[#allocation22_spill] sm:$0xff] %v10596_v47 }
0x1f2a   :  { %3579 = vmatpush.msra.mxu0 %v10584_v16  ;;  %3599 = vmatpush.msra.mxu1 %v10590_v50  ;;  %13408 = vst [vmem:[#allocation34_spill] sm:$0xff] %v10602_v9  ;;  %v10608_v16 = vld [vmem:[%s12789_s6] sm:$0xff]  ;;  %v10614_v50 = vld [vmem:[%s12789_s6 + $0x8] sm:$0xff] }
0x1f2b   :  { %13409 = vst [vmem:[#allocation23_spill] sm:$0xff] %v10608_v16 }
0x1f2c   :  { %3580 = vmatpush.msra.mxu0 %v10596_v47  ;;  %3600 = vmatpush.msra.mxu1 %v10602_v9  ;;  %13410 = vst [vmem:[#allocation35_spill] sm:$0xff] %v10614_v50 }
0x1f2e   :  { %3581 = vmatpush.msra.mxu0 %v10608_v16  ;;  %3601 = vmatpush.msra.mxu1 %v10614_v50 }
0x1f84   :  { %v10617_v47 = vpop.f32.mrf.mxu1  ;;  %v10621_v28 = vpop.f32.mrf.mxu0 }
0x1f8c   :  { %v3139_v44 = vpop.f32.mrf.mxu1  ;;  %v3119_v57 = vpop.f32.mrf.mxu0 }
0x1f8d   :  { %v3140_v6 = vadd.f32 %v3139_v44, %v13411_v17  ;;  %v3120_v16 = vadd.f32 %v3119_v57, %v13324_v14 }
0x1f8f   :  { %6311 = vtanh.f32 %v3140_v6  ;;  %v5926_v36 = vmul.f32 -1.442695, %v3120_v16 }
0x1f91   :  { %6313 = vpow2.f32 %v5926_v36 }
0x1f95   :  { %v6312_v9 = vpop.eup %6311 }
0x1f96   :  { %3183 = vrot.lane.b32.xlu0 %v6312_v9, %s6941_s7 }
0x1f97   :  { %v6314_v10 = vpop.eup %6313 }
0x1f98   :  { %v3148_v20 = vadd.f32 1.0, %v6314_v10  ;;  %v13412_v10 = vld [vmem:[#allocation26_spill] sm:$0xff] }
0x1f9a   :  { %6315 = vrcp.f32 %v3148_v20  ;;  %v3161_v44 = vand.u32 2147483648, %v3148_v20  ;;  %vm3155_vm13 = vweird.f32 %v3148_v20  ;;  %v3159_v17 = vand.u32 2147483647, %v3148_v20 }
0x1f9c   :  { %v3162_v5 = vor.u32 1.1754944e-38, %v3161_v44  ;;  %vm3160_vm1 = vcmp.eq.f32.partialorder %v3159_v17, 8.507059e+37 }
0x1fa0   :  { %v6316_v50 = vpop.eup %6315 }
0x1fa1   :  { %v3151_v2 = vmul.f32 %v6316_v50, %v3148_v20  ;;  %vm3156_vm8 = vweird.f32 %v6316_v50 }
0x1fa2   :  { %vm3157_vm11 = vmor %vm3155_vm13, %vm3156_vm8 }
0x1fa3   :  { %v3152_v53 = vsub.f32 1.0, %v3151_v2  ;;  %v10629_v2 = vsel %vm2491_vm4, %v13412_v10, %v9881_v31 }
0x1fa5   :  { %v3153_v13 = vmul.f32 %v6316_v50, %v3152_v53 }
0x1fa7   :  { %v3154_v46 = vadd.f32 %v6316_v50, %v3153_v13 }
0x1fa9   :  { %v3158_v9 = vsel %vm3157_vm11, %v6316_v50, %v3154_v46 }
0x1faa   :  { %v3163_v57 = vsel %vm3160_vm1, %v3162_v5, %v3158_v9 }
0x1fab   :  { %v3181_v13 = vmul.f32 %v3163_v57, %v10629_v2 }
0x2008   :  { %v3184_v3 = vpop.permute.xlu0 %3183 }
0x2009   :  { %v3186_v16 = vmul.f32 %v3184_v3, %v3163_v57  ;;  %v5927_v3 = vmul.f32 -1.442695, %v3140_v6 }
0x200b   :  { %3188 = vrot.lane.b32.xlu1 %v3186_v16, %s6942_s26 }
0x207d   :  { %v3189_v53 = vpop.permute.xlu1 %3188 }
0x207e   :  { %v10632_v36 = vadd.f32 %v3189_v53, %v3181_v13 }
0x2080   :  { %13413 = vst [vmem:[#allocation24_spill] sm:$0xff] %v10632_v36  ;;  %6317 = vtanh.f32 %v10632_v36 }
0x2081   :  { %6319 = vpow2.f32 %v5927_v3 }
0x2086   :  { %v6318_v46 = vpop.eup %6317 }
0x2087   :  { %3194 = vrot.lane.b32.xlu2 %v6318_v46, %s6942_s26  ;;  %v6320_v5 = vpop.eup %6319 }
0x2088   :  { %v3149_v20 = vadd.f32 1.0, %v6320_v5 }
0x208a   :  { %6321 = vrcp.f32 %v3149_v20  ;;  %v3176_v16 = vand.u32 2147483648, %v3149_v20  ;;  %vm3170_vm6 = vweird.f32 %v3149_v20  ;;  %v3174_v10 = vand.u32 2147483647, %v3149_v20 }
0x208c   :  { %v3177_v53 = vor.u32 1.1754944e-38, %v3176_v16  ;;  %vm3175_vm8 = vcmp.eq.f32.partialorder %v3174_v10, 8.507059e+37  ;;  %v13415_v16 = vld [vmem:[#allocation25_spill] sm:$0xff] }
0x208d   :  { %v13417_v10 = vld [vmem:[#allocation29_spill] sm:$0xff] }
0x208f   :  { %3210 = vrot.lane.b32.xlu2 %v10033_v32, %s6945_s29 }
0x2090   :  { %v6322_v31 = vpop.eup %6321 }
0x2091   :  { %v3166_v17 = vmul.f32 %v6322_v31, %v3149_v20  ;;  %vm3171_vm5 = vweird.f32 %v6322_v31 }
0x2092   :  { %vm3172_vm7 = vmor %vm3170_vm6, %vm3171_vm5 }
0x2093   :  { %v3167_v50 = vsub.f32 1.0, %v3166_v17 }
0x2095   :  { %v3168_v44 = vmul.f32 %v6322_v31, %v3167_v50 }
0x2097   :  { %v3169_v9 = vadd.f32 %v6322_v31, %v3168_v44  ;;  %v10664_v44 = vld [vmem:[%s12792_s8 + $0xc8] sm:$0xf] }
0x2099   :  { %v3173_v13 = vsel %vm3172_vm7, %v6322_v31, %v3169_v9  ;;  %v10672_v9 = vld [vmem:[%s12792_s8 + $0xb8] sm:$0xff] }
0x209a   :  { %v3178_v46 = vsel %vm3175_vm8, %v3177_v53, %v3173_v13  ;;  %v13419_v13 = vld [vmem:[#allocation28_spill] sm:$0xff]  ;;  %v10742_v53 = vld [vmem:[%s12792_s8 + $0x18] sm:$0xff] }
0x209b   :  { %13420 = vst [vmem:[#allocation26_spill] sm:$0xff] %v10742_v53 }
0x20e1   :  { %v3195_v36 = vpop.permute.xlu2 %3194 }
0x20e2   :  { %v3197_v6 = vmul.f32 %v3195_v36, %v3163_v57  ;;  %v3198_v3 = vmul.f32 %v3195_v36, %v3178_v46  ;;  %v13421_v46 = vld [vmem:[#allocation30_spill] sm:$0xff] }
0x20e4   :  { %v10641_v5 = vsel %vm3080_vm10, %v3198_v3, %v9893_v39  ;;  %v10646_v17 = vsel %vm3080_vm10, %v3197_v6, %v9898_v8  ;;  %v10749_v6 = vld [vmem:[%s12792_s8 + $0x8] sm:$0xff] }
0x20e5   :  { %3206 = vrot.lane.b32.xlu1 %v10641_v5, %s6944_s5  ;;  %3204 = vrot.lane.b32.xlu0 %v10646_v17, %s6944_s5  ;;  %13422 = vst [vmem:[#allocation25_spill] sm:$0xff] %v10749_v6 }
0x20e9   :  { %v3211_v20 = vpop.permute.xlu2 %3210 }
0x20ed   :  { %3212 = vrot.lane.b32.xlu0 %v10028_v58, %s6945_s29 }
0x2157   :  { %v3205_v57 = vpop.permute.xlu0 %3204  ;;  %v3207_v36 = vpop.permute.xlu1 %3206 }
0x2158   :  { %v3208_v39 = vsel %vm626_vm14, %v3205_v57, %v3207_v36  ;;  %v13423_v57 = vld [vmem:[#allocation8_spill] sm:$0xff] }
0x215f   :  { %v3213_v31 = vpop.permute.xlu0 %3212 }
0x2160   :  { %v3214_v50 = vsel %vm1328_vm12, %v3211_v20, %v3213_v31 }
0x2161   :  { %v3216_v8 = vsel %vm502_vm15, %v3208_v39, %v3214_v50  ;;  %v13424_v39 = vld [vmem:[#allocation9_spill] sm:$0xff] }
0x2162   :  { %5929 = vmatmul.msk.f32.vlgmr.msrb.gmra.mxu3 %vm656_vm3, %v3216_v8  ;;  %5931 = vmatmul.msk.f32.vlgmr.msra.gmra.mxu2 %vm656_vm3, %v3216_v8 }
0x2163   :  { %5952 = vmatpush.msk.msrb.mxu3 %vm184_vm0, %v9914_v15  ;;  %5954 = vmatpush.msk.msra.mxu2 %vm184_vm0, %v10664_v44  ;;  %v10679_v15 = vld [vmem:[%s12792_s8 + $0xa8] sm:$0xff] }
0x2165   :  { %3695 = vmatpush.msrb.mxu3 %v9923_v59  ;;  %3715 = vmatpush.msra.mxu2 %v10672_v9  ;;  %v10686_v59 = vld [vmem:[%s12792_s8 + $0x98] sm:$0xff] }
0x2167   :  { %3696 = vmatpush.msrb.mxu3 %v9930_v48  ;;  %3716 = vmatpush.msra.mxu2 %v10679_v15  ;;  %v10693_v48 = vld [vmem:[%s12792_s8 + $0x88] sm:$0xff] }
0x2169   :  { %3697 = vmatpush.msrb.mxu3 %v9937_v40  ;;  %3717 = vmatpush.msra.mxu2 %v10686_v59  ;;  %v10700_v40 = vld [vmem:[%s12792_s8 + $0x78] sm:$0xff] }
0x216b   :  { %3698 = vmatpush.msrb.mxu3 %v9944_v52  ;;  %3718 = vmatpush.msra.mxu2 %v10693_v48  ;;  %v10707_v52 = vld [vmem:[%s12792_s8 + $0x68] sm:$0xff] }
0x216d   :  { %3699 = vmatpush.msrb.mxu3 %v9951_v61  ;;  %3719 = vmatpush.msra.mxu2 %v10700_v40  ;;  %v10714_v61 = vld [vmem:[%s12792_s8 + $0x58] sm:$0xff] }
0x216f   :  { %3700 = vmatpush.msrb.mxu3 %v9958_v26  ;;  %3720 = vmatpush.msra.mxu2 %v10707_v52  ;;  %v10721_v26 = vld [vmem:[%s12792_s8 + $0x48] sm:$0xff] }
0x2170   :  { %13414 = vst [vmem:[#allocation27_spill] sm:$0xff] %v10721_v26 }
0x2171   :  { %3701 = vmatpush.msrb.mxu3 %v9965_v22  ;;  %3721 = vmatpush.msra.mxu2 %v10714_v61  ;;  %v10728_v22 = vld [vmem:[%s12792_s8 + $0x38] sm:$0xff] }
0x2172   :  { %13416 = vst [vmem:[#allocation36_spill] sm:$0xff] %v10728_v22 }
0x2173   :  { %3702 = vmatpush.msrb.mxu3 %v9972_v4  ;;  %3722 = vmatpush.msra.mxu2 %v10721_v26  ;;  %v10735_v4 = vld [vmem:[%s12792_s8 + $0x28] sm:$0xff] }
0x2174   :  { %13418 = vst [vmem:[#allocation37_spill] sm:$0xff] %v10735_v4 }
0x2175   :  { %3703 = vmatpush.msrb.mxu3 %v13415_v16  ;;  %3723 = vmatpush.msra.mxu2 %v10728_v22 }
0x2177   :  { %3704 = vmatpush.msrb.mxu3 %v13417_v10  ;;  %3724 = vmatpush.msra.mxu2 %v10735_v4 }
0x2179   :  { %3705 = vmatpush.msrb.mxu3 %v13419_v13  ;;  %3725 = vmatpush.msra.mxu2 %v10742_v53 }
0x217b   :  { %3706 = vmatpush.msrb.mxu3 %v13421_v46  ;;  %3726 = vmatpush.msra.mxu2 %v10749_v6 }
0x21e5   :  { %v3257_v3 = vpop.f32.mrf.mxu2  ;;  %v3237_v31 = vpop.f32.mrf.mxu3 }
0x21e6   :  { %v3258_v36 = vadd.f32 %v3257_v3, %v13423_v57  ;;  %v3238_v50 = vadd.f32 %v3237_v31, %v13424_v39 }
0x21e8   :  { %6323 = vtanh.f32 %v3258_v36  ;;  %v5932_v8 = vmul.f32 -1.442695, %v3238_v50 }
0x21ea   :  { %6325 = vpow2.f32 %v5932_v8  ;;  %v13425_v8 = vld [vmem:[#allocation31_spill] sm:$0xff] }
0x21ee   :  { %v6324_v20 = vpop.eup %6323 }
0x21ef   :  { %3301 = vrot.lane.b32.xlu1 %v6324_v20, %s6941_s7 }
0x21f0   :  { %v6326_v16 = vpop.eup %6325 }
0x21f1   :  { %v3266_v10 = vadd.f32 1.0, %v6326_v16  ;;  %v10760_v16 = vsel %vm2491_vm4, %v13425_v8, %v10012_v35 }
0x21f3   :  { %6327 = vrcp.f32 %v3266_v10  ;;  %v3279_v22 = vand.u32 2147483648, %v3266_v10  ;;  %vm3273_vm11 = vweird.f32 %v3266_v10  ;;  %v3277_v3 = vand.u32 2147483647, %v3266_v10 }
0x21f5   :  { %v3280_v20 = vor.u32 1.1754944e-38, %v3279_v22  ;;  %vm3278_vm5 = vcmp.eq.f32.partialorder %v3277_v3, 8.507059e+37 }
0x21f9   :  { %v6328_v13 = vpop.eup %6327 }
0x21fa   :  { %v3269_v46 = vmul.f32 %v6328_v13, %v3266_v10  ;;  %vm3274_vm13 = vweird.f32 %v6328_v13 }
0x21fb   :  { %vm3275_vm1 = vmor %vm3273_vm11, %vm3274_vm13 }
0x21fc   :  { %v3270_v53 = vsub.f32 1.0, %v3269_v46 }
0x21fe   :  { %v3271_v4 = vmul.f32 %v6328_v13, %v3270_v53 }
0x2200   :  { %v3272_v6 = vadd.f32 %v6328_v13, %v3271_v4 }
0x2202   :  { %v3276_v57 = vsel %vm3275_vm1, %v6328_v13, %v3272_v6 }
0x2203   :  { %v3281_v31 = vsel %vm3278_vm5, %v3280_v20, %v3276_v57 }
0x2204   :  { %v3299_v4 = vmul.f32 %v3281_v31, %v10760_v16 }
0x2261   :  { %v3302_v26 = vpop.permute.xlu1 %3301 }
0x2262   :  { %v3304_v50 = vmul.f32 %v3302_v26, %v3281_v31  ;;  %v5933_v26 = vmul.f32 -1.442695, %v3258_v36  ;;  %v10771_v36 = vadd.f32 %v10617_v47, %v13252_v54 }
0x2264   :  { %3306 = vrot.lane.b32.xlu2 %v3304_v50, %s6942_s26  ;;  %v5915_v56 = vmul.f32 -1.442695, %v10771_v36 }
0x22be   :  { %v3307_v53 = vpop.permute.xlu2 %3306 }
0x22bf   :  { %v10763_v46 = vadd.f32 %v3307_v53, %v3299_v4 }
0x22c1   :  { %13426 = vst [vmem:[#allocation29_spill] sm:$0xff] %v10763_v46  ;;  %6329 = vtanh.f32 %v10763_v46 }
0x22c2   :  { %6331 = vpow2.f32 %v5933_v26 }
0x22c7   :  { %v6330_v22 = vpop.eup %6329 }
0x22c8   :  { %3312 = vrot.lane.b32.xlu0 %v6330_v22, %s6942_s26  ;;  %v6332_v6 = vpop.eup %6331 }
0x22c9   :  { %v3267_v57 = vadd.f32 1.0, %v6332_v6 }
0x22cb   :  { %6333 = vrcp.f32 %v3267_v57  ;;  %v3294_v50 = vand.u32 2147483648, %v3267_v57  ;;  %vm3288_vm7 = vweird.f32 %v3267_v57  ;;  %v3292_v8 = vand.u32 2147483647, %v3267_v57 }
0x22cc   :  { %6335 = vtanh.f32 %v10771_v36 }
0x22cd   :  { %v3295_v53 = vor.u32 1.1754944e-38, %v3294_v50  ;;  %vm3293_vm13 = vcmp.eq.f32.partialorder %v3292_v8, 8.507059e+37 }
0x22d0   :  { %3328 = vrot.lane.b32.xlu0 %v10342_v34, %s6945_s29 }
0x22d1   :  { %v6334_v35 = vpop.eup %6333 }
0x22d2   :  { %v3284_v10 = vmul.f32 %v6334_v35, %v3267_v57  ;;  %vm3289_vm6 = vweird.f32 %v6334_v35  ;;  %v6336_v47 = vpop.eup %6335 }
0x22d3   :  { %vm3290_vm8 = vmor %vm3288_vm7, %vm3289_vm6 }
0x22d4   :  { %v3285_v13 = vsub.f32 1.0, %v3284_v10 }
0x22d6   :  { %v3286_v3 = vmul.f32 %v6334_v35, %v3285_v13 }
0x22d8   :  { %v3287_v20 = vadd.f32 %v6334_v35, %v3286_v3 }
0x22da   :  { %v3291_v4 = vsel %vm3290_vm8, %v6334_v35, %v3287_v20 }
0x22db   :  { %v3296_v22 = vsel %vm3293_vm13, %v3295_v53, %v3291_v4 }
0x233a   :  { %v3313_v46 = vpop.permute.xlu0 %3312 }
0x233b   :  { %v3315_v26 = vmul.f32 %v3313_v46, %v3281_v31  ;;  %v3316_v6 = vmul.f32 %v3313_v46, %v3296_v22 }
0x233d   :  { %v10776_v10 = vsel %vm3080_vm10, %v3316_v6, %v10028_v58  ;;  %v10781_v57 = vsel %vm3080_vm10, %v3315_v26, %v10033_v32  ;;  %v2887_v58 = vadd.f32 %v10621_v28, %v13253_v19 }
0x233e   :  { %3324 = vrot.lane.b32.xlu2 %v10776_v10, %s6944_s5  ;;  %3322 = vrot.lane.b32.xlu1 %v10781_v57, %s6944_s5 }
0x233f   :  { %v5914_v31 = vmul.f32 -1.442695, %v2887_v58 }
0x2341   :  { %6337 = vpow2.f32 %v5914_v31 }
0x2342   :  { %v3329_v31 = vpop.permute.xlu0 %3328 }
0x2346   :  { %2950 = vrot.lane.b32.xlu2 %v6336_v47, %s6941_s7  ;;  %3330 = vrot.lane.b32.xlu1 %v10337_v27, %s6945_s29 }
0x2347   :  { %v6338_v32 = vpop.eup %6337 }
0x2348   :  { %v2915_v46 = vadd.f32 1.0, %v6338_v32 }
0x234a   :  { %6339 = vrcp.f32 %v2915_v46  ;;  %v2928_v4 = vand.u32 2147483648, %v2915_v46  ;;  %vm2922_vm1 = vweird.f32 %v2915_v46  ;;  %v2926_v53 = vand.u32 2147483647, %v2915_v46 }
0x234c   :  { %v2929_v26 = vor.u32 1.1754944e-38, %v2928_v4  ;;  %vm2927_vm6 = vcmp.eq.f32.partialorder %v2926_v53, 8.507059e+37  ;;  %v10857_v4 = vld [vmem:[%s12792_s8 + $0x328] sm:$0xff]  ;;  %v10863_v53 = vld [vmem:[%s12792_s8 + $0x310] sm:$0xff] }
0x2350   :  { %v6340_v35 = vpop.eup %6339 }
0x2351   :  { %v2918_v13 = vmul.f32 %v6340_v35, %v2915_v46  ;;  %vm2923_vm11 = vweird.f32 %v6340_v35 }
0x2352   :  { %vm2924_vm5 = vmor %vm2922_vm1, %vm2923_vm11 }
0x2353   :  { %v2919_v3 = vsub.f32 1.0, %v2918_v13 }
0x2355   :  { %v2920_v20 = vmul.f32 %v6340_v35, %v2919_v3 }
0x2357   :  { %v2921_v8 = vadd.f32 %v6340_v35, %v2920_v20  ;;  %v10837_v20 = vld [vmem:[%s12792_s8 + $0x330] sm:$0xf] }
0x2359   :  { %v2925_v22 = vsel %vm2924_vm5, %v6340_v35, %v2921_v8  ;;  %v13440_v35 = vld [vmem:[#allocation48_spill] sm:$0xff]  ;;  %v10851_v8 = vld [vmem:[%s12792_s8 + $0x320] sm:$0xff] }
0x235a   :  { %v10793_v28 = vsel %vm2927_vm6, %v2929_v26, %v2925_v22  ;;  %v10869_v22 = vld [vmem:[%s12792_s8 + $0x318] sm:$0xff]  ;;  %v10875_v26 = vld [vmem:[%s12792_s8 + $0x300] sm:$0xff] }
0x2398   :  { %v3325_v50 = vpop.permute.xlu2 %3324 }
0x23a0   :  { %v2951_v6 = vpop.permute.xlu2 %2950 }
0x23a1   :  { %v2953_v47 = vmul.f32 %v2951_v6, %v10793_v28  ;;  %v10881_v6 = vld [vmem:[%s12792_s8 + $0x308] sm:$0xff] }
0x23a3   :  { %2955 = vrot.lane.b32.xlu2 %v2953_v47, %s6942_s26  ;;  %v10887_v47 = vld [vmem:[%s12792_s8 + $0x2f0] sm:$0xff] }
0x23b0   :  { %v3323_v58 = vpop.permute.xlu1 %3322 }
0x23b1   :  { %v3326_v13 = vsel %vm626_vm14, %v3323_v58, %v3325_v50  ;;  %v10844_v50 = vld [vmem:[%s12792_s8 + $0x338] sm:$0xf] }
0x23b2   :  { %v10893_v58 = vld [vmem:[%s12792_s8 + $0x2f8] sm:$0xff] }
0x23b8   :  { %v3331_v32 = vpop.permute.xlu1 %3330 }
0x23b9   :  { %v3332_v3 = vsel %vm1328_vm12, %v3329_v31, %v3331_v32  ;;  %v10899_v31 = vld [vmem:[%s12792_s8 + $0x2e0] sm:$0xff]  ;;  %v10905_v32 = vld [vmem:[%s12792_s8 + $0x2e8] sm:$0xff] }
0x23ba   :  { %v3334_v46 = vsel %vm502_vm15, %v3326_v13, %v3332_v3  ;;  %13441 = vst [vmem:[#allocation28_spill] sm:$0xff] %v10899_v31  ;;  %v10911_v13 = vld [vmem:[%s12792_s8 + $0x2d0] sm:$0xff]  ;;  %v10917_v3 = vld [vmem:[%s12792_s8 + $0x2d8] sm:$0xff] }
0x23bb   :  { %5935 = vmatmul.msk.f32.vlgmr.msrb.gmra.mxu0 %vm656_vm3, %v3334_v46  ;;  %5937 = vmatmul.msk.f32.vlgmr.msrb.gmra.mxu1 %vm656_vm3, %v3334_v46  ;;  %13442 = vst [vmem:[#allocation30_spill] sm:$0xff] %v10905_v32  ;;  %v10923_v46 = vld [vmem:[%s12792_s8 + $0x2c0] sm:$0xff] }
0x23bc   :  { %5958 = vmatpush.msk.msrb.mxu0 %vm184_vm0, %v10053_v25  ;;  %5960 = vmatpush.msk.msrb.mxu1 %vm184_vm0, %v10060_v43  ;;  %v13427_v25 = vld [vmem:[#allocation33_spill] sm:$0xff]  ;;  %13443 = vst [vmem:[#allocation9_spill] sm:$0xff] %v10911_v13 }
0x23bd   :  { %v13428_v43 = vld [vmem:[#allocation5_spill] sm:$0xff]  ;;  %13444 = vst [vmem:[#allocation31_spill] sm:$0xff] %v10917_v3 }
0x23be   :  { %3813 = vmatpush.msrb.mxu0 %v10067_v11  ;;  %3833 = vmatpush.msrb.mxu1 %v10073_v55  ;;  %v13429_v11 = vld [vmem:[#allocation20_spill] sm:$0xff]  ;;  %v13430_v55 = vld [vmem:[#allocation19_spill] sm:$0xff]  ;;  %13445 = vst [vmem:[#allocation33_spill] sm:$0xff] %v10923_v46 }
0x23c0   :  { %3814 = vmatpush.msrb.mxu0 %v10081_v45  ;;  %3834 = vmatpush.msrb.mxu1 %v10087_v63  ;;  %v13431_v45 = vld [vmem:[#allocation10_spill] sm:$0xff] }
0x23c1   :  { %v13432_v63 = vld [vmem:[#allocation42_spill] sm:$0xff] }
0x23c2   :  { %3815 = vmatpush.msrb.mxu0 %v10094_v33  ;;  %3835 = vmatpush.msrb.mxu1 %v10100_v60  ;;  %v13433_v33 = vld [vmem:[#allocation40_spill] sm:$0xff]  ;;  %v13434_v60 = vld [vmem:[#allocation41_spill] sm:$0xff] }
0x23c3   :  { %5947 = vmatmul.msk.f32.vlgmr.msra.gmra.mxu0 %vm502_vm15, %v10404_v24  ;;  %5949 = vmatmul.msk.f32.vlgmr.msra.gmra.mxu1 %vm502_vm15, %v10404_v24  ;;  %v13439_v24 = vld [vmem:[#allocation47_spill] sm:$0xff] }
0x23c4   :  { %3816 = vmatpush.msrb.mxu0 %v10111_v41  ;;  %3836 = vmatpush.msrb.mxu1 %v10117_v42  ;;  %v13435_v41 = vld [vmem:[#allocation43_spill] sm:$0xff]  ;;  %v13436_v42 = vld [vmem:[#allocation44_spill] sm:$0xff] }
0x23c6   :  { %3817 = vmatpush.msrb.mxu0 %v10123_v62  ;;  %3837 = vmatpush.msrb.mxu1 %v10129_v23  ;;  %v13437_v62 = vld [vmem:[#allocation45_spill] sm:$0xff]  ;;  %v13438_v23 = vld [vmem:[#allocation46_spill] sm:$0xff] }
0x23c8   :  { %3818 = vmatpush.msrb.mxu0 %v13427_v25  ;;  %3838 = vmatpush.msrb.mxu1 %v13428_v43  ;;  %v10929_v25 = vld [vmem:[%s12792_s8 + $0x2c8] sm:$0xff]  ;;  %v10935_v43 = vld [vmem:[%s12792_s8 + $0x2b0] sm:$0xff] }
0x23c9   :  { %13446 = vst [vmem:[#allocation5_spill] sm:$0xff] %v10929_v25 }
0x23ca   :  { %3819 = vmatpush.msrb.mxu0 %v13429_v11  ;;  %3839 = vmatpush.msrb.mxu1 %v13430_v55  ;;  %13447 = vst [vmem:[#allocation20_spill] sm:$0xff] %v10935_v43  ;;  %v10941_v11 = vld [vmem:[%s12792_s8 + $0x2b8] sm:$0xff]  ;;  %v10947_v55 = vld [vmem:[%s12792_s8 + $0x2a0] sm:$0xff] }
0x23cb   :  { %13448 = vst [vmem:[#allocation19_spill] sm:$0xff] %v10941_v11 }
0x23cc   :  { %3820 = vmatpush.msrb.mxu0 %v13431_v45  ;;  %3840 = vmatpush.msrb.mxu1 %v13432_v63  ;;  %13449 = vst [vmem:[#allocation10_spill] sm:$0xff] %v10947_v55  ;;  %v10953_v45 = vld [vmem:[%s12792_s8 + $0x2a8] sm:$0xff]  ;;  %v10959_v63 = vld [vmem:[%s12792_s8 + $0x290] sm:$0xff] }
0x23cd   :  { %13450 = vst [vmem:[#allocation42_spill] sm:$0xff] %v10953_v45 }
0x23ce   :  { %3821 = vmatpush.msrb.mxu0 %v13433_v33  ;;  %3841 = vmatpush.msrb.mxu1 %v13434_v60  ;;  %13451 = vst [vmem:[#allocation40_spill] sm:$0xff] %v10959_v63  ;;  %v10965_v33 = vld [vmem:[%s12792_s8 + $0x298] sm:$0xff]  ;;  %v10971_v60 = vld [vmem:[%s12792_s8 + $0x280] sm:$0xff] }
0x23cf   :  { %13452 = vst [vmem:[#allocation41_spill] sm:$0xff] %v10965_v33 }
0x23d0   :  { %3822 = vmatpush.msrb.mxu0 %v13435_v41  ;;  %3842 = vmatpush.msrb.mxu1 %v13436_v42  ;;  %13453 = vst [vmem:[#allocation43_spill] sm:$0xff] %v10971_v60  ;;  %v10977_v41 = vld [vmem:[%s12792_s8 + $0x288] sm:$0xff]  ;;  %v10983_v42 = vld [vmem:[%s12792_s8 + $0x270] sm:$0xff] }
0x23d1   :  { %13454 = vst [vmem:[#allocation44_spill] sm:$0xff] %v10977_v41 }
0x23d2   :  { %3823 = vmatpush.msrb.mxu0 %v13437_v62  ;;  %3843 = vmatpush.msrb.mxu1 %v13438_v23  ;;  %13455 = vst [vmem:[#allocation45_spill] sm:$0xff] %v10983_v42  ;;  %v10989_v62 = vld [vmem:[%s12792_s8 + $0x278] sm:$0xff]  ;;  %v13457_v23 = vld [vmem:[#allocation49_spill] sm:$0xff] }
0x23d3   :  { %13456 = vst [vmem:[#allocation46_spill] sm:$0xff] %v10989_v62 }
0x23d4   :  { %3824 = vmatpush.msrb.mxu0 %v13439_v24  ;;  %3844 = vmatpush.msrb.mxu1 %v13440_v35  ;;  %v13458_v24 = vld [vmem:[#allocation50_spill] sm:$0xff] }
0x23d5   :  { %v10996_v35 = vsel %vm1902_vm9, %v13458_v24, %v13457_v23  ;;  %v13463_v24 = vld [vmem:[#allocation38_spill] sm:$0xff] }
0x23d6   :  { %5970 = vmatpush.msk.msra.mxu0 %vm184_vm0, %v10837_v20  ;;  %5972 = vmatpush.msk.msra.mxu1 %vm184_vm0, %v10844_v50  ;;  %13459 = vst [vmem:[#allocation47_spill] sm:$0xff] %v10996_v35 }
0x23d8   :  { %4051 = vmatpush.msra.mxu0 %v10851_v8  ;;  %4071 = vmatpush.msra.mxu1 %v10857_v4 }
0x23da   :  { %4052 = vmatpush.msra.mxu0 %v10863_v53  ;;  %4072 = vmatpush.msra.mxu1 %v10869_v22 }
0x23dc   :  { %4053 = vmatpush.msra.mxu0 %v10875_v26  ;;  %4073 = vmatpush.msra.mxu1 %v10881_v6 }
0x23de   :  { %4054 = vmatpush.msra.mxu0 %v10887_v47  ;;  %4074 = vmatpush.msra.mxu1 %v10893_v58 }
0x23e0   :  { %4055 = vmatpush.msra.mxu0 %v10899_v31  ;;  %4075 = vmatpush.msra.mxu1 %v10905_v32 }
0x23e2   :  { %4056 = vmatpush.msra.mxu0 %v10911_v13  ;;  %4076 = vmatpush.msra.mxu1 %v10917_v3 }
0x23e4   :  { %4057 = vmatpush.msra.mxu0 %v10923_v46  ;;  %4077 = vmatpush.msra.mxu1 %v10929_v25 }
0x23e6   :  { %4058 = vmatpush.msra.mxu0 %v10935_v43  ;;  %4078 = vmatpush.msra.mxu1 %v10941_v11 }
0x23e8   :  { %4059 = vmatpush.msra.mxu0 %v10947_v55  ;;  %4079 = vmatpush.msra.mxu1 %v10953_v45 }
0x23ea   :  { %4060 = vmatpush.msra.mxu0 %v10959_v63  ;;  %4080 = vmatpush.msra.mxu1 %v10965_v33  ;;  %v13461_v63 = vld [vmem:[#allocation51_spill] sm:$0xff] }
0x23eb   :  { %vm3558_vm7 = vcmp.gt.s32.totalorder %v13461_v63, 5 }
0x23ec   :  { %4061 = vmatpush.msra.mxu0 %v10971_v60  ;;  %4081 = vmatpush.msra.mxu1 %v10977_v41  ;;  %v2948_v41 = vmul.f32 %v10793_v28, %v10996_v35 }
0x23ee   :  { %4062 = vmatpush.msra.mxu0 %v10983_v42  ;;  %4082 = vmatpush.msra.mxu1 %v10989_v62  ;;  %v13462_v62 = vmov 0  }
0x23ef   :  { %v3665_v45 = vsel %vm3558_vm7, 1, %v13462_v62 }
0x23fd   :  { %v2956_v60 = vpop.permute.xlu2 %2955 }
0x23fe   :  { %v11000_v33 = vadd.f32 %v2956_v60, %v2948_v41  ;;  %v3563_v41 = vld [vmem:[#allocation2 + $0x58] sm:$0xff] }
0x2400   :  { %13460 = vst [vmem:[#allocation48_spill] sm:$0xff] %v11000_v33  ;;  %6341 = vtanh.f32 %v11000_v33 }
0x2401   :  { %6343 = vpow2.f32 %v5915_v56 }
0x2406   :  { %v6342_v42 = vpop.eup %6341 }
0x2407   :  { %2961 = vrot.lane.b32.xlu2 %v6342_v42, %s6942_s26  ;;  %v6344_v60 = vpop.eup %6343 }
0x2408   :  { %v2916_v11 = vadd.f32 1.0, %v6344_v60 }
0x240a   :  { %v2943_v62 = vand.u32 2147483648, %v2916_v11  ;;  %vm2937_vm8 = vweird.f32 %v2916_v11  ;;  %v2941_v43 = vand.u32 2147483647, %v2916_v11 }
0x240c   :  { %v2944_v60 = vor.u32 1.1754944e-38, %v2943_v62  ;;  %vm2942_vm11 = vcmp.eq.f32.partialorder %v2941_v43, 8.507059e+37  ;;  %v3562_v43 = vld [vmem:[#allocation2 + $0x50] sm:$0xff] }
0x240f   :  { %3667 = vperm.xlu2 %6067, %v3665_v45  }
0x2438   :  { %v3375_v23 = vpop.f32.mrf.mxu1 }
0x2439   :  { %v11008_v55 = vadd.f32 %v3375_v23, %v13463_v24 }
0x243b   :  { %6345 = vtanh.f32 %v11008_v55 }
0x2440   :  { %v3603_v33 = vpop.f32.mrf.mxu1 }
0x2441   :  { %v6346_v35 = vpop.eup %6345  ;;  %v11011_v42 = vadd.f32 %v3603_v33, %v3563_v41 }
0x2442   :  { %3419 = vrot.lane.b32.xlu0 %v6346_v35, %s6941_s7 }
0x2443   :  { %6347 = vtanh.f32 %v11011_v42 }
0x2444   :  { %6349 = vrcp.f32 %v2916_v11 }
0x2449   :  { %v6348_v36 = vpop.eup %6347 }
0x244a   :  { %3649 = vrot.lane.b32.xlu1 %v6348_v36, %s6941_s7  ;;  %v6350_v45 = vpop.eup %6349 }
0x244b   :  { %v2933_v63 = vmul.f32 %v6350_v45, %v2916_v11  ;;  %vm2938_vm9 = vweird.f32 %v6350_v45  ;;  %v13465_v11 = vld [vmem:[#allocation39_spill] sm:$0xff] }
0x244c   :  { %vm2939_vm13 = vmor %vm2937_vm8, %vm2938_vm9 }
0x244d   :  { %v2934_v56 = vsub.f32 1.0, %v2933_v63  ;;  %v3355_v63 = vpop.f32.mrf.mxu0 }
0x244f   :  { %v2935_v23 = vmul.f32 %v6350_v45, %v2934_v56  ;;  %v3356_v56 = vadd.f32 %v3355_v63, %v13465_v11 }
0x2451   :  { %v2936_v24 = vadd.f32 %v6350_v45, %v2935_v23 }
0x2453   :  { %v2940_v33 = vsel %vm2939_vm13, %v6350_v45, %v2936_v24  ;;  %v5938_v24 = vmul.f32 -1.442695, %v3356_v56 }
0x2454   :  { %v2945_v35 = vsel %vm2942_vm11, %v2944_v60, %v2940_v33 }
0x2455   :  { %v3583_v62 = vpop.f32.mrf.mxu0  ;;  %6351 = vpow2.f32 %v5938_v24 }
0x2456   :  { %v3606_v45 = vadd.f32 %v3583_v62, %v3562_v43 }
0x2458   :  { %v5950_v23 = vmul.f32 -1.442695, %v3606_v45 }
0x245a   :  { %6353 = vpow2.f32 %v5950_v23 }
0x2461   :  { %v2962_v41 = vpop.permute.xlu2 %2961 }
0x2462   :  { %v2964_v25 = vmul.f32 %v2962_v41, %v10793_v28  ;;  %v11017_v46 = vmul.f32 %v2962_v41, %v2945_v35  ;;  %v6352_v28 = vpop.eup %6351 }
0x2463   :  { %v3384_v33 = vadd.f32 1.0, %v6352_v28  ;;  %v6354_v60 = vpop.eup %6353 }
0x2464   :  { %v11022_v36 = vsel %vm2491_vm4, %v2964_v25, %v10282_v49  ;;  %v3614_v35 = vadd.f32 1.0, %v6354_v60 }
0x2465   :  { %13464 = vst [vmem:[#allocation49_spill] sm:$0xff] %v11022_v36  ;;  %3448 = vrot.lane.b32.xlu2 %v11022_v36, %s6945_s29  ;;  %6355 = vrcp.f32 %v3384_v33  ;;  %v3397_v11 = vand.u32 2147483648, %v3384_v33  ;;  %vm3391_vm5 = vweird.f32 %v3384_v33  ;;  %v3395_v24 = vand.u32 2147483647, %v3384_v33 }
0x2466   :  { %6357 = vrcp.f32 %v3614_v35  ;;  %vm3621_vm8 = vweird.f32 %v3614_v35 }
0x2467   :  { %v3398_v45 = vor.u32 1.1754944e-38, %v3397_v11  ;;  %vm3396_vm7 = vcmp.eq.f32.partialorder %v3395_v24, 8.507059e+37 }
0x246b   :  { %v6356_v49 = vpop.eup %6355 }
0x246c   :  { %v3387_v25 = vmul.f32 %v6356_v49, %v3384_v33  ;;  %v6358_v36 = vpop.eup %6357  ;;  %vm3392_vm1 = vweird.f32 %v6356_v49 }
0x246d   :  { %v3617_v13 = vmul.f32 %v6358_v36, %v3614_v35  ;;  %vm3393_vm6 = vmor %vm3391_vm5, %vm3392_vm1  ;;  %vm3622_vm9 = vweird.f32 %v6358_v36 }
0x246e   :  { %v3388_v41 = vsub.f32 1.0, %v3387_v25  ;;  %v3627_v25 = vand.u32 2147483648, %v3614_v35  ;;  %vm3623_vm13 = vmor %vm3621_vm8, %vm3622_vm9 }
0x246f   :  { %v3618_v56 = vsub.f32 1.0, %v3617_v13 }
0x2470   :  { %v3389_v3 = vmul.f32 %v6356_v49, %v3388_v41  ;;  %v3628_v41 = vor.u32 1.1754944e-38, %v3627_v25 }
0x2471   :  { %v3619_v43 = vmul.f32 %v6358_v36, %v3618_v56 }
0x2472   :  { %v3390_v63 = vadd.f32 %v6356_v49, %v3389_v3  ;;  %v3625_v3 = vand.u32 2147483647, %v3614_v35 }
0x2473   :  { %v3620_v32 = vadd.f32 %v6358_v36, %v3619_v43  ;;  %v11058_v43 = vsel %vm2491_vm4, %v11017_v46, %v10318_v0 }
0x2474   :  { %v3394_v62 = vsel %vm3393_vm6, %v6356_v49, %v3390_v63  ;;  %vm3626_vm11 = vcmp.eq.f32.partialorder %v3625_v3, 8.507059e+37  ;;  %v11036_v49 = vsel %vm2491_vm4, %v10310_v18, %v10306_v29 }
0x2475   :  { %v3399_v28 = vsel %vm3396_vm7, %v3398_v45, %v3394_v62  ;;  %v3624_v13 = vsel %vm3623_vm13, %v6358_v36, %v3620_v32  ;;  %v11046_v32 = vsel %vm3080_vm10, %v10298_v7, %v10294_v12  ;;  %v5939_v12 = vmul.f32 -1.442695, %v11008_v55 }
0x2476   :  { %v11028_v31 = vsel %vm3626_vm11, %v3628_v41, %v3624_v13  ;;  %v3417_v63 = vmul.f32 %v3399_v28, %v11036_v49  ;;  %v5951_v7 = vmul.f32 -1.442695, %v11011_v42 }
0x2477   :  { %v3647_v36 = vmul.f32 %v11028_v31, %v11046_v32 }
0x24b4   :  { %v3420_v23 = vpop.permute.xlu0 %3419 }
0x24b5   :  { %v3422_v60 = vmul.f32 %v3420_v23, %v3399_v28 }
0x24b7   :  { %3424 = vrot.lane.b32.xlu0 %v3422_v60, %s6942_s26 }
0x24bc   :  { %v3650_v33 = vpop.permute.xlu1 %3649 }
0x24bd   :  { %v3652_v11 = vmul.f32 %v3650_v33, %v11028_v31 }
0x24bf   :  { %3654 = vrot.lane.b32.xlu1 %v3652_v11, %s6942_s26 }
0x2529   :  { %v3425_v35 = vpop.permute.xlu0 %3424 }
0x252a   :  { %v11039_v56 = vadd.f32 %v3425_v35, %v3417_v63 }
0x252c   :  { %6359 = vtanh.f32 %v11039_v56 }
0x2531   :  { %v3655_v24 = vpop.permute.xlu1 %3654 }
0x2532   :  { %v6360_v62 = vpop.eup %6359  ;;  %v11050_v29 = vadd.f32 %v3655_v24, %v3647_v36 }
0x2533   :  { %3430 = vrot.lane.b32.xlu0 %v6360_v62, %s6942_s26 }
0x2534   :  { %6361 = vtanh.f32 %v11050_v29 }
0x2535   :  { %6363 = vpow2.f32 %v5939_v12 }
0x2536   :  { %6365 = vpow2.f32 %v5951_v7 }
0x253a   :  { %v6362_v18 = vpop.eup %6361 }
0x253b   :  { %3660 = vrot.lane.b32.xlu1 %v6362_v18, %s6942_s26  ;;  %3450 = vrot.lane.b32.xlu0 %v11058_v43, %s6945_s29  ;;  %v6364_v45 = vpop.eup %6363 }
0x253c   :  { %v3385_v23 = vadd.f32 1.0, %v6364_v45  ;;  %v6366_v60 = vpop.eup %6365 }
0x253d   :  { %v3615_v25 = vadd.f32 1.0, %v6366_v60 }
0x253e   :  { %6367 = vrcp.f32 %v3385_v23  ;;  %v3412_v55 = vand.u32 2147483648, %v3385_v23  ;;  %vm3406_vm5 = vweird.f32 %v3385_v23  ;;  %v3410_v35 = vand.u32 2147483647, %v3385_v23 }
0x253f   :  { %6369 = vrcp.f32 %v3615_v25  ;;  %v3642_v60 = vand.u32 2147483648, %v3615_v25  ;;  %vm3636_vm8 = vweird.f32 %v3615_v25 }
0x2540   :  { %v3413_v24 = vor.u32 1.1754944e-38, %v3412_v55  ;;  %vm3411_vm7 = vcmp.eq.f32.partialorder %v3410_v35, 8.507059e+37 }
0x2544   :  { %v6368_v3 = vpop.eup %6367 }
0x2545   :  { %v3402_v0 = vmul.f32 %v6368_v3, %v3385_v23  ;;  %v6370_v13 = vpop.eup %6369  ;;  %vm3407_vm1 = vweird.f32 %v6368_v3 }
0x2546   :  { %v3632_v33 = vmul.f32 %v6370_v13, %v3615_v25  ;;  %vm3408_vm6 = vmor %vm3406_vm5, %vm3407_vm1  ;;  %vm3637_vm9 = vweird.f32 %v6370_v13 }
0x2547   :  { %v3403_v46 = vsub.f32 1.0, %v3402_v0  ;;  %vm3638_vm13 = vmor %vm3636_vm8, %vm3637_vm9 }
0x2548   :  { %v3633_v63 = vsub.f32 1.0, %v3632_v33  ;;  %v11079_v33 = vpop.permute.xlu2 %3667 }
0x2549   :  { %v3404_v41 = vmul.f32 %v6368_v3, %v3403_v46  ;;  %v3643_v46 = vor.u32 1.1754944e-38, %v3642_v60  ;;  %vm3669_vm1 = vcmp.eq.s32.totalorder %v11079_v33, 1  ;;  %v13472_v60 = vld [vmem:[#allocation58_spill] sm:$0xff] }
0x254a   :  { %v3634_v36 = vmul.f32 %v6370_v13, %v3633_v63 }
0x254b   :  { %v3405_v11 = vadd.f32 %v6368_v3, %v3404_v41 }
0x254c   :  { %v3635_v45 = vadd.f32 %v6370_v13, %v3634_v36  ;;  %v13466_v36 = vld [vmem:[#allocation52_spill] sm:$0xff] }
0x254d   :  { %v3409_v42 = vsel %vm3408_vm6, %v6368_v3, %v3405_v11  ;;  %v3640_v3 = vand.u32 2147483647, %v3615_v25 }
0x254e   :  { %v3414_v62 = vsel %vm3411_vm7, %v3413_v24, %v3409_v42  ;;  %v13467_v24 = vld [vmem:[#allocation53_spill] sm:$0xff] }
0x254f   :  { %vm3641_vm11 = vcmp.eq.f32.partialorder %v3640_v3, 8.507059e+37  ;;  %v13473_v3 = vld [vmem:[#allocation59_spill] sm:$0xff] }
0x25a5   :  { %v3431_v18 = vpop.permute.xlu0 %3430 }
0x25a6   :  { %v3433_v12 = vmul.f32 %v3431_v18, %v3399_v28  ;;  %v3434_v7 = vmul.f32 %v3431_v18, %v3414_v62  ;;  %v3639_v28 = vsel %vm3638_vm13, %v6370_v13, %v3635_v45  ;;  %v13468_v18 = vld [vmem:[#allocation54_spill] sm:$0xff]  ;;  %v13471_v45 = vld [vmem:[#allocation57_spill] sm:$0xff] }
0x25a7   :  { %v3644_v41 = vsel %vm3641_vm11, %v3643_v46, %v3639_v28 }
0x25a8   :  { %v11068_v0 = vsel %vm3080_vm10, %v3434_v7, %v10337_v27  ;;  %v11073_v23 = vsel %vm3080_vm10, %v3433_v12, %v10342_v34  ;;  %v13469_v12 = vld [vmem:[#allocation55_spill] sm:$0xff]  ;;  %v13470_v7 = vld [vmem:[#allocation56_spill] sm:$0xff] }
0x25a9   :  { %3442 = vrot.lane.b32.xlu1 %v11068_v0, %s6944_s5  ;;  %3440 = vrot.lane.b32.xlu0 %v11073_v23, %s6944_s5 }
0x25ad   :  { %v3661_v27 = vpop.permute.xlu1 %3660 }
0x25ae   :  { %v3663_v11 = vmul.f32 %v3661_v27, %v11028_v31  ;;  %v3664_v34 = vmul.f32 %v3661_v27, %v3644_v41  ;;  %v3451_v31 = vpop.permute.xlu0 %3450  ;;  %v13476_v27 = vld [vmem:[#allocation62_spill] sm:$0xff] }
0x25b0   :  { %v11086_v25 = vsel %vm3669_vm1, %v3664_v34, %v10328_v30  ;;  %v11091_v13 = vsel %vm3669_vm1, %v3663_v11, %v10352_v1  ;;  %v3449_v30 = vpop.permute.xlu2 %3448  ;;  %v13477_v11 = vld [vmem:[#allocation63_spill] sm:$0xff] }
0x25b1   :  { %3677 = vrot.lane.b32.xlu2 %v11086_v25, %s6944_s5  ;;  %3675 = vrot.lane.b32.xlu1 %v11091_v13, %s6944_s5  ;;  %v3452_v35 = vsel %vm1328_vm12, %v3449_v30, %v3451_v31 }
0x25b2   :  { %3681 = vrot.lane.b32.xlu0 %v10646_v17, %s6945_s29 }
0x25b9   :  { %3683 = vrot.lane.b32.xlu1 %v10641_v5, %s6945_s29 }
0x260b   :  { %v3678_v28 = vpop.permute.xlu2 %3677 }
0x261b   :  { %v3443_v63 = vpop.permute.xlu1 %3442  ;;  %v3441_v55 = vpop.permute.xlu0 %3440 }
0x261c   :  { %v3444_v1 = vsel %vm626_vm14, %v3441_v55, %v3443_v63  ;;  %v13478_v63 = vld [vmem:[#allocation64_spill] sm:$0xff]  ;;  %v13479_v55 = vld [vmem:[#allocation65_spill] sm:$0xff] }
0x261d   :  { %v3454_v42 = vsel %vm502_vm15, %v3444_v1, %v3452_v35  ;;  %v13480_v35 = vld [vmem:[#allocation66_spill] sm:$0xff]  ;;  %v13481_v1 = vld [vmem:[#allocation67_spill] sm:$0xff] }
0x261e   :  { %5941 = vmatmul.msk.f32.vlgmr.msra.gmra.mxu3 %vm656_vm3, %v3454_v42  ;;  %5943 = vmatmul.msk.f32.vlgmr.msrb.gmra.mxu2 %vm656_vm3, %v3454_v42  ;;  %v13482_v42 = vld [vmem:[#allocation68_spill] sm:$0xff] }
0x261f   :  { %5964 = vmatpush.msk.msra.mxu3 %vm184_vm0, %v10368_v51  ;;  %5966 = vmatpush.msk.msrb.mxu2 %vm184_vm0, %v10375_v38  ;;  %v13474_v51 = vld [vmem:[#allocation60_spill] sm:$0xff]  ;;  %v13475_v38 = vld [vmem:[#allocation61_spill] sm:$0xff] }
0x2621   :  { %3931 = vmatpush.msra.mxu3 %v13466_v36  ;;  %3951 = vmatpush.msrb.mxu2 %v13467_v24  ;;  %v13483_v36 = vld [vmem:[#allocation69_spill] sm:$0xff]  ;;  %v13484_v24 = vld [vmem:[#allocation70_spill] sm:$0xff] }
0x2623   :  { %v3676_v62 = vpop.permute.xlu1 %3675  ;;  %3932 = vmatpush.msra.mxu3 %v13468_v18  ;;  %3952 = vmatpush.msrb.mxu2 %v13469_v12  ;;  %v13486_v18 = vld [vmem:[#allocation72_spill] sm:$0xff] }
0x2624   :  { %v3682_v46 = vpop.permute.xlu0 %3681  ;;  %v11123_v34 = vsel %vm626_vm14, %v3676_v62, %v3678_v28  ;;  %v13485_v62 = vld [vmem:[#allocation71_spill] sm:$0xff]  ;;  %v13487_v12 = vld [vmem:[#allocation4_spill] sm:$0xff] }
0x2625   :  { %3933 = vmatpush.msra.mxu3 %v13470_v7  ;;  %3953 = vmatpush.msrb.mxu2 %v13471_v45  ;;  %v13488_v7 = vld [vmem:[#allocation6_spill] sm:$0xff]  ;;  %v13489_v45 = vld [vmem:[#allocation7_spill] sm:$0xff] }
0x2626   :  { %v13494_v28 = vld [vmem:[#allocation15_spill] sm:$0xff] }
0x2627   :  { %3934 = vmatpush.msra.mxu3 %v13472_v60  ;;  %3954 = vmatpush.msrb.mxu2 %v13473_v3  ;;  %v13490_v60 = vld [vmem:[#allocation11_spill] sm:$0xff]  ;;  %v13491_v3 = vld [vmem:[#allocation12_spill] sm:$0xff] }
0x2629   :  { %3935 = vmatpush.msra.mxu3 %v13474_v51  ;;  %3955 = vmatpush.msrb.mxu2 %v13475_v38  ;;  %v13492_v51 = vld [vmem:[#allocation13_spill] sm:$0xff]  ;;  %v13493_v38 = vld [vmem:[#allocation14_spill] sm:$0xff] }
0x262b   :  { %v3684_v41 = vpop.permute.xlu1 %3683  ;;  %3936 = vmatpush.msra.mxu3 %v13476_v27  ;;  %3956 = vmatpush.msrb.mxu2 %v13477_v11  ;;  %v13497_v27 = vld [vmem:[#allocation18_spill] sm:$0xff]  ;;  %v13498_v11 = vld [vmem:[#allocation21_spill] sm:$0xff] }
0x262c   :  { %v3685_v31 = vsel %vm1328_vm12, %v3682_v46, %v3684_v41  ;;  %v13495_v46 = vld [vmem:[#allocation16_spill] sm:$0xff]  ;;  %v13496_v41 = vld [vmem:[#allocation17_spill] sm:$0xff] }
0x262d   :  { %v3687_v30 = vsel %vm502_vm15, %v11123_v34, %v3685_v31  ;;  %3937 = vmatpush.msra.mxu3 %v13478_v63  ;;  %3957 = vmatpush.msrb.mxu2 %v13479_v55  ;;  %v13499_v31 = vld [vmem:[#allocation32_spill] sm:$0xff]  ;;  %v13501_v63 = vld [vmem:[#allocation34_spill] sm:$0xff]  ;;  %v13502_v55 = vld [vmem:[#allocation23_spill] sm:$0xff] }
0x262e   :  { %5953 = vmatmul.msk.f32.vlgmr.msrb.gmra.mxu3 %vm656_vm3, %v3687_v30  ;;  %5955 = vmatmul.msk.f32.vlgmr.msra.gmra.mxu2 %vm656_vm3, %v3687_v30  ;;  %v13500_v30 = vld [vmem:[#allocation22_spill] sm:$0xff] }
0x262f   :  { %3938 = vmatpush.msra.mxu3 %v13480_v35  ;;  %3958 = vmatpush.msrb.mxu2 %v13481_v1  ;;  %v13503_v35 = vld [vmem:[#allocation35_spill] sm:$0xff] }
0x2631   :  { %3939 = vmatpush.msra.mxu3 %v13482_v42  ;;  %3959 = vmatpush.msrb.mxu2 %v13483_v36  ;;  %v13504_v36 = vld [vmem:[#allocation3_spill] sm:$0xff] }
0x2633   :  { %3940 = vmatpush.msra.mxu3 %v13484_v24  ;;  %3960 = vmatpush.msrb.mxu2 %v13485_v62 }
0x2635   :  { %3941 = vmatpush.msra.mxu3 %v13486_v18  ;;  %3961 = vmatpush.msrb.mxu2 %v13487_v12 }
0x2637   :  { %3942 = vmatpush.msra.mxu3 %v13488_v7  ;;  %3962 = vmatpush.msrb.mxu2 %v13489_v45 }
0x2639   :  { %5976 = vmatpush.msk.msrb.mxu3 %vm506_vm2, %v13490_v60  ;;  %5978 = vmatpush.msk.msra.mxu2 %vm506_vm2, %v13491_v3 }
0x263b   :  { %4165 = vmatpush.msrb.mxu3 %v13492_v51  ;;  %4185 = vmatpush.msra.mxu2 %v13493_v38 }
0x263d   :  { %4166 = vmatpush.msrb.mxu3 %v13494_v28  ;;  %4186 = vmatpush.msra.mxu2 %v13495_v46 }
0x263f   :  { %4167 = vmatpush.msrb.mxu3 %v13496_v41  ;;  %4187 = vmatpush.msra.mxu2 %v13497_v27 }
0x2641   :  { %4168 = vmatpush.msrb.mxu3 %v13498_v11  ;;  %4188 = vmatpush.msra.mxu2 %v13499_v31 }
0x2643   :  { %4169 = vmatpush.msrb.mxu3 %v13500_v30  ;;  %4189 = vmatpush.msra.mxu2 %v13501_v63 }
0x2645   :  { %4170 = vmatpush.msrb.mxu3 %v13502_v55  ;;  %4190 = vmatpush.msra.mxu2 %v13503_v35 }
0x26a1   :  { %v11158_v1 = vpop.f32.mrf.mxu2  ;;  %v11162_v18 = vpop.f32.mrf.mxu3 }
0x26b1   :  { %v3728_v42 = vpop.f32.mrf.mxu2  ;;  %v3708_v12 = vpop.f32.mrf.mxu3 }
0x26b2   :  { %v3729_v24 = vadd.f32 %v3728_v42, %v13504_v36  ;;  %v3709_v7 = vadd.f32 %v3708_v12, %v13324_v14  ;;  %v13505_v42 = vld [vmem:[#allocation24_spill] sm:$0xff] }
0x26b4   :  { %6371 = vtanh.f32 %v3729_v24  ;;  %v5956_v45 = vmul.f32 -1.442695, %v3709_v7 }
0x26b6   :  { %6373 = vpow2.f32 %v5956_v45 }
0x26ba   :  { %v6372_v62 = vpop.eup %6371 }
0x26bb   :  { %3772 = vrot.lane.b32.xlu2 %v6372_v62, %s6941_s7  ;;  %v11170_v62 = vsel %vm3080_vm10, %v13505_v42, %v10629_v2 }
0x26bc   :  { %v6374_v60 = vpop.eup %6373 }
0x26bd   :  { %v3737_v3 = vadd.f32 1.0, %v6374_v60 }
0x26bf   :  { %6375 = vrcp.f32 %v3737_v3  ;;  %v3750_v27 = vand.u32 2147483648, %v3737_v3  ;;  %vm3744_vm6 = vweird.f32 %v3737_v3  ;;  %v3748_v11 = vand.u32 2147483647, %v3737_v3 }
0x26c1   :  { %v3751_v30 = vor.u32 1.1754944e-38, %v3750_v27  ;;  %vm3749_vm9 = vcmp.eq.f32.partialorder %v3748_v11, 8.507059e+37 }
0x26c5   :  { %v6376_v51 = vpop.eup %6375 }
0x26c6   :  { %v3740_v38 = vmul.f32 %v6376_v51, %v3737_v3  ;;  %vm3745_vm5 = vweird.f32 %v6376_v51  ;;  %v5957_v3 = vmul.f32 -1.442695, %v3729_v24 }
0x26c7   :  { %vm3746_vm7 = vmor %vm3744_vm6, %vm3745_vm5 }
0x26c8   :  { %v3741_v28 = vsub.f32 1.0, %v3740_v38 }
0x26ca   :  { %v3742_v46 = vmul.f32 %v6376_v51, %v3741_v28 }
0x26cc   :  { %v3743_v41 = vadd.f32 %v6376_v51, %v3742_v46 }
0x26ce   :  { %v3747_v31 = vsel %vm3746_vm7, %v6376_v51, %v3743_v41 }
0x26cf   :  { %v3752_v55 = vsel %vm3749_vm9, %v3751_v30, %v3747_v31 }
0x26d0   :  { %v3770_v12 = vmul.f32 %v3752_v55, %v11170_v62 }
0x2715   :  { %v3773_v63 = vpop.permute.xlu2 %3772 }
0x2716   :  { %v3775_v35 = vmul.f32 %v3773_v63, %v3752_v55 }
0x2718   :  { %3777 = vrot.lane.b32.xlu0 %v3775_v35, %s6942_s26 }
0x278a   :  { %v3778_v7 = vpop.permute.xlu0 %3777 }
0x278b   :  { %v11173_v45 = vadd.f32 %v3778_v7, %v3770_v12 }
0x278d   :  { %6377 = vtanh.f32 %v11173_v45 }
0x278e   :  { %6379 = vpow2.f32 %v5957_v3 }
0x2793   :  { %v6378_v60 = vpop.eup %6377 }
0x2794   :  { %3783 = vrot.lane.b32.xlu1 %v6378_v60, %s6942_s26  ;;  %v6380_v51 = vpop.eup %6379 }
0x2795   :  { %v3738_v38 = vadd.f32 1.0, %v6380_v51 }
0x2797   :  { %6381 = vrcp.f32 %v3738_v38  ;;  %v3765_v11 = vand.u32 2147483648, %v3738_v38  ;;  %vm3759_vm13 = vweird.f32 %v3738_v38  ;;  %v3763_v31 = vand.u32 2147483647, %v3738_v38 }
0x2799   :  { %v3766_v63 = vor.u32 1.1754944e-38, %v3765_v11  ;;  %vm3764_vm5 = vcmp.eq.f32.partialorder %v3763_v31, 8.507059e+37  ;;  %v13507_v11 = vld [vmem:[#allocation36_spill] sm:$0xff]  ;;  %v13508_v31 = vld [vmem:[#allocation37_spill] sm:$0xff] }
0x279c   :  { %3799 = vrot.lane.b32.xlu1 %v10781_v57, %s6945_s29 }
0x279d   :  { %v6382_v2 = vpop.eup %6381 }
0x279e   :  { %v3755_v28 = vmul.f32 %v6382_v2, %v3738_v38  ;;  %vm3760_vm8 = vweird.f32 %v6382_v2 }
0x279f   :  { %vm3761_vm11 = vmor %vm3759_vm13, %vm3760_vm8 }
0x27a0   :  { %v3756_v46 = vsub.f32 1.0, %v3755_v28  ;;  %v11203_v28 = vld [vmem:[%s12792_s8 + $0xc0] sm:$0xf] }
0x27a2   :  { %v3757_v41 = vmul.f32 %v6382_v2, %v3756_v46  ;;  %v11212_v46 = vld [vmem:[%s12792_s8 + $0xb0] sm:$0xff] }
0x27a4   :  { %v3758_v27 = vadd.f32 %v6382_v2, %v3757_v41  ;;  %v11219_v41 = vld [vmem:[%s12792_s8 + $0xa0] sm:$0xff] }
0x27a6   :  { %v3762_v30 = vsel %vm3761_vm11, %v6382_v2, %v3758_v27  ;;  %v13506_v27 = vld [vmem:[#allocation27_spill] sm:$0xff] }
0x27a7   :  { %v3767_v35 = vsel %vm3764_vm5, %v3766_v63, %v3762_v30  ;;  %v11282_v30 = vld [vmem:[%s12792_s8 + $0x10] sm:$0xff]  ;;  %v13510_v63 = vld [vmem:[#allocation26_spill] sm:$0xff] }
0x27a8   :  { %13509 = vst [vmem:[#allocation50_spill] sm:$0xff] %v11282_v30 }
0x2806   :  { %v3784_v42 = vpop.permute.xlu1 %3783 }
0x2807   :  { %v3786_v24 = vmul.f32 %v3784_v42, %v3752_v55  ;;  %v3787_v12 = vmul.f32 %v3784_v42, %v3767_v35  ;;  %v11289_v35 = vld [vmem:[%s12792_s8] sm:$0xff]  ;;  %v13512_v42 = vld [vmem:[#allocation25_spill] sm:$0xff] }
0x2808   :  { %13511 = vst [vmem:[#allocation51_spill] sm:$0xff] %v11289_v35 }
0x2809   :  { %v11182_v7 = vsel %vm3669_vm1, %v3787_v12, %v10641_v5  ;;  %v11187_v60 = vsel %vm3669_vm1, %v3786_v24, %v10646_v17  ;;  %v13513_v12 = vld [vmem:[#allocation8_spill] sm:$0xff] }
0x280a   :  { %3795 = vrot.lane.b32.xlu0 %v11182_v7, %s6944_s5  ;;  %3793 = vrot.lane.b32.xlu2 %v11187_v60, %s6944_s5 }
0x280e   :  { %v3800_v51 = vpop.permute.xlu1 %3799 }
0x2812   :  { %3801 = vrot.lane.b32.xlu2 %v10776_v10, %s6945_s29 }
0x2864   :  { %v3794_v55 = vpop.permute.xlu2 %3793 }
0x286c   :  { %v3802_v3 = vpop.permute.xlu2 %3801 }
0x286d   :  { %v3803_v5 = vsel %vm1328_vm12, %v3800_v51, %v3802_v3 }
0x287c   :  { %v3796_v38 = vpop.permute.xlu0 %3795 }
0x287d   :  { %v3797_v2 = vsel %vm626_vm14, %v3794_v55, %v3796_v38 }
0x287e   :  { %v3805_v17 = vsel %vm502_vm15, %v3797_v2, %v3803_v5 }
0x287f   :  { %5959 = vmatmul.msk.f32.vlgmr.msrb.gmra.mxu0 %vm656_vm3, %v3805_v17  ;;  %5961 = vmatmul.msk.f32.vlgmr.msrb.gmra.mxu1 %vm656_vm3, %v3805_v17 }
0x2880   :  { %5982 = vmatpush.msk.msrb.mxu0 %vm184_vm0, %v11203_v28  ;;  %5984 = vmatpush.msk.msrb.mxu1 %vm184_vm0, %v10664_v44  ;;  %v11226_v44 = vld [vmem:[%s12792_s8 + $0x90] sm:$0xff] }
0x2882   :  { %4284 = vmatpush.msrb.mxu0 %v11212_v46  ;;  %4304 = vmatpush.msrb.mxu1 %v10672_v9  ;;  %v11233_v9 = vld [vmem:[%s12792_s8 + $0x80] sm:$0xff] }
0x2884   :  { %4285 = vmatpush.msrb.mxu0 %v11219_v41  ;;  %4305 = vmatpush.msrb.mxu1 %v10679_v15  ;;  %v11240_v15 = vld [vmem:[%s12792_s8 + $0x70] sm:$0xff] }
0x2886   :  { %4286 = vmatpush.msrb.mxu0 %v11226_v44  ;;  %4306 = vmatpush.msrb.mxu1 %v10686_v59  ;;  %v11247_v59 = vld [vmem:[%s12792_s8 + $0x60] sm:$0xff] }
0x2888   :  { %4287 = vmatpush.msrb.mxu0 %v11233_v9  ;;  %4307 = vmatpush.msrb.mxu1 %v10693_v48  ;;  %v11254_v48 = vld [vmem:[%s12792_s8 + $0x50] sm:$0xff] }
0x288a   :  { %4288 = vmatpush.msrb.mxu0 %v11240_v15  ;;  %4308 = vmatpush.msrb.mxu1 %v10700_v40  ;;  %v11261_v40 = vld [vmem:[%s12792_s8 + $0x40] sm:$0xff] }
0x288c   :  { %4289 = vmatpush.msrb.mxu0 %v11247_v59  ;;  %4309 = vmatpush.msrb.mxu1 %v10707_v52  ;;  %v11268_v52 = vld [vmem:[%s12792_s8 + $0x30] sm:$0xff] }
0x288e   :  { %4290 = vmatpush.msrb.mxu0 %v11254_v48  ;;  %4310 = vmatpush.msrb.mxu1 %v10714_v61  ;;  %v11275_v61 = vld [vmem:[%s12792_s8 + $0x20] sm:$0xff] }
0x2890   :  { %4291 = vmatpush.msrb.mxu0 %v11261_v40  ;;  %4311 = vmatpush.msrb.mxu1 %v13506_v27 }
0x2892   :  { %4292 = vmatpush.msrb.mxu0 %v11268_v52  ;;  %4312 = vmatpush.msrb.mxu1 %v13507_v11 }
0x2894   :  { %4293 = vmatpush.msrb.mxu0 %v11275_v61  ;;  %4313 = vmatpush.msrb.mxu1 %v13508_v31 }
0x2896   :  { %4294 = vmatpush.msrb.mxu0 %v11282_v30  ;;  %4314 = vmatpush.msrb.mxu1 %v13510_v63 }
0x2898   :  { %4295 = vmatpush.msrb.mxu0 %v11289_v35  ;;  %4315 = vmatpush.msrb.mxu1 %v13512_v42 }
0x28fc   :  { %v3846_v24 = vpop.f32.mrf.mxu1  ;;  %v3826_v51 = vpop.f32.mrf.mxu0 }
0x28fd   :  { %v3847_v55 = vadd.f32 %v3846_v24, %v13513_v12  ;;  %v3827_v38 = vadd.f32 %v3826_v51, %v13424_v39 }
0x28ff   :  { %6383 = vtanh.f32 %v3847_v55  ;;  %v5962_v5 = vmul.f32 -1.442695, %v3827_v38 }
0x2901   :  { %6385 = vpow2.f32 %v5962_v5  ;;  %v13514_v5 = vld [vmem:[#allocation29_spill] sm:$0xff] }
0x2905   :  { %v6384_v3 = vpop.eup %6383 }
0x2906   :  { %3890 = vrot.lane.b32.xlu0 %v6384_v3, %s6941_s7 }
0x2907   :  { %v6386_v2 = vpop.eup %6385 }
0x2908   :  { %v3855_v17 = vadd.f32 1.0, %v6386_v2  ;;  %v11301_v2 = vsel %vm3080_vm10, %v13514_v5, %v10760_v16 }
0x290a   :  { %6387 = vrcp.f32 %v3855_v17  ;;  %v3868_v35 = vand.u32 2147483648, %v3855_v17  ;;  %vm3862_vm7 = vweird.f32 %v3855_v17  ;;  %v3866_v24 = vand.u32 2147483647, %v3855_v17 }
0x290c   :  { %v3869_v3 = vor.u32 1.1754944e-38, %v3868_v35  ;;  %vm3867_vm8 = vcmp.eq.f32.partialorder %v3866_v24, 8.507059e+37 }
0x2910   :  { %v6388_v27 = vpop.eup %6387 }
0x2911   :  { %v3858_v11 = vmul.f32 %v6388_v27, %v3855_v17  ;;  %vm3863_vm6 = vweird.f32 %v6388_v27 }
0x2912   :  { %vm3864_vm9 = vmor %vm3862_vm7, %vm3863_vm6 }
0x2913   :  { %v3859_v31 = vsub.f32 1.0, %v3858_v11 }
0x2915   :  { %v3860_v63 = vmul.f32 %v6388_v27, %v3859_v31 }
0x2917   :  { %v3861_v42 = vadd.f32 %v6388_v27, %v3860_v63 }
0x2919   :  { %v3865_v12 = vsel %vm3864_vm9, %v6388_v27, %v3861_v42 }
0x291a   :  { %v3870_v51 = vsel %vm3867_vm8, %v3869_v3, %v3865_v12 }
0x291b   :  { %v3888_v11 = vmul.f32 %v3870_v51, %v11301_v2 }
0x2978   :  { %v3891_v30 = vpop.permute.xlu0 %3890 }
0x2979   :  { %v3893_v38 = vmul.f32 %v3891_v30, %v3870_v51  ;;  %v5963_v30 = vmul.f32 -1.442695, %v3847_v55  ;;  %v11312_v55 = vadd.f32 %v11158_v1, %v13252_v54 }
0x297b   :  { %3895 = vrot.lane.b32.xlu1 %v3893_v38, %s6942_s26 }
0x29ed   :  { %v3896_v31 = vpop.permute.xlu1 %3895 }
0x29ee   :  { %v11304_v63 = vadd.f32 %v3896_v31, %v3888_v11 }
0x29f0   :  { %13515 = vst [vmem:[#allocation52_spill] sm:$0xff] %v11304_v63  ;;  %6389 = vtanh.f32 %v11304_v63 }
0x29f1   :  { %6391 = vpow2.f32 %v5963_v30 }
0x29f6   :  { %v6390_v35 = vpop.eup %6389 }
0x29f7   :  { %3901 = vrot.lane.b32.xlu2 %v6390_v35, %s6942_s26  ;;  %v6392_v12 = vpop.eup %6391 }
0x29f8   :  { %v3856_v17 = vadd.f32 1.0, %v6392_v12 }
0x29fa   :  { %6393 = vrcp.f32 %v3856_v17  ;;  %v3883_v38 = vand.u32 2147483648, %v3856_v17  ;;  %vm3877_vm11 = vweird.f32 %v3856_v17  ;;  %v3881_v5 = vand.u32 2147483647, %v3856_v17 }
0x29fb   :  { %6395 = vtanh.f32 %v11312_v55 }
0x29fc   :  { %v3884_v31 = vor.u32 1.1754944e-38, %v3883_v38  ;;  %vm3882_vm6 = vcmp.eq.f32.partialorder %v3881_v5, 8.507059e+37 }
0x29ff   :  { %3917 = vrot.lane.b32.xlu2 %v11073_v23, %s6945_s29 }
0x2a00   :  { %v6394_v16 = vpop.eup %6393 }
0x2a01   :  { %v3873_v27 = vmul.f32 %v6394_v16, %v3856_v17  ;;  %vm3878_vm13 = vweird.f32 %v6394_v16  ;;  %v6396_v1 = vpop.eup %6395 }
0x2a02   :  { %vm3879_vm5 = vmor %vm3877_vm11, %vm3878_vm13 }
0x2a03   :  { %v3874_v42 = vsub.f32 1.0, %v3873_v27 }
0x2a05   :  { %v3875_v24 = vmul.f32 %v6394_v16, %v3874_v42 }
0x2a07   :  { %v3876_v3 = vadd.f32 %v6394_v16, %v3875_v24 }
0x2a09   :  { %v3880_v11 = vsel %vm3879_vm5, %v6394_v16, %v3876_v3 }
0x2a0a   :  { %v3885_v35 = vsel %vm3882_vm6, %v3884_v31, %v3880_v11 }
0x2a51   :  { %v3902_v63 = vpop.permute.xlu2 %3901 }
0x2a52   :  { %v3904_v30 = vmul.f32 %v3902_v63, %v3870_v51  ;;  %v3905_v12 = vmul.f32 %v3902_v63, %v3885_v35 }
0x2a54   :  { %v11317_v27 = vsel %vm3669_vm1, %v3905_v12, %v10776_v10  ;;  %v11322_v17 = vsel %vm3669_vm1, %v3904_v30, %v10781_v57  ;;  %v3476_v10 = vadd.f32 %v11162_v18, %v13253_v19 }
0x2a55   :  { %3913 = vrot.lane.b32.xlu1 %v11317_v27, %s6944_s5  ;;  %3911 = vrot.lane.b32.xlu0 %v11322_v17, %s6944_s5 }
0x2a56   :  { %v5944_v51 = vmul.f32 -1.442695, %v3476_v10 }
0x2a58   :  { %6397 = vpow2.f32 %v5944_v51 }
0x2a59   :  { %v3918_v18 = vpop.permute.xlu2 %3917 }
0x2a5d   :  { %3539 = vrot.lane.b32.xlu1 %v6396_v1, %s6941_s7  ;;  %3919 = vrot.lane.b32.xlu0 %v11068_v0, %s6945_s29 }
0x2a5e   :  { %v6398_v57 = vpop.eup %6397 }
0x2a5f   :  { %v3504_v63 = vadd.f32 1.0, %v6398_v57 }
0x2a61   :  { %6399 = vrcp.f32 %v3504_v63  ;;  %v3517_v31 = vand.u32 2147483648, %v3504_v63  ;;  %vm3511_vm9 = vweird.f32 %v3504_v63  ;;  %v3515_v35 = vand.u32 2147483647, %v3504_v63 }
0x2a63   :  { %v3518_v12 = vor.u32 1.1754944e-38, %v3517_v31  ;;  %vm3516_vm13 = vcmp.eq.f32.partialorder %v3515_v35, 8.507059e+37  ;;  %v11378_v31 = vld [vmem:[%s12792_s8 + $0x178] sm:$0xff]  ;;  %v11384_v35 = vld [vmem:[%s12792_s8 + $0x160] sm:$0xff] }
0x2a64   :  { %13516 = vst [vmem:[#allocation53_spill] sm:$0xff] %v11384_v35 }
0x2a67   :  { %v6400_v16 = vpop.eup %6399 }
0x2a68   :  { %v3507_v42 = vmul.f32 %v6400_v16, %v3504_v63  ;;  %vm3512_vm7 = vweird.f32 %v6400_v16  ;;  %v11346_v63 = vld [vmem:[%s12792_s8 + $0x190] sm:$0xf] }
0x2a69   :  { %vm3513_vm8 = vmor %vm3511_vm9, %vm3512_vm7 }
0x2a6a   :  { %v3508_v24 = vsub.f32 1.0, %v3507_v42 }
0x2a6c   :  { %v3509_v3 = vmul.f32 %v6400_v16, %v3508_v24 }
0x2a6e   :  { %v3510_v11 = vadd.f32 %v6400_v16, %v3509_v3 }
0x2a70   :  { %v3514_v30 = vsel %vm3513_vm8, %v6400_v16, %v3510_v11  ;;  %v11353_v16 = vld [vmem:[%s12792_s8 + $0x198] sm:$0xf]  ;;  %v11372_v11 = vld [vmem:[%s12792_s8 + $0x170] sm:$0xff] }
0x2a71   :  { %v11334_v1 = vsel %vm3516_vm13, %v3518_v12, %v3514_v30  ;;  %v11392_v30 = vld [vmem:[%s12792_s8 + $0x168] sm:$0xff]  ;;  %v11400_v12 = vld [vmem:[%s12792_s8 + $0x150] sm:$0xff] }
0x2a72   :  { %13517 = vst [vmem:[#allocation54_spill] sm:$0xff] %v11392_v30 }
0x2a73   :  { %13518 = vst [vmem:[#allocation55_spill] sm:$0xff] %v11400_v12 }
0x2ac7   :  { %v3914_v38 = vpop.permute.xlu1 %3913  ;;  %v3912_v5 = vpop.permute.xlu0 %3911 }
0x2ac8   :  { %v3915_v57 = vsel %vm626_vm14, %v3912_v5, %v3914_v38  ;;  %v11360_v38 = vld [vmem:[%s12792_s8 + $0x180] sm:$0xff]  ;;  %v11366_v5 = vld [vmem:[%s12792_s8 + $0x188] sm:$0xff] }
0x2acf   :  { %v3540_v10 = vpop.permute.xlu1 %3539  ;;  %v3920_v51 = vpop.permute.xlu0 %3919 }
0x2ad0   :  { %v3542_v42 = vmul.f32 %v3540_v10, %v11334_v1  ;;  %v3921_v24 = vsel %vm1328_vm12, %v3918_v18, %v3920_v51  ;;  %v11406_v18 = vld [vmem:[%s12792_s8 + $0x158] sm:$0xff]  ;;  %v11412_v10 = vld [vmem:[%s12792_s8 + $0x140] sm:$0xff]  ;;  %v11424_v51 = vld [vmem:[%s12792_s8 + $0x130] sm:$0xff] }
0x2ad1   :  { %v3923_v3 = vsel %vm502_vm15, %v3915_v57, %v3921_v24  ;;  %13519 = vst [vmem:[#allocation56_spill] sm:$0xff] %v11406_v18  ;;  %v11430_v57 = vld [vmem:[%s12792_s8 + $0x138] sm:$0xff]  ;;  %v11442_v24 = vld [vmem:[%s12792_s8 + $0x128] sm:$0xff] }
0x2ad2   :  { %3544 = vrot.lane.b32.xlu1 %v3542_v42, %s6942_s26  ;;  %5965 = vmatmul.msk.f32.vlgmr.msra.gmra.mxu3 %vm656_vm3, %v3923_v3  ;;  %13520 = vst [vmem:[#allocation57_spill] sm:$0xff] %v11412_v10  ;;  %v11436_v42 = vld [vmem:[%s12792_s8 + $0x120] sm:$0xff] }
0x2ad3   :  { %5967 = vmatmul.msk.f32.vlgmr.msrb.gmra.mxu2 %vm656_vm3, %v3923_v3  ;;  %5988 = vmatpush.msk.msra.mxu3 %vm184_vm0, %v11346_v63  ;;  %13522 = vst [vmem:[#allocation59_spill] sm:$0xff] %v11424_v51  ;;  %v11448_v3 = vld [vmem:[%s12792_s8 + $0x110] sm:$0xff] }
0x2ad4   :  { %5990 = vmatpush.msk.msrb.mxu2 %vm184_vm0, %v11353_v16  ;;  %13523 = vst [vmem:[#allocation60_spill] sm:$0xff] %v11430_v57 }
0x2ad5   :  { %4402 = vmatpush.msra.mxu3 %v11360_v38  ;;  %13524 = vst [vmem:[#allocation61_spill] sm:$0xff] %v11436_v42 }
0x2ad6   :  { %4422 = vmatpush.msrb.mxu2 %v11366_v5  ;;  %13525 = vst [vmem:[#allocation62_spill] sm:$0xff] %v11442_v24 }
0x2ad7   :  { %4403 = vmatpush.msra.mxu3 %v11372_v11  ;;  %13526 = vst [vmem:[#allocation63_spill] sm:$0xff] %v11448_v3 }
0x2ad8   :  { %4423 = vmatpush.msrb.mxu2 %v11378_v31 }
0x2ad9   :  { %4404 = vmatpush.msra.mxu3 %v11384_v35 }
0x2ada   :  { %5977 = vmatmul.msk.f32.vlgmr.msrb.gmra.mxu3 %vm502_vm15, %v11123_v34  ;;  %4424 = vmatpush.msrb.mxu2 %v11392_v30 }
0x2adb   :  { %5979 = vmatmul.msk.f32.vlgmr.msra.gmra.mxu2 %vm502_vm15, %v11123_v34  ;;  %4405 = vmatpush.msra.mxu3 %v11400_v12  ;;  %v11418_v34 = vld [vmem:[%s12792_s8 + $0x148] sm:$0xff] }
0x2adc   :  { %4425 = vmatpush.msrb.mxu2 %v11406_v18  ;;  %13521 = vst [vmem:[#allocation58_spill] sm:$0xff] %v11418_v34 }
0x2add   :  { %4406 = vmatpush.msra.mxu3 %v11412_v10 }
0x2ade   :  { %4426 = vmatpush.msrb.mxu2 %v11418_v34 }
0x2adf   :  { %4407 = vmatpush.msra.mxu3 %v11424_v51  ;;  %v4151_v51 = vld [vmem:[#allocation2 + $0x60] sm:$0xff] }
0x2ae0   :  { %4427 = vmatpush.msrb.mxu2 %v11430_v57  ;;  %v11454_v57 = vld [vmem:[%s12792_s8 + $0x118] sm:$0xff] }
0x2ae1   :  { %4408 = vmatpush.msra.mxu3 %v11436_v42  ;;  %13527 = vst [vmem:[#allocation64_spill] sm:$0xff] %v11454_v57  ;;  %v11460_v42 = vld [vmem:[%s12792_s8 + $0x100] sm:$0xff] }
0x2ae2   :  { %4428 = vmatpush.msrb.mxu2 %v11442_v24  ;;  %13528 = vst [vmem:[#allocation65_spill] sm:$0xff] %v11460_v42  ;;  %v11466_v24 = vld [vmem:[%s12792_s8 + $0x108] sm:$0xff] }
0x2ae3   :  { %4409 = vmatpush.msra.mxu3 %v11448_v3  ;;  %13529 = vst [vmem:[#allocation66_spill] sm:$0xff] %v11466_v24  ;;  %v11472_v3 = vld [vmem:[%s12792_s8 + $0xf0] sm:$0xff] }
0x2ae4   :  { %4429 = vmatpush.msrb.mxu2 %v11454_v57  ;;  %13530 = vst [vmem:[#allocation67_spill] sm:$0xff] %v11472_v3  ;;  %v11478_v57 = vld [vmem:[%s12792_s8 + $0xf8] sm:$0xff] }
0x2ae5   :  { %4410 = vmatpush.msra.mxu3 %v11460_v42  ;;  %13531 = vst [vmem:[#allocation68_spill] sm:$0xff] %v11478_v57  ;;  %v11484_v42 = vld [vmem:[%s12792_s8 + $0xe0] sm:$0xff] }
0x2ae6   :  { %4430 = vmatpush.msrb.mxu2 %v11466_v24  ;;  %13532 = vst [vmem:[#allocation69_spill] sm:$0xff] %v11484_v42  ;;  %v11490_v24 = vld [vmem:[%s12792_s8 + $0xe8] sm:$0xff] }
0x2ae7   :  { %4411 = vmatpush.msra.mxu3 %v11472_v3  ;;  %13533 = vst [vmem:[#allocation70_spill] sm:$0xff] %v11490_v24  ;;  %v11496_v3 = vld [vmem:[%s12792_s8 + $0xd0] sm:$0xff] }
0x2ae8   :  { %4431 = vmatpush.msrb.mxu2 %v11478_v57  ;;  %13534 = vst [vmem:[#allocation71_spill] sm:$0xff] %v11496_v3  ;;  %v11502_v57 = vld [vmem:[%s12792_s8 + $0xd8] sm:$0xff] }
0x2ae9   :  { %4412 = vmatpush.msra.mxu3 %v11484_v42  ;;  %13535 = vst [vmem:[#allocation72_spill] sm:$0xff] %v11502_v57 }
0x2aea   :  { %4432 = vmatpush.msrb.mxu2 %v11490_v24 }
0x2aeb   :  { %4413 = vmatpush.msra.mxu3 %v11496_v3 }
0x2aec   :  { %4433 = vmatpush.msrb.mxu2 %v11502_v57  ;;  %v13537_v57 = vld [vmem:[#allocation30_spill] sm:$0xff] }
0x2aed   :  { %6000 = vmatpush.msk.msrb.mxu3 %vm184_vm0, %v10837_v20  ;;  %v13536_v20 = vld [vmem:[#allocation28_spill] sm:$0xff] }
0x2aee   :  { %6002 = vmatpush.msk.msra.mxu2 %vm184_vm0, %v10844_v50  ;;  %v13538_v50 = vld [vmem:[#allocation9_spill] sm:$0xff] }
0x2aef   :  { %4640 = vmatpush.msrb.mxu3 %v10851_v8  ;;  %v13539_v8 = vld [vmem:[#allocation31_spill] sm:$0xff] }
0x2af0   :  { %4660 = vmatpush.msra.mxu2 %v10857_v4  ;;  %v13540_v4 = vld [vmem:[#allocation33_spill] sm:$0xff] }
0x2af1   :  { %4641 = vmatpush.msrb.mxu3 %v10863_v53  ;;  %v13541_v53 = vld [vmem:[#allocation5_spill] sm:$0xff] }
0x2af2   :  { %4661 = vmatpush.msra.mxu2 %v10869_v22  ;;  %v13542_v22 = vld [vmem:[#allocation20_spill] sm:$0xff] }
0x2af3   :  { %4642 = vmatpush.msrb.mxu3 %v10875_v26  ;;  %v13543_v26 = vld [vmem:[#allocation19_spill] sm:$0xff] }
0x2af4   :  { %4662 = vmatpush.msra.mxu2 %v10881_v6  ;;  %v13544_v6 = vld [vmem:[#allocation10_spill] sm:$0xff] }
0x2af5   :  { %4643 = vmatpush.msrb.mxu3 %v10887_v47  ;;  %v13545_v47 = vld [vmem:[#allocation42_spill] sm:$0xff] }
0x2af6   :  { %4663 = vmatpush.msra.mxu2 %v10893_v58  ;;  %v13546_v58 = vld [vmem:[#allocation40_spill] sm:$0xff] }
0x2af7   :  { %4644 = vmatpush.msrb.mxu3 %v13536_v20  ;;  %v13547_v20 = vld [vmem:[#allocation41_spill] sm:$0xff] }
0x2af8   :  { %4664 = vmatpush.msra.mxu2 %v13537_v57  ;;  %v13548_v57 = vld [vmem:[#allocation43_spill] sm:$0xff] }
0x2af9   :  { %4645 = vmatpush.msrb.mxu3 %v13538_v50  ;;  %v13549_v50 = vld [vmem:[#allocation44_spill] sm:$0xff] }
0x2afa   :  { %4665 = vmatpush.msra.mxu2 %v13539_v8  ;;  %v13550_v8 = vld [vmem:[#allocation45_spill] sm:$0xff] }
0x2afb   :  { %4646 = vmatpush.msrb.mxu3 %v13540_v4  ;;  %v13551_v4 = vld [vmem:[#allocation46_spill] sm:$0xff] }
0x2afc   :  { %4666 = vmatpush.msra.mxu2 %v13541_v53  ;;  %v13552_v53 = vld [vmem:[#allocation47_spill] sm:$0xff] }
0x2afd   :  { %4647 = vmatpush.msrb.mxu3 %v13542_v22  ;;  %v13553_v22 = vld [vmem:[#allocation48_spill] sm:$0xff] }
0x2afe   :  { %4667 = vmatpush.msra.mxu2 %v13543_v26  ;;  %v11537_v26 = vsel %vm2491_vm4, %v13553_v22, %v13552_v53  ;;  %v4152_v22 = vld [vmem:[#allocation2 + $0x68] sm:$0xff] }
0x2aff   :  { %4648 = vmatpush.msrb.mxu3 %v13544_v6  ;;  %13554 = vst [vmem:[#allocation4_spill] sm:$0xff] %v11537_v26  ;;  %v3537_v6 = vmul.f32 %v11334_v1, %v11537_v26 }
0x2b00   :  { %4668 = vmatpush.msra.mxu2 %v13545_v47 }
0x2b01   :  { %4649 = vmatpush.msrb.mxu3 %v13546_v58 }
0x2b02   :  { %4669 = vmatpush.msra.mxu2 %v13547_v20 }
0x2b03   :  { %4650 = vmatpush.msrb.mxu3 %v13548_v57  ;;  %v11548_v57 = vld [vmem:[%s12791_s1] sm:$0xff] }
0x2b04   :  { %4670 = vmatpush.msra.mxu2 %v13549_v50  ;;  %13556 = vst [vmem:[#allocation7_spill] sm:$0xff] %v11548_v57  ;;  %vm4147_vm11 = vcmp.gt.s32.totalorder %v11548_v57, 6  ;;  %v13559_v57 = vld [vmem:[#allocation39_spill] sm:$0xff] }
0x2b05   :  { %4651 = vmatpush.msrb.mxu3 %v13550_v8  ;;  %v4254_v50 = vsel %vm4147_vm11, 1, %v13557_v21 }
0x2b06   :  { %4671 = vmatpush.msra.mxu2 %v13551_v4  ;;  %v13558_v4 = vld [vmem:[#allocation38_spill] sm:$0xff] }
0x2b44   :  { %v3545_v47 = vpop.permute.xlu1 %3544 }
0x2b45   :  { %v11541_v58 = vadd.f32 %v3545_v47, %v3537_v6 }
0x2b47   :  { %13555 = vst [vmem:[#allocation6_spill] sm:$0xff] %v11541_v58  ;;  %6401 = vtanh.f32 %v11541_v58 }
0x2b4d   :  { %v6402_v20 = vpop.eup %6401 }
0x2b4e   :  { %3550 = vrot.lane.b32.xlu1 %v6402_v20, %s6942_s26 }
0x2b55   :  { %v3944_v21 = vpop.f32.mrf.mxu3 }
0x2b56   :  { %v3964_v8 = vpop.f32.mrf.mxu2  ;;  %4256 = vperm.xlu1 %6065, %v4254_v50   ;;  %v3945_v50 = vadd.f32 %v3944_v21, %v13559_v57 }
0x2b57   :  { %v11553_v53 = vadd.f32 %v3964_v8, %v13558_v4  ;;  %v5945_v8 = vmul.f32 -1.442695, %v11312_v55 }
0x2b58   :  { %v5968_v26 = vmul.f32 -1.442695, %v3945_v50 }
0x2b59   :  { %6403 = vtanh.f32 %v11553_v53 }
0x2b5e   :  { %v4192_v6 = vpop.f32.mrf.mxu2 }
0x2b5f   :  { %v6404_v47 = vpop.eup %6403  ;;  %v11556_v20 = vadd.f32 %v4192_v6, %v4152_v22 }
0x2b60   :  { %4008 = vrot.lane.b32.xlu2 %v6404_v47, %s6941_s7  ;;  %v4172_v47 = vpop.f32.mrf.mxu3 }
0x2b61   :  { %6405 = vtanh.f32 %v11556_v20  ;;  %v4195_v34 = vadd.f32 %v4172_v47, %v4151_v51 }
0x2b62   :  { %6407 = vpow2.f32 %v5968_v26 }
0x2b63   :  { %6409 = vpow2.f32 %v5945_v8  ;;  %v5980_v18 = vmul.f32 -1.442695, %v4195_v34 }
0x2b67   :  { %v6406_v58 = vpop.eup %6405 }
0x2b68   :  { %4238 = vrot.lane.b32.xlu0 %v6406_v58, %s6941_s7  ;;  %v6408_v4 = vpop.eup %6407 }
0x2b69   :  { %v3973_v3 = vadd.f32 1.0, %v6408_v4  ;;  %v6410_v24 = vpop.eup %6409 }
0x2b6a   :  { %v3505_v22 = vadd.f32 1.0, %v6410_v24 }
0x2b6b   :  { %6411 = vrcp.f32 %v3973_v3  ;;  %v3986_v8 = vand.u32 2147483648, %v3973_v3  ;;  %vm3980_vm5 = vweird.f32 %v3973_v3  ;;  %v3984_v4 = vand.u32 2147483647, %v3973_v3 }
0x2b6c   :  { %6413 = vrcp.f32 %v3505_v22  ;;  %vm3526_vm8 = vweird.f32 %v3505_v22  ;;  %v3530_v47 = vand.u32 2147483647, %v3505_v22 }
0x2b6d   :  { %6415 = vpow2.f32 %v5980_v18  ;;  %v3987_v30 = vor.u32 1.1754944e-38, %v3986_v8  ;;  %vm3985_vm7 = vcmp.eq.f32.partialorder %v3984_v4, 8.507059e+37 }
0x2b6e   :  { %vm3531_vm11 = vcmp.eq.f32.partialorder %v3530_v47, 8.507059e+37 }
0x2b71   :  { %v6412_v6 = vpop.eup %6411 }
0x2b72   :  { %v3976_v42 = vmul.f32 %v6412_v6, %v3973_v3  ;;  %v6414_v58 = vpop.eup %6413  ;;  %vm3981_vm4 = vweird.f32 %v6412_v6 }
0x2b73   :  { %v3522_v21 = vmul.f32 %v6414_v58, %v3505_v22  ;;  %vm3982_vm6 = vmor %vm3980_vm5, %vm3981_vm4  ;;  %v6416_v24 = vpop.eup %6415  ;;  %vm3527_vm9 = vweird.f32 %v6414_v58 }
0x2b74   :  { %v3977_v10 = vsub.f32 1.0, %v3976_v42  ;;  %v4203_v51 = vadd.f32 1.0, %v6416_v24  ;;  %vm3528_vm13 = vmor %vm3526_vm8, %vm3527_vm9 }
0x2b75   :  { %v3523_v26 = vsub.f32 1.0, %v3522_v21 }
0x2b76   :  { %v3978_v50 = vmul.f32 %v6412_v6, %v3977_v10  ;;  %v3532_v10 = vand.u32 2147483648, %v3505_v22  ;;  %6417 = vrcp.f32 %v4203_v51  ;;  %v4216_v4 = vand.u32 2147483648, %v4203_v51 }
0x2b77   :  { %v3524_v57 = vmul.f32 %v6414_v58, %v3523_v26  ;;  %vm4210_vm5 = vweird.f32 %v4203_v51  ;;  %v4214_v24 = vand.u32 2147483647, %v4203_v51 }
0x2b78   :  { %v3979_v55 = vadd.f32 %v6412_v6, %v3978_v50  ;;  %v3533_v21 = vor.u32 1.1754944e-38, %v3532_v10 }
0x2b79   :  { %v3525_v35 = vadd.f32 %v6414_v58, %v3524_v57 }
0x2b7a   :  { %v3983_v12 = vsel %vm3982_vm6, %v6412_v6, %v3979_v55  ;;  %v13560_v55 = vld [vmem:[#allocation49_spill] sm:$0xff] }
0x2b7b   :  { %v11563_v34 = vsel %vm3985_vm7, %v3987_v30, %v3983_v12  ;;  %v3529_v3 = vsel %vm3528_vm13, %v6414_v58, %v3525_v35  ;;  %vm4215_vm7 = vcmp.eq.f32.partialorder %v4214_v24, 8.507059e+37 }
0x2b7c   :  { %v3534_v6 = vsel %vm3531_vm11, %v3533_v21, %v3529_v3  ;;  %v6418_v12 = vpop.eup %6417  ;;  %v11583_v3 = vsel %vm3080_vm10, %v11039_v56, %v11036_v49  ;;  %v5969_v49 = vmul.f32 -1.442695, %v11553_v53  ;;  %v11603_v56 = vsel %vm3669_vm1, %v11050_v29, %v11046_v32 }
0x2b7d   :  { %v4206_v22 = vmul.f32 %v6418_v12, %v4203_v51  ;;  %vm4211_vm4 = vweird.f32 %v6418_v12  ;;  %v4006_v51 = vmul.f32 %v11563_v34, %v11583_v3 }
0x2b7e   :  { %vm4212_vm6 = vmor %vm4210_vm5, %vm4211_vm4 }
0x2b7f   :  { %v4207_v8 = vsub.f32 1.0, %v4206_v22 }
0x2b81   :  { %v4208_v35 = vmul.f32 %v6418_v12, %v4207_v8 }
0x2b83   :  { %v4209_v58 = vadd.f32 %v6418_v12, %v4208_v35 }
0x2bba   :  { %v4009_v42 = vpop.permute.xlu2 %4008 }
0x2bbb   :  { %v4011_v18 = vmul.f32 %v4009_v42, %v11563_v34  ;;  %v4217_v42 = vor.u32 1.1754944e-38, %v4216_v4 }
0x2bbd   :  { %4013 = vrot.lane.b32.xlu2 %v4011_v18, %s6942_s26 }
0x2bc0   :  { %v3551_v50 = vpop.permute.xlu1 %3550 }
0x2bc1   :  { %v3553_v57 = vmul.f32 %v3551_v50, %v11334_v1  ;;  %v3554_v26 = vmul.f32 %v3551_v50, %v3534_v6  ;;  %v4213_v1 = vsel %vm4212_vm6, %v6418_v12, %v4209_v58 }
0x2bc2   :  { %v11575_v18 = vsel %vm4215_vm7, %v4217_v42, %v4213_v1 }
0x2bc3   :  { %v11571_v30 = vsel %vm3080_vm10, %v3553_v57, %v13560_v55  ;;  %v11594_v57 = vsel %vm3080_vm10, %v3554_v26, %v11058_v43  ;;  %v4236_v55 = vmul.f32 %v11575_v18, %v11603_v56 }
0x2bc4   :  { %4037 = vrot.lane.b32.xlu1 %v11571_v30, %s6945_s29 }
0x2bda   :  { %v4239_v10 = vpop.permute.xlu0 %4238 }
0x2bdb   :  { %v4241_v47 = vmul.f32 %v4239_v10, %v11575_v18 }
0x2bdd   :  { %4243 = vrot.lane.b32.xlu0 %v4241_v47, %s6942_s26 }
0x2c17   :  { %v4014_v21 = vpop.permute.xlu2 %4013 }
0x2c18   :  { %v11587_v6 = vadd.f32 %v4014_v21, %v4006_v51 }
0x2c1a   :  { %6419 = vtanh.f32 %v11587_v6 }
0x2c1b   :  { %6421 = vpow2.f32 %v5969_v49 }
0x2c20   :  { %v6420_v50 = vpop.eup %6419 }
0x2c21   :  { %4019 = vrot.lane.b32.xlu2 %v6420_v50, %s6942_s26  ;;  %v6422_v43 = vpop.eup %6421 }
0x2c22   :  { %v3974_v53 = vadd.f32 1.0, %v6422_v43 }
0x2c24   :  { %v4001_v4 = vand.u32 2147483648, %v3974_v53  ;;  %vm3995_vm8 = vweird.f32 %v3974_v53  ;;  %v3999_v24 = vand.u32 2147483647, %v3974_v53 }
0x2c26   :  { %v4002_v42 = vor.u32 1.1754944e-38, %v4001_v4  ;;  %vm4000_vm11 = vcmp.eq.f32.partialorder %v3999_v24, 8.507059e+37 }
0x2c29   :  { %4039 = vrot.lane.b32.xlu2 %v11594_v57, %s6945_s29 }
0x2c4f   :  { %v4244_v12 = vpop.permute.xlu0 %4243 }
0x2c50   :  { %v11607_v22 = vadd.f32 %v4244_v12, %v4236_v55 }
0x2c52   :  { %6423 = vtanh.f32 %v11607_v22 }
0x2c53   :  { %6425 = vrcp.f32 %v3974_v53 }
0x2c58   :  { %v6424_v26 = vpop.eup %6423 }
0x2c59   :  { %4249 = vrot.lane.b32.xlu0 %v6424_v26, %s6942_s26  ;;  %v6426_v8 = vpop.eup %6425 }
0x2c5a   :  { %v3991_v35 = vmul.f32 %v6426_v8, %v3974_v53  ;;  %vm3996_vm9 = vweird.f32 %v6426_v8 }
0x2c5b   :  { %vm3997_vm13 = vmor %vm3995_vm8, %vm3996_vm9 }
0x2c5c   :  { %v3992_v58 = vsub.f32 1.0, %v3991_v35 }
0x2c5e   :  { %v3993_v32 = vmul.f32 %v6426_v8, %v3992_v58 }
0x2c60   :  { %v3994_v29 = vadd.f32 %v6426_v8, %v3993_v32 }
0x2c62   :  { %v3998_v1 = vsel %vm3997_vm13, %v6426_v8, %v3994_v29  ;;  %v11629_v29 = vpop.permute.xlu1 %4256 }
0x2c63   :  { %v4003_v10 = vsel %vm4000_vm11, %v4002_v42, %v3998_v1  ;;  %vm4258_vm9 = vcmp.eq.s32.totalorder %v11629_v29, 1  ;;  %v5328_v29 = vld [vmem:[%s12794_s10 + $0x28] sm:$0xff] }
0x2c7b   :  { %v4020_v47 = vpop.permute.xlu2 %4019 }
0x2c7c   :  { %v4022_v51 = vmul.f32 %v4020_v47, %v11563_v34  ;;  %v4023_v21 = vmul.f32 %v4020_v47, %v4003_v10  ;;  %v5981_v34 = vmul.f32 -1.442695, %v11556_v20  ;;  %v4038_v47 = vpop.permute.xlu1 %4037 }
0x2c7e   :  { %v11615_v50 = vsel %vm3669_vm1, %v4023_v21, %v11068_v0  ;;  %v11620_v49 = vsel %vm3669_vm1, %v4022_v51, %v11073_v23  ;;  %6427 = vpow2.f32 %v5981_v34 }
0x2c7f   :  { %4031 = vrot.lane.b32.xlu0 %v11615_v50, %s6944_s5  ;;  %4029 = vrot.lane.b32.xlu2 %v11620_v49, %s6944_s5 }
0x2c84   :  { %v6428_v55 = vpop.eup %6427 }
0x2c85   :  { %v4204_v0 = vadd.f32 1.0, %v6428_v55  ;;  %v11657_v55 = vld [vmem:[%s12792_s8 + $0x260] sm:$0xf] }
0x2c87   :  { %4270 = vrot.lane.b32.xlu2 %v11187_v60, %s6945_s29  ;;  %6429 = vrcp.f32 %v4204_v0  ;;  %v4231_v8 = vand.u32 2147483648, %v4204_v0  ;;  %vm4225_vm5 = vweird.f32 %v4204_v0  ;;  %v4229_v35 = vand.u32 2147483647, %v4204_v0 }
0x2c89   :  { %v4232_v32 = vor.u32 1.1754944e-38, %v4231_v8  ;;  %vm4230_vm7 = vcmp.eq.f32.partialorder %v4229_v35, 8.507059e+37  ;;  %v11701_v8 = vld [vmem:[%s12792_s8 + $0x238] sm:$0xff]  ;;  %v11707_v35 = vld [vmem:[%s12792_s8 + $0x220] sm:$0xff] }
0x2c8a   :  { %13564 = vst [vmem:[#allocation14_spill] sm:$0xff] %v11701_v8 }
0x2c8b   :  { %13565 = vst [vmem:[#allocation15_spill] sm:$0xff] %v11707_v35 }
0x2c8d   :  { %v6430_v12 = vpop.eup %6429 }
0x2c8e   :  { %v4221_v43 = vmul.f32 %v6430_v12, %v4204_v0  ;;  %vm4226_vm4 = vweird.f32 %v6430_v12  ;;  %v11664_v0 = vld [vmem:[%s12792_s8 + $0x268] sm:$0xf] }
0x2c8f   :  { %vm4227_vm6 = vmor %vm4225_vm5, %vm4226_vm4 }
0x2c90   :  { %v4222_v26 = vsub.f32 1.0, %v4221_v43  ;;  %v11677_v43 = vld [vmem:[%s12792_s8 + $0x258] sm:$0xff] }
0x2c92   :  { %v4223_v23 = vmul.f32 %v6430_v12, %v4222_v26  ;;  %v11683_v26 = vld [vmem:[%s12792_s8 + $0x240] sm:$0xff] }
0x2c93   :  { %13561 = vst [vmem:[#allocation11_spill] sm:$0xff] %v11683_v26 }
0x2c94   :  { %v4224_v53 = vadd.f32 %v6430_v12, %v4223_v23  ;;  %v11689_v23 = vld [vmem:[%s12792_s8 + $0x248] sm:$0xff] }
0x2c95   :  { %13562 = vst [vmem:[#allocation12_spill] sm:$0xff] %v11689_v23 }
0x2c96   :  { %v4228_v58 = vsel %vm4227_vm6, %v6430_v12, %v4224_v53  ;;  %v11671_v12 = vld [vmem:[%s12792_s8 + $0x250] sm:$0xff] }
0x2c97   :  { %v4233_v20 = vsel %vm4230_vm7, %v4232_v32, %v4228_v58  ;;  %v11695_v53 = vld [vmem:[%s12792_s8 + $0x230] sm:$0xff]  ;;  %v11713_v58 = vld [vmem:[%s12792_s8 + $0x228] sm:$0xff] }
0x2c98   :  { %13563 = vst [vmem:[#allocation13_spill] sm:$0xff] %v11695_v53  ;;  %v11719_v32 = vld [vmem:[%s12792_s8 + $0x210] sm:$0xff] }
0x2c99   :  { %13566 = vst [vmem:[#allocation16_spill] sm:$0xff] %v11713_v58 }
0x2c9a   :  { %13567 = vst [vmem:[#allocation17_spill] sm:$0xff] %v11719_v32 }
0x2ccb   :  { %v4250_v4 = vpop.permute.xlu0 %4249 }
0x2ccc   :  { %v4252_v24 = vmul.f32 %v4250_v4, %v11575_v18  ;;  %v4253_v1 = vmul.f32 %v4250_v4, %v4233_v20  ;;  %v4040_v18 = vpop.permute.xlu2 %4039  ;;  %v11725_v20 = vld [vmem:[%s12792_s8 + $0x218] sm:$0xff]  ;;  %v11731_v4 = vld [vmem:[%s12792_s8 + $0x200] sm:$0xff] }
0x2ccd   :  { %13568 = vst [vmem:[#allocation18_spill] sm:$0xff] %v11725_v20 }
0x2cce   :  { %v11636_v42 = vsel %vm4258_vm9, %v4253_v1, %v11086_v25  ;;  %v11641_v10 = vsel %vm4258_vm9, %v4252_v24, %v11091_v13  ;;  %v4041_v25 = vsel %vm1328_vm12, %v4038_v47, %v4040_v18  ;;  %13569 = vst [vmem:[#allocation21_spill] sm:$0xff] %v11731_v4  ;;  %v11737_v24 = vld [vmem:[%s12792_s8 + $0x208] sm:$0xff]  ;;  %v11743_v1 = vld [vmem:[%s12792_s8 + $0x1f0] sm:$0xff]  ;;  %v11749_v18 = vld [vmem:[%s12792_s8 + $0x1f8] sm:$0xff] }
0x2ccf   :  { %4266 = vrot.lane.b32.xlu1 %v11636_v42, %s6944_s5  ;;  %4264 = vrot.lane.b32.xlu0 %v11641_v10, %s6944_s5  ;;  %13570 = vst [vmem:[#allocation32_spill] sm:$0xff] %v11737_v24  ;;  %v11755_v47 = vld [vmem:[%s12792_s8 + $0x1e0] sm:$0xff] }
0x2cd0   :  { %13571 = vst [vmem:[#allocation22_spill] sm:$0xff] %v11743_v1 }
0x2cd1   :  { %13572 = vst [vmem:[#allocation34_spill] sm:$0xff] %v11749_v18 }
0x2cd2   :  { %13573 = vst [vmem:[#allocation23_spill] sm:$0xff] %v11755_v47 }
0x2cd7   :  { %4272 = vrot.lane.b32.xlu0 %v11182_v7, %s6945_s29 }
0x2cd9   :  { %v4030_v51 = vpop.permute.xlu2 %4029 }
0x2cf1   :  { %v4032_v21 = vpop.permute.xlu0 %4031 }
0x2cf2   :  { %v4033_v34 = vsel %vm626_vm14, %v4030_v51, %v4032_v21  ;;  %v11761_v51 = vld [vmem:[%s12792_s8 + $0x1e8] sm:$0xff]  ;;  %v11767_v21 = vld [vmem:[%s12792_s8 + $0x1d0] sm:$0xff] }
0x2cf3   :  { %v4043_v13 = vsel %vm502_vm15, %v4033_v34, %v4041_v25  ;;  %13574 = vst [vmem:[#allocation35_spill] sm:$0xff] %v11761_v51  ;;  %v11773_v25 = vld [vmem:[%s12792_s8 + $0x1d8] sm:$0xff]  ;;  %v11779_v34 = vld [vmem:[%s12792_s8 + $0x1c0] sm:$0xff] }
0x2cf4   :  { %5971 = vmatmul.msk.f32.vlgmr.msra.gmra.mxu0 %vm656_vm3, %v4043_v13  ;;  %5973 = vmatmul.msk.f32.vlgmr.msra.gmra.mxu1 %vm656_vm3, %v4043_v13  ;;  %13575 = vst [vmem:[#allocation24_spill] sm:$0xff] %v11767_v21  ;;  %v11785_v13 = vld [vmem:[%s12792_s8 + $0x1c8] sm:$0xff] }
0x2cf5   :  { %5994 = vmatpush.msk.msra.mxu0 %vm184_vm0, %v11657_v55  ;;  %5996 = vmatpush.msk.msra.mxu1 %vm184_vm0, %v11664_v0  ;;  %13576 = vst [vmem:[#allocation27_spill] sm:$0xff] %v11773_v25 }
0x2cf6   :  { %13577 = vst [vmem:[#allocation36_spill] sm:$0xff] %v11779_v34 }
0x2cf7   :  { %4520 = vmatpush.msra.mxu0 %v11671_v12  ;;  %4540 = vmatpush.msra.mxu1 %v11677_v43  ;;  %13578 = vst [vmem:[#allocation37_spill] sm:$0xff] %v11785_v13 }
0x2cf9   :  { %4521 = vmatpush.msra.mxu0 %v11683_v26  ;;  %4541 = vmatpush.msra.mxu1 %v11689_v23 }
0x2cfb   :  { %4522 = vmatpush.msra.mxu0 %v11695_v53  ;;  %4542 = vmatpush.msra.mxu1 %v11701_v8 }
0x2cfd   :  { %4523 = vmatpush.msra.mxu0 %v11707_v35  ;;  %4543 = vmatpush.msra.mxu1 %v11713_v58 }
0x2cff   :  { %4524 = vmatpush.msra.mxu0 %v11719_v32  ;;  %4544 = vmatpush.msra.mxu1 %v11725_v20 }
0x2d01   :  { %4525 = vmatpush.msra.mxu0 %v11731_v4  ;;  %4545 = vmatpush.msra.mxu1 %v11737_v24 }
0x2d03   :  { %4526 = vmatpush.msra.mxu0 %v11743_v1  ;;  %4546 = vmatpush.msra.mxu1 %v11749_v18 }
0x2d05   :  { %4527 = vmatpush.msra.mxu0 %v11755_v47  ;;  %4547 = vmatpush.msra.mxu1 %v11761_v51  ;;  %v4271_v47 = vpop.permute.xlu2 %4270 }
0x2d07   :  { %4528 = vmatpush.msra.mxu0 %v11767_v21  ;;  %4548 = vmatpush.msra.mxu1 %v11773_v25  ;;  %v11791_v21 = vld [vmem:[%s12792_s8 + $0x1b0] sm:$0xff]  ;;  %v11797_v25 = vld [vmem:[%s12792_s8 + $0x1b8] sm:$0xff] }
0x2d08   :  { %13579 = vst [vmem:[#allocation26_spill] sm:$0xff] %v11791_v21 }
0x2d09   :  { %4529 = vmatpush.msra.mxu0 %v11779_v34  ;;  %4549 = vmatpush.msra.mxu1 %v11785_v13  ;;  %13580 = vst [vmem:[#allocation25_spill] sm:$0xff] %v11797_v25  ;;  %v11803_v34 = vld [vmem:[%s12792_s8 + $0x1a0] sm:$0xff]  ;;  %v11809_v13 = vld [vmem:[%s12792_s8 + $0x1a8] sm:$0xff] }
0x2d0a   :  { %13581 = vst [vmem:[#allocation29_spill] sm:$0xff] %v11803_v34 }
0x2d0b   :  { %4530 = vmatpush.msra.mxu0 %v11791_v21  ;;  %4550 = vmatpush.msra.mxu1 %v11797_v25  ;;  %13582 = vst [vmem:[#allocation28_spill] sm:$0xff] %v11809_v13 }
0x2d0d   :  { %4531 = vmatpush.msra.mxu0 %v11803_v34  ;;  %4551 = vmatpush.msra.mxu1 %v11809_v13  ;;  %v6887_v13 = vld [vmem:[%s12789_s6 + $0x60] sm:$0x3] }
0x2d41   :  { %v4265_v21 = vpop.permute.xlu0 %4264  ;;  %v4267_v51 = vpop.permute.xlu1 %4266 }
0x2d42   :  { %v11813_v25 = vsel %vm626_vm14, %v4265_v21, %v4267_v51  ;;  %v6888_v51 = vld [vmem:[%s12789_s6 + $0x68] sm:$0x3]  ;;  %v6893_v21 = vld [vmem:[%s12789_s6 + $0x30] sm:$0xff] }
0x2d49   :  { %v4273_v18 = vpop.permute.xlu0 %4272 }
0x2d4a   :  { %v4274_v1 = vsel %vm1328_vm12, %v4271_v47, %v4273_v18  ;;  %v6891_v18 = vld [vmem:[%s12789_s6 + $0x40] sm:$0xff]  ;;  %v6892_v47 = vld [vmem:[%s12789_s6 + $0x48] sm:$0xff] }
0x2d4b   :  { %v4276_v24 = vsel %vm502_vm15, %v11813_v25, %v4274_v1  ;;  %v6889_v1 = vld [vmem:[%s12789_s6 + $0x50] sm:$0xff] }
0x2d4c   :  { %5983 = vmatmul.msk.f32.vlgmr.msrb.gmra.mxu0 %vm656_vm3, %v4276_v24  ;;  %5985 = vmatmul.msk.f32.vlgmr.msrb.gmra.mxu1 %vm656_vm3, %v4276_v24  ;;  %v6890_v24 = vld [vmem:[%s12789_s6 + $0x58] sm:$0xff] }
0x2d4d   :  { %6006 = vmatpush.msk.msrb.mxu0 %vm506_vm2, %v6887_v13  ;;  %6008 = vmatpush.msk.msrb.mxu1 %vm506_vm2, %v6888_v51  ;;  %v6894_v13 = vld [vmem:[%s12789_s6 + $0x38] sm:$0xff]  ;;  %v6895_v51 = vld [vmem:[%s12789_s6 + $0x20] sm:$0xff] }
0x2d4f   :  { %4754 = vmatpush.msrb.mxu0 %v6889_v1  ;;  %4774 = vmatpush.msrb.mxu1 %v6890_v24  ;;  %v6896_v1 = vld [vmem:[%s12789_s6 + $0x28] sm:$0xff]  ;;  %v6897_v24 = vld [vmem:[%s12789_s6 + $0x10] sm:$0xff] }
0x2d51   :  { %4755 = vmatpush.msrb.mxu0 %v6891_v18  ;;  %4775 = vmatpush.msrb.mxu1 %v6892_v47  ;;  %v6898_v18 = vld [vmem:[%s12789_s6 + $0x18] sm:$0xff]  ;;  %v6899_v47 = vld [vmem:[%s12789_s6] sm:$0xff] }
0x2d53   :  { %4756 = vmatpush.msrb.mxu0 %v6893_v21  ;;  %4776 = vmatpush.msrb.mxu1 %v6894_v13  ;;  %v6900_v21 = vld [vmem:[%s12789_s6 + $0x8] sm:$0xff] }
0x2d55   :  { %4757 = vmatpush.msrb.mxu0 %v6895_v51  ;;  %4777 = vmatpush.msrb.mxu1 %v6896_v1 }
0x2d57   :  { %4758 = vmatpush.msrb.mxu0 %v6897_v24  ;;  %4778 = vmatpush.msrb.mxu1 %v6898_v18 }
0x2d59   :  { %4759 = vmatpush.msrb.mxu0 %v6899_v47  ;;  %4779 = vmatpush.msrb.mxu1 %v6900_v21 }
0x2d71   :  { %v11864_v13 = vpop.f32.mrf.mxu1  ;;  %v11868_v18 = vpop.f32.mrf.mxu0 }
0x2dc9   :  { %v4317_v51 = vpop.f32.mrf.mxu1  ;;  %v4297_v34 = vpop.f32.mrf.mxu0 }
0x2dca   :  { %v4318_v1 = vadd.f32 %v4317_v51, %v13504_v36  ;;  %v4298_v4 = vadd.f32 %v4297_v34, %v13324_v14 }
0x2dcc   :  { %6431 = vtanh.f32 %v4318_v1  ;;  %v5986_v47 = vmul.f32 -1.442695, %v4298_v4 }
0x2dce   :  { %6433 = vpow2.f32 %v5986_v47 }
0x2dd2   :  { %v6432_v24 = vpop.eup %6431 }
0x2dd3   :  { %4361 = vrot.lane.b32.xlu1 %v6432_v24, %s6941_s7 }
0x2dd4   :  { %v6434_v20 = vpop.eup %6433 }
0x2dd5   :  { %v4326_v32 = vadd.f32 1.0, %v6434_v20 }
0x2dd7   :  { %6435 = vrcp.f32 %v4326_v32  ;;  %v4339_v51 = vand.u32 2147483648, %v4326_v32  ;;  %vm4333_vm8 = vweird.f32 %v4326_v32  ;;  %v4337_v36 = vand.u32 2147483647, %v4326_v32 }
0x2dd9   :  { %v4340_v23 = vor.u32 1.1754944e-38, %v4339_v51  ;;  %vm4338_vm11 = vcmp.eq.f32.partialorder %v4337_v36, 8.507059e+37  ;;  %v5987_v36 = vmul.f32 -1.442695, %v4318_v1 }
0x2ddd   :  { %v6436_v21 = vpop.eup %6435 }
0x2dde   :  { %v4329_v58 = vmul.f32 %v6436_v21, %v4326_v32  ;;  %vm4334_vm2 = vweird.f32 %v6436_v21 }
0x2ddf   :  { %vm4335_vm13 = vmor %vm4333_vm8, %vm4334_vm2 }
0x2de0   :  { %v4330_v35 = vsub.f32 1.0, %v4329_v58  ;;  %v11876_v58 = vsel %vm3669_vm1, %v11173_v45, %v11170_v62 }
0x2de2   :  { %v4331_v8 = vmul.f32 %v6436_v21, %v4330_v35 }
0x2de4   :  { %v4332_v53 = vadd.f32 %v6436_v21, %v4331_v8 }
0x2de6   :  { %v4336_v24 = vsel %vm4335_vm13, %v6436_v21, %v4332_v53 }
0x2de7   :  { %v4341_v34 = vsel %vm4338_vm11, %v4340_v23, %v4336_v24 }
0x2de8   :  { %v4359_v8 = vmul.f32 %v4341_v34, %v11876_v58 }
0x2e45   :  { %v4362_v26 = vpop.permute.xlu1 %4361 }
0x2e46   :  { %v4364_v4 = vmul.f32 %v4362_v26, %v4341_v34 }
0x2e48   :  { %4366 = vrot.lane.b32.xlu2 %v4364_v4, %s6942_s26 }
0x2ea2   :  { %v4367_v35 = vpop.permute.xlu2 %4366 }
0x2ea3   :  { %v11879_v20 = vadd.f32 %v4367_v35, %v4359_v8 }
0x2ea5   :  { %6437 = vtanh.f32 %v11879_v20 }
0x2ea6   :  { %6439 = vpow2.f32 %v5987_v36 }
0x2eab   :  { %v6438_v53 = vpop.eup %6437 }
0x2eac   :  { %4372 = vrot.lane.b32.xlu0 %v6438_v53, %s6942_s26  ;;  %v6440_v26 = vpop.eup %6439 }
0x2ead   :  { %v4327_v23 = vadd.f32 1.0, %v6440_v26 }
0x2eaf   :  { %6441 = vrcp.f32 %v4327_v23  ;;  %v4354_v51 = vand.u32 2147483648, %v4327_v23  ;;  %vm4348_vm5 = vweird.f32 %v4327_v23  ;;  %v4352_v24 = vand.u32 2147483647, %v4327_v23 }
0x2eb1   :  { %v4355_v8 = vor.u32 1.1754944e-38, %v4354_v51  ;;  %vm4353_vm7 = vcmp.eq.f32.partialorder %v4352_v24, 8.507059e+37  ;;  %v6902_v51 = vld [vmem:[%s12792_s8 + $0xb8] sm:$0xff]  ;;  %v6903_v24 = vld [vmem:[%s12792_s8 + $0xa8] sm:$0xff] }
0x2eb4   :  { %4388 = vrot.lane.b32.xlu0 %v11322_v17, %s6945_s29 }
0x2eb5   :  { %v6442_v62 = vpop.eup %6441 }
0x2eb6   :  { %v4344_v45 = vmul.f32 %v6442_v62, %v4327_v23  ;;  %vm4349_vm4 = vweird.f32 %v6442_v62 }
0x2eb7   :  { %vm4350_vm6 = vmor %vm4348_vm5, %vm4349_vm4 }
0x2eb8   :  { %v4345_v32 = vsub.f32 1.0, %v4344_v45 }
0x2eba   :  { %v4346_v47 = vmul.f32 %v6442_v62, %v4345_v32 }
0x2ebc   :  { %v4347_v21 = vadd.f32 %v6442_v62, %v4346_v47 }
0x2ebe   :  { %v4351_v4 = vsel %vm4350_vm6, %v6442_v62, %v4347_v21  ;;  %v6901_v21 = vld [vmem:[%s12792_s8 + $0xc8] sm:$0xf] }
0x2ebf   :  { %v4356_v35 = vsel %vm4353_vm7, %v4355_v8, %v4351_v4  ;;  %v6912_v4 = vld [vmem:[%s12792_s8 + $0x18] sm:$0xff]  ;;  %v6913_v8 = vld [vmem:[%s12792_s8 + $0x8] sm:$0xff] }
0x2f1e   :  { %v4373_v53 = vpop.permute.xlu0 %4372 }
0x2f1f   :  { %v4375_v1 = vmul.f32 %v4373_v53, %v4341_v34  ;;  %v4376_v36 = vmul.f32 %v4373_v53, %v4356_v35  ;;  %v13585_v35 = vld [vmem:[#allocation8_spill] sm:$0xff] }
0x2f21   :  { %v11888_v26 = vsel %vm4258_vm9, %v4376_v36, %v11182_v7  ;;  %v11893_v45 = vsel %vm4258_vm9, %v4375_v1, %v11187_v60 }
0x2f22   :  { %4384 = vrot.lane.b32.xlu2 %v11888_v26, %s6944_s5  ;;  %4382 = vrot.lane.b32.xlu1 %v11893_v45, %s6944_s5 }
0x2f26   :  { %v4389_v23 = vpop.permute.xlu0 %4388 }
0x2f2a   :  { %4390 = vrot.lane.b32.xlu1 %v11317_v27, %s6945_s29 }
0x2f7c   :  { %v4385_v62 = vpop.permute.xlu2 %4384 }
0x2f94   :  { %v4383_v34 = vpop.permute.xlu1 %4382 }
0x2f95   :  { %v4386_v7 = vsel %vm626_vm14, %v4383_v34, %v4385_v62 }
0x2f9c   :  { %v4391_v32 = vpop.permute.xlu1 %4390 }
0x2f9d   :  { %v4392_v47 = vsel %vm1328_vm12, %v4389_v23, %v4391_v32 }
0x2f9e   :  { %v4394_v60 = vsel %vm502_vm15, %v4386_v7, %v4392_v47 }
0x2f9f   :  { %5989 = vmatmul.msk.f32.vlgmr.msra.gmra.mxu3 %vm656_vm3, %v4394_v60  ;;  %5991 = vmatmul.msk.f32.vlgmr.msrb.gmra.mxu2 %vm656_vm3, %v4394_v60 }
0x2fa0   :  { %6012 = vmatpush.msk.msra.mxu3 %vm184_vm0, %v11203_v28  ;;  %6014 = vmatpush.msk.msrb.mxu2 %vm184_vm0, %v6901_v21  ;;  %v6904_v28 = vld [vmem:[%s12792_s8 + $0x98] sm:$0xff] }
0x2fa2   :  { %4872 = vmatpush.msra.mxu3 %v11212_v46  ;;  %4892 = vmatpush.msrb.mxu2 %v6902_v51  ;;  %v6905_v46 = vld [vmem:[%s12792_s8 + $0x88] sm:$0xff] }
0x2fa4   :  { %4873 = vmatpush.msra.mxu3 %v11219_v41  ;;  %4893 = vmatpush.msrb.mxu2 %v6903_v24  ;;  %v6906_v41 = vld [vmem:[%s12792_s8 + $0x78] sm:$0xff] }
0x2fa6   :  { %4874 = vmatpush.msra.mxu3 %v11226_v44  ;;  %4894 = vmatpush.msrb.mxu2 %v6904_v28  ;;  %v6907_v44 = vld [vmem:[%s12792_s8 + $0x68] sm:$0xff] }
0x2fa8   :  { %4875 = vmatpush.msra.mxu3 %v11233_v9  ;;  %4895 = vmatpush.msrb.mxu2 %v6905_v46  ;;  %v6908_v9 = vld [vmem:[%s12792_s8 + $0x58] sm:$0xff] }
0x2faa   :  { %4876 = vmatpush.msra.mxu3 %v11240_v15  ;;  %4896 = vmatpush.msrb.mxu2 %v6906_v41  ;;  %v6909_v15 = vld [vmem:[%s12792_s8 + $0x48] sm:$0xff] }
0x2fac   :  { %4877 = vmatpush.msra.mxu3 %v11247_v59  ;;  %4897 = vmatpush.msrb.mxu2 %v6907_v44  ;;  %v6910_v59 = vld [vmem:[%s12792_s8 + $0x38] sm:$0xff] }
0x2fae   :  { %4878 = vmatpush.msra.mxu3 %v11254_v48  ;;  %4898 = vmatpush.msrb.mxu2 %v6908_v9  ;;  %v6911_v48 = vld [vmem:[%s12792_s8 + $0x28] sm:$0xff] }
0x2fb0   :  { %4879 = vmatpush.msra.mxu3 %v11261_v40  ;;  %4899 = vmatpush.msrb.mxu2 %v6909_v15  ;;  %v13583_v40 = vld [vmem:[#allocation50_spill] sm:$0xff] }
0x2fb2   :  { %4880 = vmatpush.msra.mxu3 %v11268_v52  ;;  %4900 = vmatpush.msrb.mxu2 %v6910_v59  ;;  %v13584_v52 = vld [vmem:[#allocation51_spill] sm:$0xff]  ;;  %v13586_v59 = vld [vmem:[#allocation52_spill] sm:$0xff] }
0x2fb4   :  { %4881 = vmatpush.msra.mxu3 %v11275_v61  ;;  %4901 = vmatpush.msrb.mxu2 %v6911_v48  ;;  %v11968_v48 = vsel %vm3669_vm1, %v13586_v59, %v11301_v2 }
0x2fb6   :  { %4882 = vmatpush.msra.mxu3 %v13583_v40  ;;  %4902 = vmatpush.msrb.mxu2 %v6912_v4 }
0x2fb8   :  { %4883 = vmatpush.msra.mxu3 %v13584_v52  ;;  %4903 = vmatpush.msrb.mxu2 %v6913_v8 }
0x3022   :  { %v4435_v61 = vpop.f32.mrf.mxu2  ;;  %v4415_v36 = vpop.f32.mrf.mxu3 }
0x3023   :  { %v4436_v53 = vadd.f32 %v4435_v61, %v13585_v35  ;;  %v4416_v34 = vadd.f32 %v4415_v36, %v13424_v39 }
0x3025   :  { %6443 = vtanh.f32 %v4436_v53  ;;  %v5992_v23 = vmul.f32 -1.442695, %v4416_v34  ;;  %v5993_v61 = vmul.f32 -1.442695, %v4436_v53  ;;  %v11979_v53 = vadd.f32 %v11864_v13, %v13252_v54 }
0x3027   :  { %6445 = vpow2.f32 %v5992_v23 }
0x302b   :  { %v6444_v1 = vpop.eup %6443 }
0x302c   :  { %4479 = vrot.lane.b32.xlu2 %v6444_v1, %s6941_s7 }
0x302d   :  { %v6446_v62 = vpop.eup %6445 }
0x302e   :  { %v4444_v32 = vadd.f32 1.0, %v6446_v62 }
0x3030   :  { %6447 = vrcp.f32 %v4444_v32  ;;  %v4457_v24 = vand.u32 2147483648, %v4444_v32  ;;  %vm4451_vm8 = vweird.f32 %v4444_v32  ;;  %v4455_v28 = vand.u32 2147483647, %v4444_v32 }
0x3032   :  { %v4458_v41 = vor.u32 1.1754944e-38, %v4457_v24  ;;  %vm4456_vm11 = vcmp.eq.f32.partialorder %v4455_v28, 8.507059e+37 }
0x3036   :  { %v6448_v7 = vpop.eup %6447 }
0x3037   :  { %v4447_v47 = vmul.f32 %v6448_v7, %v4444_v32  ;;  %vm4452_vm2 = vweird.f32 %v6448_v7 }
0x3038   :  { %vm4453_vm13 = vmor %vm4451_vm8, %vm4452_vm2 }
0x3039   :  { %v4448_v60 = vsub.f32 1.0, %v4447_v47 }
0x303b   :  { %v4449_v21 = vmul.f32 %v6448_v7, %v4448_v60 }
0x303d   :  { %v4450_v51 = vadd.f32 %v6448_v7, %v4449_v21 }
0x303f   :  { %v4454_v46 = vsel %vm4453_vm13, %v6448_v7, %v4450_v51 }
0x3040   :  { %v4459_v9 = vsel %vm4456_vm11, %v4458_v41, %v4454_v46 }
0x3041   :  { %v4477_v40 = vmul.f32 %v4459_v9, %v11968_v48 }
0x3086   :  { %v4480_v44 = vpop.permute.xlu2 %4479 }
0x3087   :  { %v4482_v15 = vmul.f32 %v4480_v44, %v4459_v9 }
0x3089   :  { %4484 = vrot.lane.b32.xlu0 %v4482_v15, %s6942_s26 }
0x30fb   :  { %v4485_v4 = vpop.permute.xlu0 %4484 }
0x30fc   :  { %v11971_v52 = vadd.f32 %v4485_v4, %v4477_v40 }
0x30fe   :  { %6449 = vtanh.f32 %v11971_v52 }
0x30ff   :  { %6451 = vpow2.f32 %v5993_v61 }
0x3104   :  { %v6450_v8 = vpop.eup %6449 }
0x3105   :  { %4490 = vrot.lane.b32.xlu1 %v6450_v8, %s6942_s26  ;;  %v6452_v1 = vpop.eup %6451 }
0x3106   :  { %v4445_v36 = vadd.f32 1.0, %v6452_v1 }
0x3108   :  { %6453 = vrcp.f32 %v4445_v36  ;;  %v4472_v7 = vand.u32 2147483648, %v4445_v36  ;;  %vm4466_vm5 = vweird.f32 %v4445_v36  ;;  %v4470_v47 = vand.u32 2147483647, %v4445_v36 }
0x3109   :  { %6455 = vtanh.f32 %v11979_v53 }
0x310a   :  { %v4473_v21 = vor.u32 1.1754944e-38, %v4472_v7  ;;  %vm4471_vm7 = vcmp.eq.f32.partialorder %v4470_v47, 8.507059e+37 }
0x310d   :  { %4506 = vrot.lane.b32.xlu1 %v11620_v49, %s6945_s29 }
0x310e   :  { %v6454_v2 = vpop.eup %6453 }
0x310f   :  { %v4462_v34 = vmul.f32 %v6454_v2, %v4445_v36  ;;  %vm4467_vm4 = vweird.f32 %v6454_v2  ;;  %v6456_v13 = vpop.eup %6455 }
0x3110   :  { %vm4468_vm6 = vmor %vm4466_vm5, %vm4467_vm4 }
0x3111   :  { %v4463_v23 = vsub.f32 1.0, %v4462_v34 }
0x3113   :  { %v4464_v62 = vmul.f32 %v6454_v2, %v4463_v23 }
0x3115   :  { %v4465_v32 = vadd.f32 %v6454_v2, %v4464_v62 }
0x3117   :  { %v4469_v60 = vsel %vm4468_vm6, %v6454_v2, %v4465_v32 }
0x3118   :  { %v4474_v51 = vsel %vm4471_vm7, %v4473_v21, %v4469_v60 }
0x3177   :  { %v4491_v24 = vpop.permute.xlu1 %4490 }
0x3178   :  { %v4493_v28 = vmul.f32 %v4491_v24, %v4459_v9  ;;  %v4494_v46 = vmul.f32 %v4491_v24, %v4474_v51 }
0x317a   :  { %v11984_v41 = vsel %vm4258_vm9, %v4494_v46, %v11317_v27  ;;  %v11989_v44 = vsel %vm4258_vm9, %v4493_v28, %v11322_v17  ;;  %v4065_v27 = vadd.f32 %v11868_v18, %v13253_v19  ;;  %v13588_v28 = vld [vmem:[#allocation54_spill] sm:$0xff]  ;;  %v13594_v46 = vld [vmem:[#allocation60_spill] sm:$0xff] }
0x317b   :  { %4502 = vrot.lane.b32.xlu0 %v11984_v41, %s6944_s5  ;;  %4500 = vrot.lane.b32.xlu2 %v11989_v44, %s6944_s5 }
0x317c   :  { %v5974_v9 = vmul.f32 -1.442695, %v4065_v27  ;;  %v13596_v27 = vld [vmem:[#allocation62_spill] sm:$0xff] }
0x317e   :  { %6457 = vpow2.f32 %v5974_v9  ;;  %v13597_v9 = vld [vmem:[#allocation63_spill] sm:$0xff] }
0x317f   :  { %v4507_v36 = vpop.permute.xlu1 %4506 }
0x3183   :  { %4128 = vrot.lane.b32.xlu0 %v6456_v13, %s6941_s7  ;;  %4508 = vrot.lane.b32.xlu2 %v11615_v50, %s6945_s29  ;;  %v13595_v13 = vld [vmem:[#allocation61_spill] sm:$0xff] }
0x3184   :  { %v6458_v17 = vpop.eup %6457 }
0x3185   :  { %v4093_v15 = vadd.f32 1.0, %v6458_v17  ;;  %v13598_v17 = vld [vmem:[#allocation64_spill] sm:$0xff] }
0x3187   :  { %6459 = vrcp.f32 %v4093_v15  ;;  %v4106_v32 = vand.u32 2147483648, %v4093_v15  ;;  %vm4100_vm8 = vweird.f32 %v4093_v15  ;;  %v4104_v7 = vand.u32 2147483647, %v4093_v15 }
0x3189   :  { %v4107_v60 = vor.u32 1.1754944e-38, %v4106_v32  ;;  %vm4105_vm11 = vcmp.eq.f32.partialorder %v4104_v7, 8.507059e+37  ;;  %v6920_v32 = vld [vmem:[%s12792_s8 + $0x300] sm:$0xff]  ;;  %v6921_v7 = vld [vmem:[%s12792_s8 + $0x308] sm:$0xff] }
0x318d   :  { %v6460_v59 = vpop.eup %6459 }
0x318e   :  { %v4096_v4 = vmul.f32 %v6460_v59, %v4093_v15  ;;  %vm4101_vm2 = vweird.f32 %v6460_v59  ;;  %v13600_v15 = vld [vmem:[#allocation66_spill] sm:$0xff] }
0x318f   :  { %vm4102_vm13 = vmor %vm4100_vm8, %vm4101_vm2 }
0x3190   :  { %v4097_v8 = vsub.f32 1.0, %v4096_v4  ;;  %v13603_v4 = vld [vmem:[#allocation69_spill] sm:$0xff] }
0x3192   :  { %v4098_v61 = vmul.f32 %v6460_v59, %v4097_v8  ;;  %v13604_v8 = vld [vmem:[#allocation70_spill] sm:$0xff] }
0x3194   :  { %v4099_v62 = vadd.f32 %v6460_v59, %v4098_v61  ;;  %v13605_v61 = vld [vmem:[#allocation71_spill] sm:$0xff] }
0x3196   :  { %v4103_v47 = vsel %vm4102_vm13, %v6460_v59, %v4099_v62  ;;  %v13601_v59 = vld [vmem:[#allocation67_spill] sm:$0xff]  ;;  %v6918_v62 = vld [vmem:[%s12792_s8 + $0x310] sm:$0xff] }
0x3197   :  { %v12012_v21 = vsel %vm4105_vm11, %v4107_v60, %v4103_v47  ;;  %v6922_v47 = vld [vmem:[%s12792_s8 + $0x2f0] sm:$0xff]  ;;  %v6923_v60 = vld [vmem:[%s12792_s8 + $0x2f8] sm:$0xff] }
0x31d5   :  { %v4501_v40 = vpop.permute.xlu2 %4500 }
0x31dd   :  { %v4509_v1 = vpop.permute.xlu2 %4508 }
0x31de   :  { %v4510_v34 = vsel %vm1328_vm12, %v4507_v36, %v4509_v1  ;;  %v13606_v1 = vld [vmem:[#allocation72_spill] sm:$0xff]  ;;  %v6914_v36 = vld [vmem:[%s12792_s8 + $0x330] sm:$0xf] }
0x31ed   :  { %v4503_v2 = vpop.permute.xlu0 %4502 }
0x31ee   :  { %v4504_v23 = vsel %vm626_vm14, %v4501_v40, %v4503_v2  ;;  %v13602_v40 = vld [vmem:[#allocation68_spill] sm:$0xff]  ;;  %v6915_v2 = vld [vmem:[%s12792_s8 + $0x338] sm:$0xf] }
0x31ef   :  { %v4512_v18 = vsel %vm502_vm15, %v4504_v23, %v4510_v34  ;;  %v6916_v34 = vld [vmem:[%s12792_s8 + $0x320] sm:$0xff]  ;;  %v6917_v23 = vld [vmem:[%s12792_s8 + $0x328] sm:$0xff] }
0x31f0   :  { %5995 = vmatmul.msk.f32.vlgmr.msra.gmra.mxu0 %vm656_vm3, %v4512_v18  ;;  %5997 = vmatmul.msk.f32.vlgmr.msra.gmra.mxu1 %vm656_vm3, %v4512_v18  ;;  %v6919_v18 = vld [vmem:[%s12792_s8 + $0x318] sm:$0xff] }
0x31f1   :  { %6018 = vmatpush.msk.msra.mxu0 %vm184_vm0, %v11346_v63  ;;  %6020 = vmatpush.msk.msra.mxu1 %vm184_vm0, %v11353_v16  ;;  %v13587_v63 = vld [vmem:[#allocation53_spill] sm:$0xff]  ;;  %v13589_v16 = vld [vmem:[#allocation55_spill] sm:$0xff] }
0x31f3   :  { %4989 = vmatpush.msra.mxu0 %v11360_v38  ;;  %5009 = vmatpush.msra.mxu1 %v11366_v5  ;;  %v13590_v38 = vld [vmem:[#allocation56_spill] sm:$0xff]  ;;  %v13591_v5 = vld [vmem:[#allocation57_spill] sm:$0xff] }
0x31f5   :  { %v4129_v51 = vpop.permute.xlu0 %4128  ;;  %4990 = vmatpush.msra.mxu0 %v11372_v11  ;;  %5010 = vmatpush.msra.mxu1 %v11378_v31  ;;  %v13592_v11 = vld [vmem:[#allocation58_spill] sm:$0xff]  ;;  %v13593_v31 = vld [vmem:[#allocation59_spill] sm:$0xff] }
0x31f6   :  { %v4131_v24 = vmul.f32 %v4129_v51, %v12012_v21  ;;  %v6924_v51 = vld [vmem:[%s12792_s8 + $0x2e0] sm:$0xff] }
0x31f7   :  { %4991 = vmatpush.msra.mxu0 %v13587_v63  ;;  %5011 = vmatpush.msra.mxu1 %v13588_v28  ;;  %v6926_v63 = vld [vmem:[%s12792_s8 + $0x2d0] sm:$0xff]  ;;  %v6927_v28 = vld [vmem:[%s12792_s8 + $0x2d8] sm:$0xff] }
0x31f8   :  { %4133 = vrot.lane.b32.xlu0 %v4131_v24, %s6942_s26  ;;  %6007 = vmatmul.msk.f32.vlgmr.msrb.gmra.mxu0 %vm502_vm15, %v11813_v25  ;;  %v6925_v24 = vld [vmem:[%s12792_s8 + $0x2e8] sm:$0xff] }
0x31f9   :  { %6009 = vmatmul.msk.f32.vlgmr.msrb.gmra.mxu1 %vm502_vm15, %v11813_v25  ;;  %4992 = vmatpush.msra.mxu0 %v13589_v16  ;;  %v13599_v25 = vld [vmem:[#allocation65_spill] sm:$0xff]  ;;  %v6928_v16 = vld [vmem:[%s12792_s8 + $0x2c0] sm:$0xff] }
0x31fa   :  { %5012 = vmatpush.msra.mxu1 %v13590_v38  ;;  %v6929_v38 = vld [vmem:[%s12792_s8 + $0x2c8] sm:$0xff] }
0x31fb   :  { %4993 = vmatpush.msra.mxu0 %v13591_v5  ;;  %v6930_v5 = vld [vmem:[%s12792_s8 + $0x2b0] sm:$0xff] }
0x31fc   :  { %5013 = vmatpush.msra.mxu1 %v13592_v11  ;;  %v6931_v11 = vld [vmem:[%s12792_s8 + $0x2b8] sm:$0xff] }
0x31fd   :  { %4994 = vmatpush.msra.mxu0 %v13593_v31  ;;  %v6932_v31 = vld [vmem:[%s12792_s8 + $0x2a0] sm:$0xff] }
0x31fe   :  { %5014 = vmatpush.msra.mxu1 %v13594_v46  ;;  %v6933_v46 = vld [vmem:[%s12792_s8 + $0x2a8] sm:$0xff] }
0x31ff   :  { %4995 = vmatpush.msra.mxu0 %v13595_v13  ;;  %v6934_v13 = vld [vmem:[%s12792_s8 + $0x290] sm:$0xff] }
0x3200   :  { %5015 = vmatpush.msra.mxu1 %v13596_v27  ;;  %v6935_v27 = vld [vmem:[%s12792_s8 + $0x298] sm:$0xff] }
0x3201   :  { %4996 = vmatpush.msra.mxu0 %v13597_v9  ;;  %v6936_v9 = vld [vmem:[%s12792_s8 + $0x280] sm:$0xff] }
0x3202   :  { %5016 = vmatpush.msra.mxu1 %v13598_v17  ;;  %v6937_v17 = vld [vmem:[%s12792_s8 + $0x288] sm:$0xff] }
0x3203   :  { %4997 = vmatpush.msra.mxu0 %v13599_v25  ;;  %v6938_v25 = vld [vmem:[%s12792_s8 + $0x270] sm:$0xff] }
0x3204   :  { %5017 = vmatpush.msra.mxu1 %v13600_v15  ;;  %v6939_v15 = vld [vmem:[%s12792_s8 + $0x278] sm:$0xff] }
0x3205   :  { %4998 = vmatpush.msra.mxu0 %v13601_v59  ;;  %v13607_v59 = vld [vmem:[#allocation4_spill] sm:$0xff] }
0x3206   :  { %5018 = vmatpush.msra.mxu1 %v13602_v40  ;;  %v13608_v40 = vld [vmem:[#allocation6_spill] sm:$0xff] }
0x3207   :  { %4999 = vmatpush.msra.mxu0 %v13603_v4  ;;  %v12126_v4 = vsel %vm3080_vm10, %v13608_v40, %v13607_v59 }
0x3208   :  { %5019 = vmatpush.msra.mxu1 %v13604_v8  ;;  %v4126_v8 = vmul.f32 %v12012_v21, %v12126_v4 }
0x3209   :  { %5000 = vmatpush.msra.mxu0 %v13605_v61 }
0x320a   :  { %5020 = vmatpush.msra.mxu1 %v13606_v1 }
0x320b   :  { %6030 = vmatpush.msk.msrb.mxu0 %vm184_vm0, %v6914_v36 }
0x320c   :  { %6032 = vmatpush.msk.msrb.mxu1 %vm184_vm0, %v6915_v2  ;;  %v13609_v2 = vld [vmem:[#allocation38_spill] sm:$0xff] }
0x320d   :  { %5225 = vmatpush.msrb.mxu0 %v6916_v34 }
0x320e   :  { %5245 = vmatpush.msrb.mxu1 %v6917_v23 }
0x320f   :  { %5226 = vmatpush.msrb.mxu0 %v6918_v62  ;;  %v4741_v62 = vld [vmem:[#allocation2 + $0x78] sm:$0xff] }
0x3210   :  { %5246 = vmatpush.msrb.mxu1 %v6919_v18 }
0x3211   :  { %5227 = vmatpush.msrb.mxu0 %v6920_v32  ;;  %v13610_v32 = vld [vmem:[#allocation7_spill] sm:$0xff] }
0x3212   :  { %5247 = vmatpush.msrb.mxu1 %v6921_v7  ;;  %vm4736_vm10 = vcmp.gt.s32.totalorder %v13610_v32, 7 }
0x3213   :  { %5228 = vmatpush.msrb.mxu0 %v6922_v47  ;;  %v13611_v47 = vmov 0  }
0x3214   :  { %5248 = vmatpush.msrb.mxu1 %v6923_v60  ;;  %v4843_v60 = vsel %vm4736_vm10, 1, %v13611_v47 }
0x3215   :  { %5229 = vmatpush.msrb.mxu0 %v6924_v51 }
0x3216   :  { %5249 = vmatpush.msrb.mxu1 %v6925_v24 }
0x3217   :  { %5230 = vmatpush.msrb.mxu0 %v6926_v63 }
0x3218   :  { %5250 = vmatpush.msrb.mxu1 %v6927_v28  ;;  %v4740_v28 = vld [vmem:[#allocation2 + $0x70] sm:$0xff] }
0x3219   :  { %5231 = vmatpush.msrb.mxu0 %v6928_v16 }
0x321a   :  { %5251 = vmatpush.msrb.mxu1 %v6929_v38 }
0x321b   :  { %5232 = vmatpush.msrb.mxu0 %v6930_v5 }
0x321c   :  { %5252 = vmatpush.msrb.mxu1 %v6931_v11  ;;  %v13612_v11 = vld [vmem:[#allocation39_spill] sm:$0xff] }
0x321d   :  { %5233 = vmatpush.msrb.mxu0 %v6932_v31 }
0x321e   :  { %5253 = vmatpush.msrb.mxu1 %v6933_v46  ;;  %v5975_v46 = vmul.f32 -1.442695, %v11979_v53 }
0x321f   :  { %5234 = vmatpush.msrb.mxu0 %v6934_v13 }
0x3220   :  { %5254 = vmatpush.msrb.mxu1 %v6935_v27 }
0x3221   :  { %5235 = vmatpush.msrb.mxu0 %v6936_v9 }
0x3222   :  { %5255 = vmatpush.msrb.mxu1 %v6937_v17 }
0x3223   :  { %5236 = vmatpush.msrb.mxu0 %v6938_v25 }
0x3224   :  { %5256 = vmatpush.msrb.mxu1 %v6939_v15 }
0x326a   :  { %v4134_v61 = vpop.permute.xlu0 %4133 }
0x326b   :  { %v12130_v1 = vadd.f32 %v4134_v61, %v4126_v8 }
0x326d   :  { %6461 = vtanh.f32 %v12130_v1  ;;  %v4553_v36 = vpop.f32.mrf.mxu1  ;;  %v4533_v24 = vpop.f32.mrf.mxu0 }
0x326e   :  { %v12134_v34 = vadd.f32 %v4553_v36, %v13609_v2  ;;  %v4534_v31 = vadd.f32 %v4533_v24, %v13612_v11 }
0x3270   :  { %6463 = vtanh.f32 %v12134_v34  ;;  %v5998_v27 = vmul.f32 -1.442695, %v4534_v31 }
0x3273   :  { %v6462_v23 = vpop.eup %6461 }
0x3274   :  { %4139 = vrot.lane.b32.xlu0 %v6462_v23, %s6942_s26 }
0x3275   :  { %v4761_v63 = vpop.f32.mrf.mxu0 }
0x3276   :  { %v6464_v37 = vpop.eup %6463  ;;  %v4781_v18 = vpop.f32.mrf.mxu1  ;;  %v4784_v16 = vadd.f32 %v4761_v63, %v4740_v28 }
0x3277   :  { %v12139_v7 = vadd.f32 %v4781_v18, %v4741_v62  ;;  %4597 = vrot.lane.b32.xlu1 %v6464_v37, %s6941_s7 }
0x3278   :  { %v6010_v38 = vmul.f32 -1.442695, %v4784_v16 }
0x3279   :  { %6465 = vtanh.f32 %v12139_v7 }
0x327a   :  { %6467 = vpow2.f32 %v6010_v38 }
0x327b   :  { %6469 = vpow2.f32 %v5975_v46 }
0x327c   :  { %4845 = vperm.xlu0 %6066, %v4843_v60  }
0x327f   :  { %v6466_v51 = vpop.eup %6465 }
0x3280   :  { %4827 = vrot.lane.b32.xlu2 %v6466_v51, %s6941_s7  ;;  %v6468_v5 = vpop.eup %6467 }
0x3281   :  { %v4792_v13 = vadd.f32 1.0, %v6468_v5  ;;  %v6470_v9 = vpop.eup %6469 }
0x3282   :  { %v4094_v15 = vadd.f32 1.0, %v6470_v9 }
0x3283   :  { %6471 = vrcp.f32 %v4792_v13  ;;  %v4805_v62 = vand.u32 2147483648, %v4792_v13  ;;  %vm4799_vm5 = vweird.f32 %v4792_v13  ;;  %v4803_v18 = vand.u32 2147483647, %v4792_v13 }
0x3284   :  { %6473 = vpow2.f32 %v5998_v27  ;;  %v4121_v46 = vand.u32 2147483648, %v4094_v15  ;;  %vm4115_vm8 = vweird.f32 %v4094_v15 }
0x3285   :  { %6475 = vrcp.f32 %v4094_v15  ;;  %v4806_v51 = vor.u32 1.1754944e-38, %v4805_v62  ;;  %vm4804_vm7 = vcmp.eq.f32.partialorder %v4803_v18, 8.507059e+37 }
0x3289   :  { %v6472_v17 = vpop.eup %6471 }
0x328a   :  { %v6474_v25 = vpop.eup %6473  ;;  %v4795_v59 = vmul.f32 %v6472_v17, %v4792_v13  ;;  %vm4800_vm4 = vweird.f32 %v6472_v17  ;;  %v4119_v13 = vand.u32 2147483647, %v4094_v15 }
0x328b   :  { %v4562_v40 = vadd.f32 1.0, %v6474_v25  ;;  %v6476_v36 = vpop.eup %6475  ;;  %vm4801_vm6 = vmor %vm4799_vm5, %vm4800_vm4  ;;  %v4122_v25 = vor.u32 1.1754944e-38, %v4121_v46 }
0x328c   :  { %v4796_v8 = vsub.f32 1.0, %v4795_v59  ;;  %v4111_v53 = vmul.f32 %v6476_v36, %v4094_v15  ;;  %vm4116_vm2 = vweird.f32 %v6476_v36  ;;  %vm4120_vm4 = vcmp.eq.f32.partialorder %v4119_v13, 8.507059e+37 }
0x328d   :  { %6477 = vrcp.f32 %v4562_v40  ;;  %vm4117_vm13 = vmor %vm4115_vm8, %vm4116_vm2  ;;  %vm4569_vm10 = vweird.f32 %v4562_v40  ;;  %v4573_v59 = vand.u32 2147483647, %v4562_v40 }
0x328e   :  { %v4797_v61 = vmul.f32 %v6472_v17, %v4796_v8  ;;  %v4112_v60 = vsub.f32 1.0, %v4111_v53 }
0x3290   :  { %v4798_v37 = vadd.f32 %v6472_v17, %v4797_v61  ;;  %v4113_v38 = vmul.f32 %v6476_v36, %v4112_v60 }
0x3292   :  { %v4802_v47 = vsel %vm4801_vm6, %v6472_v17, %v4798_v37  ;;  %v4114_v31 = vadd.f32 %v6476_v36, %v4113_v38  ;;  %v4575_v17 = vand.u32 2147483648, %v4562_v40  ;;  %vm4574_vm6 = vcmp.eq.f32.partialorder %v4573_v59, 8.507059e+37 }
0x3293   :  { %v6478_v23 = vpop.eup %6477  ;;  %v12147_v63 = vsel %vm4804_vm7, %v4806_v51, %v4802_v47 }
0x3294   :  { %v4565_v32 = vmul.f32 %v6478_v23, %v4562_v40  ;;  %vm4570_vm11 = vweird.f32 %v6478_v23  ;;  %v4118_v9 = vsel %vm4117_vm13, %v6476_v36, %v4114_v31  ;;  %v4576_v18 = vor.u32 1.1754944e-38, %v4575_v17 }
0x3295   :  { %vm4571_vm5 = vmor %vm4569_vm10, %vm4570_vm11  ;;  %v4123_v8 = vsel %vm4120_vm4, %v4122_v25, %v4118_v9 }
0x3296   :  { %v4566_v28 = vsub.f32 1.0, %v4565_v32 }
0x3298   :  { %v4567_v5 = vmul.f32 %v6478_v23, %v4566_v28 }
0x329a   :  { %v4568_v27 = vadd.f32 %v6478_v23, %v4567_v5 }
0x329c   :  { %v4572_v37 = vsel %vm4571_vm5, %v6478_v23, %v4568_v27 }
0x329d   :  { %v12152_v15 = vsel %vm4574_vm6, %v4576_v18, %v4572_v37 }
0x32da   :  { %v4828_v24 = vpop.permute.xlu2 %4827 }
0x32db   :  { %v4830_v16 = vmul.f32 %v4828_v24, %v12147_v63 }
0x32dd   :  { %4832 = vrot.lane.b32.xlu2 %v4830_v16, %s6942_s26 }
0x32e6   :  { %v4140_v61 = vpop.permute.xlu0 %4139 }
0x32e7   :  { %v4142_v53 = vmul.f32 %v4140_v61, %v12012_v21  ;;  %v4143_v62 = vmul.f32 %v4140_v61, %v4123_v8  ;;  %v4259_v21 = vsel %vm4258_vm9, %v11607_v22, %v11603_v56  ;;  %v6011_v22 = vmul.f32 -1.442695, %v12139_v7 }
0x32e8   :  { %v4825_v23 = vmul.f32 %v12147_v63, %v4259_v21 }
0x32e9   :  { %v4598_v32 = vpop.permute.xlu1 %4597  ;;  %v12157_v36 = vsel %vm3669_vm1, %v4142_v53, %v11571_v30  ;;  %v12173_v30 = vsel %vm3669_vm1, %v11587_v6, %v11583_v3  ;;  %v12185_v38 = vsel %vm3669_vm1, %v4143_v62, %v11594_v57  ;;  %v5999_v53 = vmul.f32 -1.442695, %v12134_v34 }
0x32ea   :  { %v4600_v40 = vmul.f32 %v4598_v32, %v12152_v15  ;;  %4626 = vrot.lane.b32.xlu0 %v12157_v36, %s6945_s29  ;;  %v4595_v24 = vmul.f32 %v12152_v15, %v12173_v30 }
0x32ec   :  { %4602 = vrot.lane.b32.xlu1 %v4600_v40, %s6942_s26 }
0x32ee   :  { %v12189_v25 = vpop.permute.xlu0 %4845 }
0x32ef   :  { %vm4847_vm11 = vcmp.eq.s32.totalorder %v12189_v25, 1  ;;  %v6070_v25 = vld [vmem:[%s12802_s15] ss:$0 sm:$0xff] }
0x3337   :  { %v4833_v47 = vpop.permute.xlu2 %4832 }
0x3338   :  { %v4835_v60 = vadd.f32 %v4833_v47, %v4825_v23 }
0x333a   :  { %6479 = vtanh.f32 %v4835_v60 }
0x3340   :  { %v6480_v51 = vpop.eup %6479 }
0x3341   :  { %4838 = vrot.lane.b32.xlu2 %v6480_v51, %s6942_s26 }
0x335e   :  { %v4603_v28 = vpop.permute.xlu1 %4602 }
0x335f   :  { %v12177_v16 = vadd.f32 %v4603_v28, %v4595_v24 }
0x3361   :  { %6481 = vtanh.f32 %v12177_v16 }
0x3362   :  { %6483 = vpow2.f32 %v6011_v22 }
0x3367   :  { %v6482_v56 = vpop.eup %6481 }
0x3368   :  { %4608 = vrot.lane.b32.xlu1 %v6482_v56, %s6942_s26  ;;  %v6484_v3 = vpop.eup %6483 }
0x3369   :  { %v4793_v6 = vadd.f32 1.0, %v6484_v3 }
0x336b   :  { %6485 = vrcp.f32 %v4793_v6  ;;  %v4820_v9 = vand.u32 2147483648, %v4793_v6  ;;  %vm4814_vm2 = vweird.f32 %v4793_v6  ;;  %v4818_v7 = vand.u32 2147483647, %v4793_v6 }
0x336c   :  { %6487 = vpow2.f32 %v5999_v53  ;;  %v13619_v53 = vld [vmem:[#allocation17_spill] sm:$0xff] }
0x336d   :  { %v4821_v57 = vor.u32 1.1754944e-38, %v4820_v9  ;;  %vm4819_vm13 = vcmp.eq.f32.partialorder %v4818_v7, 8.507059e+37 }
0x3370   :  { %4628 = vrot.lane.b32.xlu1 %v12185_v38, %s6945_s29 }
0x3371   :  { %v6486_v5 = vpop.eup %6485 }
0x3372   :  { %v4810_v31 = vmul.f32 %v6486_v5, %v4793_v6  ;;  %vm4815_vm7 = vweird.f32 %v6486_v5  ;;  %v6488_v62 = vpop.eup %6487 }
0x3373   :  { %vm4816_vm8 = vmor %vm4814_vm2, %vm4815_vm7  ;;  %v4563_v18 = vadd.f32 1.0, %v6488_v62  ;;  %v13620_v62 = vld [vmem:[#allocation18_spill] sm:$0xff] }
0x3374   :  { %v4811_v46 = vsub.f32 1.0, %v4810_v31 }
0x3375   :  { %6489 = vrcp.f32 %v4563_v18  ;;  %v4590_v60 = vand.u32 2147483648, %v4563_v18  ;;  %vm4584_vm4 = vweird.f32 %v4563_v18  ;;  %v4588_v51 = vand.u32 2147483647, %v4563_v18 }
0x3376   :  { %v4812_v13 = vmul.f32 %v6486_v5, %v4811_v46  ;;  %v4627_v46 = vpop.permute.xlu0 %4626 }
0x3377   :  { %vm4589_vm6 = vcmp.eq.f32.partialorder %v4588_v51, 8.507059e+37  ;;  %v13628_v51 = vld [vmem:[#allocation27_spill] sm:$0xff] }
0x3378   :  { %v4813_v27 = vadd.f32 %v6486_v5, %v4812_v13 }
0x337a   :  { %v4817_v17 = vsel %vm4816_vm8, %v6486_v5, %v4813_v27 }
0x337b   :  { %v4822_v59 = vsel %vm4819_vm13, %v4821_v57, %v4817_v17  ;;  %v6490_v32 = vpop.eup %6489  ;;  %v13613_v57 = vld [vmem:[#allocation11_spill] sm:$0xff] }
0x337c   :  { %v4580_v40 = vmul.f32 %v6490_v32, %v4563_v18  ;;  %vm4585_vm10 = vweird.f32 %v6490_v32  ;;  %v13621_v18 = vld [vmem:[#allocation21_spill] sm:$0xff] }
0x337d   :  { %vm4586_vm5 = vmor %vm4584_vm4, %vm4585_vm10 }
0x337e   :  { %v4581_v21 = vsub.f32 1.0, %v4580_v40  ;;  %v13623_v40 = vld [vmem:[#allocation22_spill] sm:$0xff] }
0x3380   :  { %v4582_v23 = vmul.f32 %v6490_v32, %v4581_v21  ;;  %v13624_v21 = vld [vmem:[#allocation34_spill] sm:$0xff] }
0x3382   :  { %v4583_v47 = vadd.f32 %v6490_v32, %v4582_v23  ;;  %v13625_v23 = vld [vmem:[#allocation23_spill] sm:$0xff] }
0x3384   :  { %v4587_v24 = vsel %vm4586_vm5, %v6490_v32, %v4583_v47  ;;  %v13622_v32 = vld [vmem:[#allocation32_spill] sm:$0xff]  ;;  %v13626_v47 = vld [vmem:[#allocation35_spill] sm:$0xff] }
0x339b   :  { %v4839_v8 = vpop.permute.xlu2 %4838 }
0x339c   :  { %v4842_v61 = vmul.f32 %v4839_v8, %v4822_v59  ;;  %v4841_v5 = vmul.f32 %v4839_v8, %v12147_v63  ;;  %v13614_v59 = vld [vmem:[#allocation12_spill] sm:$0xff] }
0x339e   :  { %v4849_v37 = vsel %vm4847_vm11, %v4842_v61, %v11636_v42  ;;  %v4591_v42 = vor.u32 1.1754944e-38, %v4590_v60  ;;  %v13627_v60 = vld [vmem:[#allocation24_spill] sm:$0xff] }
0x339f   :  { %4854 = vrot.lane.b32.xlu0 %v4849_v37, %s6944_s5  ;;  %v13615_v37 = vld [vmem:[#allocation13_spill] sm:$0xff] }
0x33a0   :  { %v4592_v28 = vsel %vm4589_vm6, %v4591_v42, %v4587_v24  ;;  %v13629_v24 = vld [vmem:[#allocation36_spill] sm:$0xff]  ;;  %v13630_v42 = vld [vmem:[#allocation37_spill] sm:$0xff] }
0x33da   :  { %v4609_v56 = vpop.permute.xlu1 %4608 }
0x33db   :  { %v4611_v34 = vmul.f32 %v4609_v56, %v12152_v15  ;;  %v4612_v22 = vmul.f32 %v4609_v56, %v4592_v28  ;;  %v4848_v15 = vsel %vm4847_vm11, %v4841_v5, %v11641_v10  ;;  %v13631_v28 = vld [vmem:[#allocation26_spill] sm:$0xff]  ;;  %v13632_v56 = vld [vmem:[#allocation25_spill] sm:$0xff] }
0x33dd   :  { %v12201_v3 = vsel %vm4258_vm9, %v4612_v22, %v11615_v50  ;;  %v12206_v6 = vsel %vm4258_vm9, %v4611_v34, %v11620_v49  ;;  %v13633_v34 = vld [vmem:[#allocation29_spill] sm:$0xff]  ;;  %v13634_v22 = vld [vmem:[#allocation28_spill] sm:$0xff] }
0x33de   :  { %4620 = vrot.lane.b32.xlu2 %v12201_v3, %s6944_s5  ;;  %4618 = vrot.lane.b32.xlu1 %v12206_v6, %s6944_s5 }
0x33e2   :  { %v4629_v49 = vpop.permute.xlu1 %4628 }
0x33e3   :  { %v4630_v27 = vsel %vm1328_vm12, %v4627_v46, %v4629_v49 }
0x33e6   :  { %4852 = vrot.lane.b32.xlu2 %v4848_v15, %s6944_s5  ;;  %4858 = vrot.lane.b32.xlu1 %v11893_v45, %s6945_s29 }
0x33ee   :  { %4860 = vrot.lane.b32.xlu2 %v11888_v26, %s6945_s29 }
0x3411   :  { %v4855_v10 = vpop.permute.xlu0 %4854 }
0x3438   :  { %v4621_v50 = vpop.permute.xlu2 %4620 }
0x3440   :  { %v4853_v31 = vpop.permute.xlu2 %4852 }
0x3441   :  { %v4856_v8 = vsel %vm626_vm14, %v4853_v31, %v4855_v10 }
0x3448   :  { %v4861_v7 = vpop.permute.xlu2 %4860 }
0x3450   :  { %v4619_v13 = vpop.permute.xlu1 %4618 }
0x3451   :  { %v4622_v63 = vsel %vm626_vm14, %v4619_v13, %v4621_v50  ;;  %v13635_v50 = vld [vmem:[#allocation3_spill] sm:$0xff] }
0x3452   :  { %v4632_v9 = vsel %vm502_vm15, %v4622_v63, %v4630_v27 }
0x3453   :  { %6001 = vmatmul.msk.f32.vlgmr.msrb.gmra.mxu3 %vm656_vm3, %v4632_v9  ;;  %6003 = vmatmul.msk.f32.vlgmr.msra.gmra.mxu2 %vm656_vm3, %v4632_v9 }
0x3454   :  { %6024 = vmatpush.msk.msrb.mxu3 %vm184_vm0, %v11657_v55  ;;  %6026 = vmatpush.msk.msra.mxu2 %vm184_vm0, %v11664_v0  ;;  %v13616_v0 = vld [vmem:[#allocation14_spill] sm:$0xff] }
0x3456   :  { %5106 = vmatpush.msrb.mxu3 %v11671_v12  ;;  %5126 = vmatpush.msra.mxu2 %v11677_v43  ;;  %v13617_v12 = vld [vmem:[#allocation15_spill] sm:$0xff]  ;;  %v13618_v43 = vld [vmem:[#allocation16_spill] sm:$0xff] }
0x3458   :  { %v4859_v17 = vpop.permute.xlu1 %4858  ;;  %5107 = vmatpush.msrb.mxu3 %v13613_v57  ;;  %5127 = vmatpush.msra.mxu2 %v13614_v59 }
0x3459   :  { %v4862_v61 = vsel %vm1328_vm12, %v4859_v17, %v4861_v7 }
0x345a   :  { %v4864_v55 = vsel %vm502_vm15, %v4856_v8, %v4862_v61  ;;  %5108 = vmatpush.msrb.mxu3 %v13615_v37  ;;  %5128 = vmatpush.msra.mxu2 %v13616_v0 }
0x345b   :  { %6013 = vmatmul.msk.f32.vlgmr.msra.gmra.mxu3 %vm656_vm3, %v4864_v55  ;;  %6015 = vmatmul.msk.f32.vlgmr.msrb.gmra.mxu2 %vm656_vm3, %v4864_v55 }
0x345c   :  { %5109 = vmatpush.msrb.mxu3 %v13617_v12  ;;  %5129 = vmatpush.msra.mxu2 %v13618_v43 }
0x345e   :  { %5110 = vmatpush.msrb.mxu3 %v13619_v53  ;;  %5130 = vmatpush.msra.mxu2 %v13620_v62  ;;  %v4377_v53 = vsel %vm4258_vm9, %v11879_v20, %v11876_v58 }
0x3460   :  { %5111 = vmatpush.msrb.mxu3 %v13621_v18  ;;  %5131 = vmatpush.msra.mxu2 %v13622_v32 }
0x3462   :  { %5112 = vmatpush.msrb.mxu3 %v13623_v40  ;;  %5132 = vmatpush.msra.mxu2 %v13624_v21 }
0x3464   :  { %5113 = vmatpush.msrb.mxu3 %v13625_v23  ;;  %5133 = vmatpush.msra.mxu2 %v13626_v47 }
0x3466   :  { %5114 = vmatpush.msrb.mxu3 %v13627_v60  ;;  %5134 = vmatpush.msra.mxu2 %v13628_v51 }
0x3468   :  { %5115 = vmatpush.msrb.mxu3 %v13629_v24  ;;  %5135 = vmatpush.msra.mxu2 %v13630_v42 }
0x346a   :  { %5116 = vmatpush.msrb.mxu3 %v13631_v28  ;;  %5136 = vmatpush.msra.mxu2 %v13632_v56 }
0x346c   :  { %5117 = vmatpush.msrb.mxu3 %v13633_v34  ;;  %5137 = vmatpush.msra.mxu2 %v13634_v22 }
0x34d6   :  { %v12259_v5 = vpop.f32.mrf.mxu2  ;;  %v12263_v46 = vpop.f32.mrf.mxu3 }
0x34de   :  { %v4905_v15 = vpop.f32.mrf.mxu2  ;;  %v4885_v13 = vpop.f32.mrf.mxu3 }
0x34df   :  { %v4906_v49 = vadd.f32 %v4905_v15, %v13635_v50  ;;  %v4886_v27 = vadd.f32 %v4885_v13, %v13324_v14 }
0x34e1   :  { %6491 = vtanh.f32 %v4906_v49  ;;  %v6016_v63 = vmul.f32 -1.442695, %v4886_v27  ;;  %v6017_v21 = vmul.f32 -1.442695, %v4906_v49 }
0x34e3   :  { %6493 = vpow2.f32 %v6016_v63 }
0x34e7   :  { %v6492_v31 = vpop.eup %6491 }
0x34e8   :  { %4949 = vrot.lane.b32.xlu0 %v6492_v31, %s6941_s7 }
0x34e9   :  { %v6494_v9 = vpop.eup %6493 }
0x34ea   :  { %v4914_v10 = vadd.f32 1.0, %v6494_v9 }
0x34ec   :  { %6495 = vrcp.f32 %v4914_v10  ;;  %v4927_v61 = vand.u32 2147483648, %v4914_v10  ;;  %vm4921_vm2 = vweird.f32 %v4914_v10  ;;  %v4925_v55 = vand.u32 2147483647, %v4914_v10 }
0x34ee   :  { %v4928_v0 = vor.u32 1.1754944e-38, %v4927_v61  ;;  %vm4926_vm13 = vcmp.eq.f32.partialorder %v4925_v55, 8.507059e+37 }
0x34f2   :  { %v6496_v7 = vpop.eup %6495 }
0x34f3   :  { %v4917_v17 = vmul.f32 %v6496_v7, %v4914_v10  ;;  %vm4922_vm7 = vweird.f32 %v6496_v7 }
0x34f4   :  { %vm4923_vm8 = vmor %vm4921_vm2, %vm4922_vm7 }
0x34f5   :  { %v4918_v57 = vsub.f32 1.0, %v4917_v17 }
0x34f7   :  { %v4919_v59 = vmul.f32 %v6496_v7, %v4918_v57 }
0x34f9   :  { %v4920_v8 = vadd.f32 %v6496_v7, %v4919_v59 }
0x34fb   :  { %v4924_v37 = vsel %vm4923_vm8, %v6496_v7, %v4920_v8 }
0x34fc   :  { %v4929_v14 = vsel %vm4926_vm13, %v4928_v0, %v4924_v37 }
0x34fd   :  { %v4947_v62 = vmul.f32 %v4929_v14, %v4377_v53 }
0x355a   :  { %v4950_v12 = vpop.permute.xlu0 %4949 }
0x355b   :  { %v4952_v43 = vmul.f32 %v4950_v12, %v4929_v14 }
0x355d   :  { %4954 = vrot.lane.b32.xlu1 %v4952_v43, %s6942_s26 }
0x35cf   :  { %v4955_v18 = vpop.permute.xlu1 %4954 }
0x35d0   :  { %v4957_v32 = vadd.f32 %v4955_v18, %v4947_v62 }
0x35d2   :  { %6497 = vtanh.f32 %v4957_v32 }
0x35d3   :  { %6499 = vpow2.f32 %v6017_v21 }
0x35d8   :  { %v6498_v40 = vpop.eup %6497 }
0x35d9   :  { %4960 = vrot.lane.b32.xlu2 %v6498_v40, %s6942_s26  ;;  %v6500_v23 = vpop.eup %6499 }
0x35da   :  { %v4915_v47 = vadd.f32 1.0, %v6500_v23 }
0x35dc   :  { %6501 = vrcp.f32 %v4915_v47  ;;  %v4942_v20 = vand.u32 2147483648, %v4915_v47  ;;  %vm4936_vm4 = vweird.f32 %v4915_v47  ;;  %v4940_v28 = vand.u32 2147483647, %v4915_v47 }
0x35de   :  { %v4943_v34 = vor.u32 1.1754944e-38, %v4942_v20  ;;  %vm4941_vm6 = vcmp.eq.f32.partialorder %v4940_v28, 8.507059e+37 }
0x35e1   :  { %4975 = vrot.lane.b32.xlu2 %v11989_v44, %s6945_s29 }
0x35e2   :  { %v6502_v60 = vpop.eup %6501 }
0x35e3   :  { %v4932_v51 = vmul.f32 %v6502_v60, %v4915_v47  ;;  %vm4937_vm10 = vweird.f32 %v6502_v60  ;;  %v4495_v47 = vsel %vm4258_vm9, %v11971_v52, %v11968_v48 }
0x35e4   :  { %vm4938_vm5 = vmor %vm4936_vm4, %vm4937_vm10 }
0x35e5   :  { %v4933_v24 = vsub.f32 1.0, %v4932_v51 }
0x35e7   :  { %v4934_v42 = vmul.f32 %v6502_v60, %v4933_v24 }
0x35e9   :  { %v4935_v58 = vadd.f32 %v6502_v60, %v4934_v42 }
0x35eb   :  { %v4939_v56 = vsel %vm4938_vm5, %v6502_v60, %v4935_v58 }
0x35ec   :  { %v4944_v22 = vsel %vm4941_vm6, %v4943_v34, %v4939_v56 }
0x3633   :  { %v4961_v15 = vpop.permute.xlu2 %4960 }
0x3634   :  { %v4963_v50 = vmul.f32 %v4961_v15, %v4929_v14  ;;  %v4964_v49 = vmul.f32 %v4961_v15, %v4944_v22 }
0x3636   :  { %v4966_v31 = vsel %vm4847_vm11, %v4964_v49, %v11888_v26  ;;  %v4965_v13 = vsel %vm4847_vm11, %v4963_v50, %v11893_v45 }
0x3637   :  { %4971 = vrot.lane.b32.xlu1 %v4966_v31, %s6944_s5  ;;  %4969 = vrot.lane.b32.xlu0 %v4965_v13, %s6944_s5 }
0x363b   :  { %v4976_v9 = vpop.permute.xlu2 %4975 }
0x363f   :  { %4977 = vrot.lane.b32.xlu0 %v11984_v41, %s6945_s29 }
0x36a9   :  { %v4970_v27 = vpop.permute.xlu0 %4969  ;;  %v4972_v63 = vpop.permute.xlu1 %4971 }
0x36aa   :  { %v4973_v7 = vsel %vm626_vm14, %v4970_v27, %v4972_v63  ;;  %v12302_v63 = vadd.f32 %v12259_v5, %v13252_v54  ;;  %v4654_v5 = vadd.f32 %v12263_v46, %v13253_v19 }
0x36b1   :  { %v4978_v10 = vpop.permute.xlu0 %4977 }
0x36b2   :  { %v4979_v17 = vsel %vm1328_vm12, %v4976_v9, %v4978_v10 }
0x36b3   :  { %v4981_v26 = vsel %vm502_vm15, %v4973_v7, %v4979_v17 }
0x36b4   :  { %6019 = vmatmul.msk.f32.vlgmr.msra.gmra.mxu0 %vm656_vm3, %v4981_v26  ;;  %6021 = vmatmul.msk.f32.vlgmr.msra.gmra.mxu1 %vm656_vm3, %v4981_v26 }
0x3731   :  { %v5022_v45 = vpop.f32.mrf.mxu1  ;;  %v5002_v8 = vpop.f32.mrf.mxu0 }
0x3732   :  { %v5023_v57 = vadd.f32 %v5022_v45, %v13585_v35  ;;  %v5003_v61 = vadd.f32 %v5002_v8, %v13424_v39 }
0x3734   :  { %6503 = vtanh.f32 %v5023_v57  ;;  %v6022_v55 = vmul.f32 -1.442695, %v5003_v61  ;;  %v6023_v58 = vmul.f32 -1.442695, %v5023_v57 }
0x3736   :  { %6505 = vpow2.f32 %v6022_v55 }
0x373a   :  { %v6504_v59 = vpop.eup %6503 }
0x373b   :  { %5066 = vrot.lane.b32.xlu1 %v6504_v59, %s6941_s7 }
0x373c   :  { %v6506_v37 = vpop.eup %6505 }
0x373d   :  { %v5031_v0 = vadd.f32 1.0, %v6506_v37 }
0x373f   :  { %6507 = vrcp.f32 %v5031_v0  ;;  %v5044_v18 = vand.u32 2147483648, %v5031_v0  ;;  %vm5038_vm2 = vweird.f32 %v5031_v0  ;;  %v5042_v35 = vand.u32 2147483647, %v5031_v0 }
0x3741   :  { %v5045_v40 = vor.u32 1.1754944e-38, %v5044_v18  ;;  %vm5043_vm13 = vcmp.eq.f32.partialorder %v5042_v35, 8.507059e+37 }
0x3745   :  { %v6508_v12 = vpop.eup %6507 }
0x3746   :  { %v5034_v14 = vmul.f32 %v6508_v12, %v5031_v0  ;;  %vm5039_vm7 = vweird.f32 %v6508_v12 }
0x3747   :  { %vm5040_vm8 = vmor %vm5038_vm2, %vm5039_vm7 }
0x3748   :  { %v5035_v43 = vsub.f32 1.0, %v5034_v14 }
0x374a   :  { %v5036_v53 = vmul.f32 %v6508_v12, %v5035_v43 }
0x374c   :  { %v5037_v62 = vadd.f32 %v6508_v12, %v5036_v53 }
0x374e   :  { %v5041_v32 = vsel %vm5040_vm8, %v6508_v12, %v5037_v62 }
0x374f   :  { %v5046_v39 = vsel %vm5043_vm13, %v5045_v40, %v5041_v32 }
0x3750   :  { %v5064_v60 = vmul.f32 %v5046_v39, %v4495_v47 }
0x37ad   :  { %v5067_v21 = vpop.permute.xlu1 %5066 }
0x37ae   :  { %v5069_v23 = vmul.f32 %v5067_v21, %v5046_v39 }
0x37b0   :  { %5071 = vrot.lane.b32.xlu2 %v5069_v23, %s6942_s26 }
0x380a   :  { %v5072_v51 = vpop.permute.xlu2 %5071 }
0x380b   :  { %v5074_v24 = vadd.f32 %v5072_v51, %v5064_v60  ;;  %v12329_v60 = vsel %vm3669_vm1, %v12130_v1, %v12126_v4 }
0x380d   :  { %6509 = vtanh.f32 %v5074_v24 }
0x380e   :  { %6511 = vpow2.f32 %v6023_v58 }
0x3813   :  { %v6510_v42 = vpop.eup %6509 }
0x3814   :  { %5077 = vrot.lane.b32.xlu0 %v6510_v42, %s6942_s26  ;;  %v6512_v20 = vpop.eup %6511 }
0x3815   :  { %v5032_v28 = vadd.f32 1.0, %v6512_v20 }
0x3817   :  { %6513 = vrcp.f32 %v5032_v28  ;;  %v5059_v52 = vand.u32 2147483648, %v5032_v28  ;;  %vm5053_vm4 = vweird.f32 %v5032_v28  ;;  %v5057_v50 = vand.u32 2147483647, %v5032_v28 }
0x3818   :  { %6515 = vtanh.f32 %v12302_v63 }
0x3819   :  { %v5060_v31 = vor.u32 1.1754944e-38, %v5059_v52  ;;  %vm5058_vm6 = vcmp.eq.f32.partialorder %v5057_v50, 8.507059e+37 }
0x381c   :  { %5092 = vrot.lane.b32.xlu0 %v12206_v6, %s6945_s29 }
0x381d   :  { %v6514_v56 = vpop.eup %6513 }
0x381e   :  { %v5049_v34 = vmul.f32 %v6514_v56, %v5032_v28  ;;  %vm5054_vm10 = vweird.f32 %v6514_v56  ;;  %v6516_v26 = vpop.eup %6515 }
0x381f   :  { %vm5055_vm5 = vmor %vm5053_vm4, %vm5054_vm10 }
0x3820   :  { %v5050_v22 = vsub.f32 1.0, %v5049_v34 }
0x3822   :  { %v5051_v15 = vmul.f32 %v6514_v56, %v5050_v22 }
0x3824   :  { %v5052_v48 = vadd.f32 %v6514_v56, %v5051_v15 }
0x3826   :  { %v5056_v49 = vsel %vm5055_vm5, %v6514_v56, %v5052_v48 }
0x3827   :  { %v5061_v13 = vsel %vm5058_vm6, %v5060_v31, %v5056_v49 }
0x3886   :  { %v5078_v27 = vpop.permute.xlu0 %5077 }
0x3887   :  { %v5080_v9 = vmul.f32 %v5078_v27, %v5046_v39  ;;  %v5081_v10 = vmul.f32 %v5078_v27, %v5061_v13 }
0x3889   :  { %v5083_v7 = vsel %vm4847_vm11, %v5081_v10, %v11984_v41  ;;  %v5082_v17 = vsel %vm4847_vm11, %v5080_v9, %v11989_v44  ;;  %v6004_v41 = vmul.f32 -1.442695, %v4654_v5  ;;  %v4613_v9 = vsel %vm4258_vm9, %v12177_v16, %v12173_v30 }
0x388a   :  { %5088 = vrot.lane.b32.xlu2 %v5083_v7, %s6944_s5  ;;  %5086 = vrot.lane.b32.xlu1 %v5082_v17, %s6944_s5  ;;  %v6005_v30 = vmul.f32 -1.442695, %v12302_v63 }
0x388b   :  { %6517 = vpow2.f32 %v6004_v41 }
0x388e   :  { %v5093_v35 = vpop.permute.xlu0 %5092 }
0x3891   :  { %v6518_v45 = vpop.eup %6517 }
0x3892   :  { %4717 = vrot.lane.b32.xlu2 %v6516_v26, %s6941_s7  ;;  %5094 = vrot.lane.b32.xlu1 %v12201_v3, %s6945_s29  ;;  %v4682_v57 = vadd.f32 1.0, %v6518_v45 }
0x3894   :  { %6519 = vrcp.f32 %v4682_v57  ;;  %v4695_v0 = vand.u32 2147483648, %v4682_v57  ;;  %vm4689_vm2 = vweird.f32 %v4682_v57  ;;  %v4693_v12 = vand.u32 2147483647, %v4682_v57 }
0x3896   :  { %v4696_v43 = vor.u32 1.1754944e-38, %v4695_v0  ;;  %vm4694_vm13 = vcmp.eq.f32.partialorder %v4693_v12, 8.507059e+37 }
0x389a   :  { %v6520_v44 = vpop.eup %6519 }
0x389b   :  { %v4685_v59 = vmul.f32 %v6520_v44, %v4682_v57  ;;  %vm4690_vm7 = vweird.f32 %v6520_v44 }
0x389c   :  { %vm4691_vm8 = vmor %vm4689_vm2, %vm4690_vm7 }
0x389d   :  { %v4686_v8 = vsub.f32 1.0, %v4685_v59 }
0x389f   :  { %v4687_v61 = vmul.f32 %v6520_v44, %v4686_v8 }
0x38a1   :  { %v4688_v37 = vadd.f32 %v6520_v44, %v4687_v61 }
0x38a3   :  { %v4692_v14 = vsel %vm4691_vm8, %v6520_v44, %v4688_v37 }
0x38a4   :  { %v4697_v46 = vsel %vm4694_vm13, %v4696_v43, %v4692_v14 }
0x38a5   :  { %v4715_v24 = vmul.f32 %v4697_v46, %v12329_v60 }
0x38e4   :  { %v5089_v55 = vpop.permute.xlu2 %5088 }
0x38ec   :  { %v4718_v53 = vpop.permute.xlu2 %4717 }
0x38ed   :  { %v4720_v62 = vmul.f32 %v4718_v53, %v4697_v46 }
0x38ef   :  { %4722 = vrot.lane.b32.xlu1 %v4720_v62, %s6942_s26 }
0x38fc   :  { %v5087_v18 = vpop.permute.xlu1 %5086 }
0x38fd   :  { %v5090_v40 = vsel %vm626_vm14, %v5087_v18, %v5089_v55 }
0x3904   :  { %v5095_v32 = vpop.permute.xlu1 %5094 }
0x3905   :  { %v5096_v21 = vsel %vm1328_vm12, %v5093_v35, %v5095_v32 }
0x3906   :  { %v5098_v39 = vsel %vm502_vm15, %v5090_v40, %v5096_v21 }
0x3907   :  { %6025 = vmatmul.msk.f32.vlgmr.msrb.gmra.mxu3 %vm656_vm3, %v5098_v39  ;;  %6027 = vmatmul.msk.f32.vlgmr.msra.gmra.mxu2 %vm656_vm3, %v5098_v39 }
0x3961   :  { %v4723_v51 = vpop.permute.xlu1 %4722 }
0x3962   :  { %v12332_v42 = vadd.f32 %v4723_v51, %v4715_v24 }
0x398a   :  { %v5139_v23 = vpop.f32.mrf.mxu2 }
0x398b   :  { %v5140_v47 = vadd.f32 %v5139_v23, %v13609_v2  ;;  %v5119_v2 = vpop.f32.mrf.mxu3 }
0x398c   :  { %v5120_v28 = vadd.f32 %v5119_v2, %v13612_v11 }
0x398d   :  { %6521 = vtanh.f32 %v5140_v47  ;;  %v6029_v57 = vmul.f32 -1.442695, %v5140_v47 }
0x398e   :  { %6523 = vtanh.f32 %v12332_v42  ;;  %v6028_v56 = vmul.f32 -1.442695, %v5120_v28 }
0x3990   :  { %6525 = vpow2.f32 %v6028_v56 }
0x3993   :  { %v6522_v58 = vpop.eup %6521 }
0x3994   :  { %5183 = vrot.lane.b32.xlu0 %v6522_v58, %s6941_s7  ;;  %v6524_v20 = vpop.eup %6523 }
0x3996   :  { %v6526_v33 = vpop.eup %6525 }
0x3997   :  { %v5148_v4 = vadd.f32 1.0, %v6526_v33 }
0x3999   :  { %6527 = vrcp.f32 %v5148_v4  ;;  %v5161_v52 = vand.u32 2147483648, %v5148_v4  ;;  %vm5155_vm10 = vweird.f32 %v5148_v4  ;;  %v5159_v50 = vand.u32 2147483647, %v5148_v4 }
0x399b   :  { %v5162_v31 = vor.u32 1.1754944e-38, %v5161_v52  ;;  %vm5160_vm5 = vcmp.eq.f32.partialorder %v5159_v50, 8.507059e+37 }
0x399c   :  { %4728 = vrot.lane.b32.xlu0 %v6524_v20, %s6942_s26 }
0x399f   :  { %v6528_v1 = vpop.eup %6527 }
0x39a0   :  { %v5151_v34 = vmul.f32 %v6528_v1, %v5148_v4  ;;  %vm5156_vm1 = vweird.f32 %v6528_v1 }
0x39a1   :  { %vm5157_vm4 = vmor %vm5155_vm10, %vm5156_vm1 }
0x39a2   :  { %v5152_v22 = vsub.f32 1.0, %v5151_v34 }
0x39a4   :  { %v5153_v15 = vmul.f32 %v6528_v1, %v5152_v22 }
0x39a6   :  { %v5154_v48 = vadd.f32 %v6528_v1, %v5153_v15 }
0x39a8   :  { %v5158_v49 = vsel %vm5157_vm4, %v6528_v1, %v5154_v48 }
0x39a9   :  { %v5163_v11 = vsel %vm5160_vm5, %v5162_v31, %v5158_v49 }
0x39aa   :  { %v5181_v10 = vmul.f32 %v5163_v11, %v4613_v9 }
0x3a06   :  { %v5184_v13 = vpop.permute.xlu0 %5183 }
0x3a07   :  { %v5186_v27 = vmul.f32 %v5184_v13, %v5163_v11 }
0x3a09   :  { %5188 = vrot.lane.b32.xlu2 %v5186_v27, %s6942_s26 }
0x3a0e   :  { %v4729_v5 = vpop.permute.xlu0 %4728 }
0x3a0f   :  { %v4731_v41 = vmul.f32 %v4729_v5, %v4697_v46 }
0x3a11   :  { %v12347_v45 = vsel %vm4258_vm9, %v4731_v41, %v12157_v36 }
0x3a63   :  { %v5189_v7 = vpop.permute.xlu2 %5188 }
0x3a64   :  { %v5191_v17 = vadd.f32 %v5189_v7, %v5181_v10 }
0x3a66   :  { %6529 = vtanh.f32 %v5191_v17 }
0x3a67   :  { %6531 = vpow2.f32 %v6029_v57 }
0x3a68   :  { %6533 = vpow2.f32 %v6005_v30  ;;  %v5354_v30 = vld [vmem:[%s12794_s10 + $0xf8] sm:$0xff] }
0x3a69   :  { %5391 = vmatpush.msrb.mxu2 %v5354_v30  ;;  %v5339_v30 = vld [vmem:[%s12794_s10 + $0x80] sm:$0xff] }
0x3a6c   :  { %v6530_v26 = vpop.eup %6529 }
0x3a6d   :  { %5194 = vrot.lane.b32.xlu1 %v6530_v26, %s6942_s26  ;;  %v6532_v16 = vpop.eup %6531 }
0x3a6e   :  { %v5149_v44 = vadd.f32 1.0, %v6532_v16  ;;  %v6534_v59 = vpop.eup %6533  ;;  %v5353_v16 = vld [vmem:[%s12794_s10 + $0xf0] sm:$0xff] }
0x3a6f   :  { %v4683_v8 = vadd.f32 1.0, %v6534_v59  ;;  %v5352_v59 = vld [vmem:[%s12794_s10 + $0xe8] sm:$0xff]  ;;  %5392 = vmatpush.msrb.mxu2 %v5353_v16  ;;  %v5460_v16 = vld [vmem:[%s12795_s12 + $0xd0] sm:$0xff] }
0x3a70   :  { %6535 = vrcp.f32 %v5149_v44  ;;  %v5176_v46 = vand.u32 2147483648, %v5149_v44  ;;  %vm5170_vm7 = vweird.f32 %v5149_v44  ;;  %v5174_v63 = vand.u32 2147483647, %v5149_v44 }
0x3a71   :  { %6537 = vrcp.f32 %v4683_v8  ;;  %v4710_v32 = vand.u32 2147483648, %v4683_v8  ;;  %vm4704_vm1 = vweird.f32 %v4683_v8  ;;  %v4708_v39 = vand.u32 2147483647, %v4683_v8  ;;  %5393 = vmatpush.msrb.mxu2 %v5352_v59  ;;  %v5434_v59 = vld [vmem:[%s12795_s12] sm:$0xff] }
0x3a72   :  { %v5177_v18 = vor.u32 1.1754944e-38, %v5176_v46  ;;  %vm5175_vm13 = vcmp.eq.f32.partialorder %v5174_v63, 8.507059e+37  ;;  %v5335_v46 = vld [vmem:[%s12794_s10 + $0x60] sm:$0xff]  ;;  %v5349_v63 = vld [vmem:[%s12794_s10 + $0xd0] sm:$0xff] }
0x3a73   :  { %v4711_v20 = vor.u32 1.1754944e-38, %v4710_v32  ;;  %vm4709_vm4 = vcmp.eq.f32.partialorder %v4708_v39, 8.507059e+37  ;;  %v5348_v32 = vld [vmem:[%s12794_s10 + $0xc8] sm:$0xff]  ;;  %v5333_v39 = vld [vmem:[%s12794_s10 + $0x50] sm:$0xff] }
0x3a75   :  { %5211 = vrot.lane.b32.xlu1 %v12347_v45, %s6945_s29 }
0x3a76   :  { %v6536_v61 = vpop.eup %6535 }
0x3a77   :  { %v5166_v55 = vmul.f32 %v6536_v61, %v5149_v44  ;;  %v6538_v37 = vpop.eup %6537  ;;  %vm5171_vm6 = vweird.f32 %v6536_v61  ;;  %v5449_v44 = vld [vmem:[%s12795_s12 + $0x78] sm:$0xff] }
0x3a78   :  { %v4700_v36 = vmul.f32 %v6538_v37, %v4683_v8  ;;  %vm5172_vm2 = vmor %vm5170_vm7, %vm5171_vm6  ;;  %vm4705_vm8 = vweird.f32 %v6538_v37  ;;  %5482 = vmatpush.msra.mxu1 %v5449_v44  ;;  %v5448_v8 = vld [vmem:[%s12795_s12 + $0x70] sm:$0xff]  ;;  %v5560_v44 = vld [vmem:[%s12796_s14 + $0x78] sm:$0xff] }
0x3a79   :  { %v5167_v0 = vsub.f32 1.0, %v5166_v55  ;;  %vm4706_vm10 = vmor %vm4704_vm1, %vm4705_vm8  ;;  %v5338_v55 = vld [vmem:[%s12794_s10 + $0x78] sm:$0xff] }
0x3a7a   :  { %v4701_v14 = vsub.f32 1.0, %v4700_v36  ;;  %5483 = vmatpush.msra.mxu1 %v5448_v8  ;;  %5371 = vmatpush.msra.mxu3 %v5338_v55  ;;  %v5446_v36 = vld [vmem:[%s12795_s12 + $0x60] sm:$0xff]  ;;  %v5324_v8 = vld [vmem:[%s12794_s10 + $0x8] sm:$0xff]  ;;  %v5559_v55 = vld [vmem:[%s12796_s14 + $0x70] sm:$0xff] }
0x3a7b   :  { %v5168_v12 = vmul.f32 %v6536_v61, %v5167_v0  ;;  %v5337_v0 = vld [vmem:[%s12794_s10 + $0x70] sm:$0xff] }
0x3a7c   :  { %v4702_v53 = vmul.f32 %v6538_v37, %v4701_v14  ;;  %v5350_v14 = vld [vmem:[%s12794_s10 + $0xd8] sm:$0xff]  ;;  %5372 = vmatpush.msra.mxu3 %v5337_v0  ;;  %v5323_v0 = vld [vmem:[%s12794_s10] sm:$0xff] }
0x3a7d   :  { %v5169_v43 = vadd.f32 %v6536_v61, %v5168_v12  ;;  %v5336_v12 = vld [vmem:[%s12794_s10 + $0x68] sm:$0xff] }
0x3a7e   :  { %v4703_v35 = vadd.f32 %v6538_v37, %v4702_v53  ;;  %v5360_v53 = vld [vmem:[%s12794_s10 + $0x128] sm:$0xf]  ;;  %5373 = vmatpush.msra.mxu3 %v5336_v12 }
0x3a7f   :  { %v5173_v62 = vsel %vm5172_vm2, %v6536_v61, %v5169_v43  ;;  %v5447_v61 = vld [vmem:[%s12795_s12 + $0x68] sm:$0xff]  ;;  %v5445_v43 = vld [vmem:[%s12795_s12 + $0x58] sm:$0xff]  ;;  %6036 = vmatpush.msk.msra.mxu0 %vm184_vm0, %v5360_v53  ;;  %v5557_v53 = vld [vmem:[%s12796_s14 + $0x60] sm:$0xff] }
0x3a80   :  { %v5178_v40 = vsel %vm5175_vm13, %v5177_v18, %v5173_v62  ;;  %v4707_v51 = vsel %vm4706_vm10, %v6538_v37, %v4703_v35  ;;  %v5351_v37 = vld [vmem:[%s12794_s10 + $0xe0] sm:$0xff]  ;;  %5484 = vmatpush.msra.mxu1 %v5447_v61  ;;  %v5444_v18 = vld [vmem:[%s12795_s12 + $0x50] sm:$0xff]  ;;  %v5334_v35 = vld [vmem:[%s12794_s10 + $0x58] sm:$0xff]  ;;  %5374 = vmatpush.msra.mxu3 %v5335_v46  ;;  %vm5686_vm10 = vcmask 7168  }
0x3a81   :  { %v4712_v2 = vsel %vm4709_vm4, %v4711_v20, %v4707_v51  ;;  %5394 = vmatpush.msrb.mxu2 %v5351_v37  ;;  %v5359_v62 = vld [vmem:[%s12794_s10 + $0x120] sm:$0xff]  ;;  %v5356_v20 = vld [vmem:[%s12794_s10 + $0x108] sm:$0xff]  ;;  %v5576_v37 = vld [vmem:[%s12796_s14 + $0xf8] sm:$0xff] }
0x3a82   :  { %v4732_v28 = vmul.f32 %v4729_v5, %v4712_v2  ;;  %5485 = vmatpush.msra.mxu1 %v5446_v36  ;;  %5422 = vmatpush.msra.mxu0 %v5359_v62  ;;  %v5442_v51 = vld [vmem:[%s12795_s12 + $0x40] sm:$0xff]  ;;  %v5441_v2 = vld [vmem:[%s12795_s12 + $0x38] sm:$0xff]  ;;  %v5459_v36 = vld [vmem:[%s12795_s12 + $0xc8] sm:$0xff] }
0x3a83   :  { %5395 = vmatpush.msrb.mxu2 %v5350_v14  ;;  %5375 = vmatpush.msra.mxu3 %v5334_v35  ;;  %v5558_v12 = vld [vmem:[%s12796_s14 + $0x68] sm:$0xff]  ;;  %v5575_v14 = vld [vmem:[%s12796_s14 + $0xf0] sm:$0xff]  ;;  %v5458_v46 = vld [vmem:[%s12795_s12 + $0xc0] sm:$0xff] }
0x3a84   :  { %v12363_v56 = vsel %vm4258_vm9, %v4732_v28, %v12185_v38  ;;  %5486 = vmatpush.msra.mxu1 %v5445_v43  ;;  %v5331_v28 = vld [vmem:[%s12794_s10 + $0x40] sm:$0xff]  ;;  %v5471_v43 = vld [vmem:[%s12795_s12 + $0x128] sm:$0xf]  ;;  %v5556_v35 = vld [vmem:[%s12796_s14 + $0x58] sm:$0xff] }
0x3a85   :  { %5396 = vmatpush.msrb.mxu2 %v5349_v63  ;;  %5376 = vmatpush.msra.mxu3 %v5333_v39  ;;  %v5574_v63 = vld [vmem:[%s12796_s14 + $0xe8] sm:$0xff]  ;;  %v5470_v62 = vld [vmem:[%s12795_s12 + $0x120] sm:$0xff]  ;;  %v5555_v39 = vld [vmem:[%s12796_s14 + $0x50] sm:$0xff] }
0x3a86   :  { %5487 = vmatpush.msra.mxu1 %v5444_v18  ;;  %v5457_v18 = vld [vmem:[%s12795_s12 + $0xb8] sm:$0xff] }
0x3a87   :  { %5397 = vmatpush.msrb.mxu2 %v5348_v32  ;;  %v5573_v32 = vld [vmem:[%s12796_s14 + $0xe0] sm:$0xff] }
0x3adf   :  { %v5195_v21 = vpop.permute.xlu1 %5194 }
0x3ae0   :  { %v5197_v23 = vmul.f32 %v5195_v21, %v5163_v11  ;;  %v5198_v47 = vmul.f32 %v5195_v21, %v5178_v40  ;;  %v5358_v40 = vld [vmem:[%s12794_s10 + $0x118] sm:$0xff]  ;;  %v5443_v21 = vld [vmem:[%s12795_s12 + $0x48] sm:$0xff] }
0x3ae1   :  { %5423 = vmatpush.msra.mxu0 %v5358_v40  ;;  %5488 = vmatpush.msra.mxu1 %v5443_v21  ;;  %v5469_v40 = vld [vmem:[%s12795_s12 + $0x118] sm:$0xff]  ;;  %v5456_v21 = vld [vmem:[%s12795_s12 + $0xb0] sm:$0xff] }
0x3ae2   :  { %v5200_v24 = vsel %vm4847_vm11, %v5198_v47, %v12201_v3  ;;  %v5199_v58 = vsel %vm4847_vm11, %v5197_v23, %v12206_v6  ;;  %v5347_v23 = vld [vmem:[%s12794_s10 + $0xc0] sm:$0xff]  ;;  %v5357_v47 = vld [vmem:[%s12794_s10 + $0x110] sm:$0xff] }
0x3ae3   :  { %5205 = vrot.lane.b32.xlu0 %v5200_v24, %s6944_s5  ;;  %5203 = vrot.lane.b32.xlu2 %v5199_v58, %s6944_s5  ;;  %v5332_v24 = vld [vmem:[%s12794_s10 + $0x48] sm:$0xff]  ;;  %v5346_v58 = vld [vmem:[%s12794_s10 + $0xb8] sm:$0xff] }
0x3ae4   :  { %5398 = vmatpush.msrb.mxu2 %v5347_v23  ;;  %5424 = vmatpush.msra.mxu0 %v5357_v47  ;;  %v5572_v23 = vld [vmem:[%s12796_s14 + $0xd8] sm:$0xff]  ;;  %v5320_v47 = vld [vmem:[%s12797_s2] sm:$0xff] }
0x3ae5   :  { %5489 = vmatpush.msra.mxu1 %v5442_v51  ;;  %5377 = vmatpush.msra.mxu3 %v5332_v24  ;;  %v5455_v51 = vld [vmem:[%s12795_s12 + $0xa8] sm:$0xff] }
0x3ae6   :  { %5399 = vmatpush.msrb.mxu2 %v5346_v58  ;;  %5425 = vmatpush.msra.mxu0 %v5356_v20  ;;  %v5554_v24 = vld [vmem:[%s12796_s14 + $0x48] sm:$0xff]  ;;  %v5571_v58 = vld [vmem:[%s12796_s14 + $0xd0] sm:$0xff] }
0x3ae7   :  { %v5212_v4 = vpop.permute.xlu1 %5211  ;;  %5490 = vmatpush.msra.mxu1 %v5441_v2  ;;  %5378 = vmatpush.msra.mxu3 %v5331_v28  ;;  %v5468_v20 = vld [vmem:[%s12795_s12 + $0x110] sm:$0xff]  ;;  %v5321_v2 = vld [vmem:[%s12797_s2 + $0x8] sm:$0xff]  ;;  %v5553_v28 = vld [vmem:[%s12796_s14 + $0x40] sm:$0xff] }
0x3aeb   :  { %5213 = vrot.lane.b32.xlu2 %v12363_v56, %s6945_s29 }
0x3b3d   :  { %v5204_v3 = vpop.permute.xlu2 %5203 }
0x3b45   :  { %v5214_v33 = vpop.permute.xlu2 %5213 }
0x3b46   :  { %v5215_v1 = vsel %vm1328_vm12, %v5212_v4, %v5214_v33  ;;  %v5355_v33 = vld [vmem:[%s12794_s10 + $0x100] sm:$0xff]  ;;  %v5440_v4 = vld [vmem:[%s12795_s12 + $0x30] sm:$0xff] }
0x3b47   :  { %5426 = vmatpush.msra.mxu0 %v5355_v33  ;;  %5491 = vmatpush.msra.mxu1 %v5440_v4  ;;  %v5467_v33 = vld [vmem:[%s12795_s12 + $0x108] sm:$0xff]  ;;  %v5454_v4 = vld [vmem:[%s12795_s12 + $0xa0] sm:$0xff] }
0x3b55   :  { %v5206_v6 = vpop.permute.xlu0 %5205 }
0x3b56   :  { %v5207_v34 = vsel %vm626_vm14, %v5204_v3, %v5206_v6  ;;  %v5345_v3 = vld [vmem:[%s12794_s10 + $0xb0] sm:$0xff]  ;;  %v5330_v6 = vld [vmem:[%s12794_s10 + $0x38] sm:$0xff] }
0x3b57   :  { %v5217_v22 = vsel %vm502_vm15, %v5207_v34, %v5215_v1  ;;  %v5344_v1 = vld [vmem:[%s12794_s10 + $0xa8] sm:$0xff]  ;;  %v5465_v34 = vld [vmem:[%s12795_s12 + $0xf8] sm:$0xff]  ;;  %5400 = vmatpush.msrb.mxu2 %v5345_v3  ;;  %5379 = vmatpush.msra.mxu3 %v5330_v6 }
0x3b58   :  { %6031 = vmatmul.msk.f32.vlgmr.msrb.gmra.mxu0 %vm656_vm3, %v5217_v22  ;;  %6033 = vmatmul.msk.f32.vlgmr.msrb.gmra.mxu1 %vm656_vm3, %v5217_v22  ;;  %v5439_v22 = vld [vmem:[%s12795_s12 + $0x28] sm:$0xff]  ;;  %v5552_v6 = vld [vmem:[%s12796_s14 + $0x38] sm:$0xff] }
0x3b59   :  { %5401 = vmatpush.msrb.mxu2 %v5344_v1  ;;  %5502 = vmatpush.msrb.mxu0 %v5465_v34  ;;  %v5570_v3 = vld [vmem:[%s12796_s14 + $0xc8] sm:$0xff]  ;;  %v5569_v1 = vld [vmem:[%s12796_s14 + $0xc0] sm:$0xff]  ;;  %v5322_v34 = vld [vmem:[%s12797_s2 + $0x10] sm:$0xff] }
0x3b5a   :  { %5492 = vmatpush.msra.mxu1 %v5439_v22  ;;  %v5466_v22 = vld [vmem:[%s12795_s12 + $0x100] sm:$0xff] }
0x3bd5   :  { %v5258_v15 = vpop.f32.mrf.mxu1  ;;  %v5238_v52 = vpop.f32.mrf.mxu0 }
0x3bd6   :  { %v12373_v38 = vadd.f32 %v5258_v15, %v13252_v54  ;;  %v5239_v50 = vadd.f32 %v5238_v52, %v13253_v19  ;;  %v5329_v15 = vld [vmem:[%s12794_s10 + $0x30] sm:$0xff]  ;;  %v5343_v52 = vld [vmem:[%s12794_s10 + $0xa0] sm:$0xff] }
0x3bd7   :  { %5380 = vmatpush.msra.mxu3 %v5329_v15  ;;  %5402 = vmatpush.msrb.mxu2 %v5343_v52  ;;  %v5551_v15 = vld [vmem:[%s12796_s14 + $0x30] sm:$0xff]  ;;  %v5568_v52 = vld [vmem:[%s12796_s14 + $0xb8] sm:$0xff] }
0x3bd8   :  { %6539 = vtanh.f32 %v12373_v38  ;;  %v6034_v49 = vmul.f32 -1.442695, %v5239_v50  ;;  %v5464_v50 = vld [vmem:[%s12795_s12 + $0xf0] sm:$0xff] }
0x3bd9   :  { %5503 = vmatpush.msrb.mxu0 %v5464_v50  ;;  %5381 = vmatpush.msra.mxu3 %v5328_v29  ;;  %v5582_v50 = vld [vmem:[%s12796_s14 + $0x128] sm:$0xf]  ;;  %v5567_v29 = vld [vmem:[%s12796_s14 + $0xb0] sm:$0xff] }
0x3bda   :  { %6541 = vpow2.f32 %v6034_v49 }
0x3bde   :  { %v6540_v48 = vpop.eup %6539 }
0x3bdf   :  { %5302 = vrot.lane.b32.xlu0 %v6540_v48, %s6941_s7  ;;  %v4733_v48 = vsel %vm4258_vm9, %v12332_v42, %v12329_v60  ;;  %v5342_v42 = vld [vmem:[%s12794_s10 + $0x98] sm:$0xff]  ;;  %vm13636_vm9 = vcmask 359424  }
0x3be0   :  { %v6542_v31 = vpop.eup %6541  ;;  %5403 = vmatpush.msrb.mxu2 %v5342_v42  ;;  %6037 = vmatmul.msk.f32.vlgmr.msra.gmra.mxu0 %vm13636_vm9, %v5322_v34  ;;  %v5549_v42 = vld [vmem:[%s12796_s14 + $0x20] sm:$0xff] }
0x3be1   :  { %v5267_v13 = vadd.f32 1.0, %v6542_v31  ;;  %v5438_v31 = vld [vmem:[%s12795_s12 + $0x20] sm:$0xff] }
0x3be2   :  { %5493 = vmatpush.msra.mxu1 %v5438_v31  ;;  %v5452_v31 = vld [vmem:[%s12795_s12 + $0x90] sm:$0xff] }
0x3be3   :  { %6543 = vrcp.f32 %v5267_v13  ;;  %v5280_v54 = vand.u32 2147483648, %v5267_v13  ;;  %vm5274_vm12 = vweird.f32 %v5267_v13  ;;  %v5278_v17 = vand.u32 2147483647, %v5267_v13 }
0x3be5   :  { %v5281_v5 = vor.u32 1.1754944e-38, %v5280_v54  ;;  %vm5279_vm6 = vcmp.eq.f32.partialorder %v5278_v17, 8.507059e+37  ;;  %v5436_v54 = vld [vmem:[%s12795_s12 + $0x10] sm:$0xff]  ;;  %v5326_v17 = vld [vmem:[%s12794_s10 + $0x18] sm:$0xff] }
0x3be9   :  { %v6544_v11 = vpop.eup %6543 }
0x3bea   :  { %v5270_v27 = vmul.f32 %v6544_v11, %v5267_v13  ;;  %vm5275_vm3 = vweird.f32 %v6544_v11  ;;  %v5463_v13 = vld [vmem:[%s12795_s12 + $0xe8] sm:$0xff] }
0x3beb   :  { %vm5276_vm5 = vmor %vm5274_vm12, %vm5275_vm3  ;;  %5504 = vmatpush.msrb.mxu0 %v5463_v13  ;;  %v5433_v13 = vld [vmem:[%s12799_s3 + $0x10] sm:$0xff] }
0x3bec   :  { %v5271_v9 = vsub.f32 1.0, %v5270_v27  ;;  %v5437_v27 = vld [vmem:[%s12795_s12 + $0x18] sm:$0xff] }
0x3bed   :  { %5494 = vmatpush.msra.mxu1 %v5437_v27  ;;  %v5566_v27 = vld [vmem:[%s12796_s14 + $0xa8] sm:$0xff] }
0x3bee   :  { %v5272_v10 = vmul.f32 %v6544_v11, %v5271_v9  ;;  %v5327_v9 = vld [vmem:[%s12794_s10 + $0x20] sm:$0xff] }
0x3bef   :  { %5382 = vmatpush.msra.mxu3 %v5327_v9  ;;  %5495 = vmatpush.msra.mxu1 %v5436_v54  ;;  %v5548_v9 = vld [vmem:[%s12796_s14 + $0x18] sm:$0xff]  ;;  %v5450_v54 = vld [vmem:[%s12795_s12 + $0x80] sm:$0xff] }
0x3bf0   :  { %v5273_v7 = vadd.f32 %v6544_v11, %v5272_v10  ;;  %v5341_v10 = vld [vmem:[%s12794_s10 + $0x90] sm:$0xff] }
0x3bf1   :  { %5404 = vmatpush.msrb.mxu2 %v5341_v10  ;;  %5383 = vmatpush.msra.mxu3 %v5326_v17  ;;  %v5580_v10 = vld [vmem:[%s12796_s14 + $0x118] sm:$0xff]  ;;  %v5547_v17 = vld [vmem:[%s12796_s14 + $0x10] sm:$0xff] }
0x3bf2   :  { %v5277_v26 = vsel %vm5276_vm5, %v6544_v11, %v5273_v7  ;;  %v5462_v7 = vld [vmem:[%s12795_s12 + $0xe0] sm:$0xff] }
0x3bf3   :  { %v12378_v19 = vsel %vm5279_vm6, %v5281_v5, %v5277_v26  ;;  %v5340_v26 = vld [vmem:[%s12794_s10 + $0x88] sm:$0xff]  ;;  %v5461_v5 = vld [vmem:[%s12795_s12 + $0xd8] sm:$0xff]  ;;  %5505 = vmatpush.msrb.mxu0 %v5462_v7  ;;  %v5431_v7 = vld [vmem:[%s12799_s3] sm:$0xff] }
0x3bf4   :  { %v5300_v49 = vmul.f32 %v12378_v19, %v4733_v48  ;;  %5405 = vmatpush.msrb.mxu2 %v5340_v26  ;;  %v5453_v48 = vld [vmem:[%s12795_s12 + $0x98] sm:$0xff]  ;;  %v5565_v26 = vld [vmem:[%s12796_s14 + $0xa0] sm:$0xff] }
0x3bf5   :  { %5506 = vmatpush.msrb.mxu0 %v5461_v5  ;;  %v5579_v5 = vld [vmem:[%s12796_s14 + $0x110] sm:$0xff] }
0x3bf6   :  { %5406 = vmatpush.msrb.mxu2 %v5339_v30  ;;  %v5564_v30 = vld [vmem:[%s12796_s14 + $0x98] sm:$0xff] }
0x3bf7   :  { %5507 = vmatpush.msrb.mxu0 %v5460_v16  ;;  %5407 = vmatmul.f32.vlgmr.msrb.gmra.mxu2 %v5321_v2  ;;  %v5578_v16 = vld [vmem:[%s12796_s14 + $0x108] sm:$0xff] }
0x3bf8   :  { %5593 = vmatpush.msra.mxu2 %v5560_v44  ;;  %v5545_v44 = vld [vmem:[%s12796_s14] sm:$0xff] }
0x3bf9   :  { %5508 = vmatpush.msrb.mxu0 %v5459_v36  ;;  %v5543_v36 = vld [vmem:[%s12801_s4 + $0x8] sm:$0xff] }
0x3bfa   :  { %5594 = vmatpush.msra.mxu2 %v5559_v55  ;;  %v5544_v55 = vld [vmem:[%s12801_s4 + $0x10] sm:$0xff] }
0x3bfb   :  { %5509 = vmatpush.msrb.mxu0 %v5458_v46 }
0x3bfc   :  { %5595 = vmatpush.msra.mxu2 %v5558_v12  ;;  %v6035_v12 = vmul.f32 -1.442695, %v12373_v38 }
0x3bfd   :  { %5510 = vmatpush.msrb.mxu0 %v5457_v18 }
0x3bfe   :  { %5596 = vmatpush.msra.mxu2 %v5557_v53 }
0x3bff   :  { %5511 = vmatpush.msrb.mxu0 %v5456_v21 }
0x3c00   :  { %5597 = vmatpush.msra.mxu2 %v5556_v35 }
0x3c01   :  { %5512 = vmatpush.msrb.mxu0 %v5455_v51 }
0x3c02   :  { %5598 = vmatpush.msra.mxu2 %v5555_v39 }
0x3c03   :  { %5513 = vmatpush.msrb.mxu0 %v5454_v4 }
0x3c04   :  { %5599 = vmatpush.msra.mxu2 %v5554_v24 }
0x3c05   :  { %5514 = vmatpush.msrb.mxu0 %v5453_v48 }
0x3c06   :  { %5600 = vmatpush.msra.mxu2 %v5553_v28 }
0x3c07   :  { %5515 = vmatpush.msrb.mxu0 %v5452_v31 }
0x3c08   :  { %5601 = vmatpush.msra.mxu2 %v5552_v6 }
0x3c0a   :  { %5602 = vmatpush.msra.mxu2 %v5551_v15 }
0x3c51   :  { %v5303_v41 = vpop.permute.xlu0 %5302 }
0x3c52   :  { %v5305_v57 = vmul.f32 %v5303_v41, %v12378_v19  ;;  %v5435_v41 = vld [vmem:[%s12795_s12 + $0x8] sm:$0xff] }
0x3c53   :  { %5496 = vmatpush.msra.mxu1 %v5435_v41  ;;  %v5432_v41 = vld [vmem:[%s12799_s3 + $0x8] sm:$0xff] }
0x3c54   :  { %5307 = vrot.lane.b32.xlu1 %v5305_v57, %s6942_s26  ;;  %v5325_v57 = vld [vmem:[%s12794_s10 + $0x10] sm:$0xff] }
0x3c55   :  { %5384 = vmatpush.msra.mxu3 %v5325_v57  ;;  %5497 = vmatpush.msra.mxu1 %v5434_v59  ;;  %v5546_v57 = vld [vmem:[%s12796_s14 + $0x8] sm:$0xff]  ;;  %v5563_v59 = vld [vmem:[%s12796_s14 + $0x90] sm:$0xff] }
0x3c56   :  { %5498 = vmatmul.f32.vlgmr.msra.gmra.mxu1 %v5431_v7 }
0x3c57   :  { %5385 = vmatpush.msra.mxu3 %v5324_v8  ;;  %5613 = vmatpush.msrb.mxu1 %v5576_v37  ;;  %v5542_v8 = vld [vmem:[%s12801_s4] sm:$0xff]  ;;  %v5562_v37 = vld [vmem:[%s12796_s14 + $0x88] sm:$0xff] }
0x3c59   :  { %5386 = vmatpush.msra.mxu3 %v5323_v0  ;;  %5614 = vmatpush.msrb.mxu1 %v5575_v14  ;;  %v5561_v0 = vld [vmem:[%s12796_s14 + $0x80] sm:$0xff] }
0x3c5a   :  { %5387 = vmatmul.f32.vlgmr.msra.gmra.mxu3 %v5320_v47 }
0x3c5b   :  { %6038 = vmatpush.msk.msrb.mxu3 %vm184_vm0, %v5471_v43  ;;  %5615 = vmatpush.msrb.mxu1 %v5574_v63 }
0x3c5d   :  { %5533 = vmatpush.msrb.mxu3 %v5470_v62  ;;  %5616 = vmatpush.msrb.mxu1 %v5573_v32  ;;  %v5428_v2 = vpop.f32.mrf.mxu0 }
0x3c5f   :  { %5534 = vmatpush.msrb.mxu3 %v5469_v40  ;;  %5617 = vmatpush.msrb.mxu1 %v5572_v23 }
0x3c61   :  { %5618 = vmatpush.msrb.mxu1 %v5571_v58  ;;  %5535 = vmatpush.msrb.mxu3 %v5468_v20 }
0x3c63   :  { %5619 = vmatpush.msrb.mxu1 %v5570_v3  ;;  %5536 = vmatpush.msrb.mxu3 %v5467_v33 }
0x3c65   :  { %5620 = vmatpush.msrb.mxu1 %v5569_v1  ;;  %5537 = vmatpush.msrb.mxu3 %v5466_v22 }
0x3c67   :  { %5621 = vmatpush.msrb.mxu1 %v5568_v52  ;;  %6040 = vmatpush.msk.msra.mxu3 %vm184_vm0, %v5582_v50  ;;  %vm13637_vm0 = vmmov %vm13636_vm9 }
0x3c68   :  { %6039 = vmatmul.msk.f32.vlgmr.msrb.gmra.mxu3 %vm13637_vm0, %v5433_v13  ;;  %vm13638_vm7 = vmmov %vm13637_vm0 }
0x3c69   :  { %5622 = vmatpush.msrb.mxu1 %v5567_v29 }
0x3c6b   :  { %5623 = vmatpush.msrb.mxu1 %v5566_v27 }
0x3c6d   :  { %5624 = vmatpush.msrb.mxu1 %v5565_v26 }
0x3c6f   :  { %5625 = vmatpush.msrb.mxu1 %v5564_v30 }
0x3c71   :  { %5626 = vmatpush.msrb.mxu1 %v5563_v59 }
0x3c73   :  { %5627 = vmatpush.msrb.mxu1 %v5562_v37 }
0x3c75   :  { %5628 = vmatpush.msrb.mxu1 %v5561_v0 }
0x3c76   :  { %5629 = vmatmul.f32.vlgmr.msrb.gmra.mxu1 %v5543_v36 }
0x3c7a   :  { %v5408_v20 = vpop.f32.mrf.mxu2 }
0x3cc6   :  { %v5308_v60 = vpop.permute.xlu1 %5307 }
0x3cc7   :  { %v5310_v11 = vadd.f32 %v5308_v60, %v5300_v49  ;;  %v5550_v49 = vld [vmem:[%s12796_s14 + $0x28] sm:$0xff]  ;;  %v5581_v60 = vld [vmem:[%s12796_s14 + $0x120] sm:$0xff] }
0x3cc8   :  { %5603 = vmatpush.msra.mxu2 %v5550_v49  ;;  %5644 = vmatpush.msra.mxu3 %v5581_v60 }
0x3cc9   :  { %6545 = vtanh.f32 %v5310_v11  ;;  %v5451_v11 = vld [vmem:[%s12795_s12 + $0x88] sm:$0xff] }
0x3cca   :  { %5604 = vmatpush.msra.mxu2 %v5549_v42  ;;  %5516 = vmatpush.msrb.mxu0 %v5451_v11  ;;  %6547 = vpow2.f32 %v6035_v12 }
0x3ccb   :  { %5645 = vmatpush.msra.mxu3 %v5580_v10 }
0x3ccc   :  { %5605 = vmatpush.msra.mxu2 %v5548_v9  ;;  %5517 = vmatpush.msrb.mxu0 %v5450_v54 }
0x3ccd   :  { %5646 = vmatpush.msra.mxu3 %v5579_v5  ;;  %5518 = vmatmul.f32.vlgmr.msrb.gmra.mxu0 %v5432_v41 }
0x3cce   :  { %5606 = vmatpush.msra.mxu2 %v5547_v17 }
0x3ccf   :  { %v6546_v61 = vpop.eup %6545  ;;  %5647 = vmatpush.msra.mxu3 %v5578_v16 }
0x3cd0   :  { %5313 = vrot.lane.b32.xlu2 %v6546_v61, %s6942_s26  ;;  %5607 = vmatpush.msra.mxu2 %v5546_v57  ;;  %v5577_v61 = vld [vmem:[%s12796_s14 + $0x100] sm:$0xff]  ;;  %v6548_v14 = vpop.eup %6547 }
0x3cd1   :  { %5648 = vmatpush.msra.mxu3 %v5577_v61  ;;  %v5268_v43 = vadd.f32 1.0, %v6548_v14 }
0x3cd2   :  { %5608 = vmatpush.msra.mxu2 %v5545_v44  ;;  %6041 = vmatmul.msk.f32.vlgmr.msra.gmra.mxu3 %vm13638_vm7, %v5544_v55 }
0x3cd3   :  { %5609 = vmatmul.f32.vlgmr.msra.gmra.mxu2 %v5542_v8  ;;  %6549 = vrcp.f32 %v5268_v43  ;;  %v5295_v35 = vand.u32 2147483648, %v5268_v43  ;;  %vm5289_vm8 = vweird.f32 %v5268_v43  ;;  %v5293_v32 = vand.u32 2147483647, %v5268_v43  ;;  %v5499_v28 = vpop.f32.mrf.mxu1 }
0x3cd5   :  { %v5296_v21 = vor.u32 1.1754944e-38, %v5295_v35  ;;  %vm5294_vm1 = vcmp.eq.f32.partialorder %v5293_v32, 8.507059e+37 }
0x3cd9   :  { %v6550_v46 = vpop.eup %6549 }
0x3cda   :  { %v5285_v53 = vmul.f32 %v6550_v46, %v5268_v43  ;;  %vm5290_vm2 = vweird.f32 %v6550_v46 }
0x3cdb   :  { %vm5291_vm13 = vmor %vm5289_vm8, %vm5290_vm2 }
0x3cdc   :  { %v5286_v63 = vsub.f32 1.0, %v5285_v53 }
0x3cdd   :  { %v5388_v58 = vpop.f32.mrf.mxu3 }
0x3cde   :  { %v5287_v62 = vmul.f32 %v6550_v46, %v5286_v63 }
0x3ce0   :  { %v5288_v18 = vadd.f32 %v6550_v46, %v5287_v62 }
0x3ce2   :  { %v5292_v40 = vsel %vm5291_vm13, %v6550_v46, %v5288_v18 }
0x3ce3   :  { %v5297_v39 = vsel %vm5294_vm1, %v5296_v21, %v5292_v40 }
0x3ceb   :  { %v5539_v3 = vpop.f32.mrf.mxu3 }
0x3cf3   :  { %v5630_v34 = vpop.f32.mrf.mxu1 }
0x3d2a   :  { %v5314_v23 = vpop.permute.xlu2 %5313 }
0x3d2b   :  { %v5316_v38 = vmul.f32 %v5314_v23, %v12378_v19  ;;  %v5317_v47 = vmul.f32 %v5314_v23, %v5297_v39  ;;  %v6068_v19 = vld [vmem:[%s12798_s11] ss:$0 sm:$0xff] }
0x3d2c   :  { %v5389_v33 = vadd.f32 %v6068_v19, %v5388_v58 }
0x3d2d   :  { %v5319_v51 = vsel %vm4847_vm11, %v5317_v47, %v12363_v56  ;;  %v5318_v24 = vsel %vm4847_vm11, %v5316_v38, %v12347_v45  ;;  %v6069_v56 = vld [vmem:[%s12800_s13] ss:$0 sm:$0xff] }
0x3d2e   :  { %5657 = vrot.lane.b32.xlu1 %v5319_v51, %s6944_s5  ;;  %5655 = vrot.lane.b32.xlu0 %v5318_v24, %s6944_s5  ;;  %v5500_v4 = vadd.f32 %v6069_v56, %v5499_v28  ;;  %v5409_v22 = vadd.f32 %v5408_v20, %v5389_v33 }
0x3d30   :  { %v5429_v50 = vadd.f32 %v5428_v2, %v5409_v22 }
0x3d4a   :  { %v5519_v1 = vpop.f32.mrf.mxu0 }
0x3d4b   :  { %v5520_v15 = vadd.f32 %v5519_v1, %v5500_v4 }
0x3d4d   :  { %v5540_v60 = vadd.f32 %v5539_v3, %v5520_v15 }
0x3d55   :  { %v5650_v52 = vpop.f32.mrf.mxu3 }
0x3d56   :  { %v5610_v45 = vpop.f32.mrf.mxu2 }
0x3d57   :  { %v5611_v6 = vadd.f32 %v6070_v25, %v5610_v45 }
0x3d59   :  { %v5631_v48 = vadd.f32 %v5630_v34, %v5611_v6 }
0x3d5b   :  { %v5651_v13 = vadd.f32 %v5650_v52, %v5631_v48 }
0x3da0   :  { %v5658_v49 = vpop.permute.xlu1 %5657  ;;  %v5656_v31 = vpop.permute.xlu0 %5655 }
0x3da1   :  { %v5659_v29 = vsel %vm626_vm14, %v5656_v31, %v5658_v49 }
0x3da2   :  { %v5661_v42 = vmul.f32 %v5659_v29, %v5429_v50 }
0x3da4   :  { %v5662_v11 = vmul.f32 %v5661_v42, %v5540_v60 }
0x3da6   :  { %v5663_v27 = vmul.f32 %v5662_v11, %v5651_v13 }
0x3da8   :  { %v5664_v9 = vsel %vm502_vm15, %v5663_v27, 0.0 }
0x3da9   :  { %5665 = vadd.xlane.f32.xlu2 %v5664_v9 }
0x3e1c   :  { %v5666_v10 = vpop.xlane.xlu2 %5665 }
0x3e1d   :  { %v6042_v7 = vmul.f32 -1.442695, %v5666_v10 }
0x3e1f   :  { %6551 = vpow2.f32 %v6042_v7 }
0x3e25   :  { %v6552_v54 = vpop.eup %6551 }
0x3e26   :  { %v5670_v17 = vadd.f32 1.0, %v6552_v54 }
0x3e28   :  { %6553 = vrcp.f32 %v5670_v17  ;;  %v5682_v57 = vand.u32 2147483648, %v5670_v17  ;;  %v5680_v16 = vand.u32 2147483647, %v5670_v17  ;;  %vm5676_vm11 = vweird.f32 %v5670_v17 }
0x3e2a   :  { %v5683_v59 = vor.u32 1.1754944e-38, %v5682_v57  ;;  %vm5681_vm15 = vcmp.eq.f32.partialorder %v5680_v16, 8.507059e+37 }
0x3e2e   :  { %v6554_v26 = vpop.eup %6553 }
0x3e2f   :  { %v5672_v5 = vmul.f32 %v6554_v26, %v5670_v17  ;;  %vm5677_vm14 = vweird.f32 %v6554_v26 }
0x3e30   :  { %vm5678_vm4 = vmor %vm5676_vm11, %vm5677_vm14 }
0x3e31   :  { %v5673_v41 = vsub.f32 1.0, %v5672_v5 }
0x3e33   :  { %v5674_v30 = vmul.f32 %v6554_v26, %v5673_v41 }
0x3e35   :  { %v5675_v44 = vadd.f32 %v6554_v26, %v5674_v30 }
0x3e37   :  { %v5679_v8 = vsel %vm5678_vm4, %v6554_v26, %v5675_v44 }
0x3e38   :  { %v5684_v61 = vsel %vm5681_vm15, %v5683_v59, %v5679_v8 }
0x3e39   :  { %5687 = vst.msk [vmem:[%s12803_s16] sm:$0xff] %vm5686_vm10, %v5684_v61 }

</bundles_post_ra>
